<compile_context>
chip_gen: v5e
topology: v5e:2x2
jax: 0.10.0
libtpu: 0.0.40
codegen_flags: <defaults>
</compile_context>

<pallas_src>
import numpy as np
import jax
import jax.numpy as jnp
from jax.experimental import pallas as pl
from jax.experimental.pallas import tpu as pltpu

# ----------------------------- module config (defaults of MipNeRF360MLP) ----
NETDEPTH = 8
NETWIDTH = 256
BOTTLENECK_WIDTH = 256
NETDEPTH_COND = 1
NETWIDTH_COND = 128
MIN_DEG_POINT = 0
MAX_DEG_POINT = 12
SKIP_LAYER = 4
NUM_RGB = 3
NUM_DENSITY = 1
DEG_VIEW = 4
DENSITY_BIAS = -1.0
RGB_PREMULT = 1.0
RGB_BIAS = 0.0
RGB_PADDING = 0.001
EMBED_SIZE = 64
NUM_BASIS = 21  # TODO(synk): stand-in for helper.generate_basis('icosahedron', 2)

POS_SIZE = (MAX_DEG_POINT - MIN_DEG_POINT) * 2 * NUM_BASIS + EMBED_SIZE  # 568
POS_PAD = 640                           # 568 rounded up to a multiple of 128
VIEW_POS_SIZE = (DEG_VIEW * 2 + 1) * 3  # 27

W_ORDER = ['w0', 'b0', 'w1', 'b1', 'w2', 'b2', 'w3', 'b3', 'w4', 'b4',
           'w5a', 'w5b', 'b5', 'w6', 'b6', 'w7', 'b7',
           'wd', 'bd', 'wbot', 'bbot', 'wvb', 'wrgb', 'brgb']


# ----------------------------------- Pallas kernel ---------------------------
def mlp_kernel(x_ref, dv_ref, *refs):
    (w0, b0, w1, b1, w2, b2, w3, b3, w4, b4,
     w5a, w5b, b5, w6, b6, w7, b7,
     wd, bd, wbot, bbot, wvb, wrgb, brgb,
     dens_ref, rgb_ref) = refs

    def lin(h_bf16, w, b):
        # bf16 MXU matmul with f32 accumulation; bias add in f32.
        return jnp.dot(h_bf16, w[...], preferred_element_type=jnp.float32) + b[...]

    def lin_relu(h_bf16, w, b):
        # f32 accumulate + bias + ReLU, then store the activation in bf16.
        return jnp.maximum(lin(h_bf16, w, b), 0.0).astype(jnp.bfloat16)

    x = x_ref[...]                              # (TM, POS_PAD) bf16
    dv = dv_ref[...].astype(jnp.float32)        # (TM, 128) f32: dir_enc @ wvd + bv

    # pts MLP (netdepth=8, skip concat after layer idx==4 feeds layer 5)
    h = lin_relu(x, w0, b0)
    h = lin_relu(h, w1, b1)
    h = lin_relu(h, w2, b2)
    h = lin_relu(h, w3, b3)
    h = lin_relu(h, w4, b4)
    # cat([h, x]) @ W5  ==  h @ w5a + x @ w5b
    h = jnp.maximum(
        jnp.dot(h, w5a[...], preferred_element_type=jnp.float32)
        + jnp.dot(x, w5b[...], preferred_element_type=jnp.float32)
        + b5[...], 0.0).astype(jnp.bfloat16)
    h = lin_relu(h, w6, b6)
    h = lin_relu(h, w7, b7)

    # density head off the MXU: width-1 output -> f32 VPU multiply + XLU reduce.
    # softplus(raw + density_bias) in overflow-safe form.
    raw_density = (jnp.sum(h.astype(jnp.float32) * wd[...], axis=-1, keepdims=True)
                   + bd[...] + DENSITY_BIAS)                          # (TM, 1)
    density = (jnp.maximum(raw_density, 0.0)
               + jnp.log(1.0 + jnp.exp(-jnp.abs(raw_density))))

    # bottleneck (no activation), then view-conditioned MLP (netdepth_cond=1).
    bottleneck = lin(h, wbot, bbot).astype(jnp.bfloat16)              # (TM, 256)
    v = jnp.maximum(
        jnp.dot(bottleneck, wvb[...], preferred_element_type=jnp.float32) + dv,
        0.0).astype(jnp.bfloat16)                                     # (TM, 128)

    raw_rgb = lin(v, wrgb, brgb)                                      # (TM, 3) f32
    z = RGB_PREMULT * raw_rgb + RGB_BIAS
    rgb = 1.0 / (1.0 + jnp.exp(-z))
    rgb = rgb * (1.0 + 2.0 * RGB_PADDING) - RGB_PADDING

    dens_ref[...] = density                                           # (TM, 1)
    rgb_ref[...] = rgb                                                # (TM, 3)


# --------------------------------- encoding glue (plain JAX) -----------------
def contract(x):
    eps = 1e-12
    x_mag_sq = jnp.maximum(eps, jnp.sum(x ** 2, axis=-1, keepdims=True))
    scale = jnp.where(x_mag_sq <= 1.0,
                      jnp.ones_like(x_mag_sq),
                      (2.0 * jnp.sqrt(x_mag_sq) - 1.0) / x_mag_sq)
    return scale * x


def contract_mean_cov(means, covs):
    # helper.contract(means, covs): contract means, push covariance through the
    # Jacobian of the contraction (cov' = J cov J^T).
    shape_m, shape_c = means.shape, covs.shape
    m = means.reshape(-1, 3)
    c = covs.reshape(-1, 3, 3)
    jac = jax.vmap(jax.jacfwd(contract))(m)               # (N, 3, 3)
    new_m = contract(m)
    new_c = jnp.einsum('nij,njk,nlk->nil', jac, c, jac)
    return new_m.reshape(shape_m), new_c.reshape(shape_c)


def lift_and_diagonalize(mean, cov, basis):
    # basis: (3, K)
    fn_mean = mean @ basis                                 # (..., K)
    fn_cov_diag = jnp.sum(basis * (cov @ basis), axis=-2)  # (..., K)
    return fn_mean, fn_cov_diag


def integrated_pos_enc(mean, var, min_deg, max_deg):
    num_deg = max_deg - min_deg
    k = mean.shape[-1]
    scales = 2.0 ** jnp.arange(min_deg, max_deg, dtype=jnp.float32)
    sm = (mean[..., None, :] * scales[:, None]).reshape(mean.shape[:-1] + (num_deg * k,))
    sv = (var[..., None, :] * (scales[:, None] ** 2)).reshape(var.shape[:-1] + (num_deg * k,))
    x = jnp.concatenate([sm, sm + 0.5 * jnp.pi], axis=-1)
    x_var = jnp.concatenate([sv, sv], axis=-1)
    return jnp.exp(-0.5 * x_var) * jnp.sin(x)              # expected_sin


def pos_enc(x, min_deg, max_deg, append_identity=True):
    num_deg = max_deg - min_deg
    scales = 2.0 ** jnp.arange(min_deg, max_deg, dtype=jnp.float32)
    xb = (x[..., None, :] * scales[:, None]).reshape(x.shape[:-1] + (num_deg * x.shape[-1],))
    four_feat = jnp.sin(jnp.concatenate([xb, xb + 0.5 * jnp.pi], axis=-1))
    if append_identity:
        return jnp.concatenate([x, four_feat], axis=-1)
    return four_feat


# ---------------------------------- parameters -------------------------------
def init_params(key):
    keys = iter(jax.random.split(key, 64))

    def kaiming(in_out):
        fan_in = in_out[0]
        bound = float(np.sqrt(6.0 / fan_in))              # kaiming_uniform_, a=0
        return jax.random.uniform(next(keys), in_out, jnp.float32, -bound, bound)

    def bias(fan_in, out):
        bound = float(1.0 / np.sqrt(fan_in))
        return jax.random.uniform(next(keys), (1, out), jnp.float32, -bound, bound)

    p = {}
    p['w0'] = kaiming((POS_SIZE, NETWIDTH)); p['b0'] = bias(POS_SIZE, NETWIDTH)
    for i in (1, 2, 3, 4, 6, 7):
        p[f'w{i}'] = kaiming((NETWIDTH, NETWIDTH))
        p[f'b{i}'] = bias(NETWIDTH, NETWIDTH)
    w5 = kaiming((NETWIDTH + POS_SIZE, NETWIDTH))          # skip layer (idx 5)
    p['w5a'], p['w5b'] = w5[:NETWIDTH], w5[NETWIDTH:]
    p['b5'] = bias(NETWIDTH + POS_SIZE, NETWIDTH)
    p['wd'] = kaiming((NETWIDTH, NUM_DENSITY)); p['bd'] = bias(NETWIDTH, NUM_DENSITY)
    p['wbot'] = kaiming((NETWIDTH, BOTTLENECK_WIDTH)); p['bbot'] = bias(NETWIDTH, BOTTLENECK_WIDTH)
    wv = kaiming((BOTTLENECK_WIDTH + VIEW_POS_SIZE, NETWIDTH_COND))
    p['wvb'], p['wvd'] = wv[:BOTTLENECK_WIDTH], wv[BOTTLENECK_WIDTH:]
    p['bv'] = bias(BOTTLENECK_WIDTH + VIEW_POS_SIZE, NETWIDTH_COND)
    p['wrgb'] = kaiming((NETWIDTH_COND, NUM_RGB)); p['brgb'] = bias(NETWIDTH_COND, NUM_RGB)
    # TODO(synk): original module selects one of bkgd_stateembeds via
    # transitions_times.json; use a single deterministic embedding here.
    p['state_embed'] = jax.random.normal(next(keys), (EMBED_SIZE,), jnp.float32)

    # TODO(synk): deterministic unit-vector stand-in for helper.generate_basis.
    b = jax.random.normal(next(keys), (3, NUM_BASIS), jnp.float32)
    basis = b / jnp.linalg.norm(b, axis=0, keepdims=True)
    return p, basis


def prepare_weights(params):
    """Pad the POS-dim weights to POS_PAD, cast MXU weights to bf16.

    The density head weight stays f32 and is transposed to (1, NETWIDTH) so the
    kernel can do a VPU multiply + cross-lane reduce instead of an N=1 matmul.
    """
    out = []
    for k in W_ORDER:
        w = params[k]
        if k in ('w0', 'w5b'):
            w = jnp.pad(w, ((0, POS_PAD - POS_SIZE), (0, 0)))
        if k == 'wd':
            w = w.T                         # (1, NETWIDTH), f32
        elif k[0] == 'w':
            w = w.astype(jnp.bfloat16)      # MXU inputs bf16; accumulate in f32
        out.append(w)
    return out


# ------------------------------------ wrapper --------------------------------
def _round_up(x, m):
    return (x + m - 1) // m * m


def mipnerf360_forward(params, basis, means, covs, viewdirs, tm=2048):
    B, S, _ = means.shape
    m, c = contract_mean_cov(means, covs)
    lm, lv = lift_and_diagonalize(m, c, basis)
    x_ipe = integrated_pos_enc(lm, lv, MIN_DEG_POINT, MAX_DEG_POINT)  # (B,S,504)
    emb = jnp.broadcast_to(params['state_embed'], (B, S, EMBED_SIZE))
    x_feat = jnp.concatenate([x_ipe, emb], axis=-1)                   # (B,S,568)

    # View branch hoisted out of the kernel: dir_enc is constant per ray, so
    # its view-MLP contribution (dir_enc @ wvd + bv) is a per-ray (1,128) bias,
    # staged in bf16 and added in f32 inside the kernel.
    dir_enc = pos_enc(viewdirs, 0, DEG_VIEW, True)                    # (B,27)
    dv = (dir_enc @ params['wvd'] + params['bv']).astype(jnp.bfloat16)  # (B,128)
    # TODO(synk): could be passed per-ray (B,128) to drop the S-fold redundancy,
    # but that needs ray-aligned row tiles; keep the simple broadcast.
    dv = jnp.broadcast_to(dv[:, None, :], (B, S, NETWIDTH_COND))

    n = B * S
    # Large row tile (multiple of 128) amortizes the ~0.35 us per-grid-step
    # overhead and fills the MXU; adapted down for tiny inputs.
    tm_eff = min(tm, _round_up(n, 128))
    # Keep >= 2 grid steps when possible so the "parallel" axis can shard work
    # across both v7x TensorCores.
    while tm_eff > 128 and pl.cdiv(n, tm_eff) < 2:
        tm_eff = max(128, _round_up(tm_eff // 2, 128))
    n_pad = _round_up(n, tm_eff)

    # Cast to bf16 BEFORE pad/reshape so the staged feature copy is half-width.
    x_flat = jnp.pad(x_feat.astype(jnp.bfloat16).reshape(n, POS_SIZE),
                     ((0, n_pad - n), (0, POS_PAD - POS_SIZE)))
    dv_flat = jnp.pad(dv.reshape(n, NETWIDTH_COND), ((0, n_pad - n), (0, 0)))
    weights = prepare_weights(params)

    in_specs = [pl.BlockSpec((tm_eff, POS_PAD), lambda i: (i, 0)),
                pl.BlockSpec((tm_eff, NETWIDTH_COND), lambda i: (i, 0))]
    # Constant index maps (full-array blocks) keep the ~1.8 MiB of bf16 weights
    # VMEM-resident across the whole grid; no per-step weight DMAs.
    in_specs += [pl.BlockSpec(w.shape, lambda i: (0, 0)) for w in weights]
    # Two small outputs with full-block stores (avoids the lane-shift concat).
    out_specs = [pl.BlockSpec((tm_eff, NUM_DENSITY), lambda i: (i, 0)),
                 pl.BlockSpec((tm_eff, NUM_RGB), lambda i: (i, 0))]
    out_shape = (jax.ShapeDtypeStruct((n_pad, NUM_DENSITY), jnp.float32),
                 jax.ShapeDtypeStruct((n_pad, NUM_RGB), jnp.float32))

    dens_out, rgb_out = pl.pallas_call(
        mlp_kernel,
        out_shape=out_shape,
        grid_spec=pltpu.PrefetchScalarGridSpec(
            num_scalar_prefetch=0,
            grid=(n_pad // tm_eff,),
            in_specs=in_specs,
            out_specs=out_specs),
        compiler_params=pltpu.CompilerParams(
            dimension_semantics=("parallel",),
            vmem_limit_bytes=32 * 1024 * 1024),
    )(x_flat, dv_flat, *weights)

    density = dens_out[:n, 0].reshape(B, S)
    rgb = rgb_out[:n].reshape(B, S, NUM_RGB)
    return {'density': density, 'rgb': rgb}


# -------------------------------------- main ---------------------------------
if __name__ == "__main__":
    key = jax.random.PRNGKey(0)
    k_m, k_c, k_d, k_p = jax.random.split(key, 4)

    B, S = 2, 8  # 2 rays x 8 samples per ray
    means = 0.5 * jax.random.normal(k_m, (B, S, 3), jnp.float32)
    a = 0.1 * jax.random.normal(k_c, (B, S, 3, 3), jnp.float32)
    covs = a @ jnp.swapaxes(a, -1, -2) + 1e-3 * jnp.eye(3, dtype=jnp.float32)
    vd = jax.random.normal(k_d, (B, 3), jnp.float32)
    viewdirs = vd / jnp.linalg.norm(vd, axis=-1, keepdims=True)

    params, basis = init_params(k_p)

    out = mipnerf360_forward(params, basis, means, covs, viewdirs)
    out = jax.block_until_ready(out)

    assert out['density'].shape == (B, S)
    assert out['rgb'].shape == (B, S, 3)
    assert bool(jnp.all(jnp.isfinite(out['density'])))
    assert bool(jnp.all(jnp.isfinite(out['rgb'])))
    assert bool(jnp.all(out['density'] >= 0.0))
    assert bool(jnp.all(out['rgb'] >= -RGB_PADDING)) and bool(jnp.all(out['rgb'] <= 1.0 + RGB_PADDING))
    print("KERNEL_OK")
</pallas_src>

<mosaic_0001>
module attributes {stable_mosaic.version = 11 : i64} {
  func.func @mlp_kernel(%arg0: i32, %arg1: memref<128x640xbf16, #tpu.memory_space<vmem>>, %arg2: memref<128x128xbf16, #tpu.memory_space<vmem>>, %arg3: memref<640x256xbf16, #tpu.memory_space<vmem>>, %arg4: memref<1x256xf32, #tpu.memory_space<vmem>>, %arg5: memref<256x256xbf16, #tpu.memory_space<vmem>>, %arg6: memref<1x256xf32, #tpu.memory_space<vmem>>, %arg7: memref<256x256xbf16, #tpu.memory_space<vmem>>, %arg8: memref<1x256xf32, #tpu.memory_space<vmem>>, %arg9: memref<256x256xbf16, #tpu.memory_space<vmem>>, %arg10: memref<1x256xf32, #tpu.memory_space<vmem>>, %arg11: memref<256x256xbf16, #tpu.memory_space<vmem>>, %arg12: memref<1x256xf32, #tpu.memory_space<vmem>>, %arg13: memref<256x256xbf16, #tpu.memory_space<vmem>>, %arg14: memref<640x256xbf16, #tpu.memory_space<vmem>>, %arg15: memref<1x256xf32, #tpu.memory_space<vmem>>, %arg16: memref<256x256xbf16, #tpu.memory_space<vmem>>, %arg17: memref<1x256xf32, #tpu.memory_space<vmem>>, %arg18: memref<256x256xbf16, #tpu.memory_space<vmem>>, %arg19: memref<1x256xf32, #tpu.memory_space<vmem>>, %arg20: memref<1x256xf32, #tpu.memory_space<vmem>>, %arg21: memref<1x1xf32, #tpu.memory_space<vmem>>, %arg22: memref<256x256xbf16, #tpu.memory_space<vmem>>, %arg23: memref<1x256xf32, #tpu.memory_space<vmem>>, %arg24: memref<256x128xbf16, #tpu.memory_space<vmem>>, %arg25: memref<128x3xbf16, #tpu.memory_space<vmem>>, %arg26: memref<1x3xf32, #tpu.memory_space<vmem>>, %arg27: memref<128x1xf32, #tpu.memory_space<vmem>>, %arg28: memref<128x3xf32, #tpu.memory_space<vmem>>) attributes {dimension_semantics = [#tpu.dimension_semantics<parallel>], iteration_bounds = array<i64: 1>, scalar_prefetch = 0 : i64, scratch_operands = 0 : i64, tpu.core_type = #tpu.core_type<tc>, window_params = [{transform_indices = @transform_0, window_bounds = array<i64: 128, 640>}, {transform_indices = @transform_1, window_bounds = array<i64: 128, 128>}, {pipeline_mode = #tpu.pipeline_mode<synchronous>, transform_indices = @transform_2, window_bounds = array<i64: 640, 256>}, {pipeline_mode = #tpu.pipeline_mode<synchronous>, transform_indices = @transform_3, window_bounds = array<i64: 1, 256>}, {pipeline_mode = #tpu.pipeline_mode<synchronous>, transform_indices = @transform_4, window_bounds = array<i64: 256, 256>}, {pipeline_mode = #tpu.pipeline_mode<synchronous>, transform_indices = @transform_5, window_bounds = array<i64: 1, 256>}, {pipeline_mode = #tpu.pipeline_mode<synchronous>, transform_indices = @transform_6, window_bounds = array<i64: 256, 256>}, {pipeline_mode = #tpu.pipeline_mode<synchronous>, transform_indices = @transform_7, window_bounds = array<i64: 1, 256>}, {pipeline_mode = #tpu.pipeline_mode<synchronous>, transform_indices = @transform_8, window_bounds = array<i64: 256, 256>}, {pipeline_mode = #tpu.pipeline_mode<synchronous>, transform_indices = @transform_9, window_bounds = array<i64: 1, 256>}, {pipeline_mode = #tpu.pipeline_mode<synchronous>, transform_indices = @transform_10, window_bounds = array<i64: 256, 256>}, {pipeline_mode = #tpu.pipeline_mode<synchronous>, transform_indices = @transform_11, window_bounds = array<i64: 1, 256>}, {pipeline_mode = #tpu.pipeline_mode<synchronous>, transform_indices = @transform_12, window_bounds = array<i64: 256, 256>}, {pipeline_mode = #tpu.pipeline_mode<synchronous>, transform_indices = @transform_13, window_bounds = array<i64: 640, 256>}, {pipeline_mode = #tpu.pipeline_mode<synchronous>, transform_indices = @transform_14, window_bounds = array<i64: 1, 256>}, {pipeline_mode = #tpu.pipeline_mode<synchronous>, transform_indices = @transform_15, window_bounds = array<i64: 256, 256>}, {pipeline_mode = #tpu.pipeline_mode<synchronous>, transform_indices = @transform_16, window_bounds = array<i64: 1, 256>}, {pipeline_mode = #tpu.pipeline_mode<synchronous>, transform_indices = @transform_17, window_bounds = array<i64: 256, 256>}, {pipeline_mode = #tpu.pipeline_mode<synchronous>, transform_indices = @transform_18, window_bounds = array<i64: 1, 256>}, {pipeline_mode = #tpu.pipeline_mode<synchronous>, transform_indices = @transform_19, window_bounds = array<i64: 1, 256>}, {pipeline_mode = #tpu.pipeline_mode<synchronous>, transform_indices = @transform_20, window_bounds = array<i64: 1, 1>}, {pipeline_mode = #tpu.pipeline_mode<synchronous>, transform_indices = @transform_21, window_bounds = array<i64: 256, 256>}, {pipeline_mode = #tpu.pipeline_mode<synchronous>, transform_indices = @transform_22, window_bounds = array<i64: 1, 256>}, {pipeline_mode = #tpu.pipeline_mode<synchronous>, transform_indices = @transform_23, window_bounds = array<i64: 256, 128>}, {pipeline_mode = #tpu.pipeline_mode<synchronous>, transform_indices = @transform_24, window_bounds = array<i64: 128, 3>}, {pipeline_mode = #tpu.pipeline_mode<synchronous>, transform_indices = @transform_25, window_bounds = array<i64: 1, 3>}, {transform_indices = @transform_26, window_bounds = array<i64: 128, 1>}, {transform_indices = @transform_27, window_bounds = array<i64: 128, 3>}]} {
    %c0 = arith.constant 0 : index
    %c0_0 = arith.constant 0 : index
    %0 = vector.load %arg1[%c0, %c0_0] : memref<128x640xbf16, #tpu.memory_space<vmem>>, vector<128x640xbf16>
    %c0_1 = arith.constant 0 : index
    %c0_2 = arith.constant 0 : index
    %1 = vector.load %arg2[%c0_1, %c0_2] : memref<128x128xbf16, #tpu.memory_space<vmem>>, vector<128x128xbf16>
    %2 = arith.extf %1 : vector<128x128xbf16> to vector<128x128xf32>
    %c0_3 = arith.constant 0 : index
    %c0_4 = arith.constant 0 : index
    %3 = vector.load %arg3[%c0_3, %c0_4] : memref<640x256xbf16, #tpu.memory_space<vmem>>, vector<640x256xbf16>
    %cst = arith.constant dense<0.000000e+00> : vector<128x256xf32>
    %4 = tpu.matmul %0, %3, %cst {dimension_numbers = #tpu.dot_dimension_numbers<[1], [0], [0], [1], [0, 0, 1, 1], [], []>} : vector<128x640xbf16>, vector<640x256xbf16>, vector<128x256xf32> -> vector<128x256xf32>
    %c0_5 = arith.constant 0 : index
    %c0_6 = arith.constant 0 : index
    %5 = vector.load %arg4[%c0_5, %c0_6] : memref<1x256xf32, #tpu.memory_space<vmem>>, vector<1x256xf32>
    %6 = vector.broadcast %5 : vector<1x256xf32> to vector<128x256xf32>
    %7 = arith.addf %4, %6 : vector<128x256xf32>
    %cst_7 = arith.constant 0.000000e+00 : f32
    %8 = vector.broadcast %cst_7 : f32 to vector<128x256xf32>
    %9 = arith.maximumf %7, %8 : vector<128x256xf32>
    %10 = arith.truncf %9 : vector<128x256xf32> to vector<128x256xbf16>
    %c0_8 = arith.constant 0 : index
    %c0_9 = arith.constant 0 : index
    %11 = vector.load %arg5[%c0_8, %c0_9] : memref<256x256xbf16, #tpu.memory_space<vmem>>, vector<256x256xbf16>
    %cst_10 = arith.constant dense<0.000000e+00> : vector<128x256xf32>
    %12 = tpu.matmul %10, %11, %cst_10 {dimension_numbers = #tpu.dot_dimension_numbers<[1], [0], [0], [1], [0, 0, 1, 1], [], []>} : vector<128x256xbf16>, vector<256x256xbf16>, vector<128x256xf32> -> vector<128x256xf32>
    %c0_11 = arith.constant 0 : index
    %c0_12 = arith.constant 0 : index
    %13 = vector.load %arg6[%c0_11, %c0_12] : memref<1x256xf32, #tpu.memory_space<vmem>>, vector<1x256xf32>
    %14 = vector.broadcast %13 : vector<1x256xf32> to vector<128x256xf32>
    %15 = arith.addf %12, %14 : vector<128x256xf32>
    %cst_13 = arith.constant 0.000000e+00 : f32
    %16 = vector.broadcast %cst_13 : f32 to vector<128x256xf32>
    %17 = arith.maximumf %15, %16 : vector<128x256xf32>
    %18 = arith.truncf %17 : vector<128x256xf32> to vector<128x256xbf16>
    %c0_14 = arith.constant 0 : index
    %c0_15 = arith.constant 0 : index
    %19 = vector.load %arg7[%c0_14, %c0_15] : memref<256x256xbf16, #tpu.memory_space<vmem>>, vector<256x256xbf16>
    %cst_16 = arith.constant dense<0.000000e+00> : vector<128x256xf32>
    %20 = tpu.matmul %18, %19, %cst_16 {dimension_numbers = #tpu.dot_dimension_numbers<[1], [0], [0], [1], [0, 0, 1, 1], [], []>} : vector<128x256xbf16>, vector<256x256xbf16>, vector<128x256xf32> -> vector<128x256xf32>
    %c0_17 = arith.constant 0 : index
    %c0_18 = arith.constant 0 : index
    %21 = vector.load %arg8[%c0_17, %c0_18] : memref<1x256xf32, #tpu.memory_space<vmem>>, vector<1x256xf32>
    %22 = vector.broadcast %21 : vector<1x256xf32> to vector<128x256xf32>
    %23 = arith.addf %20, %22 : vector<128x256xf32>
    %cst_19 = arith.constant 0.000000e+00 : f32
    %24 = vector.broadcast %cst_19 : f32 to vector<128x256xf32>
    %25 = arith.maximumf %23, %24 : vector<128x256xf32>
    %26 = arith.truncf %25 : vector<128x256xf32> to vector<128x256xbf16>
    %c0_20 = arith.constant 0 : index
    %c0_21 = arith.constant 0 : index
    %27 = vector.load %arg9[%c0_20, %c0_21] : memref<256x256xbf16, #tpu.memory_space<vmem>>, vector<256x256xbf16>
    %cst_22 = arith.constant dense<0.000000e+00> : vector<128x256xf32>
    %28 = tpu.matmul %26, %27, %cst_22 {dimension_numbers = #tpu.dot_dimension_numbers<[1], [0], [0], [1], [0, 0, 1, 1], [], []>} : vector<128x256xbf16>, vector<256x256xbf16>, vector<128x256xf32> -> vector<128x256xf32>
    %c0_23 = arith.constant 0 : index
    %c0_24 = arith.constant 0 : index
    %29 = vector.load %arg10[%c0_23, %c0_24] : memref<1x256xf32, #tpu.memory_space<vmem>>, vector<1x256xf32>
    %30 = vector.broadcast %29 : vector<1x256xf32> to vector<128x256xf32>
    %31 = arith.addf %28, %30 : vector<128x256xf32>
    %cst_25 = arith.constant 0.000000e+00 : f32
    %32 = vector.broadcast %cst_25 : f32 to vector<128x256xf32>
    %33 = arith.maximumf %31, %32 : vector<128x256xf32>
    %34 = arith.truncf %33 : vector<128x256xf32> to vector<128x256xbf16>
    %c0_26 = arith.constant 0 : index
    %c0_27 = arith.constant 0 : index
    %35 = vector.load %arg11[%c0_26, %c0_27] : memref<256x256xbf16, #tpu.memory_space<vmem>>, vector<256x256xbf16>
    %cst_28 = arith.constant dense<0.000000e+00> : vector<128x256xf32>
    %36 = tpu.matmul %34, %35, %cst_28 {dimension_numbers = #tpu.dot_dimension_numbers<[1], [0], [0], [1], [0, 0, 1, 1], [], []>} : vector<128x256xbf16>, vector<256x256xbf16>, vector<128x256xf32> -> vector<128x256xf32>
    %c0_29 = arith.constant 0 : index
    %c0_30 = arith.constant 0 : index
    %37 = vector.load %arg12[%c0_29, %c0_30] : memref<1x256xf32, #tpu.memory_space<vmem>>, vector<1x256xf32>
    %38 = vector.broadcast %37 : vector<1x256xf32> to vector<128x256xf32>
    %39 = arith.addf %36, %38 : vector<128x256xf32>
    %cst_31 = arith.constant 0.000000e+00 : f32
    %40 = vector.broadcast %cst_31 : f32 to vector<128x256xf32>
    %41 = arith.maximumf %39, %40 : vector<128x256xf32>
    %42 = arith.truncf %41 : vector<128x256xf32> to vector<128x256xbf16>
    %c0_32 = arith.constant 0 : index
    %c0_33 = arith.constant 0 : index
    %43 = vector.load %arg13[%c0_32, %c0_33] : memref<256x256xbf16, #tpu.memory_space<vmem>>, vector<256x256xbf16>
    %cst_34 = arith.constant dense<0.000000e+00> : vector<128x256xf32>
    %44 = tpu.matmul %42, %43, %cst_34 {dimension_numbers = #tpu.dot_dimension_numbers<[1], [0], [0], [1], [0, 0, 1, 1], [], []>} : vector<128x256xbf16>, vector<256x256xbf16>, vector<128x256xf32> -> vector<128x256xf32>
    %c0_35 = arith.constant 0 : index
    %c0_36 = arith.constant 0 : index
    %45 = vector.load %arg14[%c0_35, %c0_36] : memref<640x256xbf16, #tpu.memory_space<vmem>>, vector<640x256xbf16>
    %cst_37 = arith.constant dense<0.000000e+00> : vector<128x256xf32>
    %46 = tpu.matmul %0, %45, %cst_37 {dimension_numbers = #tpu.dot_dimension_numbers<[1], [0], [0], [1], [0, 0, 1, 1], [], []>} : vector<128x640xbf16>, vector<640x256xbf16>, vector<128x256xf32> -> vector<128x256xf32>
    %47 = arith.addf %44, %46 : vector<128x256xf32>
    %c0_38 = arith.constant 0 : index
    %c0_39 = arith.constant 0 : index
    %48 = vector.load %arg15[%c0_38, %c0_39] : memref<1x256xf32, #tpu.memory_space<vmem>>, vector<1x256xf32>
    %49 = vector.broadcast %48 : vector<1x256xf32> to vector<128x256xf32>
    %50 = arith.addf %47, %49 : vector<128x256xf32>
    %cst_40 = arith.constant 0.000000e+00 : f32
    %51 = vector.broadcast %cst_40 : f32 to vector<128x256xf32>
    %52 = arith.maximumf %50, %51 : vector<128x256xf32>
    %53 = arith.truncf %52 : vector<128x256xf32> to vector<128x256xbf16>
    %c0_41 = arith.constant 0 : index
    %c0_42 = arith.constant 0 : index
    %54 = vector.load %arg16[%c0_41, %c0_42] : memref<256x256xbf16, #tpu.memory_space<vmem>>, vector<256x256xbf16>
    %cst_43 = arith.constant dense<0.000000e+00> : vector<128x256xf32>
    %55 = tpu.matmul %53, %54, %cst_43 {dimension_numbers = #tpu.dot_dimension_numbers<[1], [0], [0], [1], [0, 0, 1, 1], [], []>} : vector<128x256xbf16>, vector<256x256xbf16>, vector<128x256xf32> -> vector<128x256xf32>
    %c0_44 = arith.constant 0 : index
    %c0_45 = arith.constant 0 : index
    %56 = vector.load %arg17[%c0_44, %c0_45] : memref<1x256xf32, #tpu.memory_space<vmem>>, vector<1x256xf32>
    %57 = vector.broadcast %56 : vector<1x256xf32> to vector<128x256xf32>
    %58 = arith.addf %55, %57 : vector<128x256xf32>
    %cst_46 = arith.constant 0.000000e+00 : f32
    %59 = vector.broadcast %cst_46 : f32 to vector<128x256xf32>
    %60 = arith.maximumf %58, %59 : vector<128x256xf32>
    %61 = arith.truncf %60 : vector<128x256xf32> to vector<128x256xbf16>
    %c0_47 = arith.constant 0 : index
    %c0_48 = arith.constant 0 : index
    %62 = vector.load %arg18[%c0_47, %c0_48] : memref<256x256xbf16, #tpu.memory_space<vmem>>, vector<256x256xbf16>
    %cst_49 = arith.constant dense<0.000000e+00> : vector<128x256xf32>
    %63 = tpu.matmul %61, %62, %cst_49 {dimension_numbers = #tpu.dot_dimension_numbers<[1], [0], [0], [1], [0, 0, 1, 1], [], []>} : vector<128x256xbf16>, vector<256x256xbf16>, vector<128x256xf32> -> vector<128x256xf32>
    %c0_50 = arith.constant 0 : index
    %c0_51 = arith.constant 0 : index
    %64 = vector.load %arg19[%c0_50, %c0_51] : memref<1x256xf32, #tpu.memory_space<vmem>>, vector<1x256xf32>
    %65 = vector.broadcast %64 : vector<1x256xf32> to vector<128x256xf32>
    %66 = arith.addf %63, %65 : vector<128x256xf32>
    %cst_52 = arith.constant 0.000000e+00 : f32
    %67 = vector.broadcast %cst_52 : f32 to vector<128x256xf32>
    %68 = arith.maximumf %66, %67 : vector<128x256xf32>
    %69 = arith.truncf %68 : vector<128x256xf32> to vector<128x256xbf16>
    %70 = arith.extf %69 : vector<128x256xbf16> to vector<128x256xf32>
    %c0_53 = arith.constant 0 : index
    %c0_54 = arith.constant 0 : index
    %71 = vector.load %arg20[%c0_53, %c0_54] : memref<1x256xf32, #tpu.memory_space<vmem>>, vector<1x256xf32>
    %72 = vector.broadcast %71 : vector<1x256xf32> to vector<128x256xf32>
    %73 = arith.mulf %70, %72 : vector<128x256xf32>
    %cst_55 = arith.constant dense<0.000000e+00> : vector<128xf32>
    %74 = vector.multi_reduction <add>, %73, %cst_55 [1] : vector<128x256xf32> to vector<128xf32>
    %75 = vector.shape_cast %74 : vector<128xf32> to vector<128x1xf32>
    %c0_56 = arith.constant 0 : index
    %c0_57 = arith.constant 0 : index
    %76 = vector.load %arg21[%c0_56, %c0_57] : memref<1x1xf32, #tpu.memory_space<vmem>>, vector<1x1xf32>
    %77 = vector.broadcast %76 : vector<1x1xf32> to vector<128x1xf32>
    %78 = arith.addf %75, %77 : vector<128x1xf32>
    %cst_58 = arith.constant -1.000000e+00 : f32
    %79 = vector.broadcast %cst_58 : f32 to vector<128x1xf32>
    %80 = arith.addf %78, %79 : vector<128x1xf32>
    %cst_59 = arith.constant 0.000000e+00 : f32
    %81 = vector.broadcast %cst_59 : f32 to vector<128x1xf32>
    %82 = arith.maximumf %80, %81 : vector<128x1xf32>
    %83 = math.absf %80 : vector<128x1xf32>
    %cst_60 = arith.constant 0.000000e+00 : f32
    %84 = vector.broadcast %cst_60 : f32 to vector<128x1xf32>
    %85 = arith.subf %84, %83 : vector<128x1xf32>
    %86 = math.exp %85 : vector<128x1xf32>
    %cst_61 = arith.constant 1.000000e+00 : f32
    %87 = vector.broadcast %cst_61 : f32 to vector<128x1xf32>
    %88 = arith.addf %87, %86 : vector<128x1xf32>
    %89 = math.log %88 : vector<128x1xf32>
    %90 = arith.addf %82, %89 : vector<128x1xf32>
    %c0_62 = arith.constant 0 : index
    %c0_63 = arith.constant 0 : index
    %91 = vector.load %arg22[%c0_62, %c0_63] : memref<256x256xbf16, #tpu.memory_space<vmem>>, vector<256x256xbf16>
    %cst_64 = arith.constant dense<0.000000e+00> : vector<128x256xf32>
    %92 = tpu.matmul %69, %91, %cst_64 {dimension_numbers = #tpu.dot_dimension_numbers<[1], [0], [0], [1], [0, 0, 1, 1], [], []>} : vector<128x256xbf16>, vector<256x256xbf16>, vector<128x256xf32> -> vector<128x256xf32>
    %c0_65 = arith.constant 0 : index
    %c0_66 = arith.constant 0 : index
    %93 = vector.load %arg23[%c0_65, %c0_66] : memref<1x256xf32, #tpu.memory_space<vmem>>, vector<1x256xf32>
    %94 = vector.broadcast %93 : vector<1x256xf32> to vector<128x256xf32>
    %95 = arith.addf %92, %94 : vector<128x256xf32>
    %96 = arith.truncf %95 : vector<128x256xf32> to vector<128x256xbf16>
    %c0_67 = arith.constant 0 : index
    %c0_68 = arith.constant 0 : index
    %97 = vector.load %arg24[%c0_67, %c0_68] : memref<256x128xbf16, #tpu.memory_space<vmem>>, vector<256x128xbf16>
    %cst_69 = arith.constant dense<0.000000e+00> : vector<128x128xf32>
    %98 = tpu.matmul %96, %97, %cst_69 {dimension_numbers = #tpu.dot_dimension_numbers<[1], [0], [0], [1], [0, 0, 1, 1], [], []>} : vector<128x256xbf16>, vector<256x128xbf16>, vector<128x128xf32> -> vector<128x128xf32>
    %99 = arith.addf %98, %2 : vector<128x128xf32>
    %cst_70 = arith.constant 0.000000e+00 : f32
    %100 = vector.broadcast %cst_70 : f32 to vector<128x128xf32>
    %101 = arith.maximumf %99, %100 : vector<128x128xf32>
    %102 = arith.truncf %101 : vector<128x128xf32> to vector<128x128xbf16>
    %c0_71 = arith.constant 0 : index
    %c0_72 = arith.constant 0 : index
    %103 = vector.load %arg25[%c0_71, %c0_72] : memref<128x3xbf16, #tpu.memory_space<vmem>>, vector<128x3xbf16>
    %cst_73 = arith.constant dense<0.000000e+00> : vector<128x3xf32>
    %104 = tpu.matmul %102, %103, %cst_73 {dimension_numbers = #tpu.dot_dimension_numbers<[1], [0], [0], [1], [0, 0, 1, 1], [], []>} : vector<128x128xbf16>, vector<128x3xbf16>, vector<128x3xf32> -> vector<128x3xf32>
    %c0_74 = arith.constant 0 : index
    %c0_75 = arith.constant 0 : index
    %105 = vector.load %arg26[%c0_74, %c0_75] : memref<1x3xf32, #tpu.memory_space<vmem>>, vector<1x3xf32>
    %106 = vector.broadcast %105 : vector<1x3xf32> to vector<128x3xf32>
    %107 = arith.addf %104, %106 : vector<128x3xf32>
    %cst_76 = arith.constant 1.000000e+00 : f32
    %108 = vector.broadcast %cst_76 : f32 to vector<128x3xf32>
    %109 = arith.mulf %108, %107 : vector<128x3xf32>
    %cst_77 = arith.constant 0.000000e+00 : f32
    %110 = vector.broadcast %cst_77 : f32 to vector<128x3xf32>
    %111 = arith.addf %109, %110 : vector<128x3xf32>
    %cst_78 = arith.constant 0.000000e+00 : f32
    %112 = vector.broadcast %cst_78 : f32 to vector<128x3xf32>
    %113 = arith.subf %112, %111 : vector<128x3xf32>
    %114 = math.exp %113 : vector<128x3xf32>
    %cst_79 = arith.constant 1.000000e+00 : f32
    %115 = vector.broadcast %cst_79 : f32 to vector<128x3xf32>
    %116 = arith.addf %115, %114 : vector<128x3xf32>
    %cst_80 = arith.constant 1.000000e+00 : f32
    %117 = vector.broadcast %cst_80 : f32 to vector<128x3xf32>
    %118 = arith.divf %117, %116 : vector<128x3xf32>
    %cst_81 = arith.constant 1.002000e+00 : f32
    %119 = vector.broadcast %cst_81 : f32 to vector<128x3xf32>
    %120 = arith.mulf %118, %119 : vector<128x3xf32>
    %cst_82 = arith.constant 1.000000e-03 : f32
    %121 = vector.broadcast %cst_82 : f32 to vector<128x3xf32>
    %122 = arith.subf %120, %121 : vector<128x3xf32>
    %c0_83 = arith.constant 0 : index
    %c0_84 = arith.constant 0 : index
    %123 = vector.load %arg27[%c0_83, %c0_84] : memref<128x1xf32, #tpu.memory_space<vmem>>, vector<128x1xf32>
    tpu.vector_store %arg27[%c0_83, %c0_84], %90 {strides = array<i32>} : memref<128x1xf32, #tpu.memory_space<vmem>>, vector<128x1xf32>,
    %c0_85 = arith.constant 0 : index
    %c0_86 = arith.constant 0 : index
    %124 = vector.load %arg28[%c0_85, %c0_86] : memref<128x3xf32, #tpu.memory_space<vmem>>, vector<128x3xf32>
    tpu.vector_store %arg28[%c0_85, %c0_86], %122 {strides = array<i32>} : memref<128x3xf32, #tpu.memory_space<vmem>>, vector<128x3xf32>,
    return
  }
  func.func @transform_0(%arg0: i32) -> (i32, i32) {
    %c0_i32 = arith.constant 0 : i32
    %c0_i32_0 = arith.constant 0 : i32
    return %arg0, %c0_i32 : i32, i32
  }
  func.func @transform_1(%arg0: i32) -> (i32, i32) {
    %c0_i32 = arith.constant 0 : i32
    %c0_i32_0 = arith.constant 0 : i32
    return %arg0, %c0_i32 : i32, i32
  }
  func.func @transform_2(%arg0: i32) -> (i32, i32) {
    %c0_i32 = arith.constant 0 : i32
    %c0_i32_0 = arith.constant 0 : i32
    %c0_i32_1 = arith.constant 0 : i32
    return %c0_i32, %c0_i32_0 : i32, i32
  }
  func.func @transform_3(%arg0: i32) -> (i32, i32) {
    %c0_i32 = arith.constant 0 : i32
    %c0_i32_0 = arith.constant 0 : i32
    %c0_i32_1 = arith.constant 0 : i32
    return %c0_i32, %c0_i32_0 : i32, i32
  }
  func.func @transform_4(%arg0: i32) -> (i32, i32) {
    %c0_i32 = arith.constant 0 : i32
    %c0_i32_0 = arith.constant 0 : i32
    %c0_i32_1 = arith.constant 0 : i32
    return %c0_i32, %c0_i32_0 : i32, i32
  }
  func.func @transform_5(%arg0: i32) -> (i32, i32) {
    %c0_i32 = arith.constant 0 : i32
    %c0_i32_0 = arith.constant 0 : i32
    %c0_i32_1 = arith.constant 0 : i32
    return %c0_i32, %c0_i32_0 : i32, i32
  }
  func.func @transform_6(%arg0: i32) -> (i32, i32) {
    %c0_i32 = arith.constant 0 : i32
    %c0_i32_0 = arith.constant 0 : i32
    %c0_i32_1 = arith.constant 0 : i32
    return %c0_i32, %c0_i32_0 : i32, i32
  }
  func.func @transform_7(%arg0: i32) -> (i32, i32) {
    %c0_i32 = arith.constant 0 : i32
    %c0_i32_0 = arith.constant 0 : i32
    %c0_i32_1 = arith.constant 0 : i32
    return %c0_i32, %c0_i32_0 : i32, i32
  }
  func.func @transform_8(%arg0: i32) -> (i32, i32) {
    %c0_i32 = arith.constant 0 : i32
    %c0_i32_0 = arith.constant 0 : i32
    %c0_i32_1 = arith.constant 0 : i32
    return %c0_i32, %c0_i32_0 : i32, i32
  }
  func.func @transform_9(%arg0: i32) -> (i32, i32) {
    %c0_i32 = arith.constant 0 : i32
    %c0_i32_0 = arith.constant 0 : i32
    %c0_i32_1 = arith.constant 0 : i32
    return %c0_i32, %c0_i32_0 : i32, i32
  }
  func.func @transform_10(%arg0: i32) -> (i32, i32) {
    %c0_i32 = arith.constant 0 : i32
    %c0_i32_0 = arith.constant 0 : i32
    %c0_i32_1 = arith.constant 0 : i32
    return %c0_i32, %c0_i32_0 : i32, i32
  }
  func.func @transform_11(%arg0: i32) -> (i32, i32) {
    %c0_i32 = arith.constant 0 : i32
    %c0_i32_0 = arith.constant 0 : i32
    %c0_i32_1 = arith.constant 0 : i32
    return %c0_i32, %c0_i32_0 : i32, i32
  }
  func.func @transform_12(%arg0: i32) -> (i32, i32) {
    %c0_i32 = arith.constant 0 : i32
    %c0_i32_0 = arith.constant 0 : i32
    %c0_i32_1 = arith.constant 0 : i32
    return %c0_i32, %c0_i32_0 : i32, i32
  }
  func.func @transform_13(%arg0: i32) -> (i32, i32) {
    %c0_i32 = arith.constant 0 : i32
    %c0_i32_0 = arith.constant 0 : i32
    %c0_i32_1 = arith.constant 0 : i32
    return %c0_i32, %c0_i32_0 : i32, i32
  }
  func.func @transform_14(%arg0: i32) -> (i32, i32) {
    %c0_i32 = arith.constant 0 : i32
    %c0_i32_0 = arith.constant 0 : i32
    %c0_i32_1 = arith.constant 0 : i32
    return %c0_i32, %c0_i32_0 : i32, i32
  }
  func.func @transform_15(%arg0: i32) -> (i32, i32) {
    %c0_i32 = arith.constant 0 : i32
    %c0_i32_0 = arith.constant 0 : i32
    %c0_i32_1 = arith.constant 0 : i32
    return %c0_i32, %c0_i32_0 : i32, i32
  }
  func.func @transform_16(%arg0: i32) -> (i32, i32) {
    %c0_i32 = arith.constant 0 : i32
    %c0_i32_0 = arith.constant 0 : i32
    %c0_i32_1 = arith.constant 0 : i32
    return %c0_i32, %c0_i32_0 : i32, i32
  }
  func.func @transform_17(%arg0: i32) -> (i32, i32) {
    %c0_i32 = arith.constant 0 : i32
    %c0_i32_0 = arith.constant 0 : i32
    %c0_i32_1 = arith.constant 0 : i32
    return %c0_i32, %c0_i32_0 : i32, i32
  }
  func.func @transform_18(%arg0: i32) -> (i32, i32) {
    %c0_i32 = arith.constant 0 : i32
    %c0_i32_0 = arith.constant 0 : i32
    %c0_i32_1 = arith.constant 0 : i32
    return %c0_i32, %c0_i32_0 : i32, i32
  }
  func.func @transform_19(%arg0: i32) -> (i32, i32) {
    %c0_i32 = arith.constant 0 : i32
    %c0_i32_0 = arith.constant 0 : i32
    %c0_i32_1 = arith.constant 0 : i32
    return %c0_i32, %c0_i32_0 : i32, i32
  }
  func.func @transform_20(%arg0: i32) -> (i32, i32) {
    %c0_i32 = arith.constant 0 : i32
    %c0_i32_0 = arith.constant 0 : i32
    %c0_i32_1 = arith.constant 0 : i32
    return %c0_i32, %c0_i32_0 : i32, i32
  }
  func.func @transform_21(%arg0: i32) -> (i32, i32) {
    %c0_i32 = arith.constant 0 : i32
    %c0_i32_0 = arith.constant 0 : i32
    %c0_i32_1 = arith.constant 0 : i32
    return %c0_i32, %c0_i32_0 : i32, i32
  }
  func.func @transform_22(%arg0: i32) -> (i32, i32) {
    %c0_i32 = arith.constant 0 : i32
    %c0_i32_0 = arith.constant 0 : i32
    %c0_i32_1 = arith.constant 0 : i32
    return %c0_i32, %c0_i32_0 : i32, i32
  }
  func.func @transform_23(%arg0: i32) -> (i32, i32) {
    %c0_i32 = arith.constant 0 : i32
    %c0_i32_0 = arith.constant 0 : i32
    %c0_i32_1 = arith.constant 0 : i32
    return %c0_i32, %c0_i32_0 : i32, i32
  }
  func.func @transform_24(%arg0: i32) -> (i32, i32) {
    %c0_i32 = arith.constant 0 : i32
    %c0_i32_0 = arith.constant 0 : i32
    %c0_i32_1 = arith.constant 0 : i32
    return %c0_i32, %c0_i32_0 : i32, i32
  }
  func.func @transform_25(%arg0: i32) -> (i32, i32) {
    %c0_i32 = arith.constant 0 : i32
    %c0_i32_0 = arith.constant 0 : i32
    %c0_i32_1 = arith.constant 0 : i32
    return %c0_i32, %c0_i32_0 : i32, i32
  }
  func.func @transform_26(%arg0: i32) -> (i32, i32) {
    %c0_i32 = arith.constant 0 : i32
    %c0_i32_0 = arith.constant 0 : i32
    return %arg0, %c0_i32 : i32, i32
  }
  func.func @transform_27(%arg0: i32) -> (i32, i32) {
    %c0_i32 = arith.constant 0 : i32
    %c0_i32_0 = arith.constant 0 : i32
    return %arg0, %c0_i32 : i32, i32
  }
}

</mosaic_0001>

<bundles_post_ra>
// kernel: tpu_custom_call.1
= control target key start
LH: loop header
LB: loop body
LE: loop exit
PB: predicated region body
PF: predicated region fallthrough
CT: control target
= control target key end

     0   :  { %s11924_s0 = inlined_call_operand.hbm [shape: bf16[128,640], index: 0, kind: input, shape index: {}]   ;;  %s11925_s1 = inlined_call_operand.vmem [shape: bf16[128,128], index: 1, kind: input, shape index: {}]   ;;  %s11926_s2 = inlined_call_operand.hbm [shape: bf16[640,256], index: 2, kind: input, shape index: {}]   ;;  %s11927_s3 = inlined_call_operand.vmem [shape: f32[1,256], index: 3, kind: input, shape index: {}]   ;;  %s11928_s4 = inlined_call_operand.hbm [shape: bf16[256,256], index: 4, kind: input, shape index: {}]   ;;  %s11929_s5 = inlined_call_operand.vmem [shape: f32[1,256], index: 5, kind: input, shape index: {}]   ;;  %s11930_s6 = inlined_call_operand.hbm [shape: bf16[256,256], index: 6, kind: input, shape index: {}]   ;;  %s11931_s7 = inlined_call_operand.vmem [shape: f32[1,256], index: 7, kind: input, shape index: {}]   ;;  %s11932_s8 = inlined_call_operand.hbm [shape: bf16[256,256], index: 8, kind: input, shape index: {}]   ;;  %s11933_s9 = inlined_call_operand.vmem [shape: f32[1,256], index: 9, kind: input, shape index: {}]   ;;  %s11934_s10 = inlined_call_operand.hbm [shape: bf16[256,256], index: 10, kind: input, shape index: {}]   ;;  %s11935_s11 = inlined_call_operand.vmem [shape: f32[1,256], index: 11, kind: input, shape index: {}]   ;;  %s11936_s12 = inlined_call_operand.hbm [shape: bf16[256,256], index: 12, kind: input, shape index: {}]   ;;  %s11937_s13 = inlined_call_operand.hbm [shape: bf16[640,256], index: 13, kind: input, shape index: {}]   ;;  %s11938_s14 = inlined_call_operand.vmem [shape: f32[1,256], index: 14, kind: input, shape index: {}]   ;;  %s11939_s15 = inlined_call_operand.hbm [shape: bf16[256,256], index: 15, kind: input, shape index: {}]   ;;  %s11940_s16 = inlined_call_operand.vmem [shape: f32[1,256], index: 16, kind: input, shape index: {}]   ;;  %s11941_s17 = inlined_call_operand.hbm [shape: bf16[256,256], index: 17, kind: input, shape index: {}]   ;;  %s11942_s18 = inlined_call_operand.vmem [shape: f32[1,256], index: 18, kind: input, shape index: {}]   ;;  %s11943_s19 = inlined_call_operand.vmem [shape: f32[1,256], index: 19, kind: input, shape index: {}]   ;;  %s11944_s20 = inlined_call_operand.<no memory space> [shape: f32[1,1], index: 20, kind: input, shape index: {}]   ;;  %s11945_s21 = inlined_call_operand.hbm [shape: bf16[256,256], index: 21, kind: input, shape index: {}]   ;;  %s11946_s22 = inlined_call_operand.vmem [shape: f32[1,256], index: 22, kind: input, shape index: {}]   ;;  %s11947_s23 = inlined_call_operand.hbm [shape: bf16[256,128], index: 23, kind: input, shape index: {}]   ;;  %s11948_s24 = inlined_call_operand.vmem [shape: bf16[128,3], index: 24, kind: input, shape index: {}]   ;;  %s11949_s25 = inlined_call_operand.vmem [shape: f32[1,3], index: 25, kind: input, shape index: {}]   ;;  %s11950_s26 = inlined_call_operand.vmem [shape: f32[128,1], index: 26, kind: output, shape index: {0}]   ;;  %s11951_s27 = inlined_call_operand.vmem [shape: f32[128,3], index: 27, kind: output, shape index: {1}]  }
   0x1   :  { %12017 = sst [smem:[#allocation62_spill]] %s11924_s0  ;;  %v33_v0 = vstv %s11944_s20 }
   0x2   :  { %12018 = sst [smem:[#allocation63_spill]] %s11925_s1  ;;  %34 = vst [vmem:[#allocation2] sm:$0x1] %v33_v0 }
   0x3   :  { %12019 = sst [smem:[#allocation64_spill]] %s11926_s2 }
   0x4   :  { %12020 = sst [smem:[#allocation65_spill]] %s11927_s3 }
   0x5   :  { %12021 = sst [smem:[#allocation66_spill]] %s11928_s4 }
   0x6   :  { %12022 = sst [smem:[#allocation67_spill]] %s11929_s5 }
   0x7   :  { %12023 = sst [smem:[#allocation68_spill]] %s11930_s6 }
   0x8   :  { %12024 = sst [smem:[#allocation69_spill]] %s11931_s7 }
   0x9   :  { %12025 = sst [smem:[#allocation70_spill]] %s11932_s8 }
   0xa   :  { %12026 = sst [smem:[#allocation71_spill]] %s11933_s9 }
   0xb   :  { %12027 = sst [smem:[#allocation72_spill]] %s11934_s10 }
   0xc   :  { %12028 = sst [smem:[#allocation73_spill]] %s11935_s11 }
   0xd   :  { %12029 = sst [smem:[#allocation74_spill]] %s11951_s27 }
   0xe   :  { %35 = vsyncpa [#allocation4], 0 }
   0xf   :  { %36 = vsyncpa [#allocation6], 0 }
  0x10   :  { %37 = vsyncpa [#allocation9], 0 }
  0x11   :  { %38 = vsyncpa [#allocation12], 0 }
  0x12   :  { %39 = vsyncpa [#allocation15], 0 }
  0x13   :  { %40 = vsyncpa [#allocation18], 0  ;;  %s12030_s9 = sld [smem:[#allocation64_spill]] }
  0x19   :  { %s61_s5 = sshll.u32 %s12030_s9, 4  ;;  %s62_s5 = int_to_ptr.hbm [resolvable:$true] %s61_s5 }
  0x1a   :  { %41 = vsyncpa [#allocation21], 0  ;;  %s10167_s28 = smov [#allocation5]   ;;  %s12031_s1 = sld [smem:[#allocation68_spill]] }
  0x1b   :  { %s63_s0 = sshll.u32 %s10167_s28, 4  ;;  %s10168_s6 = smov 128   ;;  %s64_s0 = int_to_ptr.vmem [resolvable:$true] %s63_s0 }
  0x1c   :  { %s10169_s11 = smov 8   ;;  %s10170_s2 = smov [#allocation8]  }
  0x1d   :  { %69 = dma.hbm_to_vmem [thread:$0]  %s62_s5, 10240, %s64_s0, [#allocation6], %s10168_s6, %s10168_s6, %s10169_s11  }
  0x1e   :  { %s93_s3 = sshll.u32 %s10170_s2, 4  ;;  %s12032_s8 = sld [smem:[#allocation72_spill]]  ;;  %s94_s3 = int_to_ptr.vmem [resolvable:$true] %s93_s3 }
  0x1f   :  { %s149_s10 = sshll.u32 %s11937_s13, 4  ;;  %s10171_s29 = smov [#allocation11]   ;;  %s150_s10 = int_to_ptr.hbm [resolvable:$true] %s149_s10 }
  0x20   :  { %s91_s20 = sshll.u32 %s12031_s1, 4  ;;  %s123_s1 = sshll.u32 %s10171_s29, 4  ;;  %s92_s20 = int_to_ptr.hbm [resolvable:$true] %s91_s20  ;;  %s124_s1 = int_to_ptr.vmem [resolvable:$true] %s123_s1 }
  0x21   :  { %99 = dma.hbm_to_vmem [thread:$0]  %s92_s20, 4096, %s94_s3, [#allocation9], %s10168_s6, %s10168_s6, %s10169_s11  }
  0x22   :  { %s10172_s5 = smov [#allocation14]   ;;  %s179_s4 = sshll.u32 %s11941_s17, 4  ;;  %s180_s4 = int_to_ptr.hbm [resolvable:$true] %s179_s4 }
  0x23   :  { %s151_s0 = sshll.u32 %s10172_s5, 4  ;;  %s12033_s3 = sld [smem:[#allocation62_spill]]  ;;  %s152_s0 = int_to_ptr.vmem [resolvable:$true] %s151_s0 }
  0x24   :  { %s121_s30 = sshll.u32 %s12032_s8, 4  ;;  %s10173_s9 = smov [#allocation17]   ;;  %s122_s30 = int_to_ptr.hbm [resolvable:$true] %s121_s30 }
  0x25   :  { %129 = dma.hbm_to_vmem [thread:$0]  %s122_s30, 4096, %s124_s1, [#allocation12], %s10168_s6, %s10168_s6, %s10169_s11  }
  0x26   :  { %157 = dma.hbm_to_vmem [thread:$0]  %s150_s10, 10240, %s152_s0, [#allocation15], %s10168_s6, %s10168_s6, %s10169_s11  }
  0x27   :  { %s181_s28 = sshll.u32 %s10173_s9, 4  ;;  %s10174_s30 = smov [#allocation3]   ;;  %s182_s28 = int_to_ptr.vmem [resolvable:$true] %s181_s28 }
  0x28   :  { %187 = dma.hbm_to_vmem [thread:$0]  %s180_s4, 4096, %s182_s28, [#allocation18], %s10168_s6, %s10168_s6, %s10169_s11  }
  0x29   :  { %s46_s8 = sshll.u32 %s12033_s3, 4  ;;  %s48_s17 = sshll.u32 %s10174_s30, 4  ;;  %s47_s8 = int_to_ptr.hbm [resolvable:$true] %s46_s8  ;;  %s49_s17 = int_to_ptr.vmem [resolvable:$true] %s48_s17 }
  0x2a   :  { %s10175_s29 = smov 320   ;;  %s10176_s1 = smov 20  }
  0x2b   :  { %54 = dma.hbm_to_vmem [thread:$0]  %s47_s8, 5120, %s49_s17, [#allocation4], %s10175_s29, %s10175_s29, %s10176_s1  }
  0x2c   :  { %s12034_s0 = sld [smem:[#allocation66_spill]]  ;;  %s10177_s7 = smov [#allocation7]  }
  0x2d   :  { %s78_s13 = sshll.u32 %s10177_s7, 4  ;;  %s12035_s9 = sld [smem:[#allocation70_spill]]  ;;  %s79_s13 = int_to_ptr.vmem [resolvable:$true] %s78_s13 }
  0x2e   :  { %s10178_s4 = smov [#allocation10]   ;;  %s136_s17 = sshll.u32 %s11936_s12, 4  ;;  %s137_s17 = int_to_ptr.hbm [resolvable:$true] %s136_s17 }
  0x2f   :  { %s108_s28 = sshll.u32 %s10178_s4, 4  ;;  %s164_s5 = sshll.u32 %s11939_s15, 4  ;;  %s109_s28 = int_to_ptr.vmem [resolvable:$true] %s108_s28  ;;  %s165_s5 = int_to_ptr.hbm [resolvable:$true] %s164_s5 }
  0x30   :  { %s10179_s10 = smov [#allocation13]   ;;  %s198_s20 = sshll.u32 %s11945_s21, 4  ;;  %s199_s20 = int_to_ptr.hbm [resolvable:$true] %s198_s20 }
  0x31   :  { %s213_s3 = sshll.u32 %s11947_s23, 4  ;;  %s10183_s8 = smov 64   ;;  %s214_s3 = int_to_ptr.hbm [resolvable:$true] %s213_s3 }
  0x32   :  { %s76_s2 = sshll.u32 %s12034_s0, 4  ;;  %s138_s0 = sshll.u32 %s10179_s10, 4  ;;  %s77_s2 = int_to_ptr.hbm [resolvable:$true] %s76_s2  ;;  %s139_s0 = int_to_ptr.vmem [resolvable:$true] %s138_s0 }
  0x33   :  { %s106_s27 = sshll.u32 %s12035_s9, 4  ;;  %s10181_s9 = smov [#allocation19]   ;;  %s107_s27 = int_to_ptr.hbm [resolvable:$true] %s106_s27 }
  0x34   :  { %84 = dma.hbm_to_vmem [thread:$0]  %s77_s2, 4096, %s79_s13, [#allocation6], %s10168_s6, %s10168_s6, %s10169_s11  }
  0x35   :  { %114 = dma.hbm_to_vmem [thread:$0]  %s107_s27, 4096, %s109_s28, [#allocation9], %s10168_s6, %s10168_s6, %s10169_s11  }
  0x36   :  { %144 = dma.hbm_to_vmem [thread:$0]  %s137_s17, 4096, %s139_s0, [#allocation12], %s10168_s6, %s10168_s6, %s10169_s11  }
  0x37   :  { %s10180_s2 = smov [#allocation16]   ;;  %s200_s4 = sshll.u32 %s10181_s9, 4  ;;  %s201_s4 = int_to_ptr.vmem [resolvable:$true] %s200_s4 }
  0x38   :  { %s166_s12 = sshll.u32 %s10180_s2, 4  ;;  %s10182_s28 = smov [#allocation20]   ;;  %s167_s12 = int_to_ptr.vmem [resolvable:$true] %s166_s12 }
  0x39   :  { %172 = dma.hbm_to_vmem [thread:$0]  %s165_s5, 4096, %s167_s12, [#allocation15], %s10168_s6, %s10168_s6, %s10169_s11  }
  0x3a   :  { %206 = dma.hbm_to_vmem [thread:$0]  %s199_s20, 4096, %s201_s4, [#allocation18], %s10168_s6, %s10168_s6, %s10169_s11  }
  0x3b   :  { %s215_s21 = sshll.u32 %s10182_s28, 4  ;;  %s10184_s30 = smov 4   ;;  %s216_s21 = int_to_ptr.vmem [resolvable:$true] %s215_s21 }
  0x3c   :  { %221 = dma.hbm_to_vmem [thread:$0]  %s214_s3, 2048, %s216_s21, [#allocation21], %s10183_s8, %s10183_s8, %s10184_s30  }
  0x3d   :  { %10153 = dma.done.wait [#allocation4], 5120  }
  0x3e   :  { %10154 = vsyncadd [#allocation4], 4294962176 }
  0x3f   :  { %10155 = dma.done.wait [#allocation6], 14336  }
  0x40   :  { %10156 = vsyncadd [#allocation6], 4294952960 }
  0x41   :  { %10157 = dma.done.wait [#allocation9], 8192  }
  0x42   :  { %10158 = vsyncadd [#allocation9], 4294959104 }
  0x43   :  { %10159 = dma.done.wait [#allocation12], 8192  }
  0x44   :  { %10160 = vsyncadd [#allocation12], 4294959104 }
  0x45   :  { %10161 = dma.done.wait [#allocation15], 14336  }
  0x46   :  { %10162 = vsyncadd [#allocation15], 4294952960 }
  0x47   :  { %10163 = dma.done.wait [#allocation18], 8192  }
  0x48   :  { %10164 = vsyncadd [#allocation18], 4294959104 }
  0x49   :  { %10165 = dma.done.wait [#allocation21], 2048  }
  0x4a   :  { %10166 = vsyncadd [#allocation21], 4294965248  ;;  %v7456_v1 = vld [vmem:[#allocation5 + $0x70] sm:$0xf]  ;;  %v9229_v2 = vld [vmem:[#allocation5 + $0x74] sm:$0xf0] }
  0x4b   :  { %v7584_v3 = vld [vmem:[#allocation5 + $0x170] sm:$0xf]  ;;  %v7457_v4 = vor.u32 %v9229_v2, %v7456_v1  ;;  %v9261_v5 = vld [vmem:[#allocation5 + $0x174] sm:$0xf0]  ;;  %v7448_v10 = vld [vmem:[#allocation5 + $0x60] sm:$0xf] }
  0x4c   :  { %v7520_v6 = vld [vmem:[#allocation5 + $0xf0] sm:$0xf]  ;;  %v9245_v7 = vld [vmem:[#allocation5 + $0xf4] sm:$0xf0]  ;;  %v10394_v8 = vor.u32 %v9261_v5, %v7584_v3  ;;  %v9227_v11 = vld [vmem:[#allocation5 + $0x64] sm:$0xf0] }
  0x4d   :  { %v10396_v9 = vor.u32 %v9245_v7, %v7520_v6  ;;  %v7576_v12 = vld [vmem:[#allocation5 + $0x160] sm:$0xf]  ;;  %1048 = vmatpush.bf16.msra.mxu0 %v7457_v4  ;;  %9693 = vmatpush.bf16.msra.mxu3 %v7457_v4  ;;  %v7449_v13 = vor.u32 %v9227_v11, %v7448_v10  ;;  %v9259_v14 = vld [vmem:[#allocation5 + $0x164] sm:$0xf0]  ;;  %v7440_v19 = vld [vmem:[#allocation5 + $0x50] sm:$0xf] }
  0x4e   :  { %v7512_v15 = vld [vmem:[#allocation5 + $0xe0] sm:$0xf]  ;;  %v9243_v16 = vld [vmem:[#allocation5 + $0xe4] sm:$0xf0]  ;;  %9709 = vmatpush.bf16.msra.mxu2 %v10394_v8  ;;  %v10400_v17 = vor.u32 %v9259_v14, %v7576_v12  ;;  %v9225_v20 = vld [vmem:[#allocation5 + $0x54] sm:$0xf0] }
  0x4f   :  { %9701 = vmatpush.bf16.msra.mxu1 %v10396_v9  ;;  %v10402_v18 = vor.u32 %v9243_v16, %v7512_v15  ;;  %v7568_v21 = vld [vmem:[#allocation5 + $0x150] sm:$0xf]  ;;  %v9257_v22 = vld [vmem:[#allocation5 + $0x154] sm:$0xf0]  ;;  %v7441_v25 = vor.u32 %v9225_v20, %v7440_v19  ;;  %v7432_v28 = vld [vmem:[#allocation5 + $0x40] sm:$0xf] }
  0x50   :  { %v7504_v23 = vld [vmem:[#allocation5 + $0xd0] sm:$0xf]  ;;  %v9241_v24 = vld [vmem:[#allocation5 + $0xd4] sm:$0xf0]  ;;  %v10406_v26 = vor.u32 %v9257_v22, %v7568_v21  ;;  %v9223_v29 = vld [vmem:[#allocation5 + $0x44] sm:$0xf0] }
  0x51   :  { %1049 = vmatpush.bf16.msra.mxu0 %v7449_v13  ;;  %9694 = vmatpush.bf16.msra.mxu3 %v7449_v13  ;;  %v10408_v27 = vor.u32 %v9241_v24, %v7504_v23  ;;  %v7560_v30 = vld [vmem:[#allocation5 + $0x140] sm:$0xf]  ;;  %v9255_v31 = vld [vmem:[#allocation5 + $0x144] sm:$0xf0]  ;;  %v7433_v34 = vor.u32 %v9223_v29, %v7432_v28  ;;  %v7424_v37 = vld [vmem:[#allocation5 + $0x30] sm:$0xf] }
  0x52   :  { %9710 = vmatpush.bf16.msra.mxu2 %v10400_v17  ;;  %v7496_v32 = vld [vmem:[#allocation5 + $0xc0] sm:$0xf]  ;;  %v9239_v33 = vld [vmem:[#allocation5 + $0xc4] sm:$0xf0]  ;;  %v10412_v35 = vor.u32 %v9255_v31, %v7560_v30  ;;  %v9221_v38 = vld [vmem:[#allocation5 + $0x34] sm:$0xf0] }
  0x53   :  { %9702 = vmatpush.bf16.msra.mxu1 %v10402_v18  ;;  %v10414_v36 = vor.u32 %v9239_v33, %v7496_v32  ;;  %v7552_v39 = vld [vmem:[#allocation5 + $0x130] sm:$0xf]  ;;  %v9253_v40 = vld [vmem:[#allocation5 + $0x134] sm:$0xf0]  ;;  %v7425_v43 = vor.u32 %v9221_v38, %v7424_v37  ;;  %v7416_v46 = vld [vmem:[#allocation5 + $0x20] sm:$0xf] }
  0x54   :  { %v7488_v41 = vld [vmem:[#allocation5 + $0xb0] sm:$0xf]  ;;  %v9237_v42 = vld [vmem:[#allocation5 + $0xb4] sm:$0xf0]  ;;  %v10418_v44 = vor.u32 %v9253_v40, %v7552_v39  ;;  %v9219_v47 = vld [vmem:[#allocation5 + $0x24] sm:$0xf0] }
  0x55   :  { %1050 = vmatpush.bf16.msra.mxu0 %v7441_v25  ;;  %9695 = vmatpush.bf16.msra.mxu3 %v7441_v25  ;;  %v10420_v45 = vor.u32 %v9237_v42, %v7488_v41  ;;  %v7544_v48 = vld [vmem:[#allocation5 + $0x120] sm:$0xf]  ;;  %v9251_v49 = vld [vmem:[#allocation5 + $0x124] sm:$0xf0]  ;;  %v7417_v52 = vor.u32 %v9219_v47, %v7416_v46  ;;  %v7408_v55 = vld [vmem:[#allocation5 + $0x10] sm:$0xf] }
  0x56   :  { %9711 = vmatpush.bf16.msra.mxu2 %v10406_v26  ;;  %v7480_v50 = vld [vmem:[#allocation5 + $0xa0] sm:$0xf]  ;;  %v9235_v51 = vld [vmem:[#allocation5 + $0xa4] sm:$0xf0]  ;;  %v10424_v53 = vor.u32 %v9251_v49, %v7544_v48  ;;  %v9217_v56 = vld [vmem:[#allocation5 + $0x14] sm:$0xf0] }
  0x57   :  { %9703 = vmatpush.bf16.msra.mxu1 %v10408_v27  ;;  %v10426_v54 = vor.u32 %v9235_v51, %v7480_v50  ;;  %v7536_v57 = vld [vmem:[#allocation5 + $0x110] sm:$0xf]  ;;  %v9249_v58 = vld [vmem:[#allocation5 + $0x114] sm:$0xf0]  ;;  %v7409_v61 = vor.u32 %v9217_v56, %v7408_v55  ;;  %v7400_v62 = vld [vmem:[#allocation5] sm:$0xf] }
  0x58   :  { %v7472_v59 = vld [vmem:[#allocation5 + $0x90] sm:$0xf]  ;;  %v9233_v60 = vld [vmem:[#allocation5 + $0x94] sm:$0xf0]  ;;  %v9215_v63 = vld [vmem:[#allocation5 + $0x4] sm:$0xf0]  ;;  %v10430_v1 = vor.u32 %v9249_v58, %v7536_v57 }
  0x59   :  { %1051 = vmatpush.bf16.msra.mxu0 %v7433_v34  ;;  %9696 = vmatpush.bf16.msra.mxu3 %v7433_v34  ;;  %v7528_v0 = vld [vmem:[#allocation5 + $0x100] sm:$0xf]  ;;  %v10432_v2 = vor.u32 %v9233_v60, %v7472_v59  ;;  %v9247_v3 = vld [vmem:[#allocation5 + $0x104] sm:$0xf0]  ;;  %v9176_v7 = vld [vmem:[#allocation3 + $0x10] sm:$0xf0]  ;;  %v7401_v12 = vor.u32 %v9215_v63, %v7400_v62 }
  0x5a   :  { %9712 = vmatpush.bf16.msra.mxu2 %v10412_v35  ;;  %v7464_v4 = vld [vmem:[#allocation5 + $0x80] sm:$0xf]  ;;  %v9231_v5 = vld [vmem:[#allocation5 + $0x84] sm:$0xf0]  ;;  %v7648_v10 = vld [vmem:[#allocation5 + $0x1f0] sm:$0xf]  ;;  %v10436_v16 = vor.u32 %v9247_v3, %v7528_v0 }
  0x5b   :  { %9704 = vmatpush.bf16.msra.mxu1 %v10414_v36  ;;  %v7240_v6 = vld [vmem:[#allocation3] sm:$0xf]  ;;  %v9277_v11 = vld [vmem:[#allocation5 + $0x1f4] sm:$0xf0]  ;;  %v7280_v13 = vld [vmem:[#allocation3 + $0x50] sm:$0xf]  ;;  %v10438_v19 = vor.u32 %v9231_v5, %v7464_v4 }
  0x5c   :  { %v9186_v14 = vld [vmem:[#allocation3 + $0x60] sm:$0xf0]  ;;  %v7288_v15 = vld [vmem:[#allocation3 + $0x58] sm:$0xf]  ;;  %v9187_v20 = vld [vmem:[#allocation3 + $0x68] sm:$0xf0]  ;;  %v7649_v23 = vor.u32 %v9277_v11, %v7648_v10  ;;  %v10440_v28 = vor.u32 %v9176_v7, %v7240_v6 }
  0x5d   :  { %1052 = vmatpush.bf16.msra.mxu0 %v7425_v43  ;;  %9697 = vmatpush.bf16.msra.mxu3 %v7425_v43  ;;  %v9184_v21 = vld [vmem:[#allocation3 + $0x54] sm:$0xf]  ;;  %v7282_v22 = vld [vmem:[#allocation3 + $0x64] sm:$0xf0]  ;;  %v7458_v25 = vld [vmem:[#allocation5 + $0x78] sm:$0xf0]  ;;  %v10442_v29 = vor.u32 %v9186_v14, %v7280_v13  ;;  %v10444_v32 = vor.u32 %v9187_v20, %v7288_v15 }
  0x5e   :  { %9713 = vmatpush.bf16.msra.mxu2 %v10418_v44  ;;  %v9228_v24 = vld [vmem:[#allocation5 + $0x74] sm:$0xf]  ;;  %12036 = vst [vmem:[#allocation29_spill] sm:$0xff] %v10440_v28  ;;  %v7640_v30 = vld [vmem:[#allocation5 + $0x1e0] sm:$0xf]  ;;  %v10446_v33 = vor.u32 %v9184_v21, %v7282_v22  ;;  %s12058_s11 = sld [smem:[#allocation65_spill]] }
  0x5f   :  { %9705 = vmatpush.bf16.msra.mxu1 %v10420_v45  ;;  %12037 = vst [vmem:[#allocation30_spill] sm:$0xff] %v10442_v29  ;;  %v9275_v31 = vld [vmem:[#allocation5 + $0x1e4] sm:$0xf0]  ;;  %v7461_v34 = vor.u32 %v9228_v24, %v7458_v25  ;;  %v9226_v38 = vld [vmem:[#allocation5 + $0x64] sm:$0xf]  ;;  %s12073_s1 = sld [smem:[#allocation67_spill]] }
  0x60   :  { %12038 = vst [vmem:[#allocation31_spill] sm:$0xff] %v10446_v33  ;;  %v7641_v37 = vor.u32 %v9275_v31, %v7640_v30  ;;  %v7450_v39 = vld [vmem:[#allocation5 + $0x68] sm:$0xf0]  ;;  %v7632_v40 = vld [vmem:[#allocation5 + $0x1d0] sm:$0xf]  ;;  %s12074_s0 = sld [smem:[#allocation69_spill]] }
  0x61   :  { %1053 = vmatpush.bf16.msra.mxu0 %v7417_v52  ;;  %9698 = vmatpush.bf16.msra.mxu3 %v7417_v52  ;;  %v9273_v41 = vld [vmem:[#allocation5 + $0x1d4] sm:$0xf0]  ;;  %v7453_v42 = vor.u32 %v9226_v38, %v7450_v39  ;;  %v7442_v46 = vld [vmem:[#allocation5 + $0x58] sm:$0xf0]  ;;  %v7624_v47 = vld [vmem:[#allocation5 + $0x1c0] sm:$0xf] }
  0x62   :  { %9714 = vmatpush.bf16.msra.mxu2 %v10424_v53  ;;  %v7633_v43 = vor.u32 %v9273_v41, %v7632_v40  ;;  %v9271_v48 = vld [vmem:[#allocation5 + $0x1c4] sm:$0xf0]  ;;  %v9181_v52 = vld [vmem:[#allocation3 + $0x38] sm:$0xf0]  ;;  %v7300_v55 = vld [vmem:[#allocation3 + $0x78] sm:$0xf] }
  0x63   :  { %9706 = vmatpush.bf16.msra.mxu1 %v10426_v54  ;;  %v7260_v50 = vld [vmem:[#allocation3 + $0x28] sm:$0xf]  ;;  %v7625_v51 = vor.u32 %v9271_v48, %v7624_v47  ;;  %v9191_v56 = vld [vmem:[#allocation3 + $0x88] sm:$0xf0]  ;;  %v7308_v57 = vld [vmem:[#allocation3 + $0x80] sm:$0xf] }
  0x64   :  { %v9192_v58 = vld [vmem:[#allocation3 + $0x90] sm:$0xf0]  ;;  %v9189_v59 = vld [vmem:[#allocation3 + $0x7c] sm:$0xf]  ;;  %v9222_v60 = vld [vmem:[#allocation5 + $0x44] sm:$0xf]  ;;  %v10458_v63 = vor.u32 %v9181_v52, %v7260_v50 }
  0x65   :  { %1054 = vmatpush.bf16.msra.mxu0 %v7409_v61  ;;  %9699 = vmatpush.bf16.msra.mxu3 %v7409_v61  ;;  %v7434_v61 = vld [vmem:[#allocation5 + $0x48] sm:$0xf0]  ;;  %v10462_v0 = vor.u32 %v9192_v58, %v7308_v57  ;;  %v9269_v4 = vld [vmem:[#allocation5 + $0x1b4] sm:$0xf0]  ;;  %v9220_v6 = vld [vmem:[#allocation5 + $0x34] sm:$0xf] }
  0x66   :  { %9715 = vmatpush.bf16.msra.mxu2 %v10430_v1  ;;  %v7437_v62 = vor.u32 %v9222_v60, %v7434_v61  ;;  %12039 = vst [vmem:[#allocation32_spill] sm:$0xff] %v10458_v63  ;;  %v7426_v7 = vld [vmem:[#allocation5 + $0x38] sm:$0xf0]  ;;  %v7608_v10 = vld [vmem:[#allocation5 + $0x1a0] sm:$0xf]  ;;  %s12075_s7 = sld [smem:[#allocation71_spill]] }
  0x67   :  { %9707 = vmatpush.bf16.msra.mxu1 %v10432_v2  ;;  %v9267_v11 = vld [vmem:[#allocation5 + $0x1a4] sm:$0xf0]  ;;  %v9196_v13 = vld [vmem:[#allocation3 + $0xb0] sm:$0xf0]  ;;  %v9174_v15 = vld [vmem:[#allocation3 + $0x4] sm:$0xf] }
  0x68   :  { %v7609_v14 = vor.u32 %v9267_v11, %v7608_v10  ;;  %v7242_v20 = vld [vmem:[#allocation3 + $0x14] sm:$0xf0]  ;;  %v7328_v21 = vld [vmem:[#allocation3 + $0xa8] sm:$0xf]  ;;  %v9197_v22 = vld [vmem:[#allocation3 + $0xb8] sm:$0xf0] }
  0x69   :  { %1055 = vmatpush.bf16.msra.mxu0 %v7401_v12  ;;  %9700 = vmatpush.bf16.msra.mxu3 %v7401_v12  ;;  %v7320_v12 = vld [vmem:[#allocation3 + $0xa0] sm:$0xf]  ;;  %v7322_v24 = vld [vmem:[#allocation3 + $0xb4] sm:$0xf0]  ;;  %v10476_v25 = vor.u32 %v9174_v15, %v7242_v20  ;;  %v9244_v31 = vld [vmem:[#allocation5 + $0xf4] sm:$0xf] }
  0x6a   :  { %9716 = vmatpush.bf16.msra.mxu2 %v10436_v16  ;;  %v7514_v38 = vld [vmem:[#allocation5 + $0xe8] sm:$0xf0]  ;;  %v7600_v41 = vld [vmem:[#allocation5 + $0x190] sm:$0xf]  ;;  %v7506_v47 = vld [vmem:[#allocation5 + $0xd8] sm:$0xf0] }
  0x6b   :  { %9708 = vmatpush.bf16.msra.mxu1 %v10438_v19  ;;  %12043 = vst [vmem:[#allocation36_spill] sm:$0xff] %v10476_v25  ;;  %v7418_v40 = vld [vmem:[#allocation5 + $0x28] sm:$0xf0]  ;;  %v7340_v48 = vld [vmem:[#allocation3 + $0xc8] sm:$0xf]  ;;  %s12076_s15 = sld [smem:[#allocation73_spill]] }
  0x6c   :  { %1056 = vmatmul.bf16.vlgmr.msra.gmra.mxu0 %v10440_v28  ;;  %1066 = vmatmul.bf16.vlgmr.msra.gmra.mxu3 %v10442_v29  ;;  %v9238_v50 = vld [vmem:[#allocation5 + $0xc4] sm:$0xf]  ;;  %v9179_v52 = vld [vmem:[#allocation3 + $0x2c] sm:$0xf]  ;;  %v7592_v10 = vld [vmem:[#allocation5 + $0x180] sm:$0xf] }
  0x6d   :  { %1195 = vmatpush.bf16.msrb.mxu3 %v7649_v23  ;;  %1097 = vmatpush.bf16.msrb.mxu0 %v10396_v9  ;;  %v9224_v9 = vld [vmem:[#allocation5 + $0x54] sm:$0xf]  ;;  %v9194_v23 = vld [vmem:[#allocation3 + $0xa4] sm:$0xf]  ;;  %v9199_v58 = vld [vmem:[#allocation3 + $0xcc] sm:$0xf] }
  0x6e   :  { %1164 = vmatmul.bf16.vlgmr.msra.gmra.mxu2 %v10444_v32  ;;  %1115 = vmatmul.bf16.vlgmr.msra.gmra.mxu1 %v10446_v33  ;;  %v7445_v49 = vor.u32 %v9224_v9, %v7442_v46  ;;  %v10481_v30 = vor.u32 %v9194_v23, %v7322_v24  ;;  %v9240_v46 = vld [vmem:[#allocation5 + $0xd4] sm:$0xf]  ;;  %v9202_v57 = vld [vmem:[#allocation3 + $0xe0] sm:$0xf0]  ;;  %vm7189_vm0 = vcmask 7168   ;;  %s12135_s9 = sld [smem:[#allocation63_spill]] }
  0x6f   :  { %1293 = vmatpush.bf16.msrb.mxu1 %v7461_v34  ;;  %v7522_v34 = vld [vmem:[#allocation5 + $0xf8] sm:$0xf0]  ;;  %v9234_v11 = vld [vmem:[#allocation5 + $0xa4] sm:$0xf]  ;;  %v9232_v20 = vld [vmem:[#allocation5 + $0x94] sm:$0xf] }
  0x70   :  { %12044 = vst [vmem:[#allocation37_spill] sm:$0xff] %v10481_v30  ;;  %v9206_v23 = vld [vmem:[#allocation3 + $0x100] sm:$0xf0]  ;;  %vm7206_vm5 = vcmask 23552   ;;  %s12136_s10 = sld [smem:[#allocation74_spill]] }
  0x71   :  { %1098 = vmatpush.bf16.msrb.mxu0 %v10402_v18  ;;  %1196 = vmatpush.bf16.msrb.mxu3 %v7641_v37  ;;  %v7302_v18 = vld [vmem:[#allocation3 + $0x8c] sm:$0xf0]  ;;  %v9242_v37 = vld [vmem:[#allocation5 + $0xe4] sm:$0xf] }
  0x72   :  { %v10464_v3 = vor.u32 %v9189_v59, %v7302_v18  ;;  %v7517_v39 = vor.u32 %v9242_v37, %v7514_v38  ;;  %v7342_v59 = vld [vmem:[#allocation3 + $0xdc] sm:$0xf0]  ;;  %v9230_v37 = vld [vmem:[#allocation5 + $0x84] sm:$0xf]  ;;  %v7466_v38 = vld [vmem:[#allocation5 + $0x88] sm:$0xf0] }
  0x73   :  { %1294 = vmatpush.bf16.msrb.mxu1 %v7453_v42  ;;  %v9265_v42 = vld [vmem:[#allocation5 + $0x194] sm:$0xf0] }
  0x74   :  { %12041 = vst [vmem:[#allocation34_spill] sm:$0xff] %v10464_v3  ;;  %v7601_v9 = vor.u32 %v9265_v42, %v7600_v41  ;;  %v7368_v41 = vld [vmem:[#allocation3 + $0xf8] sm:$0xf] }
  0x75   :  { %1099 = vmatpush.bf16.msrb.mxu0 %v10408_v27  ;;  %1197 = vmatpush.bf16.msrb.mxu3 %v7633_v43  ;;  %v10460_v27 = vor.u32 %v9191_v56, %v7300_v55  ;;  %v7262_v55 = vld [vmem:[#allocation3 + $0x3c] sm:$0xf0]  ;;  %v7348_v56 = vld [vmem:[#allocation3 + $0xd0] sm:$0xf] }
  0x76   :  { %v10494_v61 = vor.u32 %v9202_v57, %v7348_v56  ;;  %v9287_v56 = vld [vmem:[#allocation5 + $0x244] sm:$0xf0]  ;;  %v9260_v57 = vld [vmem:[#allocation5 + $0x174] sm:$0xf] }
  0x77   :  { %1295 = vmatpush.bf16.msrb.mxu1 %v7445_v49  ;;  %12040 = vst [vmem:[#allocation33_spill] sm:$0xff] %v10460_v27  ;;  %v7509_v49 = vor.u32 %v9240_v46, %v7506_v47  ;;  %v7469_v47 = vor.u32 %v9230_v37, %v7466_v38  ;;  %v7656_v38 = vld [vmem:[#allocation5 + $0x200] sm:$0xf] }
  0x78   :  { %12047 = vst [vmem:[#allocation40_spill] sm:$0xff] %v10494_v61 }
  0x79   :  { %1100 = vmatpush.bf16.msrb.mxu0 %v10414_v36  ;;  %1198 = vmatpush.bf16.msrb.mxu3 %v7625_v51  ;;  %v7616_v36 = vld [vmem:[#allocation5 + $0x1b0] sm:$0xf]  ;;  %v7498_v51 = vld [vmem:[#allocation5 + $0xc8] sm:$0xf0] }
  0x7a   :  { %v7617_v5 = vor.u32 %v9269_v4, %v7616_v36  ;;  %v7501_v18 = vor.u32 %v9238_v50, %v7498_v51  ;;  %v7490_v36 = vld [vmem:[#allocation5 + $0xb8] sm:$0xf0]  ;;  %v9289_v50 = vld [vmem:[#allocation5 + $0x254] sm:$0xf0] }
  0x7b   :  { %1296 = vmatpush.bf16.msrb.mxu1 %v7437_v62  ;;  %v10496_v62 = vor.u32 %v9199_v58, %v7342_v59  ;;  %v7586_v58 = vld [vmem:[#allocation5 + $0x178] sm:$0xf0] }
  0x7c   :  { %1061 = vmatmul.bf16.gmra.mxu0 %v10458_v63  ;;  %1071 = vmatmul.bf16.gmra.mxu3 %v10460_v27  ;;  %v7589_v59 = vor.u32 %v9260_v57, %v7586_v58  ;;  %v7250_v57 = vld [vmem:[#allocation3 + $0x1c] sm:$0xf0]  ;;  %v7256_v58 = vld [vmem:[#allocation3 + $0x10] sm:$0xf] }
  0x7d   :  { %1101 = vmatpush.bf16.msrb.mxu0 %v10420_v45  ;;  %1199 = vmatpush.bf16.msrb.mxu3 %v7617_v5  ;;  %v7429_v45 = vor.u32 %v9220_v6, %v7426_v7  ;;  %12048 = vst [vmem:[#allocation41_spill] sm:$0xff] %v10496_v62  ;;  %v9216_v5 = vld [vmem:[#allocation5 + $0x14] sm:$0xf]  ;;  %v7410_v6 = vld [vmem:[#allocation5 + $0x18] sm:$0xf0] }
  0x7e   :  { %1169 = vmatmul.bf16.gmra.mxu2 %v10462_v0  ;;  %1120 = vmatmul.bf16.gmra.mxu1 %v10464_v3  ;;  %v7413_v7 = vor.u32 %v9216_v5, %v7410_v6  ;;  %v7680_v5 = vld [vmem:[#allocation5 + $0x230] sm:$0xf]  ;;  %v9285_v6 = vld [vmem:[#allocation5 + $0x234] sm:$0xf0] }
  0x7f   :  { %1297 = vmatpush.bf16.msrb.mxu1 %v7429_v45  ;;  %v9263_v45 = vld [vmem:[#allocation5 + $0x184] sm:$0xf0] }
  0x81   :  { %1102 = vmatpush.bf16.msrb.mxu0 %v10426_v54  ;;  %1200 = vmatpush.bf16.msrb.mxu3 %v7609_v14  ;;  %v10474_v54 = vor.u32 %v9196_v13, %v7320_v12  ;;  %v7482_v12 = vld [vmem:[#allocation5 + $0xa8] sm:$0xf0]  ;;  %v7712_v13 = vld [vmem:[#allocation5 + $0x270] sm:$0xf]  ;;  %v9293_v14 = vld [vmem:[#allocation5 + $0x274] sm:$0xf0] }
  0x82   :  { %v7485_v15 = vor.u32 %v9234_v11, %v7482_v12  ;;  %v7713_v24 = vor.u32 %v9293_v14, %v7712_v13  ;;  %v9283_v11 = vld [vmem:[#allocation5 + $0x224] sm:$0xf0]  ;;  %v7268_v12 = vld [vmem:[#allocation3 + $0x30] sm:$0xf]  ;;  %v9182_v13 = vld [vmem:[#allocation3 + $0x40] sm:$0xf0] }
  0x83   :  { %12042 = vst [vmem:[#allocation35_spill] sm:$0xff] %v10474_v54  ;;  %v7388_v14 = vld [vmem:[#allocation3 + $0x120] sm:$0xf] }
  0x85   :  { %1103 = vmatpush.bf16.msrb.mxu0 %v10432_v2  ;;  %v10479_v2 = vor.u32 %v9197_v22, %v7328_v21  ;;  %1201 = vmatpush.bf16.msrb.mxu3 %v7601_v9  ;;  %v7474_v21 = vld [vmem:[#allocation5 + $0x98] sm:$0xf0]  ;;  %v7360_v22 = vld [vmem:[#allocation3 + $0xf0] sm:$0xf]  ;;  %v9204_v9 = vld [vmem:[#allocation3 + $0xf4] sm:$0xf] }
  0x89   :  { %1104 = vmatpush.bf16.msrb.mxu0 %v10438_v19  ;;  %v7525_v19 = vor.u32 %v9244_v31, %v7522_v34  ;;  %v9291_v31 = vld [vmem:[#allocation5 + $0x264] sm:$0xf0]  ;;  %v7477_v34 = vor.u32 %v9232_v20, %v7474_v21  ;;  %v9209_v20 = vld [vmem:[#allocation3 + $0x11c] sm:$0xf]  ;;  %v7382_v21 = vld [vmem:[#allocation3 + $0x12c] sm:$0xf0] }
  0x8b   :  { %1342 = vmatpush.bf16.msrb.mxu2 %v7525_v19  ;;  %v9214_v19 = vld [vmem:[#allocation5 + $0x4] sm:$0xf] }
  0x8c   :  { %1076 = vmatmul.bf16.gmra.mxu3 %v10474_v54  ;;  %1105 = vmatmul.bf16.vlgmr.msrb.gmra.mxu0 %v10476_v25 }
  0x8d   :  { %1146 = vmatpush.bf16.msra.mxu0 %v10394_v8  ;;  %v9218_v8 = vld [vmem:[#allocation5 + $0x24] sm:$0xf] }
  0x8e   :  { %1174 = vmatmul.bf16.gmra.mxu2 %v10479_v2  ;;  %1125 = vmatmul.bf16.gmra.mxu1 %v10481_v30  ;;  %v7421_v43 = vor.u32 %v9218_v8, %v7418_v40  ;;  %v7402_v8 = vld [vmem:[#allocation5 + $0x8] sm:$0xf0]  ;;  %v9177_v40 = vld [vmem:[#allocation3 + $0x18] sm:$0xf0] }
  0x8f   :  { %1343 = vmatpush.bf16.msrb.mxu2 %v7517_v39  ;;  %v7248_v39 = vld [vmem:[#allocation3 + $0x8] sm:$0xf]  ;;  %v7405_v42 = vor.u32 %v9214_v19, %v7402_v8  ;;  %v10524_v19 = vor.u32 %v9209_v20, %v7382_v21 }
  0x90   :  { %1298 = vmatpush.bf16.msrb.mxu1 %v7421_v43  ;;  %v9207_v43 = vld [vmem:[#allocation3 + $0x108] sm:$0xf0]  ;;  %v9279_v8 = vld [vmem:[#allocation5 + $0x204] sm:$0xf0] }
  0x91   :  { %1147 = vmatpush.bf16.msra.mxu0 %v10400_v17  ;;  %v9201_v17 = vld [vmem:[#allocation3 + $0xd8] sm:$0xf0]  ;;  %v10510_v51 = vor.u32 %v9207_v43, %v7368_v41  ;;  %12053 = vst [vmem:[#allocation46_spill] sm:$0xff] %v10524_v19  ;;  %v9258_v41 = vld [vmem:[#allocation5 + $0x164] sm:$0xf] }
  0x92   :  { %v10490_v60 = vor.u32 %v9201_v17, %v7340_v48  ;;  %v10506_v48 = vor.u32 %v9206_v23, %v7360_v22  ;;  %v7696_v17 = vld [vmem:[#allocation5 + $0x250] sm:$0xf] }
  0x93   :  { %1344 = vmatpush.bf16.msrb.mxu2 %v7509_v49  ;;  %v10508_v49 = vor.u32 %v9177_v40, %v7248_v39  ;;  %v9276_v39 = vld [vmem:[#allocation5 + $0x1f4] sm:$0xf]  ;;  %v7650_v40 = vld [vmem:[#allocation5 + $0x1f8] sm:$0xf0] }
  0x94   :  { %12045 = vst [vmem:[#allocation38_spill] sm:$0xff] %v10490_v60  ;;  %1299 = vmatpush.bf16.msrb.mxu1 %v7413_v7  ;;  %v7380_v7 = vld [vmem:[#allocation3 + $0x118] sm:$0xf] }
  0x95   :  { %1148 = vmatpush.bf16.msra.mxu0 %v10406_v26  ;;  %v10492_v26 = vor.u32 %v9179_v52, %v7262_v55  ;;  %12049 = vst [vmem:[#allocation42_spill] sm:$0xff] %v10506_v48  ;;  %v7688_v55 = vld [vmem:[#allocation5 + $0x240] sm:$0xf] }
  0x96   :  { %12050 = vst [vmem:[#allocation43_spill] sm:$0xff] %v10508_v49 }
  0x97   :  { %12046 = vst [vmem:[#allocation39_spill] sm:$0xff] %v10492_v26  ;;  %1345 = vmatpush.bf16.msrb.mxu2 %v7501_v18  ;;  %v9292_v18 = vld [vmem:[#allocation5 + $0x274] sm:$0xf] }
  0x98   :  { %1300 = vmatpush.bf16.msrb.mxu1 %v7405_v42  ;;  %v7578_v42 = vld [vmem:[#allocation5 + $0x168] sm:$0xf0] }
  0x99   :  { %1149 = vmatpush.bf16.msra.mxu0 %v10412_v35  ;;  %v9236_v35 = vld [vmem:[#allocation5 + $0xb4] sm:$0xf]  ;;  %v7581_v43 = vor.u32 %v9258_v41, %v7578_v42  ;;  %v7296_v41 = vld [vmem:[#allocation3 + $0x60] sm:$0xf] }
  0x9a   :  { %v7493_v4 = vor.u32 %v9236_v35, %v7490_v36  ;;  %v7714_v35 = vld [vmem:[#allocation5 + $0x278] sm:$0xf0]  ;;  %v7689_v36 = vor.u32 %v9287_v56, %v7688_v55  ;;  %v9175_v55 = vld [vmem:[#allocation3 + $0xc] sm:$0xf]  ;;  %v9188_v42 = vld [vmem:[#allocation3 + $0x70] sm:$0xf0] }
  0x9c   :  { %1081 = vmatmul.bf16.gmra.mxu3 %v10490_v60  ;;  %1110 = vmatmul.bf16.gmra.mxu0 %v10492_v26 }
  0x9d   :  { %1150 = vmatpush.bf16.msra.mxu0 %v10418_v44  ;;  %1346 = vmatpush.bf16.msrb.mxu2 %v7493_v4  ;;  %v7593_v44 = vor.u32 %v9263_v45, %v7592_v10  ;;  %v7717_v4 = vor.u32 %v9292_v18, %v7714_v35  ;;  %v7681_v10 = vor.u32 %v9285_v6, %v7680_v5  ;;  %v9211_v45 = vld [vmem:[#allocation3 + $0x128] sm:$0xf0]  ;;  %v9180_v6 = vld [vmem:[#allocation3 + $0x34] sm:$0xf] }
  0x9e   :  { %1179 = vmatmul.bf16.gmra.mxu2 %v10494_v61  ;;  %1130 = vmatmul.bf16.gmra.mxu1 %v10496_v62  ;;  %v10518_v23 = vor.u32 %v9211_v45, %v7380_v7  ;;  %v10530_v18 = vor.u32 %v9175_v55, %v7250_v57  ;;  %v7270_v7 = vld [vmem:[#allocation3 + $0x44] sm:$0xf0]  ;;  %v7634_v45 = vld [vmem:[#allocation5 + $0x1d8] sm:$0xf0] }
  0x9f   :  { %1202 = vmatpush.bf16.msrb.mxu3 %v7593_v44  ;;  %1489 = vmatpush.bf16.msra.mxu1 %v7717_v4  ;;  %v7672_v44 = vld [vmem:[#allocation5 + $0x220] sm:$0xf]  ;;  %v7570_v4 = vld [vmem:[#allocation5 + $0x158] sm:$0xf0]  ;;  %v10538_v20 = vor.u32 %v9180_v6, %v7270_v7 }
  0xa0   :  { %v7673_v22 = vor.u32 %v9283_v11, %v7672_v44  ;;  %12052 = vst [vmem:[#allocation45_spill] sm:$0xff] %v10518_v23  ;;  %v9288_v44 = vld [vmem:[#allocation5 + $0x254] sm:$0xf]  ;;  %v7276_v11 = vld [vmem:[#allocation3 + $0x38] sm:$0xf] }
  0xa1   :  { %1151 = vmatpush.bf16.msra.mxu0 %v10424_v53  ;;  %v7704_v53 = vld [vmem:[#allocation5 + $0x260] sm:$0xf]  ;;  %1347 = vmatpush.bf16.msrb.mxu2 %v7485_v15  ;;  %v9212_v15 = vld [vmem:[#allocation3 + $0x130] sm:$0xf0]  ;;  %12054 = vst [vmem:[#allocation47_spill] sm:$0xff] %v10530_v18 }
  0xa2   :  { %v7705_v46 = vor.u32 %v9291_v31, %v7704_v53  ;;  %v7664_v53 = vld [vmem:[#allocation5 + $0x210] sm:$0xf]  ;;  %v9281_v31 = vld [vmem:[#allocation5 + $0x214] sm:$0xf0]  ;;  %v7554_v57 = vld [vmem:[#allocation5 + $0x138] sm:$0xf0] }
  0xa3   :  { %1391 = vmatpush.bf16.msra.mxu3 %v7589_v59  ;;  %v7665_v37 = vor.u32 %v9281_v31, %v7664_v53  ;;  %v9178_v59 = vld [vmem:[#allocation3 + $0x20] sm:$0xf0]  ;;  %v7562_v53 = vld [vmem:[#allocation5 + $0x148] sm:$0xf0] }
  0xa4   :  { %v10532_v35 = vor.u32 %v9178_v59, %v7256_v58 }
  0xa5   :  { %1152 = vmatpush.bf16.msra.mxu0 %v10430_v1  ;;  %v7362_v1 = vld [vmem:[#allocation3 + $0x104] sm:$0xf0]  ;;  %1348 = vmatpush.bf16.msrb.mxu2 %v7477_v34  ;;  %v10522_v34 = vor.u32 %v9212_v15, %v7388_v14  ;;  %v7698_v14 = vld [vmem:[#allocation5 + $0x258] sm:$0xf0] }
  0xa6   :  { %v10512_v52 = vor.u32 %v9204_v9, %v7362_v1  ;;  %v9290_v9 = vld [vmem:[#allocation5 + $0x264] sm:$0xf]  ;;  %v7706_v1 = vld [vmem:[#allocation5 + $0x268] sm:$0xf0]  ;;  %12055 = vst [vmem:[#allocation48_spill] sm:$0xff] %v10532_v35  ;;  %v7701_v15 = vor.u32 %v9288_v44, %v7698_v14 }
  0xa7   :  { %1392 = vmatpush.bf16.msra.mxu3 %v7581_v43  ;;  %v7316_v14 = vld [vmem:[#allocation3 + $0x88] sm:$0xf] }
  0xa8   :  { %12051 = vst [vmem:[#allocation44_spill] sm:$0xff] %v10512_v52 }
  0xa9   :  { %1153 = vmatpush.bf16.msra.mxu0 %v10436_v16  ;;  %v7697_v16 = vor.u32 %v9289_v50, %v7696_v17  ;;  %1349 = vmatpush.bf16.msrb.mxu2 %v7469_v47  ;;  %v7709_v47 = vor.u32 %v9290_v9, %v7706_v1  ;;  %v7653_v17 = vor.u32 %v9276_v39, %v7650_v40  ;;  %v9274_v50 = vld [vmem:[#allocation5 + $0x1e4] sm:$0xf]  ;;  %v7626_v39 = vld [vmem:[#allocation5 + $0x1c8] sm:$0xf0] }
  0xaa   :  { %v9286_v40 = vld [vmem:[#allocation5 + $0x244] sm:$0xf]  ;;  %v7690_v9 = vld [vmem:[#allocation5 + $0x248] sm:$0xf0] }
  0xab   :  { %1490 = vmatpush.bf16.msra.mxu1 %v7709_v47  ;;  %v7693_v1 = vor.u32 %v9286_v40, %v7690_v9  ;;  %v10548_v47 = vor.u32 %v9188_v42, %v7296_v41 }
  0xac   :  { %1086 = vmatmul.bf16.gmra.mxu3 %v10506_v48  ;;  %1154 = vmatmul.bf16.vlgmr.msra.gmra.mxu0 %v10508_v49 }
  0xad   :  { %1244 = vmatpush.bf16.msrb.mxu0 %v7713_v24  ;;  %v10520_v24 = vor.u32 %v9182_v13, %v7268_v12  ;;  %v9183_v12 = vld [vmem:[#allocation3 + $0x48] sm:$0xf0]  ;;  %12057 = vst [vmem:[#allocation50_spill] sm:$0xff] %v10548_v47 }
  0xae   :  { %1184 = vmatmul.bf16.gmra.mxu2 %v10510_v51  ;;  %1135 = vmatmul.bf16.gmra.mxu1 %v10512_v52  ;;  %v10540_v21 = vor.u32 %v9183_v12, %v7276_v11  ;;  %v9268_v11 = vld [vmem:[#allocation5 + $0x1b4] sm:$0xf]  ;;  %v7618_v12 = vld [vmem:[#allocation5 + $0x1b8] sm:$0xf0] }
  0xaf   :  { %1491 = vmatpush.bf16.msra.mxu1 %v7701_v15  ;;  %v9193_v15 = vld [vmem:[#allocation3 + $0x98] sm:$0xf0] }
  0xb0   :  { %12056 = vst [vmem:[#allocation49_spill] sm:$0xff] %v10540_v21  ;;  %v10572_v40 = vor.u32 %v9193_v15, %v7316_v14  ;;  %v7336_v14 = vld [vmem:[#allocation3 + $0xb0] sm:$0xf]  ;;  %v9198_v15 = vld [vmem:[#allocation3 + $0xc0] sm:$0xf0] }
  0xb1   :  { %1245 = vmatpush.bf16.msrb.mxu0 %v7705_v46  ;;  %v7657_v46 = vor.u32 %v9279_v8, %v7656_v38  ;;  %v7290_v38 = vld [vmem:[#allocation3 + $0x6c] sm:$0xf0]  ;;  %v9270_v8 = vld [vmem:[#allocation5 + $0x1c4] sm:$0xf] }
  0xb2   :  { %v7629_v43 = vor.u32 %v9270_v8, %v7626_v39  ;;  %12060 = vst [vmem:[#allocation52_spill] sm:$0xff] %v10572_v40 }
  0xb3   :  { %1492 = vmatpush.bf16.msra.mxu1 %v7693_v1  ;;  %v9250_v1 = vld [vmem:[#allocation5 + $0x124] sm:$0xf] }
  0xb5   :  { %1246 = vmatpush.bf16.msrb.mxu0 %v7697_v16  ;;  %v7642_v16 = vld [vmem:[#allocation5 + $0x1e8] sm:$0xf0] }
  0xb6   :  { %v7645_v56 = vor.u32 %v9274_v50, %v7642_v16 }
  0xb9   :  { %1247 = vmatpush.bf16.msrb.mxu0 %v7689_v36  ;;  %v9256_v36 = vld [vmem:[#allocation5 + $0x154] sm:$0xf] }
  0xba   :  { %v7573_v5 = vor.u32 %v9256_v36, %v7570_v4 }
  0xbc   :  { %1091 = vmatmul.bf16.gmra.mxu3 %v10518_v23  ;;  %1159 = vmatmul.bf16.gmra.mxu0 %v10520_v24 }
  0xbd   :  { %1248 = vmatpush.bf16.msrb.mxu0 %v7681_v10  ;;  %1393 = vmatpush.bf16.msra.mxu3 %v7573_v5  ;;  %v9272_v10 = vld [vmem:[#allocation5 + $0x1d4] sm:$0xf] }
  0xbe   :  { %1189 = vmatmul.bf16.gmra.mxu2 %v10522_v34  ;;  %1140 = vmatmul.bf16.gmra.mxu1 %v10524_v19  ;;  %v7637_v13 = vor.u32 %v9272_v10, %v7634_v45  ;;  %v9190_v10 = vld [vmem:[#allocation3 + $0x84] sm:$0xf]  ;;  %v7310_v45 = vld [vmem:[#allocation3 + $0x94] sm:$0xf0] }
  0xbf   :  { %v10570_v39 = vor.u32 %v9190_v10, %v7310_v45  ;;  %v7330_v10 = vld [vmem:[#allocation3 + $0xbc] sm:$0xf0] }
  0xc1   :  { %1249 = vmatpush.bf16.msrb.mxu0 %v7673_v22  ;;  %v9254_v22 = vld [vmem:[#allocation5 + $0x144] sm:$0xf] }
  0xc2   :  { %v7565_v31 = vor.u32 %v9254_v22, %v7562_v53  ;;  %v7621_v22 = vor.u32 %v9268_v11, %v7618_v12  ;;  %v7682_v53 = vld [vmem:[#allocation5 + $0x238] sm:$0xf0]  ;;  %v9266_v11 = vld [vmem:[#allocation5 + $0x1a4] sm:$0xf]  ;;  %v7610_v12 = vld [vmem:[#allocation5 + $0x1a8] sm:$0xf0] }
  0xc4   :  { %1394 = vmatpush.bf16.msra.mxu3 %v7565_v31 }
  0xc5   :  { %1250 = vmatpush.bf16.msrb.mxu0 %v7665_v37  ;;  %v9185_v37 = vld [vmem:[#allocation3 + $0x5c] sm:$0xf] }
  0xc9   :  { %1251 = vmatpush.bf16.msrb.mxu0 %v7657_v46  ;;  %v10546_v46 = vor.u32 %v9185_v37, %v7290_v38 }
  0xcc   :  { %1203 = vmatmul.bf16.vlgmr.msrb.gmra.mxu3 %v10530_v18  ;;  %1252 = vmatmul.bf16.vlgmr.msrb.gmra.mxu0 %v10532_v35 }
  0xcd   :  { %1440 = vmatpush.bf16.msra.mxu0 %v7653_v17  ;;  %v10553_v17 = vld [vmem:[%s12058_s11] sm:$0x3] }
  0xce   :  { %1350 = vmatmul.bf16.vlgmr.msrb.gmra.mxu2 %v10476_v25  ;;  %1301 = vmatmul.bf16.vlgmr.msrb.gmra.mxu1 %v10440_v28  ;;  %12059 = vst [vmem:[#allocation51_spill] sm:$0xff] %v10553_v17  ;;  %v10558_v55 = vperm.slane %v10553_v17, 0 }
  0xd1   :  { %1441 = vmatpush.bf16.msra.mxu0 %v7645_v56  ;;  %v9252_v56 = vld [vmem:[#allocation5 + $0x134] sm:$0xf] }
  0xd2   :  { %v7557_v58 = vor.u32 %v9252_v56, %v7554_v57 }
  0xd4   :  { %1395 = vmatpush.bf16.msra.mxu3 %v7557_v58 }
  0xd5   :  { %1442 = vmatpush.bf16.msra.mxu0 %v7637_v13  ;;  %v9284_v13 = vld [vmem:[#allocation5 + $0x234] sm:$0xf] }
  0xd6   :  { %v7685_v31 = vor.u32 %v9284_v13, %v7682_v53  ;;  %v9282_v13 = vld [vmem:[#allocation5 + $0x224] sm:$0xf]  ;;  %v7674_v53 = vld [vmem:[#allocation5 + $0x228] sm:$0xf0] }
  0xd8   :  { %1493 = vmatpush.bf16.msra.mxu1 %v7685_v31  ;;  %v7677_v31 = vor.u32 %v9282_v13, %v7674_v53  ;;  %v7602_v53 = vld [vmem:[#allocation5 + $0x198] sm:$0xf0] }
  0xd9   :  { %1443 = vmatpush.bf16.msra.mxu0 %v7629_v43 }
  0xdc   :  { %1208 = vmatmul.bf16.gmra.mxu3 %v10538_v20  ;;  %1257 = vmatmul.bf16.gmra.mxu0 %v10540_v21 }
  0xdd   :  { %1444 = vmatpush.bf16.msra.mxu0 %v7621_v22  ;;  %v7613_v22 = vor.u32 %v9266_v11, %v7610_v12  ;;  %1494 = vmatpush.bf16.msra.mxu1 %v7677_v31  ;;  %v9280_v31 = vld [vmem:[#allocation5 + $0x214] sm:$0xf] }
  0xde   :  { %1355 = vmatmul.bf16.gmra.mxu2 %v10492_v26  ;;  %1306 = vmatmul.bf16.gmra.mxu1 %v10458_v63 }
  0xe1   :  { %1445 = vmatpush.bf16.msra.mxu0 %v7613_v22  ;;  %v9264_v22 = vld [vmem:[#allocation5 + $0x194] sm:$0xf] }
  0xe9   :  { %v10555_v50 = vpop.f32.mrf.mxu0 }
  0xeb   :  { %v1116_v16 = vpop.f32.mrf.mxu1 }
  0xec   :  { %1213 = vmatmul.bf16.gmra.mxu3 %v10546_v46  ;;  %1262 = vmatmul.bf16.gmra.mxu0 %v10548_v47 }
  0xee   :  { %1360 = vmatmul.bf16.gmra.mxu2 %v10446_v33  ;;  %1311 = vmatmul.bf16.gmra.mxu1 %v10442_v29 }
  0xef   :  { %v1067_v59 = vpop.f32.mrf.mxu3 }
  0xf0   :  { %v1068_v36 = vadd.f32 %v1067_v59, %v10558_v55 }
  0xf1   :  { %v1165_v4 = vpop.f32.mrf.mxu2  ;;  %v10565_v5 = vpop.f32.mrf.mxu0 }
  0xf2   :  { %v1117_v6 = vadd.f32 %v1116_v16, %v1068_v36  ;;  %v7546_v16 = vld [vmem:[#allocation5 + $0x128] sm:$0xf0] }
  0xf3   :  { %v1118_v7 = vpop.f32.mrf.mxu1  ;;  %v7549_v56 = vor.u32 %v9250_v1, %v7546_v16 }
  0xf4   :  { %v10567_v44 = vadd.f32 %v1165_v4, %v1117_v6 }
  0xf5   :  { %1396 = vmatpush.bf16.msra.mxu3 %v7549_v56 }
  0xf7   :  { %v1069_v37 = vpop.f32.mrf.mxu3 }
  0xf8   :  { %v1070_v38 = vadd.f32 %v1069_v37, %v10558_v55 }
  0xf9   :  { %v1167_v8 = vpop.f32.mrf.mxu2  ;;  %v10574_v41 = vpop.f32.mrf.mxu0 }
  0xfa   :  { %v1119_v42 = vadd.f32 %v1118_v7, %v1070_v38  ;;  %v9195_v7 = vld [vmem:[#allocation3 + $0xac] sm:$0xf]  ;;  %v1058_v38 = vadd.f32 %v10555_v50, %v10558_v55  ;;  %v9248_v50 = vld [vmem:[#allocation5 + $0x114] sm:$0xf] }
  0xfb   :  { %v1121_v43 = vpop.f32.mrf.mxu1 }
  0xfc   :  { %v10576_v9 = vadd.f32 %v1167_v8, %v1119_v42  ;;  %1218 = vmatmul.bf16.gmra.mxu3 %v10570_v39  ;;  %1267 = vmatmul.bf16.gmra.mxu0 %v10572_v40  ;;  %v10590_v42 = vor.u32 %v9195_v7, %v7330_v10 }
  0xfe   :  { %1365 = vmatmul.bf16.gmra.mxu2 %v10464_v3  ;;  %1316 = vmatmul.bf16.gmra.mxu1 %v10460_v27  ;;  %v9208_v27 = vld [vmem:[#allocation3 + $0x110] sm:$0xf0] }
  0xff   :  { %v1072_v57 = vpop.f32.mrf.mxu3 }
 0x100   :  { %v1073_v58 = vadd.f32 %v1072_v57, %v10558_v55 }
 0x101   :  { %v1170_v59 = vpop.f32.mrf.mxu2  ;;  %v10583_v36 = vpop.f32.mrf.mxu0 }
 0x102   :  { %v1122_v4 = vadd.f32 %v1121_v43, %v1073_v58  ;;  %v10592_v43 = vor.u32 %v9198_v15, %v7336_v14  ;;  %v9200_v14 = vld [vmem:[#allocation3 + $0xd4] sm:$0xf]  ;;  %v7350_v15 = vld [vmem:[#allocation3 + $0xe4] sm:$0xf0] }
 0x103   :  { %v1123_v6 = vpop.f32.mrf.mxu1 }
 0x104   :  { %v10585_v45 = vadd.f32 %v1170_v59, %v1122_v4  ;;  %12061 = vst [vmem:[#allocation53_spill] sm:$0xff] %v10592_v43  ;;  %v7538_v4 = vld [vmem:[#allocation5 + $0x118] sm:$0xf0] }
 0x105   :  { %v7541_v7 = vor.u32 %v9248_v50, %v7538_v4  ;;  %v1063_v50 = vadd.f32 %v10574_v41, %v10558_v55  ;;  %v9246_v41 = vld [vmem:[#allocation5 + $0x104] sm:$0xf] }
 0x107   :  { %v1074_v37 = vpop.f32.mrf.mxu3  ;;  %1397 = vmatpush.bf16.msra.mxu3 %v7541_v7 }
 0x108   :  { %v1075_v8 = vadd.f32 %v1074_v37, %v10558_v55  ;;  %v7356_v37 = vld [vmem:[#allocation3 + $0xd8] sm:$0xf] }
 0x109   :  { %v1106_v1 = vpop.f32.mrf.mxu0  ;;  %v1172_v58 = vpop.f32.mrf.mxu2 }
 0x10a   :  { %v1124_v16 = vadd.f32 %v1123_v6, %v1075_v8  ;;  %v10594_v56 = vadd.f32 %v1106_v1, %v1058_v38  ;;  %v9203_v38 = vld [vmem:[#allocation3 + $0xe8] sm:$0xf0]  ;;  %v7605_v8 = vor.u32 %v9264_v22, %v7602_v53  ;;  %v7666_v1 = vld [vmem:[#allocation5 + $0x218] sm:$0xf0] }
 0x10b   :  { %v1126_v57 = vpop.f32.mrf.mxu1  ;;  %v10612_v7 = vor.u32 %v9203_v38, %v7356_v37  ;;  %v9309_v37 = vld [vmem:[#allocation7 + $0x74] sm:$0xf0] }
 0x10c   :  { %v10596_v59 = vadd.f32 %v1172_v58, %v1124_v16  ;;  %1223 = vmatmul.bf16.gmra.mxu3 %v10590_v42  ;;  %1272 = vmatmul.bf16.gmra.mxu0 %v10592_v43  ;;  %v7669_v16 = vor.u32 %v9280_v31, %v7666_v1  ;;  %v7776_v31 = vld [vmem:[#allocation7 + $0x70] sm:$0xf] }
 0x10d   :  { %1446 = vmatpush.bf16.msra.mxu0 %v7605_v8  ;;  %12063 = vst [vmem:[#allocation55_spill] sm:$0xff] %v10612_v7  ;;  %v7777_v38 = vor.u32 %v9309_v37, %v7776_v31  ;;  %v9305_v37 = vld [vmem:[#allocation7 + $0x54] sm:$0xf0] }
 0x10e   :  { %1370 = vmatmul.bf16.gmra.mxu2 %v10481_v30  ;;  %1321 = vmatmul.bf16.gmra.mxu1 %v10474_v54  ;;  %v7376_v30 = vld [vmem:[#allocation3 + $0x100] sm:$0xf] }
 0x10f   :  { %v1077_v10 = vpop.f32.mrf.mxu3  ;;  %1495 = vmatpush.bf16.msra.mxu1 %v7669_v16  ;;  %1784 = vmatpush.bf16.msra.mxu2 %v7777_v38  ;;  %v10630_v29 = vor.u32 %v9208_v27, %v7376_v30  ;;  %v7744_v30 = vld [vmem:[#allocation7 + $0x30] sm:$0xf] }
 0x110   :  { %v1078_v6 = vadd.f32 %v1077_v10, %v10558_v55 }
 0x111   :  { %v10603_v11 = vpop.f32.mrf.mxu0  ;;  %12065 = vst [vmem:[#allocation57_spill] sm:$0xff] %v10630_v29 }
 0x112   :  { %v10605_v12 = vadd.f32 %v1126_v57, %v1078_v6  ;;  %v10610_v57 = vor.u32 %v9200_v14, %v7350_v15  ;;  %v7530_v14 = vld [vmem:[#allocation5 + $0x108] sm:$0xf0] }
 0x113   :  { %v1128_v13 = vpop.f32.mrf.mxu1  ;;  %v7533_v15 = vor.u32 %v9246_v41, %v7530_v14  ;;  %v9278_v14 = vld [vmem:[#allocation5 + $0x204] sm:$0xf] }
 0x114   :  { %12062 = vst [vmem:[#allocation54_spill] sm:$0xff] %v10610_v57 }
 0x115   :  { %1398 = vmatpush.bf16.msra.mxu3 %v7533_v15 }
 0x117   :  { %v1079_v58 = vpop.f32.mrf.mxu3 }
 0x118   :  { %v1080_v4 = vadd.f32 %v1079_v58, %v10558_v55  ;;  %v9205_v58 = vld [vmem:[#allocation3 + $0xfc] sm:$0xf] }
 0x119   :  { %v1111_v10 = vpop.f32.mrf.mxu0 }
 0x11a   :  { %v10614_v6 = vadd.f32 %v1128_v13, %v1080_v4  ;;  %v10616_v54 = vadd.f32 %v1111_v10, %v1063_v50  ;;  %v7370_v50 = vld [vmem:[#allocation3 + $0x10c] sm:$0xf0]  ;;  %v7768_v4 = vld [vmem:[#allocation7 + $0x60] sm:$0xf]  ;;  %v9307_v10 = vld [vmem:[#allocation7 + $0x64] sm:$0xf0] }
 0x11b   :  { %v1131_v22 = vpop.f32.mrf.mxu1  ;;  %v7769_v41 = vor.u32 %v9307_v10, %v7768_v4  ;;  %v10628_v38 = vor.u32 %v9205_v58, %v7370_v50  ;;  %v9301_v58 = vld [vmem:[#allocation7 + $0x34] sm:$0xf0] }
 0x11c   :  { %1228 = vmatmul.bf16.gmra.mxu3 %v10610_v57  ;;  %1277 = vmatmul.bf16.gmra.mxu0 %v10612_v7  ;;  %v7745_v50 = vor.u32 %v9301_v58, %v7744_v30 }
 0x11d   :  { %1785 = vmatpush.bf16.msra.mxu2 %v7769_v41  ;;  %12064 = vst [vmem:[#allocation56_spill] sm:$0xff] %v10628_v38  ;;  %v9303_v41 = vld [vmem:[#allocation7 + $0x44] sm:$0xf0] }
 0x11e   :  { %1375 = vmatmul.bf16.gmra.mxu2 %v10496_v62  ;;  %1326 = vmatmul.bf16.gmra.mxu1 %v10490_v60  ;;  %v9262_v60 = vld [vmem:[#allocation5 + $0x184] sm:$0xf]  ;;  %v7594_v62 = vld [vmem:[#allocation5 + $0x188] sm:$0xf0] }
 0x11f   :  { %v1082_v53 = vpop.f32.mrf.mxu3  ;;  %v7597_v3 = vor.u32 %v9262_v60, %v7594_v62  ;;  %v7752_v62 = vld [vmem:[#allocation7 + $0x40] sm:$0xf] }
 0x120   :  { %v1083_v13 = vadd.f32 %v1082_v53, %v10558_v55  ;;  %v7658_v53 = vld [vmem:[#allocation5 + $0x208] sm:$0xf0] }
 0x121   :  { %v10623_v8 = vpop.f32.mrf.mxu0  ;;  %v7661_v15 = vor.u32 %v9278_v14, %v7658_v53  ;;  %1447 = vmatpush.bf16.msra.mxu0 %v7597_v3  ;;  %v7753_v3 = vor.u32 %v9303_v41, %v7752_v62  ;;  %v7396_v62 = vld [vmem:[#allocation3 + $0x128] sm:$0xf]  ;;  %v9213_v41 = vld [vmem:[#allocation3 + $0x138] sm:$0xf0] }
 0x122   :  { %v10625_v1 = vadd.f32 %v1131_v22, %v1083_v13  ;;  %v7760_v22 = vld [vmem:[#allocation7 + $0x50] sm:$0xf]  ;;  %v10648_v58 = vor.u32 %v9213_v41, %v7396_v62 }
 0x123   :  { %v1133_v16 = vpop.f32.mrf.mxu1  ;;  %1496 = vmatpush.bf16.msra.mxu1 %v7661_v15  ;;  %v7761_v33 = vor.u32 %v9305_v37, %v7760_v22  ;;  %v7736_v15 = vld [vmem:[#allocation7 + $0x20] sm:$0xf]  ;;  %v9210_v22 = vld [vmem:[#allocation3 + $0x124] sm:$0xf]  ;;  %v7840_v41 = vld [vmem:[#allocation7 + $0xf0] sm:$0xf] }
 0x124   :  { %12067 = vst [vmem:[#allocation59_spill] sm:$0xff] %v10648_v58 }
 0x125   :  { %1786 = vmatpush.bf16.msra.mxu2 %v7761_v33 }
 0x127   :  { %v1084_v31 = vpop.f32.mrf.mxu3 }
 0x128   :  { %v1085_v13 = vadd.f32 %v1084_v31, %v10558_v55  ;;  %v9299_v31 = vld [vmem:[#allocation7 + $0x24] sm:$0xf0] }
 0x129   :  { %v10632_v4 = vpop.f32.mrf.mxu0  ;;  %1787 = vmatpush.bf16.msra.mxu2 %v7753_v3  ;;  %v7737_v37 = vor.u32 %v9299_v31, %v7736_v15  ;;  %v7720_v31 = vld [vmem:[#allocation7] sm:$0xf] }
 0x12a   :  { %v10634_v10 = vadd.f32 %v1133_v16, %v1085_v13  ;;  %v7390_v13 = vld [vmem:[#allocation3 + $0x134] sm:$0xf0] }
 0x12b   :  { %v1136_v60 = vpop.f32.mrf.mxu1  ;;  %v10646_v30 = vor.u32 %v9210_v22, %v7390_v13 }
 0x12c   :  { %1233 = vmatmul.bf16.gmra.mxu3 %v10628_v38  ;;  %1282 = vmatmul.bf16.gmra.mxu0 %v10630_v29 }
 0x12d   :  { %1788 = vmatpush.bf16.msra.mxu2 %v7745_v50  ;;  %12066 = vst [vmem:[#allocation58_spill] sm:$0xff] %v10646_v30  ;;  %v10652_v50 = vpop.f32.mrf.mxu2 }
 0x12e   :  { %1380 = vmatmul.bf16.gmra.mxu2 %v10512_v52  ;;  %1331 = vmatmul.bf16.gmra.mxu1 %v10506_v48  ;;  %v7728_v48 = vld [vmem:[#allocation7 + $0x10] sm:$0xf]  ;;  %v9297_v52 = vld [vmem:[#allocation7 + $0x14] sm:$0xf0] }
 0x12f   :  { %v1087_v27 = vpop.f32.mrf.mxu3 }
 0x130   :  { %v1088_v16 = vadd.f32 %v1087_v27, %v10558_v55 }
 0x131   :  { %v10641_v14 = vpop.f32.mrf.mxu0  ;;  %1789 = vmatpush.bf16.msra.mxu2 %v7737_v37  ;;  %v9295_v37 = vld [vmem:[#allocation7 + $0x4] sm:$0xf0] }
 0x132   :  { %v10643_v33 = vadd.f32 %v1136_v60, %v1088_v16  ;;  %v7729_v60 = vor.u32 %v9297_v52, %v7728_v48 }
 0x133   :  { %v1138_v53 = vpop.f32.mrf.mxu1 }
 0x135   :  { %1790 = vmatpush.bf16.msra.mxu2 %v7729_v60  ;;  %v10665_v62 = vpop.f32.mrf.mxu2 }
 0x137   :  { %v1089_v3 = vpop.f32.mrf.mxu3 }
 0x138   :  { %v1090_v27 = vadd.f32 %v1089_v3, %v10558_v55  ;;  %v7721_v3 = vor.u32 %v9295_v37, %v7720_v31 }
 0x139   :  { %v10650_v16 = vpop.f32.mrf.mxu0 }
 0x13a   :  { %v10654_v63 = vadd.f32 %v1138_v53, %v1090_v27  ;;  %1791 = vmatpush.bf16.msra.mxu2 %v7721_v3  ;;  %v9325_v27 = vld [vmem:[#allocation7 + $0xf4] sm:$0xf0] }
 0x13b   :  { %v1141_v15 = vpop.f32.mrf.mxu1  ;;  %v7841_v60 = vor.u32 %v9325_v27, %v7840_v41  ;;  %v7842_v41 = vld [vmem:[#allocation7 + $0xf8] sm:$0xf0] }
 0x13c   :  { %1238 = vmatmul.bf16.gmra.mxu3 %v10646_v30  ;;  %1287 = vmatmul.bf16.gmra.mxu0 %v10648_v58 }
 0x13d   :  { %1833 = vmatpush.bf16.msrb.mxu3 %v7841_v60  ;;  %v10675_v27 = vpop.f32.mrf.mxu2 }
 0x13e   :  { %1385 = vmatmul.bf16.gmra.mxu2 %v10524_v19  ;;  %1336 = vmatmul.bf16.gmra.mxu1 %v10518_v23 }
 0x13f   :  { %v1092_v48 = vpop.f32.mrf.mxu3 }
 0x140   :  { %v1093_v52 = vadd.f32 %v1092_v48, %v10558_v55  ;;  %v7778_v48 = vld [vmem:[#allocation7 + $0x78] sm:$0xf0] }
 0x141   :  { %v10661_v22 = vpop.f32.mrf.mxu0 }
 0x142   :  { %v10663_v53 = vadd.f32 %v1141_v15, %v1093_v52  ;;  %v9308_v15 = vld [vmem:[#allocation7 + $0x74] sm:$0xf] }
 0x143   :  { %v1143_v13 = vpop.f32.mrf.mxu1  ;;  %v9324_v52 = vld [vmem:[#allocation7 + $0xf4] sm:$0xf]  ;;  %v7781_v19 = vor.u32 %v9308_v15, %v7778_v48  ;;  %v7832_v15 = vld [vmem:[#allocation7 + $0xe0] sm:$0xf]  ;;  %v9323_v48 = vld [vmem:[#allocation7 + $0xe4] sm:$0xf0] }
 0x144   :  { %v7845_v60 = vor.u32 %v9324_v52, %v7842_v41  ;;  %v7833_v25 = vor.u32 %v9323_v48, %v7832_v15 }
 0x145   :  { %1882 = vmatpush.bf16.msrb.mxu0 %v7781_v19  ;;  %v10685_v19 = vpop.f32.mrf.mxu2 }
 0x146   :  { %1931 = vmatpush.bf16.msrb.mxu1 %v7845_v60  ;;  %1834 = vmatpush.bf16.msrb.mxu3 %v7833_v25  ;;  %v9322_v25 = vld [vmem:[#allocation7 + $0xe4] sm:$0xf] }
 0x147   :  { %v1094_v26 = vpop.f32.mrf.mxu3 }
 0x148   :  { %v1095_v31 = vadd.f32 %v1094_v26, %v10558_v55 }
 0x149   :  { %v1253_v37 = vpop.f32.mrf.mxu0 }
 0x14a   :  { %v10668_v23 = vadd.f32 %v1143_v13, %v1095_v31  ;;  %v1060_v31 = vadd.f32 %v10565_v5, %v10558_v55 }
 0x14b   :  { %v10670_v3 = vpop.f32.mrf.mxu1 }
 0x14c   :  { %12068 = vst [vmem:[#allocation60_spill] sm:$0xff] %v10668_v23  ;;  %1399 = vmatmul.bf16.vlgmr.msra.gmra.mxu3 %v10508_v49  ;;  %1448 = vmatmul.bf16.vlgmr.msra.gmra.mxu0 %v10530_v18  ;;  %v1156_v49 = vadd.f32 %v10632_v4, %v10594_v56  ;;  %v1109_v18 = vadd.f32 %v10603_v11, %v1060_v31  ;;  %v7770_v11 = vld [vmem:[#allocation7 + $0x68] sm:$0xf0] }
 0x14d   :  { %12069 = vst [vmem:[#allocation61_spill] sm:$0xff] %v10670_v3  ;;  %v1161_v31 = vadd.f32 %v10650_v16, %v10616_v54 }
 0x14e   :  { %1497 = vmatmul.bf16.vlgmr.msra.gmra.mxu1 %v10532_v35  ;;  %v1158_v52 = vadd.f32 %v10641_v14, %v1109_v18  ;;  %v7834_v14 = vld [vmem:[#allocation7 + $0xe8] sm:$0xf0] }
 0x14f   :  { %v1204_v26 = vpop.f32.mrf.mxu3 }
 0x150   :  { %v1205_v35 = vadd.f32 %v1204_v26, %v1156_v49  ;;  %v9306_v49 = vld [vmem:[#allocation7 + $0x64] sm:$0xf] }
 0x151   :  { %v1255_v13 = vpop.f32.mrf.mxu0  ;;  %v7773_v18 = vor.u32 %v9306_v49, %v7770_v11 }
 0x152   :  { %v1254_v60 = vadd.f32 %v1253_v37, %v1205_v35  ;;  %v7837_v35 = vor.u32 %v9322_v25, %v7834_v14 }
 0x153   :  { %v10681_v28 = vpop.f32.mrf.mxu1  ;;  %1883 = vmatpush.bf16.msrb.mxu0 %v7773_v18 }
 0x154   :  { %v1538_v56 = vmax.f32 %v1254_v60, 0.0  ;;  %1932 = vmatpush.bf16.msrb.mxu1 %v7837_v35  ;;  %v9321_v60 = vld [vmem:[#allocation7 + $0xd4] sm:$0xf0]  ;;  %v7762_v35 = vld [vmem:[#allocation7 + $0x58] sm:$0xf0] }
 0x157   :  { %v1206_v41 = vpop.f32.mrf.mxu3 }
 0x158   :  { %v1207_v3 = vadd.f32 %v1206_v41, %v1158_v52  ;;  %v7824_v41 = vld [vmem:[#allocation7 + $0xd0] sm:$0xf] }
 0x159   :  { %v1258_v5 = vpop.f32.mrf.mxu0 }
 0x15a   :  { %v1256_v17 = vadd.f32 %v1255_v13, %v1207_v3  ;;  %v1065_v3 = vadd.f32 %v10583_v36, %v10558_v55  ;;  %v10697_v13 = vpop.f32.mrf.mxu2 }
 0x15b   :  { %v10687_v23 = vpop.f32.mrf.mxu1 }
 0x15c   :  { %v1540_v4 = vmax.f32 %v1256_v17, 0.0  ;;  %1404 = vmatmul.bf16.gmra.mxu3 %v10520_v24  ;;  %1453 = vmatmul.bf16.gmra.mxu0 %v10538_v20  ;;  %v1114_v48 = vadd.f32 %v10623_v8, %v1065_v3  ;;  %v9304_v8 = vld [vmem:[#allocation7 + $0x54] sm:$0xf] }
 0x15e   :  { %1502 = vmatmul.bf16.gmra.mxu1 %v10540_v21  ;;  %v10692_v26 = vpack.c.bf16 %v1540_v4, %v1538_v56  ;;  %v7825_v56 = vor.u32 %v9321_v60, %v7824_v41  ;;  %v1163_v4 = vadd.f32 %v10661_v22, %v1114_v48  ;;  %v7765_v22 = vor.u32 %v9304_v8, %v7762_v35  ;;  %v7816_v60 = vld [vmem:[#allocation7 + $0xc0] sm:$0xf] }
 0x15f   :  { %v1209_v37 = vpop.f32.mrf.mxu3 }
 0x160   :  { %1792 = vmatmul.bf16.vlgmr.msra.gmra.mxu2 %v10692_v26  ;;  %v1210_v52 = vadd.f32 %v1209_v37, %v1161_v31  ;;  %1835 = vmatpush.bf16.msrb.mxu3 %v7825_v56  ;;  %v9320_v37 = vld [vmem:[#allocation7 + $0xd4] sm:$0xf]  ;;  %v9319_v56 = vld [vmem:[#allocation7 + $0xc4] sm:$0xf0] }
 0x161   :  { %v1260_v17 = vpop.f32.mrf.mxu0  ;;  %1884 = vmatpush.bf16.msrb.mxu0 %v7765_v22 }
 0x162   :  { %v1259_v11 = vadd.f32 %v1258_v5, %v1210_v52  ;;  %v10707_v14 = vpop.f32.mrf.mxu2  ;;  %v7826_v5 = vld [vmem:[#allocation7 + $0xd8] sm:$0xf0] }
 0x163   :  { %v10701_v15 = vpop.f32.mrf.mxu1 }
 0x164   :  { %v1542_v54 = vmax.f32 %v1259_v11, 0.0 }
 0x167   :  { %v1211_v49 = vpop.f32.mrf.mxu3 }
 0x168   :  { %v1212_v18 = vadd.f32 %v1211_v49, %v1163_v4  ;;  %v7817_v4 = vor.u32 %v9319_v56, %v7816_v60 }
 0x169   :  { %v1263_v55 = vpop.f32.mrf.mxu0 }
 0x16a   :  { %v1261_v36 = vadd.f32 %v1260_v17, %v1212_v18  ;;  %v7829_v17 = vor.u32 %v9320_v37, %v7826_v5  ;;  %v10718_v49 = vpop.f32.mrf.mxu2  ;;  %1836 = vmatpush.bf16.msrb.mxu3 %v7817_v4  ;;  %v7754_v37 = vld [vmem:[#allocation7 + $0x48] sm:$0xf0] }
 0x16b   :  { %v10705_v25 = vpop.f32.mrf.mxu1 }
 0x16c   :  { %v1544_v16 = vmax.f32 %v1261_v36, 0.0  ;;  %1409 = vmatmul.bf16.gmra.mxu3 %v10444_v32  ;;  %1458 = vmatmul.bf16.gmra.mxu0 %v10546_v46 }
 0x16d   :  { %1933 = vmatpush.bf16.msrb.mxu1 %v7829_v17  ;;  %v9318_v17 = vld [vmem:[#allocation7 + $0xc4] sm:$0xf] }
 0x16e   :  { %1507 = vmatmul.bf16.gmra.mxu1 %v10548_v47  ;;  %v10712_v3 = vpack.c.bf16 %v1544_v16, %v1542_v54 }
 0x16f   :  { %v1214_v31 = vpop.f32.mrf.mxu3 }
 0x170   :  { %1797 = vmatmul.bf16.gmra.mxu2 %v10712_v3  ;;  %v1215_v41 = vadd.f32 %v1214_v31, %v10567_v44  ;;  %v9302_v44 = vld [vmem:[#allocation7 + $0x44] sm:$0xf]  ;;  %v7818_v31 = vld [vmem:[#allocation7 + $0xc8] sm:$0xf0] }
 0x171   :  { %v1265_v48 = vpop.f32.mrf.mxu0  ;;  %v7757_v5 = vor.u32 %v9302_v44, %v7754_v37 }
 0x172   :  { %v1264_v18 = vadd.f32 %v1263_v55, %v1215_v41 }
 0x173   :  { %v10715_v52 = vpop.f32.mrf.mxu1  ;;  %1885 = vmatpush.bf16.msrb.mxu0 %v7757_v5 }
 0x174   :  { %v1546_v35 = vmax.f32 %v1264_v18, 0.0  ;;  %v9317_v18 = vld [vmem:[#allocation7 + $0xb4] sm:$0xf0] }
 0x177   :  { %v1216_v11 = vpop.f32.mrf.mxu3 }
 0x178   :  { %v1217_v36 = vadd.f32 %v1216_v11, %v10576_v9  ;;  %v7821_v9 = vor.u32 %v9318_v17, %v7818_v31  ;;  %v7808_v11 = vld [vmem:[#allocation7 + $0xb0] sm:$0xf] }
 0x179   :  { %v1268_v54 = vpop.f32.mrf.mxu0 }
 0x17a   :  { %v1266_v16 = vadd.f32 %v1265_v48, %v1217_v36  ;;  %v10728_v48 = vpop.f32.mrf.mxu2  ;;  %1934 = vmatpush.bf16.msrb.mxu1 %v7821_v9  ;;  %v7809_v36 = vor.u32 %v9317_v18, %v7808_v11 }
 0x17b   :  { %v10721_v8 = vpop.f32.mrf.mxu1 }
 0x17c   :  { %v1548_v22 = vmax.f32 %v1266_v16, 0.0  ;;  %1414 = vmatmul.bf16.gmra.mxu3 %v10462_v0  ;;  %1463 = vmatmul.bf16.gmra.mxu0 %v10570_v39 }
 0x17d   :  { %1837 = vmatpush.bf16.msrb.mxu3 %v7809_v36 }
 0x17e   :  { %1512 = vmatmul.bf16.gmra.mxu1 %v10572_v40  ;;  %v10726_v55 = vpack.c.bf16 %v1548_v22, %v1546_v35 }
 0x17f   :  { %v1219_v41 = vpop.f32.mrf.mxu3 }
 0x180   :  { %1802 = vmatmul.bf16.gmra.mxu2 %v10726_v55  ;;  %v1220_v4 = vadd.f32 %v1219_v41, %v10585_v45  ;;  %v9300_v45 = vld [vmem:[#allocation7 + $0x34] sm:$0xf]  ;;  %v7746_v41 = vld [vmem:[#allocation7 + $0x38] sm:$0xf0] }
 0x181   :  { %v1270_v60 = vpop.f32.mrf.mxu0  ;;  %v7749_v11 = vor.u32 %v9300_v45, %v7746_v41  ;;  %v7800_v45 = vld [vmem:[#allocation7 + $0xa0] sm:$0xf]  ;;  %v9315_v41 = vld [vmem:[#allocation7 + $0xa4] sm:$0xf0] }
 0x182   :  { %v1269_v35 = vadd.f32 %v1268_v54, %v1220_v4  ;;  %v10735_v37 = vpop.f32.mrf.mxu2  ;;  %v9316_v54 = vld [vmem:[#allocation7 + $0xb4] sm:$0xf]  ;;  %v7810_v4 = vld [vmem:[#allocation7 + $0xb8] sm:$0xf0] }
 0x183   :  { %v10731_v56 = vpop.f32.mrf.mxu1  ;;  %v7813_v18 = vor.u32 %v9316_v54, %v7810_v4  ;;  %1886 = vmatpush.bf16.msrb.mxu0 %v7749_v11 }
 0x184   :  { %v1550_v31 = vmax.f32 %v1269_v35, 0.0 }
 0x185   :  { %1935 = vmatpush.bf16.msrb.mxu1 %v7813_v18 }
 0x187   :  { %v1221_v16 = vpop.f32.mrf.mxu3 }
 0x188   :  { %v1222_v22 = vadd.f32 %v1221_v16, %v10596_v59  ;;  %v1176_v16 = vadd.f32 %v10652_v50, %v10605_v12 }
 0x189   :  { %v1273_v44 = vpop.f32.mrf.mxu0 }
 0x18a   :  { %v1271_v5 = vadd.f32 %v1270_v60, %v1222_v22  ;;  %v10749_v22 = vpop.f32.mrf.mxu2 }
 0x18b   :  { %v10737_v17 = vpop.f32.mrf.mxu1 }
 0x18c   :  { %v1552_v9 = vmax.f32 %v1271_v5, 0.0  ;;  %1419 = vmatmul.bf16.gmra.mxu3 %v10479_v2  ;;  %1468 = vmatmul.bf16.gmra.mxu0 %v10590_v42 }
 0x18e   :  { %1517 = vmatmul.bf16.gmra.mxu1 %v10592_v43  ;;  %v10742_v59 = vpack.c.bf16 %v1552_v9, %v1550_v31  ;;  %v7801_v43 = vor.u32 %v9315_v41, %v7800_v45  ;;  %v1178_v31 = vadd.f32 %v10665_v62, %v10614_v6  ;;  %v9314_v6 = vld [vmem:[#allocation7 + $0xa4] sm:$0xf]  ;;  %v7802_v62 = vld [vmem:[#allocation7 + $0xa8] sm:$0xf0] }
 0x18f   :  { %v1224_v36 = vpop.f32.mrf.mxu3 }
 0x190   :  { %1807 = vmatmul.bf16.gmra.mxu2 %v10742_v59  ;;  %v1225_v5 = vadd.f32 %v1224_v36, %v1176_v16  ;;  %1838 = vmatpush.bf16.msrb.mxu3 %v7801_v43  ;;  %v9298_v36 = vld [vmem:[#allocation7 + $0x24] sm:$0xf]  ;;  %v7738_v16 = vld [vmem:[#allocation7 + $0x28] sm:$0xf0] }
 0x191   :  { %v1275_v60 = vpop.f32.mrf.mxu0  ;;  %v7741_v45 = vor.u32 %v9298_v36, %v7738_v16  ;;  %v7792_v36 = vld [vmem:[#allocation7 + $0x90] sm:$0xf]  ;;  %v9313_v16 = vld [vmem:[#allocation7 + $0x94] sm:$0xf0] }
 0x192   :  { %v1274_v11 = vadd.f32 %v1273_v44, %v1225_v5  ;;  %v10758_v43 = vpop.f32.mrf.mxu2 }
 0x193   :  { %v10747_v35 = vpop.f32.mrf.mxu1  ;;  %1887 = vmatpush.bf16.msrb.mxu0 %v7741_v45 }
 0x194   :  { %v1554_v12 = vmax.f32 %v1274_v11, 0.0  ;;  %v9296_v11 = vld [vmem:[#allocation7 + $0x14] sm:$0xf] }
 0x197   :  { %v1226_v9 = vpop.f32.mrf.mxu3 }
 0x198   :  { %v1227_v54 = vadd.f32 %v1226_v9, %v1178_v31  ;;  %v1181_v31 = vadd.f32 %v10675_v27, %v10625_v1 }
 0x199   :  { %v1278_v4 = vpop.f32.mrf.mxu0 }
 0x19a   :  { %v1276_v18 = vadd.f32 %v1275_v60, %v1227_v54  ;;  %v7805_v60 = vor.u32 %v9314_v6, %v7802_v62  ;;  %v7730_v54 = vld [vmem:[#allocation7 + $0x18] sm:$0xf0]  ;;  %v9294_v6 = vld [vmem:[#allocation7 + $0x4] sm:$0xf]  ;;  %v7722_v62 = vld [vmem:[#allocation7 + $0x8] sm:$0xf0] }
 0x19b   :  { %v10753_v40 = vpop.f32.mrf.mxu1  ;;  %v7725_v47 = vor.u32 %v9294_v6, %v7722_v62 }
 0x19c   :  { %v1556_v50 = vmax.f32 %v1276_v18, 0.0  ;;  %1424 = vmatmul.bf16.gmra.mxu3 %v10494_v61  ;;  %1473 = vmatmul.bf16.gmra.mxu0 %v10610_v57 }
 0x19d   :  { %1936 = vmatpush.bf16.msrb.mxu1 %v7805_v60  ;;  %v10769_v60 = vpop.f32.mrf.mxu2 }
 0x19e   :  { %1522 = vmatmul.bf16.gmra.mxu1 %v10612_v7  ;;  %v10760_v44 = vpack.c.bf16 %v1556_v50, %v1554_v12  ;;  %v7733_v7 = vor.u32 %v9296_v11, %v7730_v54  ;;  %v7793_v12 = vor.u32 %v9313_v16, %v7792_v36  ;;  %v1183_v50 = vadd.f32 %v10685_v19, %v10634_v10  ;;  %v7794_v10 = vld [vmem:[#allocation7 + $0x98] sm:$0xf0] }
 0x19f   :  { %v1229_v5 = vpop.f32.mrf.mxu3  ;;  %v1188_v16 = vadd.f32 %v10707_v14, %v10654_v63  ;;  %v9310_v63 = vld [vmem:[#allocation7 + $0x84] sm:$0xf]  ;;  %v7786_v14 = vld [vmem:[#allocation7 + $0x88] sm:$0xf0] }
 0x1a0   :  { %1812 = vmatmul.bf16.gmra.mxu2 %v10760_v44  ;;  %v1230_v18 = vadd.f32 %v1229_v5, %v1181_v31  ;;  %1888 = vmatpush.bf16.msrb.mxu0 %v7733_v7  ;;  %v9312_v7 = vld [vmem:[#allocation7 + $0x94] sm:$0xf] }
 0x1a1   :  { %v1280_v41 = vpop.f32.mrf.mxu0  ;;  %1839 = vmatpush.bf16.msrb.mxu3 %v7793_v12  ;;  %v7797_v19 = vor.u32 %v9312_v7, %v7794_v10  ;;  %v7784_v12 = vld [vmem:[#allocation7 + $0x80] sm:$0xf] }
 0x1a2   :  { %v1279_v1 = vadd.f32 %v1278_v4, %v1230_v18 }
 0x1a3   :  { %v10765_v9 = vpop.f32.mrf.mxu1  ;;  %1937 = vmatpush.bf16.msrb.mxu1 %v7797_v19 }
 0x1a4   :  { %1889 = vmatpush.bf16.msrb.mxu0 %v7725_v47  ;;  %v1558_v31 = vmax.f32 %v1279_v1, 0.0  ;;  %v1186_v47 = vadd.f32 %v10697_v13, %v10643_v33 }
 0x1a7   :  { %v1231_v45 = vpop.f32.mrf.mxu3 }
 0x1a8   :  { %v1232_v27 = vadd.f32 %v1231_v45, %v1183_v50  ;;  %v9311_v50 = vld [vmem:[#allocation7 + $0x84] sm:$0xf0] }
 0x1a9   :  { %v1283_v21 = vpop.f32.mrf.mxu0  ;;  %v7785_v6 = vor.u32 %v9311_v50, %v7784_v12 }
 0x1aa   :  { %v1281_v61 = vadd.f32 %v1280_v41, %v1232_v27 }
 0x1ab   :  { %v10771_v5 = vpop.f32.mrf.mxu1  ;;  %1840 = vmatpush.bf16.msrb.mxu3 %v7785_v6  ;;  %v12071_v6 = vld [vmem:[#allocation51_spill] sm:$0xff] }
 0x1ac   :  { %v1560_v11 = vmax.f32 %v1281_v61, 0.0  ;;  %1429 = vmatmul.bf16.gmra.mxu3 %v10510_v51  ;;  %1478 = vmatmul.bf16.gmra.mxu0 %v10628_v38  ;;  %v10781_v61 = vpop.f32.mrf.mxu2 }
 0x1ae   :  { %1527 = vmatmul.bf16.gmra.mxu1 %v10630_v29  ;;  %v10776_v54 = vpack.c.bf16 %v1560_v11, %v1558_v31 }
 0x1af   :  { %v1234_v4 = vpop.f32.mrf.mxu3 }
 0x1b0   :  { %1817 = vmatmul.bf16.gmra.mxu2 %v10776_v54  ;;  %v1235_v36 = vadd.f32 %v1234_v4, %v1186_v47 }
 0x1b1   :  { %v1285_v41 = vpop.f32.mrf.mxu0 }
 0x1b2   :  { %v1284_v62 = vadd.f32 %v1283_v21, %v1235_v36  ;;  %v7789_v21 = vor.u32 %v9310_v63, %v7786_v14  ;;  %v12072_v14 = vld [vmem:[#allocation61_spill] sm:$0xff] }
 0x1b3   :  { %v10783_v18 = vpop.f32.mrf.mxu1 }
 0x1b4   :  { %v10789_v33 = vpop.f32.mrf.mxu2  ;;  %v1562_v13 = vmax.f32 %v1284_v62, 0.0  ;;  %1938 = vmatpush.bf16.msrb.mxu1 %v7789_v21  ;;  %v10806_v62 = vperm.slane %v12071_v6, 1 }
 0x1b7   :  { %v1236_v45 = vpop.f32.mrf.mxu3 }
 0x1b8   :  { %v1237_v1 = vadd.f32 %v1236_v45, %v1188_v16  ;;  %v12070_v16 = vld [vmem:[#allocation60_spill] sm:$0xff] }
 0x1b9   :  { %v1288_v27 = vpop.f32.mrf.mxu0  ;;  %v1193_v12 = vadd.f32 %v10728_v48, %v12070_v16 }
 0x1ba   :  { %v1286_v31 = vadd.f32 %v1285_v41, %v1237_v1  ;;  %v1191_v41 = vadd.f32 %v10718_v49, %v10663_v53  ;;  %v1303_v53 = vadd.f32 %v12072_v14, %v10806_v62  ;;  %v7968_v14 = vld [vmem:[#allocation8 + $0xf0] sm:$0xf] }
 0x1bb   :  { %v10787_v11 = vpop.f32.mrf.mxu1 }
 0x1bc   :  { %v1564_v7 = vmax.f32 %v1286_v31, 0.0  ;;  %1434 = vmatmul.bf16.gmra.mxu3 %v10522_v34  ;;  %1483 = vmatmul.bf16.gmra.mxu0 %v10646_v30  ;;  %v10803_v50 = vpop.f32.mrf.mxu2 }
 0x1be   :  { %1532 = vmatmul.bf16.gmra.mxu1 %v10648_v58  ;;  %v10794_v10 = vpack.c.bf16 %v1564_v7, %v1562_v13 }
 0x1bf   :  { %v1239_v19 = vpop.f32.mrf.mxu3 }
 0x1c0   :  { %1822 = vmatmul.bf16.gmra.mxu2 %v10794_v10  ;;  %v1240_v36 = vadd.f32 %v1239_v19, %v1191_v41  ;;  %v1352_v41 = vadd.f32 %v10735_v37, %v1303_v53 }
 0x1c1   :  { %v1290_v4 = vpop.f32.mrf.mxu0 }
 0x1c2   :  { %v1289_v1 = vadd.f32 %v1288_v27, %v1240_v36 }
 0x1c3   :  { %v10799_v47 = vpop.f32.mrf.mxu1 }
 0x1c4   :  { %v1566_v49 = vmax.f32 %v1289_v1, 0.0  ;;  %v10814_v16 = vpop.f32.mrf.mxu2  ;;  %v7904_v1 = vld [vmem:[#allocation8 + $0x70] sm:$0xf] }
 0x1c7   :  { %v1241_v45 = vpop.f32.mrf.mxu3 }
 0x1c8   :  { %v1242_v31 = vadd.f32 %v1241_v45, %v1193_v12  ;;  %v1305_v12 = vadd.f32 %v10681_v28, %v10806_v62  ;;  %v1308_v28 = vadd.f32 %v10687_v23, %v10806_v62  ;;  %v1310_v23 = vadd.f32 %v10701_v15, %v10806_v62 }
 0x1c9   :  { %v1449_v13 = vpop.f32.mrf.mxu0  ;;  %v1313_v15 = vadd.f32 %v10705_v25, %v10806_v62 }
 0x1ca   :  { %v1291_v7 = vadd.f32 %v1290_v4, %v1242_v31  ;;  %v1354_v45 = vadd.f32 %v10749_v22, %v1305_v12  ;;  %v9340_v22 = vld [vmem:[#allocation8 + $0x74] sm:$0xf] }
 0x1cb   :  { %v1498_v63 = vpop.f32.mrf.mxu1 }
 0x1cc   :  { %v1568_v21 = vmax.f32 %v1291_v7, 0.0  ;;  %1890 = vmatmul.bf16.vlgmr.msrb.gmra.mxu0 %v10692_v26  ;;  %v9341_v26 = vld [vmem:[#allocation8 + $0x74] sm:$0xf0] }
 0x1cd   :  { %v7905_v7 = vor.u32 %v9341_v26, %v7904_v1  ;;  %v7970_v1 = vld [vmem:[#allocation8 + $0xf8] sm:$0xf0] }
 0x1ce   :  { %v10811_v19 = vpack.c.bf16 %v1568_v21, %v1566_v49  ;;  %v9357_v49 = vld [vmem:[#allocation8 + $0xf4] sm:$0xf0] }
 0x1cf   :  { %v1400_v48 = vpop.f32.mrf.mxu3  ;;  %v7969_v53 = vor.u32 %v9357_v49, %v7968_v14  ;;  %2226 = vmatpush.bf16.msrb.mxu2 %v7905_v7  ;;  %v9339_v49 = vld [vmem:[#allocation8 + $0x64] sm:$0xf0] }
 0x1d0   :  { %1827 = vmatmul.bf16.gmra.mxu2 %v10811_v19  ;;  %v1401_v36 = vadd.f32 %v1400_v48, %v1352_v41 }
 0x1d1   :  { %v1451_v27 = vpop.f32.mrf.mxu0  ;;  %2275 = vmatpush.bf16.msra.mxu3 %v7969_v53 }
 0x1d2   :  { %v1450_v6 = vadd.f32 %v1449_v13, %v1401_v36  ;;  %v7906_v13 = vld [vmem:[#allocation8 + $0x78] sm:$0xf0]  ;;  %v9356_v36 = vld [vmem:[#allocation8 + $0xf4] sm:$0xf] }
 0x1d3   :  { %v1500_v4 = vpop.f32.mrf.mxu1  ;;  %v7909_v12 = vor.u32 %v9340_v22, %v7906_v13  ;;  %v9355_v22 = vld [vmem:[#allocation8 + $0xe4] sm:$0xf0] }
 0x1d4   :  { %v1499_v58 = vadd.f32 %v1498_v63, %v1450_v6  ;;  %v1357_v63 = vadd.f32 %v10758_v43, %v1308_v28 }
 0x1d5   :  { %2324 = vmatpush.bf16.msra.mxu0 %v7909_v12 }
 0x1d6   :  { %v1539_v26 = vmax.f32 %v1499_v58, 0.0  ;;  %v7896_v58 = vld [vmem:[#allocation8 + $0x60] sm:$0xf] }
 0x1d7   :  { %v1402_v31 = vpop.f32.mrf.mxu3  ;;  %v7897_v53 = vor.u32 %v9339_v49, %v7896_v58 }
 0x1d8   :  { %v1403_v37 = vadd.f32 %v1402_v31, %v1354_v45  ;;  %v7973_v31 = vor.u32 %v9356_v36, %v7970_v1 }
 0x1d9   :  { %v1454_v21 = vpop.f32.mrf.mxu0  ;;  %2227 = vmatpush.bf16.msrb.mxu2 %v7897_v53  ;;  %v9337_v53 = vld [vmem:[#allocation8 + $0x54] sm:$0xf0] }
 0x1da   :  { %v1452_v29 = vadd.f32 %v1451_v27, %v1403_v37  ;;  %2373 = vmatpush.bf16.msra.mxu1 %v7973_v31 }
 0x1db   :  { %v1503_v48 = vpop.f32.mrf.mxu1 }
 0x1dc   :  { %v1501_v41 = vadd.f32 %v1500_v4, %v1452_v29  ;;  %1895 = vmatmul.bf16.gmra.mxu0 %v10712_v3  ;;  %v1359_v3 = vadd.f32 %v10769_v60, %v1310_v23  ;;  %v9338_v60 = vld [vmem:[#allocation8 + $0x64] sm:$0xf] }
 0x1de   :  { %v1541_v45 = vmax.f32 %v1501_v41, 0.0  ;;  %v7960_v41 = vld [vmem:[#allocation8 + $0xe0] sm:$0xf] }
 0x1df   :  { %v1405_v14 = vpop.f32.mrf.mxu3  ;;  %v7961_v28 = vor.u32 %v9355_v22, %v7960_v41 }
 0x1e0   :  { %v1571_v27 = vpack.c.bf16 %v1541_v45, %v1539_v26  ;;  %v1406_v7 = vadd.f32 %v1405_v14, %v1357_v63  ;;  %v9354_v45 = vld [vmem:[#allocation8 + $0xe4] sm:$0xf]  ;;  %v7962_v14 = vld [vmem:[#allocation8 + $0xe8] sm:$0xf0] }
 0x1e1   :  { %v1456_v6 = vpop.f32.mrf.mxu0  ;;  %2276 = vmatpush.bf16.msra.mxu3 %v7961_v28 }
 0x1e2   :  { %1841 = vmatmul.bf16.vlgmr.msrb.gmra.mxu3 %v1571_v27  ;;  %1939 = vmatmul.bf16.vlgmr.msrb.gmra.mxu1 %v1571_v27  ;;  %v1455_v4 = vadd.f32 %v1454_v21, %v1406_v7  ;;  %v7898_v21 = vld [vmem:[#allocation8 + $0x68] sm:$0xf0]  ;;  %v7965_v7 = vor.u32 %v9354_v45, %v7962_v14  ;;  %v9352_v45 = vld [vmem:[#allocation8 + $0xd4] sm:$0xf]  ;;  %v7954_v14 = vld [vmem:[#allocation8 + $0xd8] sm:$0xf0] }
 0x1e3   :  { %v1505_v29 = vpop.f32.mrf.mxu1  ;;  %v7901_v31 = vor.u32 %v9338_v60, %v7898_v21 }
 0x1e4   :  { %v1504_v36 = vadd.f32 %v1503_v48, %v1455_v4  ;;  %v1362_v48 = vadd.f32 %v10781_v61, %v1313_v15  ;;  %2374 = vmatpush.bf16.msra.mxu1 %v7965_v7  ;;  %v7952_v61 = vld [vmem:[#allocation8 + $0xd0] sm:$0xf]  ;;  %v7957_v7 = vor.u32 %v9352_v45, %v7954_v14 }
 0x1e5   :  { %2325 = vmatpush.bf16.msra.mxu0 %v7901_v31 }
 0x1e6   :  { %v1543_v63 = vmax.f32 %v1504_v36, 0.0 }
 0x1e7   :  { %v1407_v37 = vpop.f32.mrf.mxu3 }
 0x1e8   :  { %v1408_v43 = vadd.f32 %v1407_v37, %v1359_v3  ;;  %v7888_v37 = vld [vmem:[#allocation8 + $0x50] sm:$0xf]  ;;  %2375 = vmatpush.bf16.msra.mxu1 %v7957_v7 }
 0x1e9   :  { %v1459_v13 = vpop.f32.mrf.mxu0  ;;  %v7889_v22 = vor.u32 %v9337_v53, %v7888_v37 }
 0x1ea   :  { %v1457_v12 = vadd.f32 %v1456_v6, %v1408_v43  ;;  %v9353_v43 = vld [vmem:[#allocation8 + $0xd4] sm:$0xf0] }
 0x1eb   :  { %v1508_v1 = vpop.f32.mrf.mxu1  ;;  %v7953_v36 = vor.u32 %v9353_v43, %v7952_v61  ;;  %2228 = vmatpush.bf16.msrb.mxu2 %v7889_v22  ;;  %v9351_v22 = vld [vmem:[#allocation8 + $0xc4] sm:$0xf0] }
 0x1ec   :  { %v1506_v26 = vadd.f32 %v1505_v29, %v1457_v12  ;;  %1900 = vmatmul.bf16.gmra.mxu0 %v10726_v55  ;;  %v1315_v55 = vadd.f32 %v10715_v52, %v10806_v62  ;;  %v10833_v29 = vpop.f32.mrf.mxu2  ;;  %v1318_v52 = vadd.f32 %v10721_v8, %v10806_v62 }
 0x1ed   :  { %2277 = vmatpush.bf16.msra.mxu3 %v7953_v36 }
 0x1ee   :  { %v1545_v27 = vmax.f32 %v1506_v26, 0.0  ;;  %v1364_v58 = vadd.f32 %v10789_v33, %v1315_v55  ;;  %v9336_v33 = vld [vmem:[#allocation8 + $0x54] sm:$0xf] }
 0x1ef   :  { %v1410_v23 = vpop.f32.mrf.mxu3 }
 0x1f0   :  { %v1573_v6 = vpack.c.bf16 %v1545_v27, %v1543_v63  ;;  %v1411_v4 = vadd.f32 %v1410_v23, %v1362_v48 }
 0x1f1   :  { %v1461_v3 = vpop.f32.mrf.mxu0 }
 0x1f2   :  { %1846 = vmatmul.bf16.gmra.mxu3 %v1573_v6  ;;  %1944 = vmatmul.bf16.gmra.mxu1 %v1573_v6  ;;  %v1460_v49 = vadd.f32 %v1459_v13, %v1411_v4  ;;  %v7890_v13 = vld [vmem:[#allocation8 + $0x58] sm:$0xf0]  ;;  %v1320_v4 = vadd.f32 %v10731_v56, %v10806_v62  ;;  %v1323_v56 = vadd.f32 %v10737_v17, %v10806_v62 }
 0x1f3   :  { %v1510_v25 = vpop.f32.mrf.mxu1  ;;  %v7893_v31 = vor.u32 %v9336_v33, %v7890_v13  ;;  %v7946_v13 = vld [vmem:[#allocation8 + $0xc8] sm:$0xf0] }
 0x1f4   :  { %v1509_v15 = vadd.f32 %v1508_v1, %v1460_v49  ;;  %v1373_v23 = vpop.f32.mrf.mxu2  ;;  %v1367_v1 = vadd.f32 %v10803_v50, %v1318_v52  ;;  %v9335_v49 = vld [vmem:[#allocation8 + $0x44] sm:$0xf0]  ;;  %v7882_v52 = vld [vmem:[#allocation8 + $0x48] sm:$0xf0] }
 0x1f5   :  { %2326 = vmatpush.bf16.msra.mxu0 %v7893_v31 }
 0x1f6   :  { %v1547_v63 = vmax.f32 %v1509_v15, 0.0 }
 0x1f7   :  { %v1412_v41 = vpop.f32.mrf.mxu3 }
 0x1f8   :  { %v1413_v28 = vadd.f32 %v1412_v41, %v1364_v58  ;;  %v7880_v58 = vld [vmem:[#allocation8 + $0x40] sm:$0xf] }
 0x1f9   :  { %v1464_v12 = vpop.f32.mrf.mxu0  ;;  %v7881_v53 = vor.u32 %v9335_v49, %v7880_v58  ;;  %v7944_v41 = vld [vmem:[#allocation8 + $0xc0] sm:$0xf]  ;;  %v9349_v58 = vld [vmem:[#allocation8 + $0xb4] sm:$0xf0] }
 0x1fa   :  { %v1462_v26 = vadd.f32 %v1461_v3, %v1413_v28  ;;  %v7945_v61 = vor.u32 %v9351_v22, %v7944_v41 }
 0x1fb   :  { %v1513_v60 = vpop.f32.mrf.mxu1  ;;  %2229 = vmatpush.bf16.msrb.mxu2 %v7881_v53 }
 0x1fc   :  { %v1511_v21 = vadd.f32 %v1510_v25, %v1462_v26  ;;  %1905 = vmatmul.bf16.gmra.mxu0 %v10742_v59  ;;  %v1369_v25 = vadd.f32 %v10814_v16, %v1320_v4  ;;  %v1376_v43 = vpop.f32.mrf.mxu2  ;;  %2278 = vmatpush.bf16.msra.mxu3 %v7945_v61  ;;  %v7874_v61 = vld [vmem:[#allocation8 + $0x38] sm:$0xf0] }
 0x1fe   :  { %v1549_v27 = vmax.f32 %v1511_v21, 0.0  ;;  %v9350_v21 = vld [vmem:[#allocation8 + $0xc4] sm:$0xf] }
 0x1ff   :  { %v1415_v48 = vpop.f32.mrf.mxu3  ;;  %v7949_v14 = vor.u32 %v9350_v21, %v7946_v13 }
 0x200   :  { %v1575_v6 = vpack.c.bf16 %v1549_v27, %v1547_v63  ;;  %v1416_v8 = vadd.f32 %v1415_v48, %v1367_v1  ;;  %v1325_v1 = vadd.f32 %v10747_v35, %v10806_v62 }
 0x201   :  { %v1466_v3 = vpop.f32.mrf.mxu0  ;;  %2376 = vmatpush.bf16.msra.mxu1 %v7949_v14 }
 0x202   :  { %1851 = vmatmul.bf16.gmra.mxu3 %v1575_v6  ;;  %1949 = vmatmul.bf16.gmra.mxu1 %v1575_v6  ;;  %v1465_v55 = vadd.f32 %v1464_v12, %v1416_v8  ;;  %v9334_v12 = vld [vmem:[#allocation8 + $0x44] sm:$0xf]  ;;  %v1374_v6 = vadd.f32 %v1373_v23, %v1325_v1  ;;  %v7872_v8 = vld [vmem:[#allocation8 + $0x30] sm:$0xf]  ;;  %v9332_v23 = vld [vmem:[#allocation8 + $0x34] sm:$0xf] }
 0x203   :  { %v1515_v59 = vpop.f32.mrf.mxu1  ;;  %v7885_v33 = vor.u32 %v9334_v12, %v7882_v52  ;;  %v9347_v1 = vld [vmem:[#allocation8 + $0xa4] sm:$0xf0] }
 0x204   :  { %v1514_v36 = vadd.f32 %v1513_v60, %v1465_v55  ;;  %v1372_v60 = vadd.f32 %v10833_v29, %v1323_v56  ;;  %v7936_v55 = vld [vmem:[#allocation8 + $0xb0] sm:$0xf]  ;;  %v7938_v56 = vld [vmem:[#allocation8 + $0xb8] sm:$0xf0] }
 0x205   :  { %2327 = vmatpush.bf16.msra.mxu0 %v7885_v33  ;;  %v7937_v49 = vor.u32 %v9349_v58, %v7936_v55  ;;  %v9346_v55 = vld [vmem:[#allocation8 + $0xa4] sm:$0xf] }
 0x206   :  { %v1551_v45 = vmax.f32 %v1514_v36, 0.0 }
 0x207   :  { %v1417_v37 = vpop.f32.mrf.mxu3  ;;  %2279 = vmatpush.bf16.msra.mxu3 %v7937_v49  ;;  %v7930_v49 = vld [vmem:[#allocation8 + $0xa8] sm:$0xf0] }
 0x208   :  { %v1418_v50 = vadd.f32 %v1417_v37, %v1369_v25 }
 0x209   :  { %v1469_v28 = vpop.f32.mrf.mxu0 }
 0x20a   :  { %v1467_v15 = vadd.f32 %v1466_v3, %v1418_v50  ;;  %v1328_v50 = vadd.f32 %v10753_v40, %v10806_v62 }
 0x20b   :  { %v1518_v26 = vpop.f32.mrf.mxu1 }
 0x20c   :  { %v1516_v16 = vadd.f32 %v1515_v59, %v1467_v15  ;;  %1910 = vmatmul.bf16.gmra.mxu0 %v10760_v44  ;;  %v1378_v44 = vpop.f32.mrf.mxu2  ;;  %v9333_v59 = vld [vmem:[#allocation8 + $0x34] sm:$0xf0]  ;;  %v7877_v15 = vor.u32 %v9332_v23, %v7874_v61 }
 0x20d   :  { %v7873_v25 = vor.u32 %v9333_v59, %v7872_v8 }
 0x20e   :  { %v1553_v31 = vmax.f32 %v1516_v16, 0.0  ;;  %2328 = vmatpush.bf16.msra.mxu0 %v7877_v15  ;;  %v9329_v15 = vld [vmem:[#allocation8 + $0x14] sm:$0xf0] }
 0x20f   :  { %v1420_v63 = vpop.f32.mrf.mxu3  ;;  %2230 = vmatpush.bf16.msrb.mxu2 %v7873_v25  ;;  %v7866_v25 = vld [vmem:[#allocation8 + $0x28] sm:$0xf0] }
 0x210   :  { %v1577_v27 = vpack.c.bf16 %v1553_v31, %v1551_v45  ;;  %v1421_v48 = vadd.f32 %v1420_v63, %v1372_v60  ;;  %v7864_v63 = vld [vmem:[#allocation8 + $0x20] sm:$0xf]  ;;  %v9331_v60 = vld [vmem:[#allocation8 + $0x24] sm:$0xf0] }
 0x211   :  { %v1471_v7 = vpop.f32.mrf.mxu0 }
 0x212   :  { %1856 = vmatmul.bf16.gmra.mxu3 %v1577_v27  ;;  %1954 = vmatmul.bf16.gmra.mxu1 %v1577_v27  ;;  %v1470_v3 = vadd.f32 %v1469_v28, %v1421_v48  ;;  %v9348_v28 = vld [vmem:[#allocation8 + $0xb4] sm:$0xf]  ;;  %v7865_v48 = vor.u32 %v9331_v60, %v7864_v63  ;;  %v7858_v60 = vld [vmem:[#allocation8 + $0x18] sm:$0xf0] }
 0x213   :  { %v1520_v17 = vpop.f32.mrf.mxu1  ;;  %v7941_v52 = vor.u32 %v9348_v28, %v7938_v56  ;;  %v7856_v28 = vld [vmem:[#allocation8 + $0x10] sm:$0xf]  ;;  %v9328_v63 = vld [vmem:[#allocation8 + $0x14] sm:$0xf] }
 0x214   :  { %v1519_v53 = vadd.f32 %v1518_v26, %v1470_v3  ;;  %v1381_v36 = vpop.f32.mrf.mxu2  ;;  %v1377_v26 = vadd.f32 %v1376_v43, %v1328_v50  ;;  %2231 = vmatpush.bf16.msrb.mxu2 %v7865_v48  ;;  %v7920_v56 = vld [vmem:[#allocation8 + $0x90] sm:$0xf]  ;;  %v7922_v48 = vld [vmem:[#allocation8 + $0x98] sm:$0xf0] }
 0x215   :  { %2377 = vmatpush.bf16.msra.mxu1 %v7941_v52 }
 0x216   :  { %v1555_v16 = vmax.f32 %v1519_v53, 0.0 }
 0x217   :  { %v1422_v4 = vpop.f32.mrf.mxu3 }
 0x218   :  { %v1423_v29 = vadd.f32 %v1422_v4, %v1374_v6  ;;  %v1333_v4 = vadd.f32 %v10771_v5, %v10806_v62 }
 0x219   :  { %v1474_v37 = vpop.f32.mrf.mxu0 }
 0x21a   :  { %v1472_v41 = vadd.f32 %v1471_v7, %v1423_v29 }
 0x21b   :  { %v1523_v22 = vpop.f32.mrf.mxu1 }
 0x21c   :  { %v1521_v35 = vadd.f32 %v1520_v17, %v1472_v41  ;;  %1915 = vmatmul.bf16.gmra.mxu0 %v10776_v54  ;;  %v1330_v54 = vadd.f32 %v10765_v9, %v10806_v62  ;;  %v1383_v27 = vpop.f32.mrf.mxu2  ;;  %v7928_v17 = vld [vmem:[#allocation8 + $0xa0] sm:$0xf]  ;;  %v7933_v41 = vor.u32 %v9346_v55, %v7930_v49  ;;  %v1340_v55 = vadd.f32 %v10799_v47, %v10806_v62  ;;  %v7850_v47 = vld [vmem:[#allocation8 + $0x8] sm:$0xf0] }
 0x21d   :  { %v7929_v6 = vor.u32 %v9347_v1, %v7928_v17 }
 0x21e   :  { %v1557_v12 = vmax.f32 %v1521_v35, 0.0  ;;  %v1379_v31 = vadd.f32 %v1378_v44, %v1330_v54  ;;  %v9330_v44 = vld [vmem:[#allocation8 + $0x24] sm:$0xf]  ;;  %2378 = vmatpush.bf16.msra.mxu1 %v7933_v41  ;;  %v9343_v41 = vld [vmem:[#allocation8 + $0x84] sm:$0xf0] }
 0x21f   :  { %v1425_v21 = vpop.f32.mrf.mxu3  ;;  %2280 = vmatpush.bf16.msra.mxu3 %v7929_v6  ;;  %v7869_v29 = vor.u32 %v9330_v44, %v7866_v25 }
 0x220   :  { %v1579_v33 = vpack.c.bf16 %v1557_v12, %v1555_v16  ;;  %v1426_v45 = vadd.f32 %v1425_v21, %v1377_v26  ;;  %v7857_v16 = vor.u32 %v9329_v15, %v7856_v28  ;;  %v9345_v12 = vld [vmem:[#allocation8 + $0x94] sm:$0xf0] }
 0x221   :  { %v1476_v13 = vpop.f32.mrf.mxu0  ;;  %2329 = vmatpush.bf16.msra.mxu0 %v7869_v29  ;;  %v7921_v26 = vor.u32 %v9345_v12, %v7920_v56  ;;  %v9326_v56 = vld [vmem:[#allocation8 + $0x4] sm:$0xf] }
 0x222   :  { %1861 = vmatmul.bf16.gmra.mxu3 %v1579_v33  ;;  %1959 = vmatmul.bf16.gmra.mxu1 %v1579_v33  ;;  %v1475_v14 = vadd.f32 %v1474_v37, %v1426_v45 }
 0x223   :  { %v1525_v40 = vpop.f32.mrf.mxu1  ;;  %2232 = vmatpush.bf16.msrb.mxu2 %v7857_v16  ;;  %2281 = vmatpush.bf16.msra.mxu3 %v7921_v26  ;;  %v7853_v16 = vor.u32 %v9326_v56, %v7850_v47 }
 0x224   :  { %v1524_v8 = vadd.f32 %v1523_v22, %v1475_v14  ;;  %v1382_v22 = vadd.f32 %v1381_v36, %v1333_v4  ;;  %v1386_v23 = vpop.f32.mrf.mxu2 }
 0x226   :  { %v1559_v37 = vmax.f32 %v1524_v8, 0.0 }
 0x227   :  { %v1427_v7 = vpop.f32.mrf.mxu3 }
 0x228   :  { %v1428_v43 = vadd.f32 %v1427_v7, %v1379_v31  ;;  %v7861_v7 = vor.u32 %v9328_v63, %v7858_v60 }
 0x229   :  { %v1479_v3 = vpop.f32.mrf.mxu0 }
 0x22a   :  { %v1477_v59 = vadd.f32 %v1476_v13, %v1428_v43  ;;  %2330 = vmatpush.bf16.msra.mxu0 %v7861_v7 }
 0x22b   :  { %v1528_v58 = vpop.f32.mrf.mxu1 }
 0x22c   :  { %v1526_v9 = vadd.f32 %v1525_v40, %v1477_v59  ;;  %1920 = vmatmul.bf16.gmra.mxu0 %v10794_v10  ;;  %v1335_v10 = vadd.f32 %v10783_v18, %v10806_v62  ;;  %v1388_v31 = vpop.f32.mrf.mxu2  ;;  %v1338_v18 = vadd.f32 %v10787_v11, %v10806_v62  ;;  %v7848_v11 = vld [vmem:[#allocation8] sm:$0xf] }
 0x22e   :  { %v1561_v53 = vmax.f32 %v1526_v9, 0.0  ;;  %v1384_v52 = vadd.f32 %v1383_v27, %v1335_v10  ;;  %v9344_v27 = vld [vmem:[#allocation8 + $0x94] sm:$0xf]  ;;  %2331 = vmatpush.bf16.msra.mxu0 %v7853_v16 }
 0x22f   :  { %v1430_v50 = vpop.f32.mrf.mxu3  ;;  %v7925_v43 = vor.u32 %v9344_v27, %v7922_v48 }
 0x230   :  { %v1581_v35 = vpack.c.bf16 %v1561_v53, %v1559_v37  ;;  %v1431_v5 = vadd.f32 %v1430_v50, %v1382_v22  ;;  %v7912_v53 = vld [vmem:[#allocation8 + $0x80] sm:$0xf] }
 0x231   :  { %v1481_v61 = vpop.f32.mrf.mxu0  ;;  %2379 = vmatpush.bf16.msra.mxu1 %v7925_v43  ;;  %v7913_v22 = vor.u32 %v9343_v41, %v7912_v53 }
 0x232   :  { %1866 = vmatmul.bf16.gmra.mxu3 %v1581_v35  ;;  %1964 = vmatmul.bf16.gmra.mxu1 %v1581_v35  ;;  %v1480_v21 = vadd.f32 %v1479_v3, %v1431_v5  ;;  %v1387_v3 = vadd.f32 %v1386_v23, %v1338_v18  ;;  %v9342_v35 = vld [vmem:[#allocation8 + $0x84] sm:$0xf]  ;;  %v7914_v23 = vld [vmem:[#allocation8 + $0x88] sm:$0xf0] }
 0x233   :  { %v1530_v33 = vpop.f32.mrf.mxu1  ;;  %v7917_v10 = vor.u32 %v9342_v35, %v7914_v23  ;;  %2282 = vmatpush.bf16.msra.mxu3 %v7913_v22  ;;  %v9372_v22 = vld [vmem:[#allocation10 + $0x74] sm:$0xf]  ;;  %v8034_v35 = vld [vmem:[#allocation10 + $0x78] sm:$0xf0] }
 0x234   :  { %v1529_v40 = vadd.f32 %v1528_v58, %v1480_v21  ;;  %v1793_v44 = vpop.f32.mrf.mxu2  ;;  %v1389_v58 = vadd.f32 %v1388_v31, %v1340_v55  ;;  %v8037_v23 = vor.u32 %v9372_v22, %v8034_v35 }
 0x235   :  { %2380 = vmatpush.bf16.msra.mxu1 %v7917_v10 }
 0x236   :  { %v1563_v17 = vmax.f32 %v1529_v40, 0.0  ;;  %2766 = vmatpush.bf16.msrb.mxu0 %v8037_v23 }
 0x237   :  { %v1432_v36 = vpop.f32.mrf.mxu3 }
 0x238   :  { %v1433_v13 = vadd.f32 %v1432_v36, %v1384_v52 }
 0x239   :  { %v1484_v45 = vpop.f32.mrf.mxu0 }
 0x23a   :  { %v1482_v54 = vadd.f32 %v1481_v61, %v1433_v13  ;;  %v1618_v13 = vld [vmem:[%s12073_s1] sm:$0x3] }
 0x23b   :  { %v1533_v59 = vpop.f32.mrf.mxu1  ;;  %v10867_v40 = vperm.slane %v1618_v13, 1  ;;  %v10870_v63 = vperm.slane %v1618_v13, 0 }
 0x23c   :  { %v1531_v14 = vadd.f32 %v1530_v33, %v1482_v54  ;;  %1925 = vmatmul.bf16.gmra.mxu0 %v10811_v19  ;;  %v9327_v19 = vld [vmem:[#allocation8 + $0x4] sm:$0xf0]  ;;  %v1795_v62 = vpop.f32.mrf.mxu2 }
 0x23d   :  { %v7849_v25 = vor.u32 %v9327_v19, %v7848_v11  ;;  %v9389_v11 = vld [vmem:[#allocation10 + $0xf4] sm:$0xf0]  ;;  %v1796_v19 = vadd.f32 %v1795_v62, %v10870_v63 }
 0x23e   :  { %v1565_v1 = vmax.f32 %v1531_v14, 0.0 }
 0x23f   :  { %v1435_v6 = vpop.f32.mrf.mxu3  ;;  %2233 = vmatpush.bf16.msrb.mxu2 %v7849_v25 }
 0x240   :  { %v1583_v8 = vpack.c.bf16 %v1565_v1, %v1563_v17  ;;  %v1436_v9 = vadd.f32 %v1435_v6, %v1387_v3  ;;  %v1794_v1 = vadd.f32 %v1793_v44, %v10870_v63  ;;  %v8032_v3 = vld [vmem:[#allocation10 + $0x70] sm:$0xf] }
 0x241   :  { %v1486_v4 = vpop.f32.mrf.mxu0 }
 0x242   :  { %1871 = vmatmul.bf16.gmra.mxu3 %v1583_v8  ;;  %1969 = vmatmul.bf16.gmra.mxu1 %v1583_v8  ;;  %v1485_v29 = vadd.f32 %v1484_v45, %v1436_v9  ;;  %v9373_v8 = vld [vmem:[#allocation10 + $0x74] sm:$0xf0]  ;;  %v8096_v9 = vld [vmem:[#allocation10 + $0xf0] sm:$0xf] }
 0x243   :  { %v1535_v28 = vpop.f32.mrf.mxu1 }
 0x244   :  { %v1534_v61 = vadd.f32 %v1533_v59, %v1485_v29  ;;  %v1798_v33 = vpop.f32.mrf.mxu2 }
 0x246   :  { %v1567_v12 = vmax.f32 %v1534_v61, 0.0  ;;  %v9388_v61 = vld [vmem:[#allocation10 + $0xf4] sm:$0xf] }
 0x247   :  { %v1437_v49 = vpop.f32.mrf.mxu3 }
 0x248   :  { %v1438_v37 = vadd.f32 %v1437_v49, %v1389_v58  ;;  %v8097_v58 = vor.u32 %v9389_v11, %v8096_v9  ;;  %v9370_v9 = vld [vmem:[#allocation10 + $0x64] sm:$0xf]  ;;  %v8026_v11 = vld [vmem:[#allocation10 + $0x68] sm:$0xf0] }
 0x249   :  { %v1891_v50 = vpop.f32.mrf.mxu0 }
 0x24a   :  { %v1487_v5 = vadd.f32 %v1486_v4, %v1438_v37  ;;  %v1892_v18 = vadd.f32 %v1891_v50, %v10867_v40  ;;  %v8033_v4 = vor.u32 %v9373_v8, %v8032_v3  ;;  %2717 = vmatpush.bf16.msrb.mxu3 %v8097_v58 }
 0x24c   :  { %v1536_v15 = vadd.f32 %v1535_v28, %v1487_v5  ;;  %v1800_v54 = vpop.f32.mrf.mxu2  ;;  %2668 = vmatpush.bf16.msra.mxu2 %v8033_v4  ;;  %v8098_v5 = vld [vmem:[#allocation10 + $0xf8] sm:$0xf0] }
 0x24d   :  { %v8101_v28 = vor.u32 %v9388_v61, %v8098_v5  ;;  %v8016_v5 = vld [vmem:[#allocation10 + $0x50] sm:$0xf] }
 0x24e   :  { %v1569_v52 = vmax.f32 %v1536_v15, 0.0 }
 0x24f   :  { %2815 = vmatpush.bf16.msrb.mxu1 %v8101_v28  ;;  %v8080_v28 = vld [vmem:[#allocation10 + $0xd0] sm:$0xf] }
 0x250   :  { %v1585_v21 = vpack.c.bf16 %v1569_v52, %v1567_v12 }
 0x251   :  { %v1893_v26 = vpop.f32.mrf.mxu0 }
 0x252   :  { %1876 = vmatmul.bf16.gmra.mxu3 %v1585_v21  ;;  %1974 = vmatmul.bf16.gmra.mxu1 %v1585_v21  ;;  %v1894_v60 = vadd.f32 %v1893_v26, %v10867_v40  ;;  %v1799_v21 = vadd.f32 %v1798_v33, %v10870_v63 }
 0x254   :  { %v10876_v59 = vpop.f32.mrf.mxu2 }
 0x255   :  { %v1804_v35 = vadd.f32 %v10876_v59, %v10870_v63 }
 0x259   :  { %v1896_v36 = vpop.f32.mrf.mxu0 }
 0x25a   :  { %v1897_v10 = vadd.f32 %v1896_v36, %v10867_v40  ;;  %v9371_v36 = vld [vmem:[#allocation10 + $0x64] sm:$0xf0] }
 0x25c   :  { %v1805_v15 = vpop.f32.mrf.mxu2 }
 0x25f   :  { %v1940_v45 = vpop.f32.mrf.mxu1 }
 0x260   :  { %v1941_v27 = vadd.f32 %v1940_v45, %v1892_v18  ;;  %v8024_v45 = vld [vmem:[#allocation10 + $0x60] sm:$0xf] }
 0x261   :  { %v1898_v31 = vpop.f32.mrf.mxu0  ;;  %v8025_v18 = vor.u32 %v9371_v36, %v8024_v45 }
 0x262   :  { %v1981_v43 = vmax.f32 %v1941_v27, 0.0  ;;  %v1899_v47 = vadd.f32 %v1898_v31, %v10867_v40  ;;  %v1801_v27 = vadd.f32 %v1800_v54, %v10870_v63  ;;  %v9386_v54 = vld [vmem:[#allocation10 + $0xe4] sm:$0xf] }
 0x263   :  { %2669 = vmatpush.bf16.msra.mxu2 %v8025_v18  ;;  %v9368_v18 = vld [vmem:[#allocation10 + $0x54] sm:$0xf] }
 0x265   :  { %v1842_v14 = vpop.f32.mrf.mxu3 }
 0x266   :  { %v1843_v25 = vadd.f32 %v1842_v14, %v1794_v1  ;;  %v8088_v14 = vld [vmem:[#allocation10 + $0xe0] sm:$0xf] }
 0x267   :  { %v1942_v7 = vpop.f32.mrf.mxu1 }
 0x268   :  { %v1943_v48 = vadd.f32 %v1942_v7, %v1894_v60  ;;  %v1980_v37 = vmax.f32 %v1843_v25, 0.0  ;;  %v9387_v60 = vld [vmem:[#allocation10 + $0xe4] sm:$0xf0]  ;;  %v8029_v25 = vor.u32 %v9370_v9, %v8026_v11 }
 0x269   :  { %v10873_v17 = vpop.f32.mrf.mxu0  ;;  %v8089_v31 = vor.u32 %v9387_v60, %v8088_v14  ;;  %v8018_v14 = vld [vmem:[#allocation10 + $0x58] sm:$0xf0] }
 0x26a   :  { %v1983_v6 = vmax.f32 %v1943_v48, 0.0  ;;  %v1902_v58 = vadd.f32 %v10873_v17, %v10867_v40  ;;  %2767 = vmatpush.bf16.msrb.mxu0 %v8029_v25 }
 0x26b   :  { %2718 = vmatpush.bf16.msrb.mxu3 %v8089_v31 }
 0x26c   :  { %v2013_v55 = vpack.c.bf16 %v1983_v6, %v1981_v43  ;;  %v10885_v6 = vpop.f32.mrf.mxu2 }
 0x26d   :  { %v1844_v29 = vpop.f32.mrf.mxu3  ;;  %v1809_v9 = vadd.f32 %v10885_v6, %v10870_v63 }
 0x26e   :  { %v1845_v49 = vadd.f32 %v1844_v29, %v1796_v19  ;;  %2283 = vmatmul.bf16.vlgmr.msra.gmra.mxu3 %v2013_v55  ;;  %2381 = vmatmul.bf16.vlgmr.msra.gmra.mxu1 %v2013_v55  ;;  %v8090_v55 = vld [vmem:[#allocation10 + $0xe8] sm:$0xf0] }
 0x26f   :  { %v1945_v44 = vpop.f32.mrf.mxu1  ;;  %v8093_v29 = vor.u32 %v9386_v54, %v8090_v55  ;;  %v8008_v54 = vld [vmem:[#allocation10 + $0x40] sm:$0xf]  ;;  %v9367_v55 = vld [vmem:[#allocation10 + $0x44] sm:$0xf0] }
 0x270   :  { %v1982_v53 = vmax.f32 %v1845_v49, 0.0  ;;  %v1946_v62 = vadd.f32 %v1945_v44, %v1897_v10  ;;  %v9369_v10 = vld [vmem:[#allocation10 + $0x54] sm:$0xf0] }
 0x271   :  { %v1903_v41 = vpop.f32.mrf.mxu0  ;;  %2816 = vmatpush.bf16.msrb.mxu1 %v8093_v29  ;;  %v8017_v17 = vor.u32 %v9369_v10, %v8016_v5  ;;  %v9383_v29 = vld [vmem:[#allocation10 + $0xc4] sm:$0xf0] }
 0x272   :  { %v2012_v50 = vpack.c.bf16 %v1982_v53, %v1980_v37  ;;  %v1985_v26 = vmax.f32 %v1946_v62, 0.0  ;;  %v1904_v44 = vadd.f32 %v1903_v41, %v10867_v40 }
 0x273   :  { %2670 = vmatpush.bf16.msra.mxu2 %v8017_v17  ;;  %v9366_v17 = vld [vmem:[#allocation10 + $0x44] sm:$0xf] }
 0x274   :  { %2234 = vmatmul.bf16.vlgmr.msrb.gmra.mxu2 %v2012_v50  ;;  %2332 = vmatmul.bf16.vlgmr.msra.gmra.mxu0 %v2012_v50  ;;  %v1810_v22 = vpop.f32.mrf.mxu2 }
 0x275   :  { %v1847_v56 = vpop.f32.mrf.mxu3 }
 0x276   :  { %v1848_v7 = vadd.f32 %v1847_v56, %v1799_v21  ;;  %v9385_v56 = vld [vmem:[#allocation10 + $0xd4] sm:$0xf0] }
 0x277   :  { %v1947_v16 = vpop.f32.mrf.mxu1  ;;  %v8081_v41 = vor.u32 %v9385_v56, %v8080_v28  ;;  %v8010_v28 = vld [vmem:[#allocation10 + $0x48] sm:$0xf0] }
 0x278   :  { %v1948_v12 = vadd.f32 %v1947_v16, %v1899_v47  ;;  %v1984_v3 = vmax.f32 %v1848_v7, 0.0  ;;  %v1806_v47 = vadd.f32 %v1805_v15, %v10870_v63  ;;  %v9384_v7 = vld [vmem:[#allocation10 + $0xd4] sm:$0xf]  ;;  %v8082_v15 = vld [vmem:[#allocation10 + $0xd8] sm:$0xf0]  ;;  %v8013_v56 = vor.u32 %v9366_v17, %v8010_v28 }
 0x279   :  { %v10881_v52 = vpop.f32.mrf.mxu0  ;;  %2719 = vmatpush.bf16.msrb.mxu3 %v8081_v41  ;;  %v8085_v31 = vor.u32 %v9384_v7, %v8082_v15  ;;  %v9365_v7 = vld [vmem:[#allocation10 + $0x34] sm:$0xf0]  ;;  %v7992_v28 = vld [vmem:[#allocation10 + $0x20] sm:$0xf] }
 0x27a   :  { %v1987_v13 = vmax.f32 %v1948_v12, 0.0 }
 0x27b   :  { %2817 = vmatpush.bf16.msrb.mxu1 %v8085_v31  ;;  %v9381_v31 = vld [vmem:[#allocation10 + $0xb4] sm:$0xf0] }
 0x27c   :  { %v2015_v48 = vpack.c.bf16 %v1987_v13, %v1985_v26  ;;  %v1813_v60 = vpop.f32.mrf.mxu2 }
 0x27d   :  { %v1849_v1 = vpop.f32.mrf.mxu3 }
 0x27e   :  { %v1850_v43 = vadd.f32 %v1849_v1, %v1801_v27  ;;  %2288 = vmatmul.bf16.gmra.mxu3 %v2015_v48  ;;  %2386 = vmatmul.bf16.gmra.mxu1 %v2015_v48  ;;  %v8021_v27 = vor.u32 %v9368_v18, %v8018_v14  ;;  %v1907_v48 = vadd.f32 %v10881_v52, %v10867_v40 }
 0x27f   :  { %v1950_v33 = vpop.f32.mrf.mxu1  ;;  %v8009_v52 = vor.u32 %v9367_v55, %v8008_v54  ;;  %v9364_v55 = vld [vmem:[#allocation10 + $0x34] sm:$0xf] }
 0x280   :  { %v1986_v8 = vmax.f32 %v1850_v43, 0.0  ;;  %v1951_v37 = vadd.f32 %v1950_v33, %v1902_v58  ;;  %2768 = vmatpush.bf16.msrb.mxu0 %v8021_v27  ;;  %v8072_v58 = vld [vmem:[#allocation10 + $0xc0] sm:$0xf]  ;;  %v8000_v27 = vld [vmem:[#allocation10 + $0x30] sm:$0xf] }
 0x281   :  { %v1908_v19 = vpop.f32.mrf.mxu0  ;;  %2671 = vmatpush.bf16.msra.mxu2 %v8009_v52  ;;  %v8002_v52 = vld [vmem:[#allocation10 + $0x38] sm:$0xf0] }
 0x282   :  { %v2014_v4 = vpack.c.bf16 %v1986_v8, %v1984_v3  ;;  %v1989_v23 = vmax.f32 %v1951_v37, 0.0  ;;  %v1909_v43 = vadd.f32 %v1908_v19, %v10867_v40  ;;  %v8073_v19 = vor.u32 %v9383_v29, %v8072_v58  ;;  %v9380_v29 = vld [vmem:[#allocation10 + $0xb4] sm:$0xf] }
 0x283   :  { %v8005_v58 = vor.u32 %v9364_v55, %v8002_v52 }
 0x284   :  { %2239 = vmatmul.bf16.gmra.mxu2 %v2014_v4  ;;  %2337 = vmatmul.bf16.gmra.mxu0 %v2014_v4 }
 0x285   :  { %v1852_v49 = vpop.f32.mrf.mxu3  ;;  %2720 = vmatpush.bf16.msrb.mxu3 %v8073_v19  ;;  %2769 = vmatpush.bf16.msrb.mxu0 %v8013_v56  ;;  %v9363_v56 = vld [vmem:[#allocation10 + $0x24] sm:$0xf0] }
 0x286   :  { %v1853_v62 = vadd.f32 %v1852_v49, %v1804_v35  ;;  %v1811_v49 = vadd.f32 %v1810_v22, %v10870_v63  ;;  %v8074_v22 = vld [vmem:[#allocation10 + $0xc8] sm:$0xf0] }
 0x287   :  { %v1952_v53 = vpop.f32.mrf.mxu1 }
 0x288   :  { %v1953_v50 = vadd.f32 %v1952_v53, %v1904_v44  ;;  %v1988_v59 = vmax.f32 %v1853_v62, 0.0  ;;  %v1815_v53 = vpop.f32.mrf.mxu2 }
 0x289   :  { %v1911_v12 = vpop.f32.mrf.mxu0  ;;  %2770 = vmatpush.bf16.msrb.mxu0 %v8005_v58 }
 0x28a   :  { %v1991_v61 = vmax.f32 %v1953_v50, 0.0  ;;  %v1912_v62 = vadd.f32 %v1911_v12, %v10867_v40  ;;  %v8001_v12 = vor.u32 %v9365_v7, %v8000_v27  ;;  %v9362_v27 = vld [vmem:[#allocation10 + $0x24] sm:$0xf]  ;;  %v7994_v7 = vld [vmem:[#allocation10 + $0x28] sm:$0xf0] }
 0x28c   :  { %v2017_v16 = vpack.c.bf16 %v1991_v61, %v1989_v23  ;;  %2672 = vmatpush.bf16.msra.mxu2 %v8001_v12  ;;  %v9378_v12 = vld [vmem:[#allocation10 + $0xa4] sm:$0xf] }
 0x28d   :  { %v1854_v21 = vpop.f32.mrf.mxu3 }
 0x28e   :  { %v1855_v26 = vadd.f32 %v1854_v21, %v1806_v47  ;;  %2293 = vmatmul.bf16.gmra.mxu3 %v2017_v16  ;;  %2391 = vmatmul.bf16.gmra.mxu1 %v2017_v16  ;;  %v9382_v47 = vld [vmem:[#allocation10 + $0xc4] sm:$0xf] }
 0x28f   :  { %v1955_v13 = vpop.f32.mrf.mxu1  ;;  %v8077_v16 = vor.u32 %v9382_v47, %v8074_v22  ;;  %v8056_v22 = vld [vmem:[#allocation10 + $0xa0] sm:$0xf] }
 0x290   :  { %v1990_v45 = vmax.f32 %v1855_v26, 0.0  ;;  %v1956_v33 = vadd.f32 %v1955_v13, %v1907_v48  ;;  %v1818_v13 = vpop.f32.mrf.mxu2  ;;  %v8064_v48 = vld [vmem:[#allocation10 + $0xb0] sm:$0xf] }
 0x291   :  { %v1913_v3 = vpop.f32.mrf.mxu0  ;;  %2818 = vmatpush.bf16.msrb.mxu1 %v8077_v16 }
 0x292   :  { %v2016_v36 = vpack.c.bf16 %v1990_v45, %v1988_v59  ;;  %v1993_v11 = vmax.f32 %v1956_v33, 0.0  ;;  %v1914_v21 = vadd.f32 %v1913_v3, %v10867_v40  ;;  %v8065_v3 = vor.u32 %v9381_v31, %v8064_v48  ;;  %v8058_v48 = vld [vmem:[#allocation10 + $0xa8] sm:$0xf0] }
 0x294   :  { %2244 = vmatmul.bf16.gmra.mxu2 %v2016_v36  ;;  %2342 = vmatmul.bf16.gmra.mxu0 %v2016_v36  ;;  %v1814_v36 = vadd.f32 %v1813_v60, %v10870_v63 }
 0x295   :  { %v1857_v1 = vpop.f32.mrf.mxu3  ;;  %2721 = vmatpush.bf16.msrb.mxu3 %v8065_v3  ;;  %v9361_v3 = vld [vmem:[#allocation10 + $0x14] sm:$0xf0] }
 0x296   :  { %v1858_v44 = vadd.f32 %v1857_v1, %v1809_v9  ;;  %v1816_v1 = vadd.f32 %v1815_v53, %v10870_v63 }
 0x297   :  { %v1957_v8 = vpop.f32.mrf.mxu1 }
 0x298   :  { %v1958_v4 = vadd.f32 %v1957_v8, %v1909_v43  ;;  %v1992_v6 = vmax.f32 %v1858_v44, 0.0 }
 0x299   :  { %v1916_v5 = vpop.f32.mrf.mxu0 }
 0x29a   :  { %v1995_v25 = vmax.f32 %v1958_v4, 0.0  ;;  %v1917_v44 = vadd.f32 %v1916_v5, %v10867_v40  ;;  %v7993_v5 = vor.u32 %v9363_v56, %v7992_v28 }
 0x29c   :  { %v2019_v37 = vpack.c.bf16 %v1995_v25, %v1993_v11  ;;  %v1820_v25 = vpop.f32.mrf.mxu2  ;;  %2673 = vmatpush.bf16.msra.mxu2 %v7993_v5 }
 0x29d   :  { %v1859_v50 = vpop.f32.mrf.mxu3  ;;  %v1821_v16 = vadd.f32 %v1820_v25, %v10870_v63 }
 0x29e   :  { %v1860_v35 = vadd.f32 %v1859_v50, %v1811_v49  ;;  %2298 = vmatmul.bf16.gmra.mxu3 %v2019_v37  ;;  %2396 = vmatmul.bf16.gmra.mxu1 %v2019_v37  ;;  %v8066_v49 = vld [vmem:[#allocation10 + $0xb8] sm:$0xf0] }
 0x29f   :  { %v1960_v23 = vpop.f32.mrf.mxu1  ;;  %v8069_v37 = vor.u32 %v9380_v29, %v8066_v49 }
 0x2a0   :  { %v1994_v61 = vmax.f32 %v1860_v35, 0.0  ;;  %v1961_v26 = vadd.f32 %v1960_v23, %v1912_v62  ;;  %v9379_v62 = vld [vmem:[#allocation10 + $0xa4] sm:$0xf0] }
 0x2a1   :  { %v1918_v15 = vpop.f32.mrf.mxu0  ;;  %2819 = vmatpush.bf16.msrb.mxu1 %v8069_v37 }
 0x2a2   :  { %v2018_v10 = vpack.c.bf16 %v1994_v61, %v1992_v6  ;;  %v1997_v18 = vmax.f32 %v1961_v26, 0.0  ;;  %v1919_v50 = vadd.f32 %v1918_v15, %v10867_v40  ;;  %v1819_v61 = vadd.f32 %v1818_v13, %v10870_v63 }
 0x2a3   :  { %v8057_v26 = vor.u32 %v9379_v62, %v8056_v22  ;;  %v7997_v15 = vor.u32 %v9362_v27, %v7994_v7 }
 0x2a4   :  { %2249 = vmatmul.bf16.gmra.mxu2 %v2018_v10  ;;  %2347 = vmatmul.bf16.gmra.mxu0 %v2018_v10  ;;  %v1823_v47 = vpop.f32.mrf.mxu2 }
 0x2a5   :  { %v1862_v41 = vpop.f32.mrf.mxu3  ;;  %2722 = vmatpush.bf16.msrb.mxu3 %v8057_v26  ;;  %2771 = vmatpush.bf16.msrb.mxu0 %v7997_v15  ;;  %v1824_v49 = vadd.f32 %v1823_v47, %v10870_v63  ;;  %v9376_v26 = vld [vmem:[#allocation10 + $0x94] sm:$0xf] }
 0x2a6   :  { %v1863_v43 = vadd.f32 %v1862_v41, %v1814_v36 }
 0x2a7   :  { %v1962_v59 = vpop.f32.mrf.mxu1 }
 0x2a8   :  { %v1963_v45 = vadd.f32 %v1962_v59, %v1914_v21  ;;  %v1996_v60 = vmax.f32 %v1863_v43, 0.0 }
 0x2a9   :  { %v1921_v19 = vpop.f32.mrf.mxu0 }
 0x2aa   :  { %v1999_v14 = vmax.f32 %v1963_v45, 0.0  ;;  %v1922_v43 = vadd.f32 %v1921_v19, %v10867_v40  ;;  %v9360_v19 = vld [vmem:[#allocation10 + $0x14] sm:$0xf] }
 0x2ac   :  { %v2021_v33 = vpack.c.bf16 %v1999_v14, %v1997_v18 }
 0x2ad   :  { %v1864_v8 = vpop.f32.mrf.mxu3 }
 0x2ae   :  { %v1865_v4 = vadd.f32 %v1864_v8, %v1816_v1  ;;  %2303 = vmatmul.bf16.gmra.mxu3 %v2021_v33  ;;  %2401 = vmatmul.bf16.gmra.mxu1 %v2021_v33  ;;  %v8061_v1 = vor.u32 %v9378_v12, %v8058_v48  ;;  %v7984_v33 = vld [vmem:[#allocation10 + $0x10] sm:$0xf] }
 0x2af   :  { %v1965_v9 = vpop.f32.mrf.mxu1  ;;  %v8048_v8 = vld [vmem:[#allocation10 + $0x90] sm:$0xf] }
 0x2b0   :  { %v1998_v11 = vmax.f32 %v1865_v4, 0.0  ;;  %v1966_v35 = vadd.f32 %v1965_v9, %v1917_v44  ;;  %v1825_v4 = vpop.f32.mrf.mxu2  ;;  %2820 = vmatpush.bf16.msrb.mxu1 %v8061_v1  ;;  %v9359_v1 = vld [vmem:[#allocation10 + $0x4] sm:$0xf0] }
 0x2b1   :  { %v1923_v36 = vpop.f32.mrf.mxu0 }
 0x2b2   :  { %v2020_v54 = vpack.c.bf16 %v1998_v11, %v1996_v60  ;;  %v2001_v10 = vmax.f32 %v1966_v35, 0.0  ;;  %v7985_v60 = vor.u32 %v9361_v3, %v7984_v33  ;;  %v9377_v11 = vld [vmem:[#allocation10 + $0x94] sm:$0xf0]  ;;  %v1924_v25 = vadd.f32 %v1923_v36, %v10867_v40  ;;  %v8040_v33 = vld [vmem:[#allocation10 + $0x80] sm:$0xf] }
 0x2b3   :  { %v8049_v55 = vor.u32 %v9377_v11, %v8048_v8  ;;  %v9375_v3 = vld [vmem:[#allocation10 + $0x84] sm:$0xf0]  ;;  %v9374_v8 = vld [vmem:[#allocation10 + $0x84] sm:$0xf] }
 0x2b4   :  { %2254 = vmatmul.bf16.gmra.mxu2 %v2020_v54  ;;  %2352 = vmatmul.bf16.gmra.mxu0 %v2020_v54 }
 0x2b5   :  { %v1867_v53 = vpop.f32.mrf.mxu3  ;;  %2674 = vmatpush.bf16.msra.mxu2 %v7985_v60  ;;  %2723 = vmatpush.bf16.msrb.mxu3 %v8049_v55  ;;  %v8042_v60 = vld [vmem:[#allocation10 + $0x88] sm:$0xf0]  ;;  %v9358_v55 = vld [vmem:[#allocation10 + $0x4] sm:$0xf] }
 0x2b6   :  { %v1868_v41 = vadd.f32 %v1867_v53, %v1819_v61  ;;  %v7986_v53 = vld [vmem:[#allocation10 + $0x18] sm:$0xf0]  ;;  %v8045_v11 = vor.u32 %v9374_v8, %v8042_v60 }
 0x2b7   :  { %v1967_v23 = vpop.f32.mrf.mxu1 }
 0x2b8   :  { %v1968_v6 = vadd.f32 %v1967_v23, %v1919_v50  ;;  %v2000_v18 = vmax.f32 %v1868_v41, 0.0  ;;  %v1826_v50 = vadd.f32 %v1825_v4, %v10870_v63 }
 0x2b9   :  { %v1926_v29 = vpop.f32.mrf.mxu0 }
 0x2ba   :  { %v2003_v17 = vmax.f32 %v1968_v6, 0.0  ;;  %v7989_v6 = vor.u32 %v9360_v19, %v7986_v53  ;;  %v1927_v62 = vadd.f32 %v1926_v29, %v10867_v40 }
 0x2bc   :  { %v2023_v21 = vpack.c.bf16 %v2003_v17, %v2001_v10  ;;  %v1828_v17 = vpop.f32.mrf.mxu2  ;;  %2772 = vmatpush.bf16.msrb.mxu0 %v7989_v6 }
 0x2bd   :  { %v1869_v59 = vpop.f32.mrf.mxu3 }
 0x2be   :  { %v1870_v45 = vadd.f32 %v1869_v59, %v1821_v16  ;;  %2308 = vmatmul.bf16.gmra.mxu3 %v2023_v21  ;;  %2406 = vmatmul.bf16.gmra.mxu1 %v2023_v21  ;;  %v8050_v59 = vld [vmem:[#allocation10 + $0x98] sm:$0xf0] }
 0x2bf   :  { %v1970_v13 = vpop.f32.mrf.mxu1  ;;  %v8053_v36 = vor.u32 %v9376_v26, %v8050_v59  ;;  %v8224_v26 = vld [vmem:[#allocation11 + $0xf0] sm:$0xf]  ;;  %v9421_v59 = vld [vmem:[#allocation11 + $0xf4] sm:$0xf0] }
 0x2c0   :  { %v2002_v14 = vmax.f32 %v1870_v45, 0.0  ;;  %v1971_v54 = vadd.f32 %v1970_v13, %v1922_v43 }
 0x2c1   :  { %v1928_v47 = vpop.f32.mrf.mxu0  ;;  %2821 = vmatpush.bf16.msrb.mxu1 %v8053_v36 }
 0x2c2   :  { %v2022_v31 = vpack.c.bf16 %v2002_v14, %v2000_v18  ;;  %v2005_v44 = vmax.f32 %v1971_v54, 0.0  ;;  %v1929_v41 = vadd.f32 %v1928_v47, %v10867_v40  ;;  %v1829_v14 = vadd.f32 %v1828_v17, %v10870_v63 }
 0x2c4   :  { %2259 = vmatmul.bf16.gmra.mxu2 %v2022_v31  ;;  %2357 = vmatmul.bf16.gmra.mxu0 %v2022_v31  ;;  %v1830_v18 = vpop.f32.mrf.mxu2  ;;  %v7976_v31 = vld [vmem:[#allocation10] sm:$0xf] }
 0x2c5   :  { %v1872_v9 = vpop.f32.mrf.mxu3  ;;  %v1831_v15 = vadd.f32 %v1830_v18, %v10870_v63  ;;  %v7977_v40 = vor.u32 %v9359_v1, %v7976_v31  ;;  %2822 = vmatpush.bf16.msrb.mxu1 %v8045_v11  ;;  %v8225_v18 = vor.u32 %v9421_v59, %v8224_v26 }
 0x2c6   :  { %v1873_v35 = vadd.f32 %v1872_v9, %v1824_v49  ;;  %v8041_v9 = vor.u32 %v9375_v3, %v8040_v33  ;;  %v2060_v49 = vld [vmem:[%s12074_s0] sm:$0x3] }
 0x2c7   :  { %v1972_v52 = vpop.f32.mrf.mxu1  ;;  %2675 = vmatpush.bf16.msra.mxu2 %v7977_v40  ;;  %v10918_v19 = vperm.slane %v2060_v49, 1 }
 0x2c8   :  { %v1973_v58 = vadd.f32 %v1972_v52, %v1924_v25  ;;  %v2004_v56 = vmax.f32 %v1873_v35, 0.0  ;;  %2724 = vmatpush.bf16.msrb.mxu3 %v8041_v9  ;;  %v7978_v52 = vld [vmem:[#allocation10 + $0x8] sm:$0xf0] }
 0x2ca   :  { %v2007_v37 = vmax.f32 %v1973_v58, 0.0  ;;  %v7981_v58 = vor.u32 %v9358_v55, %v7978_v52 }
 0x2cc   :  { %v2025_v23 = vpack.c.bf16 %v2007_v37, %v2005_v44  ;;  %2773 = vmatpush.bf16.msrb.mxu0 %v7981_v58  ;;  %3159 = vmatpush.bf16.msra.mxu3 %v8225_v18  ;;  %v8216_v58 = vld [vmem:[#allocation11 + $0xe0] sm:$0xf] }
 0x2cd   :  { %v1874_v61 = vpop.f32.mrf.mxu3 }
 0x2ce   :  { %v1875_v10 = vadd.f32 %v1874_v61, %v1826_v50  ;;  %2313 = vmatmul.bf16.gmra.mxu3 %v2025_v23  ;;  %2411 = vmatmul.bf16.gmra.mxu1 %v2025_v23  ;;  %v10921_v23 = vperm.slane %v2060_v49, 0 }
 0x2cf   :  { %v1975_v28 = vpop.f32.mrf.mxu1 }
 0x2d0   :  { %v2006_v5 = vmax.f32 %v1875_v10, 0.0  ;;  %v1976_v21 = vadd.f32 %v1975_v28, %v1927_v62  ;;  %v8160_v62 = vld [vmem:[#allocation11 + $0x70] sm:$0xf] }
 0x2d2   :  { %v2024_v22 = vpack.c.bf16 %v2006_v5, %v2004_v56  ;;  %v2009_v27 = vmax.f32 %v1976_v21, 0.0 }
 0x2d4   :  { %2264 = vmatmul.bf16.gmra.mxu2 %v2024_v22  ;;  %2362 = vmatmul.bf16.gmra.mxu0 %v2024_v22 }
 0x2d5   :  { %v1877_v16 = vpop.f32.mrf.mxu3 }
 0x2d6   :  { %v1878_v12 = vadd.f32 %v1877_v16, %v1829_v14  ;;  %v9405_v16 = vld [vmem:[#allocation11 + $0x74] sm:$0xf0] }
 0x2d7   :  { %v1977_v45 = vpop.f32.mrf.mxu1  ;;  %v8161_v21 = vor.u32 %v9405_v16, %v8160_v62 }
 0x2d8   :  { %v1978_v13 = vadd.f32 %v1977_v45, %v1929_v41  ;;  %v2008_v25 = vmax.f32 %v1878_v12, 0.0 }
 0x2d9   :  { %3110 = vmatpush.bf16.msrb.mxu2 %v8161_v21 }
 0x2da   :  { %v2011_v7 = vmax.f32 %v1978_v13, 0.0 }
 0x2dc   :  { %v2027_v48 = vpack.c.bf16 %v2011_v7, %v2009_v27 }
 0x2dd   :  { %v1879_v43 = vpop.f32.mrf.mxu3 }
 0x2de   :  { %v1880_v4 = vadd.f32 %v1879_v43, %v1831_v15  ;;  %2318 = vmatmul.bf16.gmra.mxu3 %v2027_v48  ;;  %2416 = vmatmul.bf16.gmra.mxu1 %v2027_v48 }
 0x2e0   :  { %v2010_v54 = vmax.f32 %v1880_v4, 0.0 }
 0x2e2   :  { %v2026_v63 = vpack.c.bf16 %v2010_v54, %v2008_v25  ;;  %v8152_v54 = vld [vmem:[#allocation11 + $0x60] sm:$0xf] }
 0x2e4   :  { %2269 = vmatmul.bf16.gmra.mxu2 %v2026_v63  ;;  %2367 = vmatmul.bf16.gmra.mxu0 %v2026_v63  ;;  %v9403_v63 = vld [vmem:[#allocation11 + $0x64] sm:$0xf0] }
 0x2e5   :  { %v8153_v52 = vor.u32 %v9403_v63, %v8152_v54 }
 0x2e7   :  { %3111 = vmatpush.bf16.msrb.mxu2 %v8153_v52 }
 0x2eb   :  { %v2382_v29 = vpop.f32.mrf.mxu1 }
 0x2f1   :  { %v2284_v44 = vpop.f32.mrf.mxu3  ;;  %v2333_v37 = vpop.f32.mrf.mxu0 }
 0x2f2   :  { %v2334_v50 = vadd.f32 %v2333_v37, %v10918_v19 }
 0x2f3   :  { %v2384_v53 = vpop.f32.mrf.mxu1 }
 0x2f4   :  { %v2383_v10 = vadd.f32 %v2382_v29, %v2334_v50  ;;  %v9419_v29 = vld [vmem:[#allocation11 + $0xe4] sm:$0xf0] }
 0x2f6   :  { %v2423_v22 = vmax.f32 %v2383_v10, 0.0 }
 0x2f7   :  { %v2235_v35 = vpop.f32.mrf.mxu2 }
 0x2f8   :  { %v2236_v56 = vadd.f32 %v2235_v35, %v10921_v23 }
 0x2f9   :  { %v2286_v6 = vpop.f32.mrf.mxu3  ;;  %v2335_v61 = vpop.f32.mrf.mxu0 }
 0x2fa   :  { %v2336_v17 = vadd.f32 %v2335_v61, %v10918_v19  ;;  %v2285_v45 = vadd.f32 %v2284_v44, %v2236_v56 }
 0x2fb   :  { %v2387_v28 = vpop.f32.mrf.mxu1 }
 0x2fc   :  { %v2385_v5 = vadd.f32 %v2384_v53, %v2336_v17  ;;  %v2422_v12 = vmax.f32 %v2285_v45, 0.0  ;;  %v8217_v53 = vor.u32 %v9419_v29, %v8216_v58 }
 0x2fe   :  { %v2425_v47 = vmax.f32 %v2385_v5, 0.0  ;;  %3160 = vmatpush.bf16.msra.mxu3 %v8217_v53 }
 0x2ff   :  { %v2237_v41 = vpop.f32.mrf.mxu2 }
 0x300   :  { %v2455_v36 = vpack.c.bf16 %v2425_v47, %v2423_v22  ;;  %v2238_v13 = vadd.f32 %v2237_v41, %v10921_v23 }
 0x301   :  { %v2289_v14 = vpop.f32.mrf.mxu3  ;;  %v2338_v27 = vpop.f32.mrf.mxu0 }
 0x302   :  { %v2287_v7 = vadd.f32 %v2286_v6, %v2238_v13  ;;  %2725 = vmatmul.bf16.vlgmr.msrb.gmra.mxu3 %v2455_v36  ;;  %2823 = vmatmul.bf16.vlgmr.msrb.gmra.mxu1 %v2455_v36  ;;  %v2339_v1 = vadd.f32 %v2338_v27, %v10918_v19  ;;  %v8144_v36 = vld [vmem:[#allocation11 + $0x50] sm:$0xf]  ;;  %v9401_v13 = vld [vmem:[#allocation11 + $0x54] sm:$0xf0] }
 0x303   :  { %v2389_v15 = vpop.f32.mrf.mxu1  ;;  %v8208_v27 = vld [vmem:[#allocation11 + $0xd0] sm:$0xf] }
 0x304   :  { %v2424_v48 = vmax.f32 %v2287_v7, 0.0  ;;  %v2388_v3 = vadd.f32 %v2387_v28, %v2339_v1  ;;  %v9417_v7 = vld [vmem:[#allocation11 + $0xd4] sm:$0xf0] }
 0x306   :  { %v2454_v31 = vpack.c.bf16 %v2424_v48, %v2422_v12  ;;  %v2427_v11 = vmax.f32 %v2388_v3, 0.0 }
 0x307   :  { %v2240_v43 = vpop.f32.mrf.mxu2 }
 0x308   :  { %2676 = vmatmul.bf16.vlgmr.msra.gmra.mxu2 %v2454_v31  ;;  %2774 = vmatmul.bf16.vlgmr.msrb.gmra.mxu0 %v2454_v31  ;;  %v2241_v9 = vadd.f32 %v2240_v43, %v10921_v23  ;;  %v8209_v31 = vor.u32 %v9417_v7, %v8208_v27 }
 0x309   :  { %v2291_v40 = vpop.f32.mrf.mxu3  ;;  %v2340_v33 = vpop.f32.mrf.mxu0 }
 0x30a   :  { %v2341_v8 = vadd.f32 %v2340_v33, %v10918_v19  ;;  %v2290_v49 = vadd.f32 %v2289_v14, %v2241_v9  ;;  %v8145_v14 = vor.u32 %v9401_v13, %v8144_v36  ;;  %3161 = vmatpush.bf16.msra.mxu3 %v8209_v31 }
 0x30b   :  { %v2392_v4 = vpop.f32.mrf.mxu1 }
 0x30c   :  { %v2390_v60 = vadd.f32 %v2389_v15, %v2341_v8  ;;  %v2426_v10 = vmax.f32 %v2290_v49, 0.0  ;;  %3112 = vmatpush.bf16.msrb.mxu2 %v8145_v14 }
 0x30e   :  { %v2429_v25 = vmax.f32 %v2390_v60, 0.0 }
 0x30f   :  { %v2242_v55 = vpop.f32.mrf.mxu2 }
 0x310   :  { %v2243_v44 = vadd.f32 %v2242_v55, %v10921_v23  ;;  %v2457_v37 = vpack.c.bf16 %v2429_v25, %v2427_v11 }
 0x311   :  { %v2294_v50 = vpop.f32.mrf.mxu3  ;;  %v2343_v35 = vpop.f32.mrf.mxu0 }
 0x312   :  { %v2292_v6 = vadd.f32 %v2291_v40, %v2243_v44  ;;  %2730 = vmatmul.bf16.gmra.mxu3 %v2457_v37  ;;  %2828 = vmatmul.bf16.gmra.mxu1 %v2457_v37  ;;  %v2344_v28 = vadd.f32 %v2343_v35, %v10918_v19  ;;  %v8136_v44 = vld [vmem:[#allocation11 + $0x40] sm:$0xf]  ;;  %v9399_v37 = vld [vmem:[#allocation11 + $0x44] sm:$0xf0] }
 0x313   :  { %v2394_v61 = vpop.f32.mrf.mxu1  ;;  %v8200_v35 = vld [vmem:[#allocation11 + $0xc0] sm:$0xf] }
 0x314   :  { %v2428_v17 = vmax.f32 %v2292_v6, 0.0  ;;  %v2393_v62 = vadd.f32 %v2392_v4, %v2344_v28  ;;  %v9415_v6 = vld [vmem:[#allocation11 + $0xc4] sm:$0xf0] }
 0x315   :  { %v8201_v28 = vor.u32 %v9415_v6, %v8200_v35 }
 0x316   :  { %v2456_v56 = vpack.c.bf16 %v2428_v17, %v2426_v10  ;;  %v2431_v59 = vmax.f32 %v2393_v62, 0.0 }
 0x317   :  { %v2245_v5 = vpop.f32.mrf.mxu2  ;;  %3162 = vmatpush.bf16.msra.mxu3 %v8201_v28 }
 0x318   :  { %2681 = vmatmul.bf16.gmra.mxu2 %v2456_v56  ;;  %2779 = vmatmul.bf16.gmra.mxu0 %v2456_v56  ;;  %v2246_v21 = vadd.f32 %v2245_v5, %v10921_v23 }
 0x319   :  { %v2296_v22 = vpop.f32.mrf.mxu3  ;;  %v2345_v47 = vpop.f32.mrf.mxu0 }
 0x31a   :  { %v2346_v16 = vadd.f32 %v2345_v47, %v10918_v19  ;;  %v2295_v15 = vadd.f32 %v2294_v50, %v2246_v21  ;;  %v8137_v50 = vor.u32 %v9399_v37, %v8136_v44 }
 0x31b   :  { %v2397_v41 = vpop.f32.mrf.mxu1 }
 0x31c   :  { %v2395_v26 = vadd.f32 %v2394_v61, %v2346_v16  ;;  %v2430_v3 = vmax.f32 %v2295_v15, 0.0  ;;  %3113 = vmatpush.bf16.msrb.mxu2 %v8137_v50 }
 0x31e   :  { %v2433_v45 = vmax.f32 %v2395_v26, 0.0 }
 0x31f   :  { %v2247_v18 = vpop.f32.mrf.mxu2 }
 0x320   :  { %v2248_v12 = vadd.f32 %v2247_v18, %v10921_v23  ;;  %v2459_v48 = vpack.c.bf16 %v2433_v45, %v2431_v59 }
 0x321   :  { %v2299_v1 = vpop.f32.mrf.mxu3  ;;  %v2348_v43 = vpop.f32.mrf.mxu0 }
 0x322   :  { %v2297_v40 = vadd.f32 %v2296_v22, %v2248_v12  ;;  %2735 = vmatmul.bf16.gmra.mxu3 %v2459_v48  ;;  %2833 = vmatmul.bf16.gmra.mxu1 %v2459_v48  ;;  %v2349_v4 = vadd.f32 %v2348_v43, %v10918_v19  ;;  %v8128_v12 = vld [vmem:[#allocation11 + $0x30] sm:$0xf]  ;;  %v9397_v48 = vld [vmem:[#allocation11 + $0x34] sm:$0xf0] }
 0x323   :  { %v2399_v33 = vpop.f32.mrf.mxu1  ;;  %v8192_v43 = vld [vmem:[#allocation11 + $0xb0] sm:$0xf] }
 0x324   :  { %v2432_v8 = vmax.f32 %v2297_v40, 0.0  ;;  %v2398_v54 = vadd.f32 %v2397_v41, %v2349_v4  ;;  %v9413_v40 = vld [vmem:[#allocation11 + $0xb4] sm:$0xf0] }
 0x325   :  { %v8193_v4 = vor.u32 %v9413_v40, %v8192_v43 }
 0x326   :  { %v2458_v9 = vpack.c.bf16 %v2432_v8, %v2430_v3  ;;  %v2435_v29 = vmax.f32 %v2398_v54, 0.0 }
 0x327   :  { %v2250_v60 = vpop.f32.mrf.mxu2  ;;  %3163 = vmatpush.bf16.msra.mxu3 %v8193_v4 }
 0x328   :  { %2686 = vmatmul.bf16.gmra.mxu2 %v2458_v9  ;;  %2784 = vmatmul.bf16.gmra.mxu0 %v2458_v9  ;;  %v2251_v52 = vadd.f32 %v2250_v60, %v10921_v23 }
 0x329   :  { %v2301_v11 = vpop.f32.mrf.mxu3  ;;  %v2350_v25 = vpop.f32.mrf.mxu0 }
 0x32a   :  { %v2351_v63 = vadd.f32 %v2350_v25, %v10918_v19  ;;  %v2300_v61 = vadd.f32 %v2299_v1, %v2251_v52  ;;  %v8129_v1 = vor.u32 %v9397_v48, %v8128_v12  ;;  %v9418_v48 = vld [vmem:[#allocation11 + $0xe4] sm:$0xf] }
 0x32b   :  { %v2402_v55 = vpop.f32.mrf.mxu1 }
 0x32c   :  { %v2400_v58 = vadd.f32 %v2399_v33, %v2351_v63  ;;  %v2434_v62 = vmax.f32 %v2300_v61, 0.0  ;;  %3114 = vmatpush.bf16.msrb.mxu2 %v8129_v1  ;;  %v8112_v1 = vld [vmem:[#allocation11 + $0x10] sm:$0xf] }
 0x32e   :  { %v2437_v49 = vmax.f32 %v2400_v58, 0.0 }
 0x32f   :  { %v2252_v53 = vpop.f32.mrf.mxu2 }
 0x330   :  { %v2253_v10 = vadd.f32 %v2252_v53, %v10921_v23  ;;  %v2461_v17 = vpack.c.bf16 %v2437_v49, %v2435_v29 }
 0x331   :  { %v2304_v56 = vpop.f32.mrf.mxu3  ;;  %v2353_v5 = vpop.f32.mrf.mxu0 }
 0x332   :  { %v2302_v22 = vadd.f32 %v2301_v11, %v2253_v10  ;;  %2740 = vmatmul.bf16.gmra.mxu3 %v2461_v17  ;;  %2838 = vmatmul.bf16.gmra.mxu1 %v2461_v17  ;;  %v2354_v41 = vadd.f32 %v2353_v5, %v10918_v19  ;;  %v8120_v10 = vld [vmem:[#allocation11 + $0x20] sm:$0xf]  ;;  %v9395_v17 = vld [vmem:[#allocation11 + $0x24] sm:$0xf0] }
 0x333   :  { %v2404_v47 = vpop.f32.mrf.mxu1  ;;  %v8184_v5 = vld [vmem:[#allocation11 + $0xa0] sm:$0xf] }
 0x334   :  { %v2436_v16 = vmax.f32 %v2302_v22, 0.0  ;;  %v2403_v36 = vadd.f32 %v2402_v55, %v2354_v41  ;;  %v9411_v22 = vld [vmem:[#allocation11 + $0xa4] sm:$0xf0] }
 0x335   :  { %v8185_v41 = vor.u32 %v9411_v22, %v8184_v5  ;;  %v8202_v5 = vld [vmem:[#allocation11 + $0xc8] sm:$0xf0] }
 0x336   :  { %v2460_v21 = vpack.c.bf16 %v2436_v16, %v2434_v62  ;;  %v2439_v7 = vmax.f32 %v2403_v36, 0.0 }
 0x337   :  { %v2255_v26 = vpop.f32.mrf.mxu2  ;;  %3164 = vmatpush.bf16.msra.mxu3 %v8185_v41  ;;  %v9400_v41 = vld [vmem:[#allocation11 + $0x54] sm:$0xf] }
 0x338   :  { %2691 = vmatmul.bf16.gmra.mxu2 %v2460_v21  ;;  %2789 = vmatmul.bf16.gmra.mxu0 %v2460_v21  ;;  %v2256_v14 = vadd.f32 %v2255_v26, %v10921_v23 }
 0x339   :  { %v2306_v59 = vpop.f32.mrf.mxu3  ;;  %v2355_v45 = vpop.f32.mrf.mxu0 }
 0x33a   :  { %v2356_v13 = vadd.f32 %v2355_v45, %v10918_v19  ;;  %v2305_v33 = vadd.f32 %v2304_v56, %v2256_v14  ;;  %v8121_v56 = vor.u32 %v9395_v17, %v8120_v10 }
 0x33b   :  { %v2407_v18 = vpop.f32.mrf.mxu1 }
 0x33c   :  { %v2405_v27 = vadd.f32 %v2404_v47, %v2356_v13  ;;  %v2438_v54 = vmax.f32 %v2305_v33, 0.0  ;;  %3115 = vmatpush.bf16.msrb.mxu2 %v8121_v56  ;;  %v9420_v13 = vld [vmem:[#allocation11 + $0xf4] sm:$0xf]  ;;  %v9393_v33 = vld [vmem:[#allocation11 + $0x14] sm:$0xf0] }
 0x33e   :  { %v2441_v15 = vmax.f32 %v2405_v27, 0.0 }
 0x33f   :  { %v2257_v31 = vpop.f32.mrf.mxu2 }
 0x340   :  { %v2258_v3 = vadd.f32 %v2257_v31, %v10921_v23  ;;  %v2463_v8 = vpack.c.bf16 %v2441_v15, %v2439_v7  ;;  %v8218_v31 = vld [vmem:[#allocation11 + $0xe8] sm:$0xf0] }
 0x341   :  { %v2309_v9 = vpop.f32.mrf.mxu3  ;;  %v2358_v60 = vpop.f32.mrf.mxu0  ;;  %v8221_v40 = vor.u32 %v9418_v48, %v8218_v31  ;;  %v8138_v48 = vld [vmem:[#allocation11 + $0x48] sm:$0xf0] }
 0x342   :  { %v2307_v11 = vadd.f32 %v2306_v59, %v2258_v3  ;;  %2745 = vmatmul.bf16.gmra.mxu3 %v2463_v8  ;;  %2843 = vmatmul.bf16.gmra.mxu1 %v2463_v8  ;;  %v2359_v55 = vadd.f32 %v2358_v60, %v10918_v19  ;;  %v9404_v3 = vld [vmem:[#allocation11 + $0x74] sm:$0xf]  ;;  %v8162_v8 = vld [vmem:[#allocation11 + $0x78] sm:$0xf0]  ;;  %v8113_v60 = vor.u32 %v9393_v33, %v8112_v1 }
 0x343   :  { %v2409_v25 = vpop.f32.mrf.mxu1 }
 0x344   :  { %v2440_v63 = vmax.f32 %v2307_v11, 0.0  ;;  %v2408_v44 = vadd.f32 %v2407_v18, %v2359_v55  ;;  %v8226_v18 = vld [vmem:[#allocation11 + $0xf8] sm:$0xf0]  ;;  %v8165_v11 = vor.u32 %v9404_v3, %v8162_v8  ;;  %3116 = vmatpush.bf16.msrb.mxu2 %v8113_v60 }
 0x345   :  { %v8229_v14 = vor.u32 %v9420_v13, %v8226_v18  ;;  %v8194_v13 = vld [vmem:[#allocation11 + $0xb8] sm:$0xf0] }
 0x346   :  { %v2462_v52 = vpack.c.bf16 %v2440_v63, %v2438_v54  ;;  %v2443_v6 = vmax.f32 %v2408_v44, 0.0  ;;  %v9409_v54 = vld [vmem:[#allocation11 + $0x94] sm:$0xf0]  ;;  %3208 = vmatpush.bf16.msra.mxu0 %v8165_v11  ;;  %v8130_v60 = vld [vmem:[#allocation11 + $0x38] sm:$0xf0] }
 0x347   :  { %v2260_v58 = vpop.f32.mrf.mxu2  ;;  %3257 = vmatpush.bf16.msra.mxu1 %v8229_v14 }
 0x348   :  { %2696 = vmatmul.bf16.gmra.mxu2 %v2462_v52  ;;  %2794 = vmatmul.bf16.gmra.mxu0 %v2462_v52  ;;  %v2261_v53 = vadd.f32 %v2260_v58, %v10921_v23 }
 0x349   :  { %v2311_v29 = vpop.f32.mrf.mxu3  ;;  %v2360_v49 = vpop.f32.mrf.mxu0 }
 0x34a   :  { %v2361_v37 = vadd.f32 %v2360_v49, %v10918_v19  ;;  %v2310_v47 = vadd.f32 %v2309_v9, %v2261_v53  ;;  %v8210_v49 = vld [vmem:[#allocation11 + $0xd8] sm:$0xf0] }
 0x34b   :  { %v2412_v35 = vpop.f32.mrf.mxu1  ;;  %3258 = vmatpush.bf16.msra.mxu1 %v8221_v40  ;;  %v8186_v40 = vld [vmem:[#allocation11 + $0xa8] sm:$0xf0] }
 0x34c   :  { %v2410_v50 = vadd.f32 %v2409_v25, %v2361_v37  ;;  %v2442_v45 = vmax.f32 %v2310_v47, 0.0  ;;  %v8176_v25 = vld [vmem:[#allocation11 + $0x90] sm:$0xf] }
 0x34d   :  { %v8177_v63 = vor.u32 %v9409_v54, %v8176_v25 }
 0x34e   :  { %v2445_v61 = vmax.f32 %v2410_v50, 0.0 }
 0x34f   :  { %v2262_v28 = vpop.f32.mrf.mxu2  ;;  %3165 = vmatpush.bf16.msra.mxu3 %v8177_v63  ;;  %v9408_v63 = vld [vmem:[#allocation11 + $0x94] sm:$0xf] }
 0x350   :  { %v2263_v62 = vadd.f32 %v2262_v28, %v10921_v23  ;;  %v2465_v16 = vpack.c.bf16 %v2445_v61, %v2443_v6  ;;  %v8154_v6 = vld [vmem:[#allocation11 + $0x68] sm:$0xf0]  ;;  %v9414_v61 = vld [vmem:[#allocation11 + $0xc4] sm:$0xf] }
 0x351   :  { %v2363_v21 = vpop.f32.mrf.mxu0  ;;  %v2314_v59 = vpop.f32.mrf.mxu3 }
 0x352   :  { %v2312_v26 = vadd.f32 %v2311_v29, %v2263_v62  ;;  %2750 = vmatmul.bf16.gmra.mxu3 %v2465_v16  ;;  %2848 = vmatmul.bf16.gmra.mxu1 %v2465_v16  ;;  %v2364_v27 = vadd.f32 %v2363_v21, %v10918_v19  ;;  %v9416_v29 = vld [vmem:[#allocation11 + $0xd4] sm:$0xf]  ;;  %v8205_v62 = vor.u32 %v9414_v61, %v8202_v5  ;;  %v8146_v21 = vld [vmem:[#allocation11 + $0x58] sm:$0xf0]  ;;  %v9406_v5 = vld [vmem:[#allocation11 + $0x84] sm:$0xf] }
 0x353   :  { %v2414_v15 = vpop.f32.mrf.mxu1  ;;  %v8213_v53 = vor.u32 %v9416_v29, %v8210_v49 }
 0x354   :  { %v2444_v36 = vmax.f32 %v2312_v26, 0.0  ;;  %v2413_v4 = vadd.f32 %v2412_v35, %v2364_v27  ;;  %v9402_v35 = vld [vmem:[#allocation11 + $0x64] sm:$0xf] }
 0x355   :  { %3259 = vmatpush.bf16.msra.mxu1 %v8213_v53  ;;  %v8157_v56 = vor.u32 %v9402_v35, %v8154_v6  ;;  %v8104_v35 = vld [vmem:[#allocation11] sm:$0xf]  ;;  %v9391_v6 = vld [vmem:[#allocation11 + $0x4] sm:$0xf0] }
 0x356   :  { %v2464_v7 = vpack.c.bf16 %v2444_v36, %v2442_v45  ;;  %v2447_v44 = vmax.f32 %v2413_v4, 0.0  ;;  %v8149_v36 = vor.u32 %v9400_v41, %v8146_v21  ;;  %v9392_v41 = vld [vmem:[#allocation11 + $0x14] sm:$0xf] }
 0x357   :  { %v2265_v12 = vpop.f32.mrf.mxu2  ;;  %3209 = vmatpush.bf16.msra.mxu0 %v8157_v56  ;;  %v9407_v56 = vld [vmem:[#allocation11 + $0x84] sm:$0xf0] }
 0x358   :  { %2701 = vmatmul.bf16.gmra.mxu2 %v2464_v7  ;;  %2799 = vmatmul.bf16.gmra.mxu0 %v2464_v7  ;;  %v2266_v55 = vadd.f32 %v2265_v12, %v10921_v23  ;;  %v9398_v12 = vld [vmem:[#allocation11 + $0x44] sm:$0xf] }
 0x359   :  { %v2365_v43 = vpop.f32.mrf.mxu0  ;;  %v2316_v58 = vpop.f32.mrf.mxu3  ;;  %3260 = vmatpush.bf16.msra.mxu1 %v8205_v62  ;;  %v8141_v31 = vor.u32 %v9398_v12, %v8138_v48  ;;  %v8170_v62 = vld [vmem:[#allocation11 + $0x88] sm:$0xf0]  ;;  %v8352_v12 = vld [vmem:[#allocation14 + $0xf0] sm:$0xf]  ;;  %v9485_v48 = vld [vmem:[#allocation14 + $0xf4] sm:$0xf0] }
 0x35a   :  { %v2366_v9 = vadd.f32 %v2365_v43, %v10918_v19  ;;  %v2315_v10 = vadd.f32 %v2314_v59, %v2266_v55  ;;  %v9412_v59 = vld [vmem:[#allocation11 + $0xb4] sm:$0xf]  ;;  %v9410_v43 = vld [vmem:[#allocation11 + $0xa4] sm:$0xf]  ;;  %v8178_v55 = vld [vmem:[#allocation11 + $0x98] sm:$0xf0] }
 0x35b   :  { %v2417_v22 = vpop.f32.mrf.mxu1  ;;  %v8197_v27 = vor.u32 %v9412_v59, %v8194_v13  ;;  %3210 = vmatpush.bf16.msra.mxu0 %v8149_v36  ;;  %v8189_v8 = vor.u32 %v9410_v43, %v8186_v40  ;;  %v8181_v29 = vor.u32 %v9408_v63, %v8178_v55  ;;  %v9390_v59 = vld [vmem:[#allocation11 + $0x4] sm:$0xf]  ;;  %v8106_v13 = vld [vmem:[#allocation11 + $0x8] sm:$0xf0] }
 0x35c   :  { %v2415_v52 = vadd.f32 %v2414_v15, %v2366_v9  ;;  %v2446_v26 = vmax.f32 %v2315_v10, 0.0  ;;  %v9396_v9 = vld [vmem:[#allocation11 + $0x34] sm:$0xf] }
 0x35d   :  { %3261 = vmatpush.bf16.msra.mxu1 %v8197_v27  ;;  %v8133_v54 = vor.u32 %v9396_v9, %v8130_v60  ;;  %v8288_v27 = vld [vmem:[#allocation14 + $0x70] sm:$0xf] }
 0x35e   :  { %v2449_v37 = vmax.f32 %v2415_v52, 0.0 }
 0x35f   :  { %v2267_v50 = vpop.f32.mrf.mxu2  ;;  %3211 = vmatpush.bf16.msra.mxu0 %v8141_v31  ;;  %v2502_v31 = vld [vmem:[%s12075_s7] sm:$0x3] }
 0x360   :  { %v2268_v17 = vadd.f32 %v2267_v50, %v10921_v23  ;;  %v2467_v28 = vpack.c.bf16 %v2449_v37, %v2447_v44  ;;  %v9394_v44 = vld [vmem:[#allocation11 + $0x24] sm:$0xf]  ;;  %v8122_v37 = vld [vmem:[#allocation11 + $0x28] sm:$0xf0]  ;;  %v10960_v9 = vperm.slane %v2502_v31, 0 }
 0x361   :  { %v2368_v47 = vpop.f32.mrf.mxu0  ;;  %v2319_v7 = vpop.f32.mrf.mxu3  ;;  %3262 = vmatpush.bf16.msra.mxu1 %v8189_v8  ;;  %v8125_v61 = vor.u32 %v9394_v44, %v8122_v37 }
 0x362   :  { %v2317_v16 = vadd.f32 %v2316_v58, %v2268_v17  ;;  %2755 = vmatmul.bf16.gmra.mxu3 %v2467_v28  ;;  %2853 = vmatmul.bf16.gmra.mxu1 %v2467_v28  ;;  %v2369_v18 = vadd.f32 %v2368_v47, %v10918_v19  ;;  %v8105_v17 = vor.u32 %v9391_v6, %v8104_v35  ;;  %v8168_v28 = vld [vmem:[#allocation11 + $0x80] sm:$0xf] }
 0x363   :  { %v2419_v4 = vpop.f32.mrf.mxu1  ;;  %3212 = vmatpush.bf16.msra.mxu0 %v8133_v54  ;;  %v8169_v47 = vor.u32 %v9407_v56, %v8168_v28 }
 0x364   :  { %v2448_v45 = vmax.f32 %v2317_v16, 0.0  ;;  %v2418_v33 = vadd.f32 %v2417_v22, %v2369_v18  ;;  %3117 = vmatpush.bf16.msrb.mxu2 %v8105_v17  ;;  %v8173_v16 = vor.u32 %v9406_v5, %v8170_v62  ;;  %v8109_v18 = vor.u32 %v9390_v59, %v8106_v13 }
 0x365   :  { %3263 = vmatpush.bf16.msra.mxu1 %v8181_v29  ;;  %3166 = vmatpush.bf16.msra.mxu3 %v8169_v47  ;;  %v9467_v29 = vld [vmem:[#allocation14 + $0x64] sm:$0xf0] }
 0x366   :  { %v2466_v14 = vpack.c.bf16 %v2448_v45, %v2446_v26  ;;  %v2451_v52 = vmax.f32 %v2418_v33, 0.0  ;;  %v10957_v33 = vperm.slane %v2502_v31, 1 }
 0x367   :  { %v2270_v15 = vpop.f32.mrf.mxu2  ;;  %3213 = vmatpush.bf16.msra.mxu0 %v8125_v61 }
 0x368   :  { %2706 = vmatmul.bf16.gmra.mxu2 %v2466_v14  ;;  %2804 = vmatmul.bf16.gmra.mxu0 %v2466_v14  ;;  %v2271_v11 = vadd.f32 %v2270_v15, %v10921_v23 }
 0x369   :  { %v2370_v1 = vpop.f32.mrf.mxu0  ;;  %v2321_v10 = vpop.f32.mrf.mxu3  ;;  %3264 = vmatpush.bf16.msra.mxu1 %v8173_v16 }
 0x36a   :  { %v2371_v3 = vadd.f32 %v2370_v1, %v10918_v19  ;;  %v2320_v19 = vadd.f32 %v2319_v7, %v2271_v11  ;;  %v9469_v7 = vld [vmem:[#allocation14 + $0x74] sm:$0xf0]  ;;  %v8353_v1 = vor.u32 %v9485_v48, %v8352_v12  ;;  %v8336_v12 = vld [vmem:[#allocation14 + $0xd0] sm:$0xf] }
 0x36b   :  { %v8289_v15 = vor.u32 %v9469_v7, %v8288_v27  ;;  %v9481_v48 = vld [vmem:[#allocation14 + $0xd4] sm:$0xf0] }
 0x36c   :  { %v2420_v25 = vadd.f32 %v2419_v4, %v2371_v3  ;;  %v2450_v21 = vmax.f32 %v2320_v19, 0.0  ;;  %3915 = vmatpush.bf16.msrb.mxu3 %v8353_v1  ;;  %v8344_v19 = vld [vmem:[#allocation14 + $0xe0] sm:$0xf]  ;;  %v8337_v1 = vor.u32 %v9481_v48, %v8336_v12 }
 0x36d   :  { %3866 = vmatpush.bf16.msra.mxu2 %v8289_v15 }
 0x36e   :  { %v2453_v58 = vmax.f32 %v2420_v25, 0.0 }
 0x36f   :  { %v2272_v49 = vpop.f32.mrf.mxu2 }
 0x370   :  { %v2273_v53 = vadd.f32 %v2272_v49, %v10921_v23  ;;  %v2469_v50 = vpack.c.bf16 %v2453_v58, %v2451_v52  ;;  %v8114_v23 = vld [vmem:[#allocation11 + $0x18] sm:$0xf0]  ;;  %v8280_v58 = vld [vmem:[#allocation14 + $0x60] sm:$0xf] }
 0x371   :  { %v8117_v45 = vor.u32 %v9392_v41, %v8114_v23  ;;  %v8281_v49 = vor.u32 %v9467_v29, %v8280_v58 }
 0x372   :  { %v2322_v22 = vadd.f32 %v2321_v10, %v2273_v53  ;;  %2760 = vmatmul.bf16.gmra.mxu3 %v2469_v50  ;;  %2858 = vmatmul.bf16.gmra.mxu1 %v2469_v50  ;;  %v9483_v53 = vld [vmem:[#allocation14 + $0xe4] sm:$0xf0] }
 0x373   :  { %3214 = vmatpush.bf16.msra.mxu0 %v8117_v45  ;;  %3867 = vmatpush.bf16.msra.mxu2 %v8281_v49  ;;  %v8345_v35 = vor.u32 %v9483_v53, %v8344_v19 }
 0x374   :  { %v2452_v26 = vmax.f32 %v2322_v22, 0.0 }
 0x375   :  { %3916 = vmatpush.bf16.msrb.mxu3 %v8345_v35  ;;  %v9463_v35 = vld [vmem:[#allocation14 + $0x44] sm:$0xf0] }
 0x376   :  { %v2468_v36 = vpack.c.bf16 %v2452_v26, %v2450_v21 }
 0x377   :  { %3215 = vmatpush.bf16.msra.mxu0 %v8109_v18  ;;  %v8272_v18 = vld [vmem:[#allocation14 + $0x50] sm:$0xf] }
 0x378   :  { %2711 = vmatmul.bf16.gmra.mxu2 %v2468_v36  ;;  %2809 = vmatmul.bf16.gmra.mxu0 %v2468_v36 }
 0x379   :  { %3917 = vmatpush.bf16.msrb.mxu3 %v8337_v1  ;;  %v9461_v1 = vld [vmem:[#allocation14 + $0x34] sm:$0xf0] }
 0x37f   :  { %v2824_v14 = vpop.f32.mrf.mxu1 }
 0x385   :  { %v2726_v43 = vpop.f32.mrf.mxu3  ;;  %v2775_v40 = vpop.f32.mrf.mxu0 }
 0x386   :  { %v2776_v8 = vadd.f32 %v2775_v40, %v10957_v33 }
 0x387   :  { %v2826_v3 = vpop.f32.mrf.mxu1 }
 0x388   :  { %v2825_v25 = vadd.f32 %v2824_v14, %v2776_v8  ;;  %v9465_v14 = vld [vmem:[#allocation14 + $0x54] sm:$0xf0] }
 0x389   :  { %v8273_v27 = vor.u32 %v9465_v14, %v8272_v18 }
 0x38a   :  { %v2865_v44 = vmax.f32 %v2825_v25, 0.0 }
 0x38b   :  { %v2677_v4 = vpop.f32.mrf.mxu2  ;;  %3868 = vmatpush.bf16.msra.mxu2 %v8273_v27 }
 0x38c   :  { %v2678_v55 = vadd.f32 %v2677_v4, %v10960_v9 }
 0x38d   :  { %v2728_v60 = vpop.f32.mrf.mxu3  ;;  %v2777_v11 = vpop.f32.mrf.mxu0 }
 0x38e   :  { %v2778_v54 = vadd.f32 %v2777_v11, %v10957_v33  ;;  %v2727_v6 = vadd.f32 %v2726_v43, %v2678_v55 }
 0x38f   :  { %v2829_v63 = vpop.f32.mrf.mxu1 }
 0x390   :  { %v2827_v52 = vadd.f32 %v2826_v3, %v2778_v54  ;;  %v2864_v22 = vmax.f32 %v2727_v6, 0.0 }
 0x392   :  { %v2867_v37 = vmax.f32 %v2827_v52, 0.0 }
 0x393   :  { %v2679_v50 = vpop.f32.mrf.mxu2 }
 0x394   :  { %v2897_v61 = vpack.c.bf16 %v2867_v37, %v2865_v44  ;;  %v2680_v10 = vadd.f32 %v2679_v50, %v10960_v9  ;;  %v8264_v50 = vld [vmem:[#allocation14 + $0x40] sm:$0xf] }
 0x395   :  { %v2731_v17 = vpop.f32.mrf.mxu3  ;;  %v2780_v28 = vpop.f32.mrf.mxu0  ;;  %v8265_v6 = vor.u32 %v9463_v35, %v8264_v50 }
 0x396   :  { %v2729_v56 = vadd.f32 %v2728_v60, %v2680_v10  ;;  %3167 = vmatmul.bf16.vlgmr.msra.gmra.mxu3 %v2897_v61  ;;  %3265 = vmatmul.bf16.vlgmr.msra.gmra.mxu1 %v2897_v61  ;;  %v2781_v16 = vadd.f32 %v2780_v28, %v10957_v33  ;;  %v9479_v28 = vld [vmem:[#allocation14 + $0xc4] sm:$0xf0] }
 0x397   :  { %v2831_v5 = vpop.f32.mrf.mxu1  ;;  %3869 = vmatpush.bf16.msra.mxu2 %v8265_v6 }
 0x398   :  { %v2866_v47 = vmax.f32 %v2729_v56, 0.0  ;;  %v2830_v26 = vadd.f32 %v2829_v63, %v2781_v16 }
 0x39a   :  { %v2896_v62 = vpack.c.bf16 %v2866_v47, %v2864_v22  ;;  %v2869_v7 = vmax.f32 %v2830_v26, 0.0 }
 0x39b   :  { %v2682_v41 = vpop.f32.mrf.mxu2 }
 0x39c   :  { %3118 = vmatmul.bf16.vlgmr.msrb.gmra.mxu2 %v2896_v62  ;;  %3216 = vmatmul.bf16.vlgmr.msra.gmra.mxu0 %v2896_v62  ;;  %v2683_v59 = vadd.f32 %v2682_v41, %v10960_v9 }
 0x39d   :  { %v2733_v23 = vpop.f32.mrf.mxu3  ;;  %v2782_v21 = vpop.f32.mrf.mxu0 }
 0x39e   :  { %v2783_v45 = vadd.f32 %v2782_v21, %v10957_v33  ;;  %v2732_v43 = vadd.f32 %v2731_v17, %v2683_v59  ;;  %v8328_v17 = vld [vmem:[#allocation14 + $0xc0] sm:$0xf] }
 0x39f   :  { %v2834_v36 = vpop.f32.mrf.mxu1 }
 0x3a0   :  { %v2832_v13 = vadd.f32 %v2831_v5, %v2783_v45  ;;  %v2868_v25 = vmax.f32 %v2732_v43, 0.0  ;;  %v8329_v5 = vor.u32 %v9479_v28, %v8328_v17 }
 0x3a2   :  { %v2871_v15 = vmax.f32 %v2832_v13, 0.0  ;;  %3918 = vmatpush.bf16.msrb.mxu3 %v8329_v5  ;;  %v9459_v5 = vld [vmem:[#allocation14 + $0x24] sm:$0xf0] }
 0x3a3   :  { %v2684_v31 = vpop.f32.mrf.mxu2 }
 0x3a4   :  { %v2685_v40 = vadd.f32 %v2684_v31, %v10960_v9  ;;  %v2899_v3 = vpack.c.bf16 %v2871_v15, %v2869_v7  ;;  %v8256_v31 = vld [vmem:[#allocation14 + $0x30] sm:$0xf] }
 0x3a5   :  { %v2736_v8 = vpop.f32.mrf.mxu3  ;;  %v2785_v4 = vpop.f32.mrf.mxu0  ;;  %v8257_v43 = vor.u32 %v9461_v1, %v8256_v31  ;;  %v8472_v31 = vld [vmem:[#allocation14 + $0x1e0] sm:$0xf]  ;;  %v9515_v1 = vld [vmem:[#allocation14 + $0x1e4] sm:$0xf0] }
 0x3a6   :  { %v2734_v60 = vadd.f32 %v2733_v23, %v2685_v40  ;;  %3172 = vmatmul.bf16.gmra.mxu3 %v2899_v3  ;;  %3270 = vmatmul.bf16.gmra.mxu1 %v2899_v3  ;;  %v2786_v63 = vadd.f32 %v2785_v4, %v10957_v33  ;;  %v9477_v4 = vld [vmem:[#allocation14 + $0xb4] sm:$0xf0] }
 0x3a7   :  { %v2836_v11 = vpop.f32.mrf.mxu1  ;;  %3870 = vmatpush.bf16.msra.mxu2 %v8257_v43 }
 0x3a8   :  { %v2870_v54 = vmax.f32 %v2734_v60, 0.0  ;;  %v2835_v49 = vadd.f32 %v2834_v36, %v2786_v63 }
 0x3aa   :  { %v2898_v55 = vpack.c.bf16 %v2870_v54, %v2868_v25  ;;  %v2873_v61 = vmax.f32 %v2835_v49, 0.0 }
 0x3ab   :  { %v2687_v52 = vpop.f32.mrf.mxu2 }
 0x3ac   :  { %3123 = vmatmul.bf16.gmra.mxu2 %v2898_v55  ;;  %3221 = vmatmul.bf16.gmra.mxu0 %v2898_v55  ;;  %v2688_v19 = vadd.f32 %v2687_v52, %v10960_v9 }
 0x3ad   :  { %v2738_v58 = vpop.f32.mrf.mxu3  ;;  %v2787_v29 = vpop.f32.mrf.mxu0 }
 0x3ae   :  { %v2788_v44 = vadd.f32 %v2787_v29, %v10957_v33  ;;  %v2737_v22 = vadd.f32 %v2736_v8, %v2688_v19  ;;  %v8320_v8 = vld [vmem:[#allocation14 + $0xb0] sm:$0xf] }
 0x3af   :  { %v2839_v37 = vpop.f32.mrf.mxu1 }
 0x3b0   :  { %v2837_v53 = vadd.f32 %v2836_v11, %v2788_v44  ;;  %v2872_v26 = vmax.f32 %v2737_v22, 0.0  ;;  %v8321_v11 = vor.u32 %v9477_v4, %v8320_v8  ;;  %v8416_v4 = vld [vmem:[#allocation14 + $0x170] sm:$0xf] }
 0x3b2   :  { %v2875_v10 = vmax.f32 %v2837_v53, 0.0  ;;  %3919 = vmatpush.bf16.msrb.mxu3 %v8321_v11 }
 0x3b3   :  { %v2689_v56 = vpop.f32.mrf.mxu2 }
 0x3b4   :  { %v2690_v47 = vadd.f32 %v2689_v56, %v10960_v9  ;;  %v2901_v62 = vpack.c.bf16 %v2875_v10, %v2873_v61  ;;  %v8248_v56 = vld [vmem:[#allocation14 + $0x20] sm:$0xf] }
 0x3b5   :  { %v2741_v16 = vpop.f32.mrf.mxu3  ;;  %v2790_v41 = vpop.f32.mrf.mxu0  ;;  %v8249_v22 = vor.u32 %v9459_v5, %v8248_v56 }
 0x3b6   :  { %v2739_v23 = vadd.f32 %v2738_v58, %v2690_v47  ;;  %3177 = vmatmul.bf16.gmra.mxu3 %v2901_v62  ;;  %3275 = vmatmul.bf16.gmra.mxu1 %v2901_v62  ;;  %v2791_v36 = vadd.f32 %v2790_v41, %v10957_v33  ;;  %v9475_v41 = vld [vmem:[#allocation14 + $0xa4] sm:$0xf0] }
 0x3b7   :  { %v2841_v21 = vpop.f32.mrf.mxu1  ;;  %3871 = vmatpush.bf16.msra.mxu2 %v8249_v22  ;;  %v9473_v22 = vld [vmem:[#allocation14 + $0x94] sm:$0xf0] }
 0x3b8   :  { %v2874_v45 = vmax.f32 %v2739_v23, 0.0  ;;  %v2840_v27 = vadd.f32 %v2839_v37, %v2791_v36 }
 0x3ba   :  { %v2900_v59 = vpack.c.bf16 %v2874_v45, %v2872_v26  ;;  %v2877_v40 = vmax.f32 %v2840_v27, 0.0 }
 0x3bb   :  { %v2692_v13 = vpop.f32.mrf.mxu2 }
 0x3bc   :  { %3128 = vmatmul.bf16.gmra.mxu2 %v2900_v59  ;;  %3226 = vmatmul.bf16.gmra.mxu0 %v2900_v59  ;;  %v2693_v12 = vadd.f32 %v2692_v13, %v10960_v9 }
 0x3bd   :  { %v2743_v18 = vpop.f32.mrf.mxu3  ;;  %v2792_v14 = vpop.f32.mrf.mxu0 }
 0x3be   :  { %v2793_v7 = vadd.f32 %v2792_v14, %v10957_v33  ;;  %v2742_v25 = vadd.f32 %v2741_v16, %v2693_v12  ;;  %v8312_v16 = vld [vmem:[#allocation14 + $0xa0] sm:$0xf]  ;;  %v9517_v14 = vld [vmem:[#allocation14 + $0x1f4] sm:$0xf0] }
 0x3bf   :  { %v2844_v15 = vpop.f32.mrf.mxu1 }
 0x3c0   :  { %v2842_v48 = vadd.f32 %v2841_v21, %v2793_v7  ;;  %v2876_v49 = vmax.f32 %v2742_v25, 0.0  ;;  %v8313_v21 = vor.u32 %v9475_v41, %v8312_v16  ;;  %v8400_v41 = vld [vmem:[#allocation14 + $0x150] sm:$0xf] }
 0x3c2   :  { %v2879_v3 = vmax.f32 %v2842_v48, 0.0  ;;  %3920 = vmatpush.bf16.msrb.mxu3 %v8313_v21 }
 0x3c3   :  { %v2694_v60 = vpop.f32.mrf.mxu2 }
 0x3c4   :  { %v2695_v54 = vadd.f32 %v2694_v60, %v10960_v9  ;;  %v2903_v63 = vpack.c.bf16 %v2879_v3, %v2877_v40  ;;  %v8473_v3 = vor.u32 %v9515_v1, %v8472_v31  ;;  %v9501_v60 = vld [vmem:[#allocation14 + $0x174] sm:$0xf0] }
 0x3c5   :  { %v2746_v55 = vpop.f32.mrf.mxu3  ;;  %v2795_v52 = vpop.f32.mrf.mxu0  ;;  %v8417_v11 = vor.u32 %v9501_v60, %v8416_v4 }
 0x3c6   :  { %v2744_v58 = vadd.f32 %v2743_v18, %v2695_v54  ;;  %3182 = vmatmul.bf16.gmra.mxu3 %v2903_v63  ;;  %3280 = vmatmul.bf16.gmra.mxu1 %v2903_v63  ;;  %v2796_v37 = vadd.f32 %v2795_v52, %v10957_v33  ;;  %v8480_v18 = vld [vmem:[#allocation14 + $0x1f0] sm:$0xf] }
 0x3c7   :  { %v2846_v29 = vpop.f32.mrf.mxu1  ;;  %v8481_v7 = vor.u32 %v9517_v14, %v8480_v18  ;;  %v8464_v63 = vld [vmem:[#allocation14 + $0x1d0] sm:$0xf]  ;;  %3964 = vmatpush.bf16.msrb.mxu0 %v8417_v11  ;;  %v9509_v14 = vld [vmem:[#allocation14 + $0x1b4] sm:$0xf0] }
 0x3c8   :  { %v2878_v44 = vmax.f32 %v2744_v58, 0.0  ;;  %v2845_v6 = vadd.f32 %v2844_v15, %v2796_v37  ;;  %v8448_v18 = vld [vmem:[#allocation14 + $0x1b0] sm:$0xf] }
 0x3c9   :  { %4013 = vmatpush.bf16.msrb.mxu1 %v8481_v7  ;;  %v8449_v7 = vor.u32 %v9509_v14, %v8448_v18 }
 0x3ca   :  { %v2902_v19 = vpack.c.bf16 %v2878_v44, %v2876_v49  ;;  %v2881_v47 = vmax.f32 %v2845_v6, 0.0  ;;  %v8408_v49 = vld [vmem:[#allocation14 + $0x160] sm:$0xf]  ;;  %v9499_v44 = vld [vmem:[#allocation14 + $0x164] sm:$0xf0] }
 0x3cb   :  { %v2697_v53 = vpop.f32.mrf.mxu2 }
 0x3cc   :  { %3133 = vmatmul.bf16.gmra.mxu2 %v2902_v19  ;;  %3231 = vmatmul.bf16.gmra.mxu0 %v2902_v19  ;;  %v2698_v17 = vadd.f32 %v2697_v53, %v10960_v9  ;;  %v8240_v53 = vld [vmem:[#allocation14 + $0x10] sm:$0xf] }
 0x3cd   :  { %v2748_v50 = vpop.f32.mrf.mxu3  ;;  %v2797_v35 = vpop.f32.mrf.mxu0  ;;  %4014 = vmatpush.bf16.msrb.mxu1 %v8473_v3 }
 0x3ce   :  { %v2798_v61 = vadd.f32 %v2797_v35, %v10957_v33  ;;  %v2747_v26 = vadd.f32 %v2746_v55, %v2698_v17  ;;  %v9513_v55 = vld [vmem:[#allocation14 + $0x1d4] sm:$0xf0]  ;;  %v8409_v35 = vor.u32 %v9499_v44, %v8408_v49  ;;  %v8456_v17 = vld [vmem:[#allocation14 + $0x1c0] sm:$0xf]  ;;  %v9471_v44 = vld [vmem:[#allocation14 + $0x84] sm:$0xf0] }
 0x3cf   :  { %v2849_v10 = vpop.f32.mrf.mxu1 }
 0x3d0   :  { %v2847_v28 = vadd.f32 %v2846_v29, %v2798_v61  ;;  %v2880_v12 = vmax.f32 %v2747_v26, 0.0  ;;  %v8465_v29 = vor.u32 %v9513_v55, %v8464_v63  ;;  %3965 = vmatpush.bf16.msrb.mxu0 %v8409_v35  ;;  %v8232_v63 = vld [vmem:[#allocation14] sm:$0xf]  ;;  %v9455_v55 = vld [vmem:[#allocation14 + $0x4] sm:$0xf0] }
 0x3d1   :  { %v8233_v49 = vor.u32 %v9455_v55, %v8232_v63 }
 0x3d2   :  { %v2883_v62 = vmax.f32 %v2847_v28, 0.0  ;;  %4015 = vmatpush.bf16.msrb.mxu1 %v8465_v29  ;;  %v9511_v28 = vld [vmem:[#allocation14 + $0x1c4] sm:$0xf0] }
 0x3d3   :  { %v2699_v23 = vpop.f32.mrf.mxu2 }
 0x3d4   :  { %v2700_v45 = vadd.f32 %v2699_v23, %v10960_v9  ;;  %v2905_v36 = vpack.c.bf16 %v2883_v62, %v2881_v47  ;;  %v8457_v47 = vor.u32 %v9511_v28, %v8456_v17  ;;  %v9497_v23 = vld [vmem:[#allocation14 + $0x154] sm:$0xf0]  ;;  %v8376_v17 = vld [vmem:[#allocation14 + $0x120] sm:$0xf]  ;;  %v9491_v28 = vld [vmem:[#allocation14 + $0x124] sm:$0xf0] }
 0x3d5   :  { %v2751_v59 = vpop.f32.mrf.mxu3  ;;  %v2800_v13 = vpop.f32.mrf.mxu0 }
 0x3d6   :  { %v2749_v27 = vadd.f32 %v2748_v50, %v2700_v45  ;;  %3187 = vmatmul.bf16.gmra.mxu3 %v2905_v36  ;;  %3285 = vmatmul.bf16.gmra.mxu1 %v2905_v36  ;;  %v2801_v43 = vadd.f32 %v2800_v13, %v10957_v33  ;;  %v9457_v50 = vld [vmem:[#allocation14 + $0x14] sm:$0xf0]  ;;  %v8401_v36 = vor.u32 %v9497_v23, %v8400_v41 }
 0x3d7   :  { %v2851_v15 = vpop.f32.mrf.mxu1  ;;  %v8241_v61 = vor.u32 %v9457_v50, %v8240_v53  ;;  %4016 = vmatpush.bf16.msrb.mxu1 %v8457_v47  ;;  %v8424_v47 = vld [vmem:[#allocation14 + $0x180] sm:$0xf] }
 0x3d8   :  { %v2882_v48 = vmax.f32 %v2749_v27, 0.0  ;;  %v2850_v52 = vadd.f32 %v2849_v10, %v2801_v43  ;;  %v8304_v10 = vld [vmem:[#allocation14 + $0x90] sm:$0xf]  ;;  %3966 = vmatpush.bf16.msrb.mxu0 %v8401_v36  ;;  %v8440_v43 = vld [vmem:[#allocation14 + $0x1a0] sm:$0xf] }
 0x3d9   :  { %3872 = vmatpush.bf16.msra.mxu2 %v8241_v61  ;;  %v8305_v16 = vor.u32 %v9473_v22, %v8304_v10 }
 0x3da   :  { %v2904_v40 = vpack.c.bf16 %v2882_v48, %v2880_v12  ;;  %v2885_v56 = vmax.f32 %v2850_v52, 0.0  ;;  %v8392_v12 = vld [vmem:[#allocation14 + $0x140] sm:$0xf]  ;;  %v9495_v48 = vld [vmem:[#allocation14 + $0x144] sm:$0xf0] }
 0x3db   :  { %v2702_v8 = vpop.f32.mrf.mxu2  ;;  %3921 = vmatpush.bf16.msrb.mxu3 %v8305_v16  ;;  %4017 = vmatpush.bf16.msrb.mxu1 %v8449_v7 }
 0x3dc   :  { %3138 = vmatmul.bf16.gmra.mxu2 %v2904_v40  ;;  %3236 = vmatmul.bf16.gmra.mxu0 %v2904_v40  ;;  %v2703_v37 = vadd.f32 %v2702_v8, %v10960_v9  ;;  %v9507_v40 = vld [vmem:[#allocation14 + $0x1a4] sm:$0xf0] }
 0x3dd   :  { %v2753_v25 = vpop.f32.mrf.mxu3  ;;  %v2802_v54 = vpop.f32.mrf.mxu0  ;;  %v8441_v3 = vor.u32 %v9507_v40, %v8440_v43  ;;  %3873 = vmatpush.bf16.msra.mxu2 %v8233_v49 }
 0x3de   :  { %v2803_v58 = vadd.f32 %v2802_v54, %v10957_v33  ;;  %v2752_v21 = vadd.f32 %v2751_v59, %v2703_v37  ;;  %v8393_v59 = vor.u32 %v9495_v48, %v8392_v12  ;;  %v9493_v54 = vld [vmem:[#allocation14 + $0x134] sm:$0xf0]  ;;  %v8432_v37 = vld [vmem:[#allocation14 + $0x190] sm:$0xf]  ;;  %v8360_v12 = vld [vmem:[#allocation14 + $0x100] sm:$0xf] }
 0x3df   :  { %v2854_v6 = vpop.f32.mrf.mxu1  ;;  %4018 = vmatpush.bf16.msrb.mxu1 %v8441_v3  ;;  %v9487_v48 = vld [vmem:[#allocation14 + $0x104] sm:$0xf0] }
 0x3e0   :  { %v2852_v19 = vadd.f32 %v2851_v15, %v2803_v58  ;;  %v2884_v31 = vmax.f32 %v2752_v21, 0.0  ;;  %3967 = vmatpush.bf16.msrb.mxu0 %v8393_v59  ;;  %v8296_v58 = vld [vmem:[#allocation14 + $0x80] sm:$0xf]  ;;  %v8368_v21 = vld [vmem:[#allocation14 + $0x110] sm:$0xf]  ;;  %v8361_v59 = vor.u32 %v9487_v48, %v8360_v12 }
 0x3e1   :  { %v8297_v35 = vor.u32 %v9471_v44, %v8296_v58  ;;  %v8528_v12 = vld [vmem:[#allocation14 + $0x250] sm:$0xf]  ;;  %v9529_v48 = vld [vmem:[#allocation14 + $0x254] sm:$0xf0] }
 0x3e2   :  { %v2887_v5 = vmax.f32 %v2852_v19, 0.0  ;;  %v9505_v19 = vld [vmem:[#allocation14 + $0x194] sm:$0xf0] }
 0x3e3   :  { %v2704_v62 = vpop.f32.mrf.mxu2  ;;  %v8433_v61 = vor.u32 %v9505_v19, %v8432_v37  ;;  %3922 = vmatpush.bf16.msrb.mxu3 %v8297_v35 }
 0x3e4   :  { %v2705_v26 = vadd.f32 %v2704_v62, %v10960_v9  ;;  %v2907_v45 = vpack.c.bf16 %v2887_v5, %v2885_v56  ;;  %v8377_v56 = vor.u32 %v9491_v28, %v8376_v17  ;;  %v9503_v62 = vld [vmem:[#allocation14 + $0x184] sm:$0xf0] }
 0x3e5   :  { %v2805_v13 = vpop.f32.mrf.mxu0  ;;  %v2756_v15 = vpop.f32.mrf.mxu3  ;;  %4019 = vmatpush.bf16.msrb.mxu1 %v8433_v61 }
 0x3e6   :  { %v2754_v27 = vadd.f32 %v2753_v25, %v2705_v26  ;;  %3192 = vmatmul.bf16.gmra.mxu3 %v2907_v45  ;;  %3290 = vmatmul.bf16.gmra.mxu1 %v2907_v45  ;;  %v2806_v8 = vadd.f32 %v2805_v13, %v10957_v33  ;;  %v8384_v25 = vld [vmem:[#allocation14 + $0x130] sm:$0xf]  ;;  %v9489_v26 = vld [vmem:[#allocation14 + $0x114] sm:$0xf0] }
 0x3e7   :  { %v2856_v60 = vpop.f32.mrf.mxu1  ;;  %v8385_v52 = vor.u32 %v9493_v54, %v8384_v25  ;;  %v8369_v18 = vor.u32 %v9489_v26, %v8368_v21  ;;  %v9533_v25 = vld [vmem:[#allocation14 + $0x274] sm:$0xf0]  ;;  %v9468_v54 = vld [vmem:[#allocation14 + $0x74] sm:$0xf] }
 0x3e8   :  { %v2886_v1 = vmax.f32 %v2754_v27, 0.0  ;;  %v2855_v53 = vadd.f32 %v2854_v6, %v2806_v8  ;;  %v8425_v6 = vor.u32 %v9503_v62, %v8424_v47  ;;  %v8282_v62 = vld [vmem:[#allocation14 + $0x68] sm:$0xf0] }
 0x3e9   :  { %3968 = vmatpush.bf16.msrb.mxu0 %v8385_v52  ;;  %v8290_v52 = vld [vmem:[#allocation14 + $0x78] sm:$0xf0] }
 0x3ea   :  { %v2906_v4 = vpack.c.bf16 %v2886_v1, %v2884_v31  ;;  %v2889_v16 = vmax.f32 %v2855_v53, 0.0  ;;  %4020 = vmatpush.bf16.msrb.mxu1 %v8425_v6  ;;  %v8293_v49 = vor.u32 %v9468_v54, %v8290_v52  ;;  %v12077_v6 = vld [vmem:[#allocation36_spill] sm:$0xff] }
 0x3eb   :  { %v2707_v11 = vpop.f32.mrf.mxu2 }
 0x3ec   :  { %3143 = vmatmul.bf16.gmra.mxu2 %v2906_v4  ;;  %3241 = vmatmul.bf16.gmra.mxu0 %v2906_v4  ;;  %v2708_v5 = vadd.f32 %v2707_v11, %v10960_v9  ;;  %v8544_v11 = vld [vmem:[#allocation14 + $0x270] sm:$0xf] }
 0x3ed   :  { %v2807_v29 = vpop.f32.mrf.mxu0  ;;  %v2758_v22 = vpop.f32.mrf.mxu3  ;;  %3969 = vmatpush.bf16.msrb.mxu0 %v8377_v56  ;;  %v8545_v55 = vor.u32 %v9533_v25, %v8544_v11  ;;  %4111 = vmatpush.bf16.msra.mxu3 %v8293_v49 }
 0x3ee   :  { %v2808_v50 = vadd.f32 %v2807_v29, %v10957_v33  ;;  %v2757_v45 = vadd.f32 %v2756_v15, %v2708_v5  ;;  %v8536_v5 = vld [vmem:[#allocation14 + $0x260] sm:$0xf] }
 0x3ef   :  { %v2859_v14 = vpop.f32.mrf.mxu1  ;;  %4062 = vmatpush.bf16.msrb.mxu2 %v8545_v55  ;;  %v12081_v55 = vld [vmem:[#allocation39_spill] sm:$0xff] }
 0x3f0   :  { %v2857_v10 = vadd.f32 %v2856_v60, %v2808_v50  ;;  %v2888_v31 = vmax.f32 %v2757_v45, 0.0 }
 0x3f1   :  { %3970 = vmatpush.bf16.msrb.mxu0 %v8369_v18 }
 0x3f2   :  { %v2891_v41 = vmax.f32 %v2857_v10, 0.0  ;;  %v9531_v10 = vld [vmem:[#allocation14 + $0x264] sm:$0xf0] }
 0x3f3   :  { %v2709_v23 = vpop.f32.mrf.mxu2  ;;  %v8537_v47 = vor.u32 %v9531_v10, %v8536_v5 }
 0x3f4   :  { %v2710_v36 = vadd.f32 %v2709_v23, %v10960_v9  ;;  %v2909_v13 = vpack.c.bf16 %v2891_v41, %v2889_v16  ;;  %v12078_v23 = vld [vmem:[#allocation47_spill] sm:$0xff] }
 0x3f5   :  { %v2810_v27 = vpop.f32.mrf.mxu0  ;;  %v2761_v15 = vpop.f32.mrf.mxu3  ;;  %3971 = vmatpush.bf16.msrb.mxu0 %v8361_v59  ;;  %4063 = vmatpush.bf16.msrb.mxu2 %v8537_v47  ;;  %v9464_v59 = vld [vmem:[#allocation14 + $0x54] sm:$0xf]  ;;  %v8266_v47 = vld [vmem:[#allocation14 + $0x48] sm:$0xf0] }
 0x3f6   :  { %v2759_v7 = vadd.f32 %v2758_v22, %v2710_v36  ;;  %3197 = vmatmul.bf16.gmra.mxu3 %v2909_v13  ;;  %3295 = vmatmul.bf16.gmra.mxu1 %v2909_v13  ;;  %v2811_v43 = vadd.f32 %v2810_v27, %v10957_v33  ;;  %v9466_v22 = vld [vmem:[#allocation14 + $0x64] sm:$0xf]  ;;  %v12080_v27 = vld [vmem:[#allocation43_spill] sm:$0xff] }
 0x3f7   :  { %v2861_v63 = vpop.f32.mrf.mxu1  ;;  %v8285_v16 = vor.u32 %v9466_v22, %v8282_v62  ;;  %v9462_v22 = vld [vmem:[#allocation14 + $0x44] sm:$0xf] }
 0x3f8   :  { %v2890_v1 = vmax.f32 %v2759_v7, 0.0  ;;  %v2860_v4 = vadd.f32 %v2859_v14, %v2811_v43  ;;  %v12079_v14 = vld [vmem:[#allocation29_spill] sm:$0xff]  ;;  %v8274_v43 = vld [vmem:[#allocation14 + $0x58] sm:$0xf0] }
 0x3f9   :  { %4112 = vmatpush.bf16.msra.mxu3 %v8285_v16  ;;  %v8269_v16 = vor.u32 %v9462_v22, %v8266_v47  ;;  %v12085_v47 = vld [vmem:[#allocation34_spill] sm:$0xff] }
 0x3fa   :  { %v2908_v40 = vpack.c.bf16 %v2890_v1, %v2888_v31  ;;  %v2893_v44 = vmax.f32 %v2860_v4, 0.0  ;;  %v8529_v1 = vor.u32 %v9529_v48, %v8528_v12  ;;  %v12083_v48 = vld [vmem:[#allocation31_spill] sm:$0xff] }
 0x3fb   :  { %v2712_v3 = vpop.f32.mrf.mxu2 }
 0x3fc   :  { %3148 = vmatmul.bf16.gmra.mxu2 %v2908_v40  ;;  %3246 = vmatmul.bf16.gmra.mxu0 %v2908_v40  ;;  %v2713_v58 = vadd.f32 %v2712_v3, %v10960_v9 }
 0x3fd   :  { %v2812_v8 = vpop.f32.mrf.mxu0  ;;  %4064 = vmatpush.bf16.msrb.mxu2 %v8529_v1 }
 0x3fe   :  { %v2813_v60 = vadd.f32 %v2812_v8, %v10957_v33  ;;  %v2762_v53 = vadd.f32 %v2761_v15, %v2713_v58  ;;  %v2763_v33 = vpop.f32.mrf.mxu3  ;;  %v8277_v15 = vor.u32 %v9464_v59, %v8274_v43 }
 0x400   :  { %v2862_v29 = vadd.f32 %v2861_v63, %v2813_v60  ;;  %v2892_v17 = vmax.f32 %v2762_v53, 0.0  ;;  %4113 = vmatpush.bf16.msra.mxu3 %v8277_v15 }
 0x402   :  { %v2895_v37 = vmax.f32 %v2862_v29, 0.0 }
 0x403   :  { %v2714_v19 = vpop.f32.mrf.mxu2 }
 0x404   :  { %v2715_v50 = vadd.f32 %v2714_v19, %v10960_v9  ;;  %v2911_v35 = vpack.c.bf16 %v2895_v37, %v2893_v44  ;;  %v2944_v9 = vld [vmem:[%s12076_s15] sm:$0x3]  ;;  %4114 = vmatpush.bf16.msra.mxu3 %v8269_v16 }
 0x405   :  { %v10998_v21 = vperm.slane %v2944_v9, 1  ;;  %v11003_v7 = vperm.slane %v2944_v9, 0 }
 0x406   :  { %v2764_v61 = vadd.f32 %v2763_v33, %v2715_v50  ;;  %3202 = vmatmul.bf16.gmra.mxu3 %v2911_v35  ;;  %3300 = vmatmul.bf16.gmra.mxu1 %v2911_v35 }
 0x408   :  { %v2894_v28 = vmax.f32 %v2764_v61, 0.0  ;;  %v12082_v61 = vld [vmem:[#allocation32_spill] sm:$0xff] }
 0x40a   :  { %v2910_v56 = vpack.c.bf16 %v2894_v28, %v2892_v17  ;;  %v8520_v28 = vld [vmem:[#allocation14 + $0x240] sm:$0xf] }
 0x40c   :  { %3153 = vmatmul.bf16.gmra.mxu2 %v2910_v56  ;;  %3251 = vmatmul.bf16.gmra.mxu0 %v2910_v56  ;;  %v9527_v56 = vld [vmem:[#allocation14 + $0x244] sm:$0xf0] }
 0x40d   :  { %v8521_v10 = vor.u32 %v9527_v56, %v8520_v28 }
 0x40f   :  { %4065 = vmatpush.bf16.msrb.mxu2 %v8521_v10 }
 0x413   :  { %v3266_v41 = vpop.f32.mrf.mxu1 }
 0x416   :  { %3923 = vmatmul.bf16.vlgmr.msrb.gmra.mxu3 %v12077_v6  ;;  %4021 = vmatmul.bf16.vlgmr.msrb.gmra.mxu1 %v12078_v23 }
 0x419   :  { %v3168_v26 = vpop.f32.mrf.mxu3  ;;  %v3217_v45 = vpop.f32.mrf.mxu0 }
 0x41a   :  { %v3218_v36 = vadd.f32 %v3217_v45, %v10998_v21 }
 0x41b   :  { %v3268_v13 = vpop.f32.mrf.mxu1 }
 0x41c   :  { %v3267_v18 = vadd.f32 %v3266_v41, %v3218_v36  ;;  %3874 = vmatmul.bf16.vlgmr.msra.gmra.mxu2 %v12079_v14  ;;  %3972 = vmatmul.bf16.vlgmr.msrb.gmra.mxu0 %v12080_v27 }
 0x41e   :  { %v3307_v54 = vmax.f32 %v3267_v18, 0.0 }
 0x41f   :  { %v3119_v31 = vpop.f32.mrf.mxu2 }
 0x420   :  { %v3120_v40 = vadd.f32 %v3119_v31, %v11003_v7 }
 0x421   :  { %v3170_v3 = vpop.f32.mrf.mxu3  ;;  %v3219_v8 = vpop.f32.mrf.mxu0 }
 0x422   :  { %v3169_v4 = vadd.f32 %v3168_v26, %v3120_v40  ;;  %v3220_v60 = vadd.f32 %v3219_v8, %v10998_v21 }
 0x423   :  { %v3271_v11 = vpop.f32.mrf.mxu1 }
 0x424   :  { %v3269_v25 = vadd.f32 %v3268_v13, %v3220_v60  ;;  %v3306_v50 = vmax.f32 %v3169_v4, 0.0 }
 0x426   :  { %v3309_v63 = vmax.f32 %v3269_v25, 0.0  ;;  %3928 = vmatmul.bf16.gmra.mxu3 %v12081_v55  ;;  %4026 = vmatmul.bf16.gmra.mxu1 %v10538_v20  ;;  %v12084_v25 = vld [vmem:[#allocation30_spill] sm:$0xff] }
 0x427   :  { %v3121_v52 = vpop.f32.mrf.mxu2 }
 0x428   :  { %v11009_v58 = vpack.c.bf16 %v3309_v63, %v3307_v54  ;;  %v3122_v29 = vadd.f32 %v3121_v52, %v11003_v7  ;;  %v8512_v54 = vld [vmem:[#allocation14 + $0x230] sm:$0xf]  ;;  %v9525_v63 = vld [vmem:[#allocation14 + $0x234] sm:$0xf0] }
 0x429   :  { %v3173_v49 = vpop.f32.mrf.mxu3  ;;  %v3222_v44 = vpop.f32.mrf.mxu0 }
 0x42a   :  { %v3171_v37 = vadd.f32 %v3170_v3, %v3122_v29  ;;  %v3223_v19 = vadd.f32 %v3222_v44, %v10998_v21  ;;  %v9460_v44 = vld [vmem:[#allocation14 + $0x34] sm:$0xf] }
 0x42b   :  { %v3273_v53 = vpop.f32.mrf.mxu1 }
 0x42c   :  { %v3308_v35 = vmax.f32 %v3171_v37, 0.0  ;;  %v3272_v33 = vadd.f32 %v3271_v11, %v3223_v19  ;;  %3879 = vmatmul.bf16.gmra.mxu2 %v12082_v61  ;;  %3977 = vmatmul.bf16.gmra.mxu0 %v10520_v24  ;;  %v8258_v37 = vld [vmem:[#allocation14 + $0x38] sm:$0xf0] }
 0x42e   :  { %v11015_v17 = vpack.c.bf16 %v3308_v35, %v3306_v50  ;;  %v3311_v18 = vmax.f32 %v3272_v33, 0.0 }
 0x42f   :  { %v3124_v5 = vpop.f32.mrf.mxu2 }
 0x430   :  { %v3125_v62 = vadd.f32 %v3124_v5, %v11003_v7 }
 0x431   :  { %v3175_v41 = vpop.f32.mrf.mxu3  ;;  %v3224_v9 = vpop.f32.mrf.mxu0 }
 0x432   :  { %v3174_v26 = vadd.f32 %v3173_v49, %v3125_v62  ;;  %v3225_v45 = vadd.f32 %v3224_v9, %v10998_v21  ;;  %v8513_v49 = vor.u32 %v9525_v63, %v8512_v54 }
 0x433   :  { %v3276_v36 = vpop.f32.mrf.mxu1 }
 0x434   :  { %v3274_v13 = vadd.f32 %v3273_v53, %v3225_v45  ;;  %v3310_v4 = vmax.f32 %v3174_v26, 0.0  ;;  %v8261_v53 = vor.u32 %v9460_v44, %v8258_v37  ;;  %4066 = vmatpush.bf16.msrb.mxu2 %v8513_v49 }
 0x436   :  { %v3313_v12 = vmax.f32 %v3274_v13, 0.0  ;;  %3933 = vmatmul.bf16.gmra.mxu3 %v12083_v48  ;;  %4031 = vmatmul.bf16.gmra.mxu1 %v10546_v46 }
 0x437   :  { %v3126_v31 = vpop.f32.mrf.mxu2  ;;  %4115 = vmatpush.bf16.msra.mxu3 %v8261_v53  ;;  %v9500_v53 = vld [vmem:[#allocation14 + $0x174] sm:$0xf] }
 0x438   :  { %v3127_v1 = vadd.f32 %v3126_v31, %v11003_v7  ;;  %v11022_v59 = vpack.c.bf16 %v3313_v12, %v3311_v18 }
 0x439   :  { %v3178_v43 = vpop.f32.mrf.mxu3  ;;  %v3227_v40 = vpop.f32.mrf.mxu0 }
 0x43a   :  { %v3176_v15 = vadd.f32 %v3175_v41, %v3127_v1  ;;  %v3228_v3 = vadd.f32 %v3227_v40, %v10998_v21  ;;  %v12086_v1 = vld [vmem:[#allocation33_spill] sm:$0xff]  ;;  %v9523_v40 = vld [vmem:[#allocation14 + $0x224] sm:$0xf0] }
 0x43b   :  { %v3278_v8 = vpop.f32.mrf.mxu1 }
 0x43c   :  { %v3312_v60 = vmax.f32 %v3176_v15, 0.0  ;;  %v3277_v11 = vadd.f32 %v3276_v36, %v3228_v3  ;;  %3884 = vmatmul.bf16.gmra.mxu2 %v12084_v25  ;;  %3982 = vmatmul.bf16.gmra.mxu0 %v10444_v32 }
 0x43e   :  { %v11027_v52 = vpack.c.bf16 %v3312_v60, %v3310_v4  ;;  %v3315_v10 = vmax.f32 %v3277_v11, 0.0  ;;  %v9458_v4 = vld [vmem:[#allocation14 + $0x24] sm:$0xf]  ;;  %v8250_v60 = vld [vmem:[#allocation14 + $0x28] sm:$0xf0] }
 0x43f   :  { %v3129_v29 = vpop.f32.mrf.mxu2  ;;  %v8253_v54 = vor.u32 %v9458_v4, %v8250_v60  ;;  %v9496_v60 = vld [vmem:[#allocation14 + $0x154] sm:$0xf] }
 0x440   :  { %v3130_v19 = vadd.f32 %v3129_v29, %v11003_v7 }
 0x441   :  { %v3180_v50 = vpop.f32.mrf.mxu3  ;;  %v3229_v35 = vpop.f32.mrf.mxu0  ;;  %4116 = vmatpush.bf16.msra.mxu3 %v8253_v54  ;;  %v8496_v54 = vld [vmem:[#allocation14 + $0x210] sm:$0xf] }
 0x442   :  { %v3179_v33 = vadd.f32 %v3178_v43, %v3130_v19  ;;  %v3230_v28 = vadd.f32 %v3229_v35, %v10998_v21  ;;  %v8504_v43 = vld [vmem:[#allocation14 + $0x220] sm:$0xf] }
 0x443   :  { %v3281_v56 = vpop.f32.mrf.mxu1 }
 0x444   :  { %v3279_v5 = vadd.f32 %v3278_v8, %v3230_v28  ;;  %v3314_v18 = vmax.f32 %v3179_v33, 0.0  ;;  %v8505_v8 = vor.u32 %v9523_v40, %v8504_v43  ;;  %v12087_v28 = vld [vmem:[#allocation37_spill] sm:$0xff] }
 0x446   :  { %v3317_v22 = vmax.f32 %v3279_v5, 0.0  ;;  %3938 = vmatmul.bf16.gmra.mxu3 %v12085_v47  ;;  %4036 = vmatmul.bf16.gmra.mxu1 %v10570_v39 }
 0x447   :  { %v3131_v62 = vpop.f32.mrf.mxu2  ;;  %4067 = vmatpush.bf16.msrb.mxu2 %v8505_v8  ;;  %v12088_v8 = vld [vmem:[#allocation35_spill] sm:$0xff] }
 0x448   :  { %v3132_v16 = vadd.f32 %v3131_v62, %v11003_v7  ;;  %v11034_v41 = vpack.c.bf16 %v3317_v22, %v3315_v10 }
 0x449   :  { %v3183_v9 = vpop.f32.mrf.mxu3  ;;  %v3232_v26 = vpop.f32.mrf.mxu0 }
 0x44a   :  { %v3181_v45 = vadd.f32 %v3180_v50, %v3132_v16  ;;  %v3233_v36 = vadd.f32 %v3232_v26, %v10998_v21  ;;  %v8418_v50 = vld [vmem:[#allocation14 + $0x178] sm:$0xf0]  ;;  %v8410_v26 = vld [vmem:[#allocation14 + $0x168] sm:$0xf0] }
 0x44b   :  { %v3283_v13 = vpop.f32.mrf.mxu1 }
 0x44c   :  { %v3316_v12 = vmax.f32 %v3181_v45, 0.0  ;;  %v3282_v31 = vadd.f32 %v3281_v56, %v3233_v36  ;;  %3889 = vmatmul.bf16.gmra.mxu2 %v12086_v1  ;;  %3987 = vmatmul.bf16.gmra.mxu0 %v10462_v0  ;;  %v8421_v56 = vor.u32 %v9500_v53, %v8418_v50  ;;  %v9456_v50 = vld [vmem:[#allocation14 + $0x14] sm:$0xf] }
 0x44e   :  { %v11039_v15 = vpack.c.bf16 %v3316_v12, %v3314_v18  ;;  %v3319_v35 = vmax.f32 %v3282_v31, 0.0  ;;  %4209 = vmatpush.bf16.msra.mxu1 %v8421_v56  ;;  %v9484_v12 = vld [vmem:[#allocation14 + $0xf4] sm:$0xf]  ;;  %v8354_v31 = vld [vmem:[#allocation14 + $0xf8] sm:$0xf0] }
 0x44f   :  { %v3134_v3 = vpop.f32.mrf.mxu2  ;;  %v8357_v4 = vor.u32 %v9484_v12, %v8354_v31  ;;  %v8346_v56 = vld [vmem:[#allocation14 + $0xe8] sm:$0xf0]  ;;  %v9480_v31 = vld [vmem:[#allocation14 + $0xd4] sm:$0xf] }
 0x450   :  { %v3135_v11 = vadd.f32 %v3134_v3, %v11003_v7 }
 0x451   :  { %v3185_v63 = vpop.f32.mrf.mxu3  ;;  %v3234_v29 = vpop.f32.mrf.mxu0  ;;  %4160 = vmatpush.bf16.msra.mxu0 %v8357_v4 }
 0x452   :  { %v3184_v49 = vadd.f32 %v3183_v9, %v3135_v11  ;;  %v3235_v44 = vadd.f32 %v3234_v29, %v10998_v21  ;;  %v9498_v9 = vld [vmem:[#allocation14 + $0x164] sm:$0xf]  ;;  %v8402_v11 = vld [vmem:[#allocation14 + $0x158] sm:$0xf0]  ;;  %v9521_v29 = vld [vmem:[#allocation14 + $0x214] sm:$0xf0] }
 0x453   :  { %v3286_v37 = vpop.f32.mrf.mxu1  ;;  %v8497_v53 = vor.u32 %v9521_v29, %v8496_v54 }
 0x454   :  { %v3284_v19 = vadd.f32 %v3283_v13, %v3235_v44  ;;  %v8413_v13 = vor.u32 %v9498_v9, %v8410_v26  ;;  %v3318_v43 = vmax.f32 %v3184_v49, 0.0  ;;  %v8242_v49 = vld [vmem:[#allocation14 + $0x18] sm:$0xf0]  ;;  %v9494_v9 = vld [vmem:[#allocation14 + $0x144] sm:$0xf] }
 0x455   :  { %4068 = vmatpush.bf16.msrb.mxu2 %v8497_v53  ;;  %v8394_v26 = vld [vmem:[#allocation14 + $0x148] sm:$0xf0]  ;;  %v9478_v53 = vld [vmem:[#allocation14 + $0xc4] sm:$0xf] }
 0x456   :  { %v3321_v33 = vmax.f32 %v3284_v19, 0.0  ;;  %3943 = vmatmul.bf16.gmra.mxu3 %v12087_v28  ;;  %4041 = vmatmul.bf16.gmra.mxu1 %v10590_v42 }
 0x457   :  { %v3136_v5 = vpop.f32.mrf.mxu2  ;;  %4210 = vmatpush.bf16.msra.mxu1 %v8413_v13  ;;  %v8397_v13 = vor.u32 %v9494_v9, %v8394_v26 }
 0x458   :  { %v3137_v10 = vadd.f32 %v3136_v5, %v11003_v7  ;;  %v11046_v22 = vpack.c.bf16 %v3321_v33, %v3319_v35  ;;  %v9482_v35 = vld [vmem:[#allocation14 + $0xe4] sm:$0xf]  ;;  %v8245_v33 = vor.u32 %v9456_v50, %v8242_v49  ;;  %v8330_v50 = vld [vmem:[#allocation14 + $0xc8] sm:$0xf0] }
 0x459   :  { %v3188_v62 = vpop.f32.mrf.mxu3  ;;  %v3237_v16 = vpop.f32.mrf.mxu0 }
 0x45a   :  { %v3186_v45 = vadd.f32 %v3185_v63, %v3137_v10  ;;  %v3238_v36 = vadd.f32 %v3237_v16, %v10998_v21  ;;  %v8405_v63 = vor.u32 %v9496_v60, %v8402_v11  ;;  %v8349_v16 = vor.u32 %v9482_v35, %v8346_v56  ;;  %4117 = vmatpush.bf16.msra.mxu3 %v8245_v33  ;;  %v9492_v60 = vld [vmem:[#allocation14 + $0x134] sm:$0xf]  ;;  %v8386_v11 = vld [vmem:[#allocation14 + $0x138] sm:$0xf0]  ;;  %v9490_v56 = vld [vmem:[#allocation14 + $0x124] sm:$0xf] }
 0x45b   :  { %v3288_v18 = vpop.f32.mrf.mxu1  ;;  %v8333_v35 = vor.u32 %v9478_v53, %v8330_v50 }
 0x45c   :  { %v3320_v40 = vmax.f32 %v3186_v45, 0.0  ;;  %v3287_v3 = vadd.f32 %v3286_v37, %v3238_v36  ;;  %3894 = vmatmul.bf16.gmra.mxu2 %v12088_v8  ;;  %3992 = vmatmul.bf16.gmra.mxu0 %v10479_v2 }
 0x45d   :  { %4211 = vmatpush.bf16.msra.mxu1 %v8405_v63  ;;  %4161 = vmatpush.bf16.msra.mxu0 %v8349_v16  ;;  %v12089_v63 = vld [vmem:[#allocation41_spill] sm:$0xff] }
 0x45e   :  { %v11051_v44 = vpack.c.bf16 %v3320_v40, %v3318_v43  ;;  %v8338_v43 = vld [vmem:[#allocation14 + $0xd8] sm:$0xf0]  ;;  %v3323_v54 = vmax.f32 %v3287_v3, 0.0  ;;  %v8378_v3 = vld [vmem:[#allocation14 + $0x128] sm:$0xf0] }
 0x45f   :  { %v3139_v19 = vpop.f32.mrf.mxu2  ;;  %v8341_v4 = vor.u32 %v9480_v31, %v8338_v43  ;;  %v8381_v9 = vor.u32 %v9490_v56, %v8378_v3  ;;  %v8314_v3 = vld [vmem:[#allocation14 + $0xa8] sm:$0xf0] }
 0x460   :  { %v3140_v37 = vadd.f32 %v3139_v19, %v11003_v7 }
 0x461   :  { %v3190_v5 = vpop.f32.mrf.mxu3  ;;  %v3239_v10 = vpop.f32.mrf.mxu0  ;;  %4212 = vmatpush.bf16.msra.mxu1 %v8397_v13  ;;  %4162 = vmatpush.bf16.msra.mxu0 %v8341_v4  ;;  %v8322_v13 = vld [vmem:[#allocation14 + $0xb8] sm:$0xf0]  ;;  %v12090_v4 = vld [vmem:[#allocation38_spill] sm:$0xff] }
 0x462   :  { %v3189_v45 = vadd.f32 %v3188_v62, %v3140_v37  ;;  %v3240_v36 = vadd.f32 %v3239_v10, %v10998_v21  ;;  %v8389_v62 = vor.u32 %v9492_v60, %v8386_v11  ;;  %v12091_v60 = vld [vmem:[#allocation40_spill] sm:$0xff] }
 0x463   :  { %v3291_v12 = vpop.f32.mrf.mxu1 }
 0x464   :  { %v3289_v40 = vadd.f32 %v3288_v18, %v3240_v36  ;;  %v9476_v36 = vld [vmem:[#allocation14 + $0xb4] sm:$0xf]  ;;  %v3322_v31 = vmax.f32 %v3189_v45, 0.0  ;;  %v8234_v45 = vld [vmem:[#allocation14 + $0x8] sm:$0xf0] }
 0x465   :  { %4213 = vmatpush.bf16.msra.mxu1 %v8389_v62  ;;  %4163 = vmatpush.bf16.msra.mxu0 %v8333_v35  ;;  %v8325_v11 = vor.u32 %v9476_v36, %v8322_v13  ;;  %v8488_v62 = vld [vmem:[#allocation14 + $0x200] sm:$0xf]  ;;  %v9454_v35 = vld [vmem:[#allocation14 + $0x4] sm:$0xf]  ;;  %v8362_v13 = vld [vmem:[#allocation14 + $0x108] sm:$0xf0] }
 0x466   :  { %v3325_v29 = vmax.f32 %v3289_v40, 0.0  ;;  %3948 = vmatmul.bf16.gmra.mxu3 %v12089_v63  ;;  %4046 = vmatmul.bf16.gmra.mxu1 %v10610_v57  ;;  %v8237_v56 = vor.u32 %v9454_v35, %v8234_v45  ;;  %v9486_v36 = vld [vmem:[#allocation14 + $0x104] sm:$0xf]  ;;  %v12092_v57 = vld [vmem:[#allocation44_spill] sm:$0xff] }
 0x467   :  { %v3141_v19 = vpop.f32.mrf.mxu2 }
 0x468   :  { %v3142_v49 = vadd.f32 %v3141_v19, %v11003_v7  ;;  %v11058_v37 = vpack.c.bf16 %v3325_v29, %v3323_v54  ;;  %v9488_v54 = vld [vmem:[#allocation14 + $0x114] sm:$0xf]  ;;  %v8370_v29 = vld [vmem:[#allocation14 + $0x118] sm:$0xf0]  ;;  %4118 = vmatpush.bf16.msra.mxu3 %v8237_v56 }
 0x469   :  { %v3193_v18 = vpop.f32.mrf.mxu3  ;;  %v3242_v33 = vpop.f32.mrf.mxu0  ;;  %4214 = vmatpush.bf16.msra.mxu1 %v8381_v9  ;;  %v8373_v19 = vor.u32 %v9488_v54, %v8370_v29  ;;  %4164 = vmatpush.bf16.msra.mxu0 %v8325_v11  ;;  %v9472_v29 = vld [vmem:[#allocation14 + $0x94] sm:$0xf] }
 0x46a   :  { %v3191_v10 = vadd.f32 %v3190_v5, %v3142_v49  ;;  %v3243_v16 = vadd.f32 %v3242_v33, %v10998_v21  ;;  %v9519_v5 = vld [vmem:[#allocation14 + $0x204] sm:$0xf0]  ;;  %v9474_v33 = vld [vmem:[#allocation14 + $0xa4] sm:$0xf] }
 0x46b   :  { %v3293_v26 = vpop.f32.mrf.mxu1  ;;  %v8489_v49 = vor.u32 %v9519_v5, %v8488_v62  ;;  %v8317_v9 = vor.u32 %v9474_v33, %v8314_v3  ;;  %v8306_v62 = vld [vmem:[#allocation14 + $0x98] sm:$0xf0] }
 0x46c   :  { %v3324_v43 = vmax.f32 %v3191_v10, 0.0  ;;  %v3292_v40 = vadd.f32 %v3291_v12, %v3243_v16  ;;  %3899 = vmatmul.bf16.gmra.mxu2 %v12090_v4  ;;  %3997 = vmatmul.bf16.gmra.mxu0 %v12091_v60 }
 0x46d   :  { %4069 = vmatpush.bf16.msrb.mxu2 %v8489_v49  ;;  %4215 = vmatpush.bf16.msra.mxu1 %v8373_v19  ;;  %v8298_v49 = vld [vmem:[#allocation14 + $0x88] sm:$0xf0] }
 0x46e   :  { %v11063_v53 = vpack.c.bf16 %v3324_v43, %v3322_v31  ;;  %v8365_v43 = vor.u32 %v9486_v36, %v8362_v13  ;;  %4165 = vmatpush.bf16.msra.mxu0 %v8317_v9  ;;  %v3327_v35 = vmax.f32 %v3292_v40, 0.0 }
 0x46f   :  { %v3144_v50 = vpop.f32.mrf.mxu2 }
 0x470   :  { %v3145_v12 = vadd.f32 %v3144_v50, %v11003_v7  ;;  %v8309_v50 = vor.u32 %v9472_v29, %v8306_v62  ;;  %v9516_v29 = vld [vmem:[#allocation14 + $0x1f4] sm:$0xf]  ;;  %v8482_v62 = vld [vmem:[#allocation14 + $0x1f8] sm:$0xf0] }
 0x471   :  { %v3195_v10 = vpop.f32.mrf.mxu3  ;;  %v3244_v16 = vpop.f32.mrf.mxu0  ;;  %4216 = vmatpush.bf16.msra.mxu1 %v8365_v43  ;;  %v12093_v43 = vld [vmem:[#allocation42_spill] sm:$0xff] }
 0x472   :  { %v3194_v54 = vadd.f32 %v3193_v18, %v3145_v12  ;;  %v3245_v31 = vadd.f32 %v3244_v16, %v10998_v21  ;;  %4166 = vmatpush.bf16.msra.mxu0 %v8309_v50  ;;  %v9470_v18 = vld [vmem:[#allocation14 + $0x84] sm:$0xf]  ;;  %v9532_v50 = vld [vmem:[#allocation14 + $0x274] sm:$0xf] }
 0x473   :  { %v3296_v11 = vpop.f32.mrf.mxu1  ;;  %v8301_v12 = vor.u32 %v9470_v18, %v8298_v49 }
 0x474   :  { %v3294_v5 = vadd.f32 %v3293_v26, %v3245_v31  ;;  %v3326_v36 = vmax.f32 %v3194_v54, 0.0 }
 0x476   :  { %v3329_v45 = vmax.f32 %v3294_v5, 0.0  ;;  %3953 = vmatmul.bf16.gmra.mxu3 %v12092_v57  ;;  %4051 = vmatmul.bf16.gmra.mxu1 %v10628_v38  ;;  %v8485_v5 = vor.u32 %v9516_v29, %v8482_v62  ;;  %v12095_v29 = vld [vmem:[#allocation46_spill] sm:$0xff] }
 0x477   :  { %v3146_v19 = vpop.f32.mrf.mxu2  ;;  %4167 = vmatpush.bf16.msra.mxu0 %v8301_v12 }
 0x478   :  { %v3147_v33 = vadd.f32 %v3146_v19, %v11003_v7  ;;  %v11070_v56 = vpack.c.bf16 %v3329_v45, %v3327_v35  ;;  %v8546_v35 = vld [vmem:[#allocation14 + $0x278] sm:$0xf0]  ;;  %4258 = vmatpush.bf16.msra.mxu2 %v8485_v5 }
 0x479   :  { %v3198_v3 = vpop.f32.mrf.mxu3  ;;  %v3247_v16 = vpop.f32.mrf.mxu0  ;;  %v8549_v45 = vor.u32 %v9532_v50, %v8546_v35 }
 0x47a   :  { %v3196_v26 = vadd.f32 %v3195_v10, %v3147_v33  ;;  %v3248_v9 = vadd.f32 %v3247_v16, %v10998_v21 }
 0x47b   :  { %v3298_v40 = vpop.f32.mrf.mxu1  ;;  %4307 = vmatpush.bf16.msrb.mxu3 %v8549_v45 }
 0x47c   :  { %v3328_v13 = vmax.f32 %v3196_v26, 0.0  ;;  %v3297_v31 = vadd.f32 %v3296_v11, %v3248_v9  ;;  %3904 = vmatmul.bf16.gmra.mxu2 %v12093_v43  ;;  %4002 = vmatmul.bf16.gmra.mxu0 %v10510_v51 }
 0x47e   :  { %v11075_v19 = vpack.c.bf16 %v3328_v13, %v3326_v36  ;;  %v3331_v26 = vmax.f32 %v3297_v31, 0.0  ;;  %v12097_v31 = vld [vmem:[#allocation45_spill] sm:$0xff] }
 0x47f   :  { %v3149_v10 = vpop.f32.mrf.mxu2 }
 0x480   :  { %12094 = vst [vmem:[#allocation60_spill] sm:$0xff] %v11075_v19  ;;  %v3150_v18 = vadd.f32 %v3149_v10, %v11003_v7 }
 0x481   :  { %v3200_v54 = vpop.f32.mrf.mxu3  ;;  %v3249_v49 = vpop.f32.mrf.mxu0 }
 0x482   :  { %v3199_v11 = vadd.f32 %v3198_v3, %v3150_v18  ;;  %v3250_v33 = vadd.f32 %v3249_v49, %v10998_v21  ;;  %v9514_v49 = vld [vmem:[#allocation14 + $0x1e4] sm:$0xf] }
 0x483   :  { %v3301_v12 = vpop.f32.mrf.mxu1 }
 0x484   :  { %v3299_v16 = vadd.f32 %v3298_v40, %v3250_v33  ;;  %v3330_v10 = vmax.f32 %v3199_v11, 0.0  ;;  %v8474_v33 = vld [vmem:[#allocation14 + $0x1e8] sm:$0xf0] }
 0x486   :  { %v3333_v9 = vmax.f32 %v3299_v16, 0.0  ;;  %3958 = vmatmul.bf16.gmra.mxu3 %v12095_v29  ;;  %4056 = vmatmul.bf16.gmra.mxu1 %v10646_v30  ;;  %v8477_v16 = vor.u32 %v9514_v49, %v8474_v33  ;;  %v9530_v30 = vld [vmem:[#allocation14 + $0x264] sm:$0xf] }
 0x487   :  { %v3151_v36 = vpop.f32.mrf.mxu2 }
 0x488   :  { %v3152_v13 = vadd.f32 %v3151_v36, %v11003_v7  ;;  %v11082_v62 = vpack.c.bf16 %v3333_v9, %v3331_v26  ;;  %v8538_v36 = vld [vmem:[#allocation14 + $0x268] sm:$0xf0]  ;;  %4259 = vmatpush.bf16.msra.mxu2 %v8477_v16 }
 0x489   :  { %v3203_v5 = vpop.f32.mrf.mxu3  ;;  %v3252_v50 = vpop.f32.mrf.mxu0  ;;  %v8541_v26 = vor.u32 %v9530_v30, %v8538_v36 }
 0x48a   :  { %12096 = vst [vmem:[#allocation51_spill] sm:$0xff] %v11082_v62  ;;  %v3201_v35 = vadd.f32 %v3200_v54, %v3152_v13  ;;  %v3253_v3 = vadd.f32 %v3252_v50, %v10998_v21 }
 0x48b   :  { %v3303_v45 = vpop.f32.mrf.mxu1  ;;  %4308 = vmatpush.bf16.msrb.mxu3 %v8541_v26  ;;  %v9528_v26 = vld [vmem:[#allocation14 + $0x254] sm:$0xf] }
 0x48c   :  { %v3332_v18 = vmax.f32 %v3201_v35, 0.0  ;;  %v3302_v40 = vadd.f32 %v3301_v12, %v3253_v3  ;;  %3909 = vmatmul.bf16.gmra.mxu2 %v12097_v31  ;;  %4007 = vmatmul.bf16.gmra.mxu0 %v10522_v34 }
 0x48e   :  { %v11087_v9 = vpack.c.bf16 %v3332_v18, %v3330_v10  ;;  %v3335_v62 = vmax.f32 %v3302_v40, 0.0  ;;  %v8466_v40 = vld [vmem:[#allocation14 + $0x1d8] sm:$0xf0] }
 0x48f   :  { %v3154_v38 = vpop.f32.mrf.mxu2 }
 0x490   :  { %v3155_v54 = vadd.f32 %v3154_v38, %v11003_v7 }
 0x491   :  { %v3205_v11 = vpop.f32.mrf.mxu3  ;;  %v3254_v13 = vpop.f32.mrf.mxu0 }
 0x492   :  { %v3204_v12 = vadd.f32 %v3203_v5, %v3155_v54  ;;  %v3255_v50 = vadd.f32 %v3254_v13, %v10998_v21  ;;  %v12099_v21 = vld [vmem:[#allocation48_spill] sm:$0xff] }
 0x493   :  { %v4022_v35 = vpop.f32.mrf.mxu1 }
 0x494   :  { %v3304_v3 = vadd.f32 %v3303_v45, %v3255_v50  ;;  %v3334_v5 = vmax.f32 %v3204_v12, 0.0  ;;  %v9512_v45 = vld [vmem:[#allocation14 + $0x1d4] sm:$0xf] }
 0x496   :  { %v3337_v19 = vmax.f32 %v3304_v3, 0.0  ;;  %4119 = vmatmul.bf16.vlgmr.msra.gmra.mxu3 %v12079_v14  ;;  %4217 = vmatmul.bf16.vlgmr.msra.gmra.mxu1 %v12080_v27  ;;  %v8469_v14 = vor.u32 %v9512_v45, %v8466_v40  ;;  %v8530_v27 = vld [vmem:[#allocation14 + $0x258] sm:$0xf0]  ;;  %v12101_v45 = vld [vmem:[#allocation49_spill] sm:$0xff]  ;;  %v8458_v40 = vld [vmem:[#allocation14 + $0x1c8] sm:$0xf0] }
 0x497   :  { %v3156_v30 = vpop.f32.mrf.mxu2  ;;  %v8533_v54 = vor.u32 %v9528_v26, %v8530_v27  ;;  %v8522_v26 = vld [vmem:[#allocation14 + $0x248] sm:$0xf0] }
 0x498   :  { %v3157_v10 = vadd.f32 %v3156_v30, %v11003_v7  ;;  %v11094_v18 = vpack.c.bf16 %v3337_v19, %v3335_v62  ;;  %4260 = vmatpush.bf16.msra.mxu2 %v8469_v14 }
 0x499   :  { %v3924_v38 = vpop.f32.mrf.mxu3  ;;  %v3973_v49 = vpop.f32.mrf.mxu0  ;;  %4309 = vmatpush.bf16.msrb.mxu3 %v8533_v54 }
 0x49a   :  { %12098 = vst [vmem:[#allocation61_spill] sm:$0xff] %v11094_v18  ;;  %v3206_v33 = vadd.f32 %v3205_v11, %v3157_v10 }
 0x49b   :  { %v4024_v16 = vpop.f32.mrf.mxu1 }
 0x49c   :  { %v3336_v36 = vmax.f32 %v3206_v33, 0.0  ;;  %4070 = vmatmul.bf16.vlgmr.msrb.gmra.mxu2 %v12099_v21  ;;  %4168 = vmatmul.bf16.vlgmr.msra.gmra.mxu0 %v12077_v6 }
 0x49e   :  { %v11098_v13 = vpack.c.bf16 %v3336_v36, %v3334_v5 }
 0x49f   :  { %v3875_v7 = vpop.f32.mrf.mxu2 }
 0x4a0   :  { %12100 = vst [vmem:[#allocation36_spill] sm:$0xff] %v11098_v13  ;;  %v3925_v19 = vadd.f32 %v3924_v38, %v3875_v7  ;;  %v9510_v38 = vld [vmem:[#allocation14 + $0x1c4] sm:$0xf] }
 0x4a1   :  { %v3926_v62 = vpop.f32.mrf.mxu3  ;;  %v3975_v11 = vpop.f32.mrf.mxu0 }
 0x4a2   :  { %v3974_v12 = vadd.f32 %v3973_v49, %v3925_v19  ;;  %v9526_v49 = vld [vmem:[#allocation14 + $0x244] sm:$0xf] }
 0x4a3   :  { %v4027_v50 = vpop.f32.mrf.mxu1 }
 0x4a4   :  { %v11100_v3 = vadd.f32 %v4022_v35, %v3974_v12  ;;  %v8461_v35 = vor.u32 %v9510_v38, %v8458_v40  ;;  %v12102_v38 = vld [vmem:[#allocation50_spill] sm:$0xff]  ;;  %v8450_v40 = vld [vmem:[#allocation14 + $0x1b8] sm:$0xf0] }
 0x4a6   :  { %4124 = vmatmul.bf16.gmra.mxu3 %v12082_v61  ;;  %4222 = vmatmul.bf16.gmra.mxu1 %v10520_v24  ;;  %v8525_v61 = vor.u32 %v9526_v49, %v8522_v26 }
 0x4a7   :  { %v3877_v6 = vpop.f32.mrf.mxu2  ;;  %4261 = vmatpush.bf16.msra.mxu2 %v8461_v35  ;;  %v8514_v35 = vld [vmem:[#allocation14 + $0x238] sm:$0xf0] }
 0x4a8   :  { %v3927_v30 = vadd.f32 %v3926_v62, %v3877_v6  ;;  %4310 = vmatpush.bf16.msrb.mxu3 %v8525_v61 }
 0x4a9   :  { %v3929_v10 = vpop.f32.mrf.mxu3  ;;  %v3978_v33 = vpop.f32.mrf.mxu0 }
 0x4aa   :  { %v3976_v5 = vadd.f32 %v3975_v11, %v3927_v30 }
 0x4ab   :  { %v4029_v36 = vpop.f32.mrf.mxu1 }
 0x4ac   :  { %4075 = vmatmul.bf16.gmra.mxu2 %v12101_v45  ;;  %4173 = vmatmul.bf16.gmra.mxu0 %v12081_v55  ;;  %v11106_v14 = vadd.f32 %v4024_v16, %v3976_v5 }
 0x4af   :  { %v3880_v27 = vpop.f32.mrf.mxu2 }
 0x4b0   :  { %v3930_v24 = vadd.f32 %v3929_v10, %v3880_v27  ;;  %v9508_v10 = vld [vmem:[#allocation14 + $0x1b4] sm:$0xf] }
 0x4b1   :  { %v3931_v54 = vpop.f32.mrf.mxu3  ;;  %v3980_v7 = vpop.f32.mrf.mxu0 }
 0x4b2   :  { %v3979_v19 = vadd.f32 %v3978_v33, %v3930_v24  ;;  %v9524_v33 = vld [vmem:[#allocation14 + $0x234] sm:$0xf] }
 0x4b3   :  { %v4032_v62 = vpop.f32.mrf.mxu1 }
 0x4b4   :  { %v11108_v11 = vadd.f32 %v4027_v50, %v3979_v19  ;;  %v8453_v50 = vor.u32 %v9508_v10, %v8450_v40  ;;  %v12103_v10 = vld [vmem:[#allocation52_spill] sm:$0xff]  ;;  %v8442_v40 = vld [vmem:[#allocation14 + $0x1a8] sm:$0xf0] }
 0x4b6   :  { %4129 = vmatmul.bf16.gmra.mxu3 %v12084_v25  ;;  %4227 = vmatmul.bf16.gmra.mxu1 %v10444_v32  ;;  %v8517_v25 = vor.u32 %v9524_v33, %v8514_v35 }
 0x4b7   :  { %v3882_v55 = vpop.f32.mrf.mxu2  ;;  %4262 = vmatpush.bf16.msra.mxu2 %v8453_v50  ;;  %v8506_v50 = vld [vmem:[#allocation14 + $0x228] sm:$0xf0] }
 0x4b8   :  { %v3932_v16 = vadd.f32 %v3931_v54, %v3882_v55  ;;  %4311 = vmatpush.bf16.msrb.mxu3 %v8517_v25 }
 0x4b9   :  { %v3934_v12 = vpop.f32.mrf.mxu3  ;;  %v3983_v6 = vpop.f32.mrf.mxu0 }
 0x4ba   :  { %v3981_v30 = vadd.f32 %v3980_v7, %v3932_v16 }
 0x4bb   :  { %v4034_v5 = vpop.f32.mrf.mxu1 }
 0x4bc   :  { %4080 = vmatmul.bf16.gmra.mxu2 %v12102_v38  ;;  %4178 = vmatmul.bf16.gmra.mxu0 %v12083_v48  ;;  %v11114_v49 = vadd.f32 %v4029_v36, %v3981_v30 }
 0x4bf   :  { %v3885_v26 = vpop.f32.mrf.mxu2 }
 0x4c0   :  { %v3935_v32 = vadd.f32 %v3934_v12, %v3885_v26  ;;  %v9506_v12 = vld [vmem:[#allocation14 + $0x1a4] sm:$0xf] }
 0x4c1   :  { %v3936_v61 = vpop.f32.mrf.mxu3  ;;  %v3985_v27 = vpop.f32.mrf.mxu0 }
 0x4c2   :  { %v3984_v24 = vadd.f32 %v3983_v6, %v3935_v32  ;;  %v9522_v6 = vld [vmem:[#allocation14 + $0x224] sm:$0xf] }
 0x4c3   :  { %v4037_v54 = vpop.f32.mrf.mxu1 }
 0x4c4   :  { %v11116_v7 = vadd.f32 %v4032_v62, %v3984_v24  ;;  %v8445_v62 = vor.u32 %v9506_v12, %v8442_v40  ;;  %v8672_v24 = vld [vmem:[#allocation13 + $0xf0] sm:$0xf]  ;;  %v9451_v40 = vld [vmem:[#allocation13 + $0xe4] sm:$0xf0] }
 0x4c6   :  { %4134 = vmatmul.bf16.gmra.mxu3 %v12086_v1  ;;  %4232 = vmatmul.bf16.gmra.mxu1 %v10462_v0  ;;  %v8509_v1 = vor.u32 %v9522_v6, %v8506_v50  ;;  %v9437_v50 = vld [vmem:[#allocation13 + $0x74] sm:$0xf0] }
 0x4c7   :  { %v3887_v48 = vpop.f32.mrf.mxu2  ;;  %4263 = vmatpush.bf16.msra.mxu2 %v8445_v62 }
 0x4c8   :  { %v3937_v36 = vadd.f32 %v3936_v61, %v3887_v48  ;;  %4312 = vmatpush.bf16.msrb.mxu3 %v8509_v1  ;;  %v12104_v1 = vld [vmem:[#allocation53_spill] sm:$0xff] }
 0x4c9   :  { %v3939_v19 = vpop.f32.mrf.mxu3  ;;  %v3988_v55 = vpop.f32.mrf.mxu0 }
 0x4ca   :  { %v3986_v16 = vadd.f32 %v3985_v27, %v3937_v36 }
 0x4cb   :  { %v4039_v30 = vpop.f32.mrf.mxu1 }
 0x4cc   :  { %4085 = vmatmul.bf16.gmra.mxu2 %v12103_v10  ;;  %4183 = vmatmul.bf16.gmra.mxu0 %v12085_v47  ;;  %v11122_v33 = vadd.f32 %v4034_v5, %v3986_v16  ;;  %v9453_v47 = vld [vmem:[#allocation13 + $0xf4] sm:$0xf0] }
 0x4cd   :  { %v8673_v5 = vor.u32 %v9453_v47, %v8672_v24  ;;  %v8498_v24 = vld [vmem:[#allocation14 + $0x218] sm:$0xf0]  ;;  %v8656_v47 = vld [vmem:[#allocation13 + $0xd0] sm:$0xf] }
 0x4cf   :  { %v3890_v35 = vpop.f32.mrf.mxu2  ;;  %4565 = vmatpush.bf16.msrb.mxu1 %v8673_v5 }
 0x4d0   :  { %v3940_v0 = vadd.f32 %v3939_v19, %v3890_v35  ;;  %v8664_v19 = vld [vmem:[#allocation13 + $0xe0] sm:$0xf] }
 0x4d1   :  { %v3941_v25 = vpop.f32.mrf.mxu3  ;;  %v3990_v26 = vpop.f32.mrf.mxu0  ;;  %v8665_v62 = vor.u32 %v9451_v40, %v8664_v19  ;;  %v8600_v19 = vld [vmem:[#allocation13 + $0x60] sm:$0xf]  ;;  %v9435_v40 = vld [vmem:[#allocation13 + $0x64] sm:$0xf0] }
 0x4d2   :  { %v3989_v32 = vadd.f32 %v3988_v55, %v3940_v0  ;;  %v9520_v0 = vld [vmem:[#allocation14 + $0x214] sm:$0xf] }
 0x4d3   :  { %v4042_v61 = vpop.f32.mrf.mxu1  ;;  %4566 = vmatpush.bf16.msrb.mxu1 %v8665_v62  ;;  %v8501_v5 = vor.u32 %v9520_v0, %v8498_v24 }
 0x4d4   :  { %v11124_v27 = vadd.f32 %v4037_v54, %v3989_v32  ;;  %v8608_v54 = vld [vmem:[#allocation13 + $0x70] sm:$0xf] }
 0x4d5   :  { %v8609_v35 = vor.u32 %v9437_v50, %v8608_v54  ;;  %4313 = vmatpush.bf16.msrb.mxu3 %v8501_v5  ;;  %v8584_v5 = vld [vmem:[#allocation13 + $0x40] sm:$0xf] }
 0x4d6   :  { %4139 = vmatmul.bf16.gmra.mxu3 %v12088_v8  ;;  %4237 = vmatmul.bf16.gmra.mxu1 %v10479_v2  ;;  %v9504_v8 = vld [vmem:[#allocation14 + $0x194] sm:$0xf]  ;;  %v8434_v2 = vld [vmem:[#allocation14 + $0x198] sm:$0xf0] }
 0x4d7   :  { %v3892_v48 = vpop.f32.mrf.mxu2  ;;  %v8437_v32 = vor.u32 %v9504_v8, %v8434_v2  ;;  %4516 = vmatpush.bf16.msrb.mxu0 %v8609_v35  ;;  %v8592_v2 = vld [vmem:[#allocation13 + $0x50] sm:$0xf]  ;;  %v9433_v35 = vld [vmem:[#allocation13 + $0x54] sm:$0xf0] }
 0x4d8   :  { %v3942_v36 = vadd.f32 %v3941_v25, %v3892_v48  ;;  %v8593_v0 = vor.u32 %v9433_v35, %v8592_v2  ;;  %v8426_v2 = vld [vmem:[#allocation14 + $0x188] sm:$0xf0] }
 0x4d9   :  { %v3944_v16 = vpop.f32.mrf.mxu3  ;;  %v3993_v12 = vpop.f32.mrf.mxu0  ;;  %4264 = vmatpush.bf16.msra.mxu2 %v8437_v32  ;;  %v8640_v32 = vld [vmem:[#allocation13 + $0xb0] sm:$0xf] }
 0x4da   :  { %v3991_v6 = vadd.f32 %v3990_v26, %v3942_v36  ;;  %v9449_v26 = vld [vmem:[#allocation13 + $0xd4] sm:$0xf0] }
 0x4db   :  { %v11128_v55 = vpop.f32.mrf.mxu1  ;;  %v8657_v48 = vor.u32 %v9449_v26, %v8656_v47  ;;  %v9445_v47 = vld [vmem:[#allocation13 + $0xb4] sm:$0xf0] }
 0x4dc   :  { %4090 = vmatmul.bf16.gmra.mxu2 %v12104_v1  ;;  %4188 = vmatmul.bf16.gmra.mxu0 %v12087_v28  ;;  %v11132_v25 = vadd.f32 %v4039_v30, %v3991_v6  ;;  %v8601_v28 = vor.u32 %v9435_v40, %v8600_v19  ;;  %v8648_v30 = vld [vmem:[#allocation13 + $0xc0] sm:$0xf]  ;;  %v9447_v6 = vld [vmem:[#allocation13 + $0xc4] sm:$0xf0] }
 0x4dd   :  { %4567 = vmatpush.bf16.msrb.mxu1 %v8657_v48  ;;  %v8649_v50 = vor.u32 %v9447_v6, %v8648_v30  ;;  %v8632_v40 = vld [vmem:[#allocation13 + $0xa0] sm:$0xf] }
 0x4de   :  { %4517 = vmatpush.bf16.msrb.mxu0 %v8601_v28 }
 0x4df   :  { %v3895_v36 = vpop.f32.mrf.mxu2 }
 0x4e0   :  { %v3945_v13 = vadd.f32 %v3944_v16, %v3895_v36  ;;  %v8641_v16 = vor.u32 %v9445_v47, %v8640_v32  ;;  %v8490_v47 = vld [vmem:[#allocation14 + $0x208] sm:$0xf0] }
 0x4e1   :  { %v3946_v18 = vpop.f32.mrf.mxu3  ;;  %v3995_v54 = vpop.f32.mrf.mxu0  ;;  %4568 = vmatpush.bf16.msrb.mxu1 %v8649_v50  ;;  %v12105_v50 = vld [vmem:[#allocation55_spill] sm:$0xff] }
 0x4e2   :  { %v3994_v62 = vadd.f32 %v3993_v12, %v3945_v13  ;;  %4518 = vmatpush.bf16.msrb.mxu0 %v8593_v0  ;;  %v9431_v13 = vld [vmem:[#allocation13 + $0x44] sm:$0xf0] }
 0x4e3   :  { %v4047_v8 = vpop.f32.mrf.mxu1  ;;  %v8585_v48 = vor.u32 %v9431_v13, %v8584_v5 }
 0x4e4   :  { %v11134_v24 = vadd.f32 %v4042_v61, %v3994_v62  ;;  %v9443_v61 = vld [vmem:[#allocation13 + $0xa4] sm:$0xf0]  ;;  %v8576_v62 = vld [vmem:[#allocation13 + $0x30] sm:$0xf] }
 0x4e5   :  { %4569 = vmatpush.bf16.msrb.mxu1 %v8641_v16  ;;  %v8633_v30 = vor.u32 %v9443_v61, %v8632_v40  ;;  %v9441_v16 = vld [vmem:[#allocation13 + $0x94] sm:$0xf0] }
 0x4e6   :  { %4144 = vmatmul.bf16.gmra.mxu3 %v12090_v4  ;;  %4242 = vmatmul.bf16.gmra.mxu1 %v12091_v60  ;;  %v9429_v4 = vld [vmem:[#allocation13 + $0x34] sm:$0xf0]  ;;  %v9502_v60 = vld [vmem:[#allocation14 + $0x184] sm:$0xf] }
 0x4e7   :  { %v3897_v26 = vpop.f32.mrf.mxu2  ;;  %4519 = vmatpush.bf16.msrb.mxu0 %v8585_v48  ;;  %v8577_v35 = vor.u32 %v9429_v4, %v8576_v62  ;;  %v8429_v32 = vor.u32 %v9502_v60, %v8426_v2  ;;  %v9427_v48 = vld [vmem:[#allocation13 + $0x24] sm:$0xf0]  ;;  %v8560_v2 = vld [vmem:[#allocation13 + $0x10] sm:$0xf] }
 0x4e8   :  { %v3947_v12 = vadd.f32 %v3946_v18, %v3897_v26  ;;  %v9518_v18 = vld [vmem:[#allocation14 + $0x204] sm:$0xf] }
 0x4e9   :  { %v3949_v36 = vpop.f32.mrf.mxu3  ;;  %v3998_v19 = vpop.f32.mrf.mxu0  ;;  %4570 = vmatpush.bf16.msrb.mxu1 %v8633_v30  ;;  %v8493_v26 = vor.u32 %v9518_v18, %v8490_v47  ;;  %4265 = vmatpush.bf16.msra.mxu2 %v8429_v32  ;;  %v9425_v18 = vld [vmem:[#allocation13 + $0x14] sm:$0xf0]  ;;  %v9423_v32 = vld [vmem:[#allocation13 + $0x4] sm:$0xf0] }
 0x4ea   :  { %v3996_v28 = vadd.f32 %v3995_v54, %v3947_v12  ;;  %v8624_v54 = vld [vmem:[#allocation13 + $0x90] sm:$0xf]  ;;  %v8568_v12 = vld [vmem:[#allocation13 + $0x20] sm:$0xf]  ;;  %v8561_v47 = vor.u32 %v9425_v18, %v8560_v2 }
 0x4eb   :  { %v4049_v6 = vpop.f32.mrf.mxu1  ;;  %v8625_v5 = vor.u32 %v9441_v16, %v8624_v54  ;;  %4520 = vmatpush.bf16.msrb.mxu0 %v8577_v35  ;;  %4314 = vmatpush.bf16.msrb.mxu3 %v8493_v26  ;;  %v8569_v40 = vor.u32 %v9427_v48, %v8568_v12  ;;  %v8552_v35 = vld [vmem:[#allocation13] sm:$0xf] }
 0x4ec   :  { %4095 = vmatmul.bf16.gmra.mxu2 %v12105_v50  ;;  %4193 = vmatmul.bf16.gmra.mxu0 %v12089_v63  ;;  %v11141_v0 = vadd.f32 %v11128_v55, %v3996_v28  ;;  %v8616_v55 = vld [vmem:[#allocation13 + $0x80] sm:$0xf]  ;;  %v9439_v28 = vld [vmem:[#allocation13 + $0x84] sm:$0xf0]  ;;  %v8553_v26 = vor.u32 %v9423_v32, %v8552_v35 }
 0x4ed   :  { %4571 = vmatpush.bf16.msrb.mxu1 %v8625_v5  ;;  %v8617_v4 = vor.u32 %v9439_v28, %v8616_v55  ;;  %v12106_v48 = vld [vmem:[#allocation57_spill] sm:$0xff]  ;;  %v8674_v55 = vld [vmem:[#allocation13 + $0xf8] sm:$0xf0] }
 0x4ef   :  { %v3900_v13 = vpop.f32.mrf.mxu2  ;;  %4521 = vmatpush.bf16.msrb.mxu0 %v8569_v40 }
 0x4f0   :  { %v3950_v63 = vadd.f32 %v3949_v36, %v3900_v13 }
 0x4f1   :  { %v3951_v61 = vpop.f32.mrf.mxu3  ;;  %v4000_v62 = vpop.f32.mrf.mxu0  ;;  %4572 = vmatpush.bf16.msrb.mxu1 %v8617_v4 }
 0x4f2   :  { %v3999_v30 = vadd.f32 %v3998_v19, %v3950_v63  ;;  %v8610_v63 = vld [vmem:[#allocation13 + $0x78] sm:$0xf0] }
 0x4f3   :  { %v4052_v60 = vpop.f32.mrf.mxu1  ;;  %4522 = vmatpush.bf16.msrb.mxu0 %v8561_v47 }
 0x4f4   :  { %v11143_v54 = vadd.f32 %v4047_v8, %v3999_v30  ;;  %v9436_v8 = vld [vmem:[#allocation13 + $0x74] sm:$0xf] }
 0x4f6   :  { %4149 = vmatmul.bf16.gmra.mxu3 %v12093_v43  ;;  %4247 = vmatmul.bf16.gmra.mxu1 %v10510_v51  ;;  %v9452_v43 = vld [vmem:[#allocation13 + $0xf4] sm:$0xf]  ;;  %v8613_v51 = vor.u32 %v9436_v8, %v8610_v63  ;;  %v8666_v63 = vld [vmem:[#allocation13 + $0xe8] sm:$0xf0] }
 0x4f7   :  { %v3902_v36 = vpop.f32.mrf.mxu2  ;;  %4523 = vmatpush.bf16.msrb.mxu0 %v8553_v26  ;;  %v8677_v28 = vor.u32 %v9452_v43, %v8674_v55  ;;  %v12107_v26 = vld [vmem:[#allocation59_spill] sm:$0xff] }
 0x4f8   :  { %v3952_v16 = vadd.f32 %v3951_v61, %v3902_v36  ;;  %4614 = vmatpush.bf16.msrb.mxu2 %v8613_v51 }
 0x4f9   :  { %v3954_v19 = vpop.f32.mrf.mxu3  ;;  %v4003_v5 = vpop.f32.mrf.mxu0  ;;  %4663 = vmatpush.bf16.msra.mxu3 %v8677_v28 }
 0x4fa   :  { %v4001_v13 = vadd.f32 %v4000_v62, %v3952_v16 }
 0x4fb   :  { %v4054_v12 = vpop.f32.mrf.mxu1 }
 0x4fc   :  { %4100 = vmatmul.bf16.gmra.mxu2 %v12106_v48  ;;  %4198 = vmatmul.bf16.gmra.mxu0 %v12092_v57  ;;  %v11149_v40 = vadd.f32 %v4049_v6, %v4001_v13  ;;  %v8602_v13 = vld [vmem:[#allocation13 + $0x68] sm:$0xf0] }
 0x4ff   :  { %v3905_v30 = vpop.f32.mrf.mxu2 }
 0x500   :  { %v3955_v61 = vadd.f32 %v3954_v19, %v3905_v30  ;;  %v9434_v19 = vld [vmem:[#allocation13 + $0x64] sm:$0xf] }
 0x501   :  { %v3956_v4 = vpop.f32.mrf.mxu3  ;;  %v4005_v62 = vpop.f32.mrf.mxu0 }
 0x502   :  { %v4004_v2 = vadd.f32 %v4003_v5, %v3955_v61  ;;  %v9450_v5 = vld [vmem:[#allocation13 + $0xe4] sm:$0xf] }
 0x503   :  { %v4057_v18 = vpop.f32.mrf.mxu1 }
 0x504   :  { %v11151_v47 = vadd.f32 %v4052_v60, %v4004_v2  ;;  %v8605_v60 = vor.u32 %v9434_v19, %v8602_v13  ;;  %v8658_v13 = vld [vmem:[#allocation13 + $0xd8] sm:$0xf0] }
 0x506   :  { %4154 = vmatmul.bf16.gmra.mxu3 %v12097_v31  ;;  %4252 = vmatmul.bf16.gmra.mxu1 %v10522_v34  ;;  %v8669_v31 = vor.u32 %v9450_v5, %v8666_v63 }
 0x507   :  { %v3907_v57 = vpop.f32.mrf.mxu2  ;;  %4615 = vmatpush.bf16.msrb.mxu2 %v8605_v60 }
 0x508   :  { %v3957_v6 = vadd.f32 %v3956_v4, %v3907_v57  ;;  %4664 = vmatpush.bf16.msra.mxu3 %v8669_v31 }
 0x509   :  { %v3959_v36 = vpop.f32.mrf.mxu3  ;;  %v4008_v35 = vpop.f32.mrf.mxu0 }
 0x50a   :  { %v4006_v32 = vadd.f32 %v4005_v62, %v3957_v6 }
 0x50b   :  { %v4059_v16 = vpop.f32.mrf.mxu1 }
 0x50c   :  { %4105 = vmatmul.bf16.gmra.mxu2 %v12107_v26  ;;  %4203 = vmatmul.bf16.gmra.mxu0 %v12095_v29  ;;  %v11157_v8 = vadd.f32 %v4054_v12, %v4006_v32  ;;  %v9448_v32 = vld [vmem:[#allocation13 + $0xd4] sm:$0xf] }
 0x50d   :  { %v8661_v5 = vor.u32 %v9448_v32, %v8658_v13 }
 0x50f   :  { %v3910_v43 = vpop.f32.mrf.mxu2  ;;  %4665 = vmatpush.bf16.msra.mxu3 %v8661_v5 }
 0x510   :  { %v3960_v34 = vadd.f32 %v3959_v36, %v3910_v43  ;;  %v9432_v36 = vld [vmem:[#allocation13 + $0x54] sm:$0xf] }
 0x511   :  { %v3961_v51 = vpop.f32.mrf.mxu3  ;;  %v4010_v55 = vpop.f32.mrf.mxu0 }
 0x512   :  { %v4009_v28 = vadd.f32 %v4008_v35, %v3960_v34  ;;  %v8594_v35 = vld [vmem:[#allocation13 + $0x58] sm:$0xf0] }
 0x513   :  { %v4218_v30 = vpop.f32.mrf.mxu1 }
 0x514   :  { %v11159_v61 = vadd.f32 %v4057_v18, %v4009_v28 }
 0x516   :  { %4315 = vmatmul.bf16.vlgmr.msrb.gmra.mxu3 %v12099_v21  ;;  %4573 = vmatmul.bf16.vlgmr.msrb.gmra.mxu1 %v11009_v58  ;;  %v8597_v21 = vor.u32 %v9432_v36, %v8594_v35 }
 0x517   :  { %v3912_v29 = vpop.f32.mrf.mxu2 }
 0x518   :  { %v3962_v12 = vadd.f32 %v3961_v51, %v3912_v29  ;;  %4616 = vmatpush.bf16.msrb.mxu2 %v8597_v21 }
 0x519   :  { %v4120_v4 = vpop.f32.mrf.mxu3  ;;  %v4169_v62 = vpop.f32.mrf.mxu0 }
 0x51a   :  { %v4011_v2 = vadd.f32 %v4010_v55, %v3962_v12  ;;  %v4170_v57 = vadd.f32 %v4169_v62, %v4120_v4  ;;  %v9430_v12 = vld [vmem:[#allocation13 + $0x44] sm:$0xf]  ;;  %v8586_v4 = vld [vmem:[#allocation13 + $0x48] sm:$0xf0] }
 0x51b   :  { %v4220_v6 = vpop.f32.mrf.mxu1  ;;  %v9446_v62 = vld [vmem:[#allocation13 + $0xc4] sm:$0xf] }
 0x51c   :  { %4266 = vmatmul.bf16.vlgmr.msra.gmra.mxu2 %v12078_v23  ;;  %4524 = vmatmul.bf16.vlgmr.msrb.gmra.mxu0 %v11015_v17  ;;  %v11165_v18 = vadd.f32 %v4059_v16, %v4011_v2  ;;  %v11167_v19 = vadd.f32 %v4218_v30, %v4170_v57  ;;  %v8650_v57 = vld [vmem:[#allocation13 + $0xc8] sm:$0xf0] }
 0x51f   :  { %v4071_v60 = vpop.f32.mrf.mxu2 }
 0x520   :  { %v11170_v63 = vadd.f32 %v4071_v60, %v11100_v3 }
 0x521   :  { %v4122_v31 = vpop.f32.mrf.mxu3  ;;  %v4171_v23 = vpop.f32.mrf.mxu0 }
 0x522   :  { %v4172_v43 = vadd.f32 %v4171_v23, %v4122_v31 }
 0x523   :  { %v4223_v34 = vpop.f32.mrf.mxu1 }
 0x524   :  { %v11172_v51 = vadd.f32 %v4220_v6, %v4172_v43  ;;  %v8653_v6 = vor.u32 %v9446_v62, %v8650_v57 }
 0x526   :  { %4320 = vmatmul.bf16.gmra.mxu3 %v12101_v45  ;;  %4578 = vmatmul.bf16.gmra.mxu1 %v11022_v59  ;;  %v8589_v45 = vor.u32 %v9430_v12, %v8586_v4 }
 0x527   :  { %v4073_v16 = vpop.f32.mrf.mxu2  ;;  %4666 = vmatpush.bf16.msra.mxu3 %v8653_v6 }
 0x528   :  { %v11177_v55 = vadd.f32 %v4073_v16, %v11106_v14  ;;  %4617 = vmatpush.bf16.msrb.mxu2 %v8589_v45  ;;  %v8578_v16 = vld [vmem:[#allocation13 + $0x38] sm:$0xf0] }
 0x529   :  { %v4125_v28 = vpop.f32.mrf.mxu3  ;;  %v4174_v30 = vpop.f32.mrf.mxu0 }
 0x52a   :  { %v4175_v29 = vadd.f32 %v4174_v30, %v4125_v28  ;;  %v9444_v28 = vld [vmem:[#allocation13 + $0xb4] sm:$0xf] }
 0x52b   :  { %v4225_v3 = vpop.f32.mrf.mxu1 }
 0x52c   :  { %4271 = vmatmul.bf16.gmra.mxu2 %v10538_v20  ;;  %4529 = vmatmul.bf16.gmra.mxu0 %v11027_v52  ;;  %v11181_v2 = vadd.f32 %v4223_v34, %v4175_v29  ;;  %v9428_v34 = vld [vmem:[#allocation13 + $0x34] sm:$0xf]  ;;  %v8642_v29 = vld [vmem:[#allocation13 + $0xb8] sm:$0xf0] }
 0x52f   :  { %v4076_v36 = vpop.f32.mrf.mxu2 }
 0x530   :  { %v11184_v14 = vadd.f32 %v4076_v36, %v11108_v11 }
 0x531   :  { %v4127_v35 = vpop.f32.mrf.mxu3  ;;  %v4176_v32 = vpop.f32.mrf.mxu0 }
 0x532   :  { %v4177_v21 = vadd.f32 %v4176_v32, %v4127_v35 }
 0x533   :  { %v4228_v20 = vpop.f32.mrf.mxu1 }
 0x534   :  { %v11186_v13 = vadd.f32 %v4225_v3, %v4177_v21  ;;  %v8645_v3 = vor.u32 %v9444_v28, %v8642_v29 }
 0x536   :  { %4325 = vmatmul.bf16.gmra.mxu3 %v12102_v38  ;;  %4583 = vmatmul.bf16.gmra.mxu1 %v11034_v41  ;;  %v8581_v38 = vor.u32 %v9428_v34, %v8578_v16 }
 0x537   :  { %v4078_v5 = vpop.f32.mrf.mxu2  ;;  %4667 = vmatpush.bf16.msra.mxu3 %v8645_v3 }
 0x538   :  { %v11191_v60 = vadd.f32 %v4078_v5, %v11114_v49  ;;  %4618 = vmatpush.bf16.msrb.mxu2 %v8581_v38  ;;  %v8570_v5 = vld [vmem:[#allocation13 + $0x28] sm:$0xf0] }
 0x539   :  { %v4130_v31 = vpop.f32.mrf.mxu3  ;;  %v4179_v23 = vpop.f32.mrf.mxu0 }
 0x53a   :  { %v4180_v43 = vadd.f32 %v4179_v23, %v4130_v31  ;;  %v9442_v31 = vld [vmem:[#allocation13 + $0xa4] sm:$0xf] }
 0x53b   :  { %v4230_v11 = vpop.f32.mrf.mxu1 }
 0x53c   :  { %4276 = vmatmul.bf16.gmra.mxu2 %v10546_v46  ;;  %4534 = vmatmul.bf16.gmra.mxu0 %v11039_v15  ;;  %v11195_v30 = vadd.f32 %v4228_v20, %v4180_v43  ;;  %v9426_v20 = vld [vmem:[#allocation13 + $0x24] sm:$0xf]  ;;  %v8634_v43 = vld [vmem:[#allocation13 + $0xa8] sm:$0xf0] }
 0x53f   :  { %v4081_v12 = vpop.f32.mrf.mxu2 }
 0x540   :  { %v11198_v49 = vadd.f32 %v4081_v12, %v11116_v7 }
 0x541   :  { %v4132_v4 = vpop.f32.mrf.mxu3  ;;  %v4181_v62 = vpop.f32.mrf.mxu0 }
 0x542   :  { %v4182_v45 = vadd.f32 %v4181_v62, %v4132_v4 }
 0x543   :  { %v4233_v46 = vpop.f32.mrf.mxu1 }
 0x544   :  { %v11200_v57 = vadd.f32 %v4230_v11, %v4182_v45  ;;  %v8637_v11 = vor.u32 %v9442_v31, %v8634_v43 }
 0x546   :  { %4330 = vmatmul.bf16.gmra.mxu3 %v12103_v10  ;;  %4588 = vmatmul.bf16.gmra.mxu1 %v11046_v22  ;;  %v8573_v10 = vor.u32 %v9426_v20, %v8570_v5 }
 0x547   :  { %v4083_v6 = vpop.f32.mrf.mxu2  ;;  %4668 = vmatpush.bf16.msra.mxu3 %v8637_v11 }
 0x548   :  { %v11205_v36 = vadd.f32 %v4083_v6, %v11122_v33  ;;  %4619 = vmatpush.bf16.msrb.mxu2 %v8573_v10  ;;  %v8562_v6 = vld [vmem:[#allocation13 + $0x18] sm:$0xf0] }
 0x549   :  { %v4135_v35 = vpop.f32.mrf.mxu3  ;;  %v4184_v32 = vpop.f32.mrf.mxu0 }
 0x54a   :  { %v4185_v21 = vadd.f32 %v4184_v32, %v4135_v35  ;;  %v9440_v35 = vld [vmem:[#allocation13 + $0x94] sm:$0xf] }
 0x54b   :  { %v4235_v7 = vpop.f32.mrf.mxu1 }
 0x54c   :  { %4281 = vmatmul.bf16.gmra.mxu2 %v10570_v39  ;;  %4539 = vmatmul.bf16.gmra.mxu0 %v11051_v44  ;;  %v11209_v23 = vadd.f32 %v4233_v46, %v4185_v21  ;;  %v9424_v46 = vld [vmem:[#allocation13 + $0x14] sm:$0xf]  ;;  %v8626_v21 = vld [vmem:[#allocation13 + $0x98] sm:$0xf0] }
 0x54f   :  { %v4086_v34 = vpop.f32.mrf.mxu2 }
 0x550   :  { %v11212_v33 = vadd.f32 %v4086_v34, %v11124_v27 }
 0x551   :  { %v4137_v16 = vpop.f32.mrf.mxu3  ;;  %v4186_v28 = vpop.f32.mrf.mxu0 }
 0x552   :  { %v4187_v38 = vadd.f32 %v4186_v28, %v4137_v16 }
 0x553   :  { %v4238_v39 = vpop.f32.mrf.mxu1 }
 0x554   :  { %v11214_v29 = vadd.f32 %v4235_v7, %v4187_v38  ;;  %v8629_v7 = vor.u32 %v9440_v35, %v8626_v21  ;;  %v9549_v38 = vld [vmem:[#allocation16 + $0x74] sm:$0xf0]  ;;  %v8728_v21 = vld [vmem:[#allocation16 + $0x60] sm:$0xf] }
 0x556   :  { %4335 = vmatmul.bf16.gmra.mxu3 %v12104_v1  ;;  %4593 = vmatmul.bf16.gmra.mxu1 %v11058_v37  ;;  %v8565_v1 = vor.u32 %v9424_v46, %v8562_v6 }
 0x557   :  { %v4088_v3 = vpop.f32.mrf.mxu2  ;;  %4669 = vmatpush.bf16.msra.mxu3 %v8629_v7  ;;  %v9547_v7 = vld [vmem:[#allocation16 + $0x64] sm:$0xf0] }
 0x558   :  { %v11219_v12 = vadd.f32 %v4088_v3, %v11132_v25  ;;  %4620 = vmatpush.bf16.msrb.mxu2 %v8565_v1  ;;  %v12109_v3 = vld [vmem:[#allocation60_spill] sm:$0xff] }
 0x559   :  { %v4140_v4 = vpop.f32.mrf.mxu3  ;;  %v4189_v62 = vpop.f32.mrf.mxu0 }
 0x55a   :  { %v4190_v45 = vadd.f32 %v4189_v62, %v4140_v4  ;;  %v9422_v4 = vld [vmem:[#allocation13 + $0x4] sm:$0xf]  ;;  %v8554_v62 = vld [vmem:[#allocation13 + $0x8] sm:$0xf0] }
 0x55b   :  { %v11221_v27 = vpop.f32.mrf.mxu1  ;;  %v8557_v6 = vor.u32 %v9422_v4, %v8554_v62  ;;  %v8712_v62 = vld [vmem:[#allocation16 + $0x40] sm:$0xf] }
 0x55c   :  { %4286 = vmatmul.bf16.gmra.mxu2 %v10590_v42  ;;  %4544 = vmatmul.bf16.gmra.mxu0 %v11063_v53  ;;  %v11225_v32 = vadd.f32 %v4238_v39, %v4190_v45  ;;  %v12108_v39 = vld [vmem:[#allocation54_spill] sm:$0xff]  ;;  %v9438_v45 = vld [vmem:[#allocation13 + $0x84] sm:$0xf] }
 0x55d   :  { %4621 = vmatpush.bf16.msrb.mxu2 %v8557_v6 }
 0x55f   :  { %v4091_v20 = vpop.f32.mrf.mxu2 }
 0x560   :  { %v11228_v25 = vadd.f32 %v4091_v20, %v11134_v24  ;;  %v8736_v24 = vld [vmem:[#allocation16 + $0x70] sm:$0xf] }
 0x561   :  { %v11230_v5 = vpop.f32.mrf.mxu3  ;;  %v11232_v31 = vpop.f32.mrf.mxu0 }
 0x563   :  { %v4243_v42 = vpop.f32.mrf.mxu1 }
 0x566   :  { %4340 = vmatmul.bf16.gmra.mxu3 %v12105_v50  ;;  %4598 = vmatmul.bf16.gmra.mxu1 %v11070_v56  ;;  %v8737_v50 = vor.u32 %v9549_v38, %v8736_v24  ;;  %v9545_v24 = vld [vmem:[#allocation16 + $0x54] sm:$0xf0] }
 0x567   :  { %v4093_v10 = vpop.f32.mrf.mxu2 }
 0x568   :  { %v11237_v43 = vadd.f32 %v4093_v10, %v11141_v0  ;;  %v8618_v0 = vld [vmem:[#allocation13 + $0x88] sm:$0xf0]  ;;  %4996 = vmatpush.bf16.msra.mxu0 %v8737_v50  ;;  %v8729_v10 = vor.u32 %v9547_v7, %v8728_v21  ;;  %v8704_v21 = vld [vmem:[#allocation16 + $0x30] sm:$0xf]  ;;  %v9541_v7 = vld [vmem:[#allocation16 + $0x34] sm:$0xf0] }
 0x569   :  { %v4145_v11 = vpop.f32.mrf.mxu3  ;;  %v4194_v34 = vpop.f32.mrf.mxu0  ;;  %v8621_v35 = vor.u32 %v9438_v45, %v8618_v0 }
 0x56a   :  { %v4195_v16 = vadd.f32 %v4194_v34, %v4145_v11 }
 0x56b   :  { %v11239_v28 = vpop.f32.mrf.mxu1  ;;  %4670 = vmatpush.bf16.msra.mxu3 %v8621_v35 }
 0x56c   :  { %4291 = vmatmul.bf16.gmra.mxu2 %v12108_v39  ;;  %4549 = vmatmul.bf16.gmra.mxu0 %v12109_v3  ;;  %v11243_v46 = vadd.f32 %v4243_v42, %v4195_v16  ;;  %v8720_v16 = vld [vmem:[#allocation16 + $0x50] sm:$0xf] }
 0x56d   :  { %4997 = vmatpush.bf16.msra.mxu0 %v8729_v10  ;;  %v8721_v38 = vor.u32 %v9545_v24, %v8720_v16  ;;  %v12110_v39 = vld [vmem:[#allocation51_spill] sm:$0xff]  ;;  %v12112_v10 = vld [vmem:[#allocation56_spill] sm:$0xff] }
 0x56f   :  { %v4096_v1 = vpop.f32.mrf.mxu2 }
 0x570   :  { %v11246_v20 = vadd.f32 %v4096_v1, %v11143_v54  ;;  %v9543_v54 = vld [vmem:[#allocation16 + $0x44] sm:$0xf0] }
 0x571   :  { %v11248_v11 = vpop.f32.mrf.mxu3  ;;  %v11250_v34 = vpop.f32.mrf.mxu0  ;;  %4998 = vmatpush.bf16.msra.mxu0 %v8721_v38  ;;  %v8713_v45 = vor.u32 %v9543_v54, %v8712_v62  ;;  %v9539_v38 = vld [vmem:[#allocation16 + $0x24] sm:$0xf0] }
 0x573   :  { %v4248_v42 = vpop.f32.mrf.mxu1 }
 0x575   :  { %4999 = vmatpush.bf16.msra.mxu0 %v8713_v45 }
 0x576   :  { %4345 = vmatmul.bf16.gmra.mxu3 %v12106_v48  ;;  %4603 = vmatmul.bf16.gmra.mxu1 %v12110_v39  ;;  %v8705_v48 = vor.u32 %v9541_v7, %v8704_v21  ;;  %v8680_v21 = vld [vmem:[#allocation16] sm:$0xf]  ;;  %v9535_v7 = vld [vmem:[#allocation16 + $0x4] sm:$0xf0] }
 0x577   :  { %v4098_v4 = vpop.f32.mrf.mxu2 }
 0x578   :  { %v11255_v50 = vadd.f32 %v4098_v4, %v11149_v40  ;;  %v8696_v40 = vld [vmem:[#allocation16 + $0x20] sm:$0xf] }
 0x579   :  { %v4150_v6 = vpop.f32.mrf.mxu3  ;;  %v4199_v0 = vpop.f32.mrf.mxu0  ;;  %5000 = vmatpush.bf16.msra.mxu0 %v8705_v48  ;;  %v8697_v62 = vor.u32 %v9539_v38, %v8696_v40  ;;  %v8681_v48 = vor.u32 %v9535_v7, %v8680_v21 }
 0x57a   :  { %v4200_v35 = vadd.f32 %v4199_v0, %v4150_v6  ;;  %v8688_v0 = vld [vmem:[#allocation16 + $0x10] sm:$0xf] }
 0x57b   :  { %v11257_v1 = vpop.f32.mrf.mxu1 }
 0x57c   :  { %12111 = vst [vmem:[#allocation47_spill] sm:$0xff] %v11257_v1  ;;  %4296 = vmatmul.bf16.gmra.mxu2 %v12112_v10  ;;  %4554 = vmatmul.bf16.gmra.mxu0 %v11087_v9  ;;  %v11261_v16 = vadd.f32 %v4248_v42, %v4200_v35  ;;  %v9537_v10 = vld [vmem:[#allocation16 + $0x14] sm:$0xf0]  ;;  %v12114_v42 = vld [vmem:[#allocation61_spill] sm:$0xff] }
 0x57d   :  { %5001 = vmatpush.bf16.msra.mxu0 %v8697_v62  ;;  %v8689_v1 = vor.u32 %v9537_v10, %v8688_v0  ;;  %v12116_v62 = vld [vmem:[#allocation58_spill] sm:$0xff]  ;;  %v12117_v0 = vld [vmem:[#allocation36_spill] sm:$0xff] }
 0x57f   :  { %v4101_v24 = vpop.f32.mrf.mxu2 }
 0x580   :  { %v11264_v4 = vadd.f32 %v4101_v24, %v11151_v47 }
 0x581   :  { %v11266_v54 = vpop.f32.mrf.mxu3  ;;  %v11268_v45 = vpop.f32.mrf.mxu0  ;;  %5002 = vmatpush.bf16.msra.mxu0 %v8689_v1 }
 0x582   :  { %12113 = vst [vmem:[#allocation29_spill] sm:$0xff] %v11268_v45 }
 0x583   :  { %v4253_v6 = vpop.f32.mrf.mxu1 }
 0x585   :  { %5003 = vmatpush.bf16.msra.mxu0 %v8681_v48  ;;  %v9564_v48 = vld [vmem:[#allocation16 + $0xf4] sm:$0xf] }
 0x586   :  { %4350 = vmatmul.bf16.gmra.mxu3 %v12107_v26  ;;  %4608 = vmatmul.bf16.gmra.mxu1 %v12114_v42  ;;  %v9548_v42 = vld [vmem:[#allocation16 + $0x74] sm:$0xf] }
 0x587   :  { %v4103_v35 = vpop.f32.mrf.mxu2 }
 0x588   :  { %v11273_v47 = vadd.f32 %v4103_v35, %v11157_v8  ;;  %v8738_v8 = vld [vmem:[#allocation16 + $0x78] sm:$0xf0] }
 0x589   :  { %v4155_v24 = vpop.f32.mrf.mxu3  ;;  %v4204_v40 = vpop.f32.mrf.mxu0  ;;  %v8741_v7 = vor.u32 %v9548_v42, %v8738_v8 }
 0x58a   :  { %v4205_v38 = vadd.f32 %v4204_v40, %v4155_v24  ;;  %v8802_v40 = vld [vmem:[#allocation16 + $0xf8] sm:$0xf0] }
 0x58b   :  { %v11275_v45 = vpop.f32.mrf.mxu1  ;;  %5094 = vmatpush.bf16.msra.mxu2 %v8741_v7 }
 0x58c   :  { %12115 = vst [vmem:[#allocation43_spill] sm:$0xff] %v11275_v45  ;;  %4301 = vmatmul.bf16.gmra.mxu2 %v12116_v62  ;;  %4559 = vmatmul.bf16.gmra.mxu0 %v12117_v0  ;;  %v11279_v26 = vadd.f32 %v4253_v6, %v4205_v38  ;;  %v8800_v62 = vld [vmem:[#allocation16 + $0xf0] sm:$0xf]  ;;  %v8805_v38 = vor.u32 %v9564_v48, %v8802_v40  ;;  %v9565_v45 = vld [vmem:[#allocation16 + $0xf4] sm:$0xf0] }
 0x58d   :  { %v9546_v48 = vld [vmem:[#allocation16 + $0x64] sm:$0xf]  ;;  %v8730_v40 = vld [vmem:[#allocation16 + $0x68] sm:$0xf0] }
 0x58e   :  { %12118 = vst [vmem:[#allocation39_spill] sm:$0xff] %v11279_v26  ;;  %5143 = vmatpush.bf16.msrb.mxu3 %v8805_v38  ;;  %v8733_v38 = vor.u32 %v9546_v48, %v8730_v40 }
 0x58f   :  { %v4106_v10 = vpop.f32.mrf.mxu2 }
 0x590   :  { %v11282_v1 = vadd.f32 %v4106_v10, %v11159_v61  ;;  %v8801_v10 = vor.u32 %v9565_v45, %v8800_v62  ;;  %5095 = vmatpush.bf16.msra.mxu2 %v8733_v38 }
 0x591   :  { %v11284_v35 = vpop.f32.mrf.mxu3  ;;  %v11286_v21 = vpop.f32.mrf.mxu0 }
 0x592   :  { %12119 = vst [vmem:[#allocation32_spill] sm:$0xff] %v11282_v1  ;;  %5045 = vmatpush.bf16.msra.mxu1 %v8801_v10  ;;  %v9563_v1 = vld [vmem:[#allocation16 + $0xe4] sm:$0xf0] }
 0x593   :  { %12120 = vst [vmem:[#allocation31_spill] sm:$0xff] %v11284_v35  ;;  %v4574_v24 = vpop.f32.mrf.mxu1 }
 0x594   :  { %12121 = vst [vmem:[#allocation30_spill] sm:$0xff] %v11286_v21 }
 0x596   :  { %4671 = vmatmul.bf16.vlgmr.msra.gmra.mxu3 %v11009_v58  ;;  %v11297_v58 = vld [vmem:[%s11938_s14] sm:$0x3] }
 0x597   :  { %v4108_v6 = vpop.f32.mrf.mxu2  ;;  %12123 = vst [vmem:[#allocation33_spill] sm:$0xff] %v11297_v58 }
 0x598   :  { %v11290_v61 = vadd.f32 %v4108_v6, %v11165_v18  ;;  %v11300_v18 = vperm.slane %v11297_v58, 0 }
 0x599   :  { %v4316_v26 = vpop.f32.mrf.mxu3  ;;  %v4525_v0 = vpop.f32.mrf.mxu0 }
 0x59a   :  { %12122 = vst [vmem:[#allocation34_spill] sm:$0xff] %v11290_v61  ;;  %v4526_v42 = vadd.f32 %v4525_v0, %v11170_v63 }
 0x59b   :  { %v4576_v21 = vpop.f32.mrf.mxu1 }
 0x59c   :  { %4622 = vmatmul.bf16.vlgmr.msrb.gmra.mxu2 %v11015_v17  ;;  %v4575_v7 = vadd.f32 %v4574_v24, %v4526_v42  ;;  %v9562_v42 = vld [vmem:[#allocation16 + $0xe4] sm:$0xf] }
 0x59e   :  { %v4718_v10 = vadd.f32 %v11300_v18, %v4575_v7 }
 0x59f   :  { %v4267_v8 = vpop.f32.mrf.mxu2 }
 0x5a0   :  { %v4268_v45 = vadd.f32 %v4267_v8, %v11167_v19  ;;  %v8794_v19 = vld [vmem:[#allocation16 + $0xe8] sm:$0xf0]  ;;  %v8792_v8 = vld [vmem:[#allocation16 + $0xe0] sm:$0xf]  ;;  %v4750_v48 = vmax.f32 %v4718_v10, 0.0 }
 0x5a1   :  { %v4318_v62 = vpop.f32.mrf.mxu3  ;;  %v4527_v6 = vpop.f32.mrf.mxu0  ;;  %v8797_v35 = vor.u32 %v9562_v42, %v8794_v19 }
 0x5a2   :  { %v4528_v63 = vadd.f32 %v4527_v6, %v11177_v55  ;;  %v11304_v17 = vadd.f32 %v4316_v26, %v4268_v45  ;;  %v8793_v26 = vor.u32 %v9563_v1, %v8792_v8  ;;  %v9544_v1 = vld [vmem:[#allocation16 + $0x54] sm:$0xf] }
 0x5a3   :  { %v4579_v0 = vpop.f32.mrf.mxu1  ;;  %5144 = vmatpush.bf16.msrb.mxu3 %v8797_v35 }
 0x5a4   :  { %v4577_v61 = vadd.f32 %v4576_v21, %v4528_v63  ;;  %5046 = vmatpush.bf16.msra.mxu1 %v8793_v26  ;;  %v9561_v26 = vld [vmem:[#allocation16 + $0xd4] sm:$0xf0] }
 0x5a6   :  { %v4720_v24 = vadd.f32 %v11300_v18, %v4577_v61  ;;  %4676 = vmatmul.bf16.gmra.mxu3 %v11022_v59 }
 0x5a7   :  { %v4269_v58 = vpop.f32.mrf.mxu2 }
 0x5a8   :  { %v4752_v40 = vmax.f32 %v4720_v24, 0.0  ;;  %v4270_v55 = vadd.f32 %v4269_v58, %v11172_v51  ;;  %v8722_v58 = vld [vmem:[#allocation16 + $0x58] sm:$0xf0] }
 0x5a9   :  { %v4321_v45 = vpop.f32.mrf.mxu3  ;;  %v4530_v6 = vpop.f32.mrf.mxu0  ;;  %v8725_v24 = vor.u32 %v9544_v1, %v8722_v58 }
 0x5aa   :  { %v11310_v7 = vpack.c.bf16 %v4752_v40, %v4750_v48  ;;  %v11312_v21 = vadd.f32 %v4318_v62, %v4270_v55  ;;  %v4531_v61 = vadd.f32 %v4530_v6, %v11184_v14  ;;  %v8784_v48 = vld [vmem:[#allocation16 + $0xd0] sm:$0xf] }
 0x5ab   :  { %v4581_v59 = vpop.f32.mrf.mxu1  ;;  %5096 = vmatpush.bf16.msra.mxu2 %v8725_v24  ;;  %v9542_v24 = vld [vmem:[#allocation16 + $0x44] sm:$0xf] }
 0x5ac   :  { %4627 = vmatmul.bf16.gmra.mxu2 %v11027_v52  ;;  %5004 = vmatmul.bf16.vlgmr.msra.gmra.mxu0 %v11310_v7  ;;  %v4580_v63 = vadd.f32 %v4579_v0, %v4531_v61  ;;  %v9560_v0 = vld [vmem:[#allocation16 + $0xd4] sm:$0xf]  ;;  %v8785_v61 = vor.u32 %v9561_v26, %v8784_v48 }
 0x5ae   :  { %v4722_v14 = vadd.f32 %v11300_v18, %v4580_v63  ;;  %5047 = vmatpush.bf16.msra.mxu1 %v8785_v61 }
 0x5af   :  { %v4272_v38 = vpop.f32.mrf.mxu2 }
 0x5b0   :  { %v4273_v51 = vadd.f32 %v4272_v38, %v11181_v2  ;;  %v8786_v2 = vld [vmem:[#allocation16 + $0xd8] sm:$0xf0]  ;;  %v4754_v6 = vmax.f32 %v4722_v14, 0.0 }
 0x5b1   :  { %v4323_v10 = vpop.f32.mrf.mxu3  ;;  %v4532_v35 = vpop.f32.mrf.mxu0  ;;  %v8789_v55 = vor.u32 %v9560_v0, %v8786_v2 }
 0x5b2   :  { %v4533_v42 = vadd.f32 %v4532_v35, %v11191_v60  ;;  %v11319_v62 = vadd.f32 %v4321_v45, %v4273_v51 }
 0x5b3   :  { %v4584_v19 = vpop.f32.mrf.mxu1  ;;  %5145 = vmatpush.bf16.msrb.mxu3 %v8789_v55 }
 0x5b4   :  { %v4582_v52 = vadd.f32 %v4581_v59, %v4533_v42  ;;  %v8714_v42 = vld [vmem:[#allocation16 + $0x48] sm:$0xf0] }
 0x5b6   :  { %v4724_v8 = vadd.f32 %v11300_v18, %v4582_v52  ;;  %4681 = vmatmul.bf16.gmra.mxu3 %v11034_v41 }
 0x5b7   :  { %v4274_v40 = vpop.f32.mrf.mxu2 }
 0x5b8   :  { %v4275_v60 = vadd.f32 %v4274_v40, %v11186_v13  ;;  %v4756_v45 = vmax.f32 %v4724_v8, 0.0  ;;  %v8717_v8 = vor.u32 %v9542_v24, %v8714_v42  ;;  %v8776_v40 = vld [vmem:[#allocation16 + $0xc0] sm:$0xf]  ;;  %v9540_v24 = vld [vmem:[#allocation16 + $0x34] sm:$0xf] }
 0x5b9   :  { %v4326_v38 = vpop.f32.mrf.mxu3  ;;  %v4535_v51 = vpop.f32.mrf.mxu0  ;;  %v8706_v42 = vld [vmem:[#allocation16 + $0x38] sm:$0xf0] }
 0x5ba   :  { %v11325_v63 = vpack.c.bf16 %v4756_v45, %v4754_v6  ;;  %v11327_v59 = vadd.f32 %v4323_v10, %v4275_v60  ;;  %v4536_v1 = vadd.f32 %v4535_v51, %v11198_v49  ;;  %5097 = vmatpush.bf16.msra.mxu2 %v8717_v8  ;;  %v9559_v6 = vld [vmem:[#allocation16 + $0xc4] sm:$0xf0] }
 0x5bb   :  { %v4586_v41 = vpop.f32.mrf.mxu1  ;;  %v8777_v61 = vor.u32 %v9559_v6, %v8776_v40 }
 0x5bc   :  { %4632 = vmatmul.bf16.gmra.mxu2 %v11039_v15  ;;  %5009 = vmatmul.bf16.gmra.mxu0 %v11325_v63  ;;  %v4585_v35 = vadd.f32 %v4584_v19, %v4536_v1  ;;  %v9558_v19 = vld [vmem:[#allocation16 + $0xc4] sm:$0xf] }
 0x5bd   :  { %5048 = vmatpush.bf16.msra.mxu1 %v8777_v61 }
 0x5be   :  { %v4726_v49 = vadd.f32 %v11300_v18, %v4585_v35 }
 0x5bf   :  { %v4277_v58 = vpop.f32.mrf.mxu2 }
 0x5c0   :  { %v4278_v13 = vadd.f32 %v4277_v58, %v11195_v30  ;;  %v8778_v30 = vld [vmem:[#allocation16 + $0xc8] sm:$0xf0]  ;;  %v4758_v60 = vmax.f32 %v4726_v49, 0.0 }
 0x5c1   :  { %v4328_v14 = vpop.f32.mrf.mxu3  ;;  %v4537_v52 = vpop.f32.mrf.mxu0  ;;  %v8781_v26 = vor.u32 %v9558_v19, %v8778_v30  ;;  %v8768_v19 = vld [vmem:[#allocation16 + $0xb0] sm:$0xf] }
 0x5c2   :  { %v4538_v0 = vadd.f32 %v4537_v52, %v11205_v36  ;;  %v11334_v10 = vadd.f32 %v4326_v38, %v4278_v13 }
 0x5c3   :  { %v4589_v2 = vpop.f32.mrf.mxu1  ;;  %5146 = vmatpush.bf16.msrb.mxu3 %v8781_v26 }
 0x5c4   :  { %v4587_v15 = vadd.f32 %v4586_v41, %v4538_v0  ;;  %v8709_v0 = vor.u32 %v9540_v24, %v8706_v42 }
 0x5c6   :  { %v4728_v48 = vadd.f32 %v11300_v18, %v4587_v15  ;;  %4686 = vmatmul.bf16.gmra.mxu3 %v11046_v22  ;;  %5098 = vmatpush.bf16.msra.mxu2 %v8709_v0 }
 0x5c7   :  { %v4279_v55 = vpop.f32.mrf.mxu2 }
 0x5c8   :  { %v4280_v36 = vadd.f32 %v4279_v55, %v11200_v57  ;;  %v4760_v45 = vmax.f32 %v4728_v48, 0.0  ;;  %v9557_v55 = vld [vmem:[#allocation16 + $0xb4] sm:$0xf0] }
 0x5c9   :  { %v4331_v38 = vpop.f32.mrf.mxu3  ;;  %v4540_v51 = vpop.f32.mrf.mxu0 }
 0x5ca   :  { %v11340_v1 = vpack.c.bf16 %v4760_v45, %v4758_v60  ;;  %v11342_v41 = vadd.f32 %v4328_v14, %v4280_v36  ;;  %v4541_v58 = vadd.f32 %v4540_v51, %v11212_v33  ;;  %v8769_v60 = vor.u32 %v9557_v55, %v8768_v19 }
 0x5cb   :  { %v4591_v22 = vpop.f32.mrf.mxu1 }
 0x5cc   :  { %4637 = vmatmul.bf16.gmra.mxu2 %v11051_v44  ;;  %5014 = vmatmul.bf16.gmra.mxu0 %v11340_v1  ;;  %v4590_v13 = vadd.f32 %v4589_v2, %v4541_v58  ;;  %v9556_v2 = vld [vmem:[#allocation16 + $0xb4] sm:$0xf] }
 0x5cd   :  { %5049 = vmatpush.bf16.msra.mxu1 %v8769_v60 }
 0x5ce   :  { %v4730_v33 = vadd.f32 %v11300_v18, %v4590_v13  ;;  %v8698_v13 = vld [vmem:[#allocation16 + $0x28] sm:$0xf0] }
 0x5cf   :  { %v4282_v35 = vpop.f32.mrf.mxu2 }
 0x5d0   :  { %v4283_v57 = vadd.f32 %v4282_v35, %v11209_v23  ;;  %v8770_v23 = vld [vmem:[#allocation16 + $0xb8] sm:$0xf0]  ;;  %v4762_v26 = vmax.f32 %v4730_v33, 0.0  ;;  %v9538_v35 = vld [vmem:[#allocation16 + $0x24] sm:$0xf] }
 0x5d1   :  { %v4333_v52 = vpop.f32.mrf.mxu3  ;;  %v4542_v8 = vpop.f32.mrf.mxu0  ;;  %v8773_v40 = vor.u32 %v9556_v2, %v8770_v23  ;;  %v8701_v42 = vor.u32 %v9538_v35, %v8698_v13  ;;  %v9554_v33 = vld [vmem:[#allocation16 + $0xa4] sm:$0xf] }
 0x5d2   :  { %v4543_v49 = vadd.f32 %v4542_v8, %v11219_v12  ;;  %v11349_v14 = vadd.f32 %v4331_v38, %v4283_v57 }
 0x5d3   :  { %v4594_v15 = vpop.f32.mrf.mxu1  ;;  %5147 = vmatpush.bf16.msrb.mxu3 %v8773_v40  ;;  %5099 = vmatpush.bf16.msra.mxu2 %v8701_v42 }
 0x5d4   :  { %v4592_v44 = vadd.f32 %v4591_v22, %v4543_v49 }
 0x5d6   :  { %v4732_v48 = vadd.f32 %v11300_v18, %v4592_v44  ;;  %4691 = vmatmul.bf16.gmra.mxu3 %v11058_v37  ;;  %v8762_v44 = vld [vmem:[#allocation16 + $0xa8] sm:$0xf0] }
 0x5d7   :  { %v4284_v30 = vpop.f32.mrf.mxu2 }
 0x5d8   :  { %v4285_v12 = vadd.f32 %v4284_v30, %v11214_v29  ;;  %v4764_v6 = vmax.f32 %v4732_v48, 0.0  ;;  %v8760_v48 = vld [vmem:[#allocation16 + $0xa0] sm:$0xf] }
 0x5d9   :  { %v4336_v36 = vpop.f32.mrf.mxu3  ;;  %v4545_v45 = vpop.f32.mrf.mxu0 }
 0x5da   :  { %v11355_v61 = vpack.c.bf16 %v4764_v6, %v4762_v26  ;;  %v11357_v38 = vadd.f32 %v4333_v52, %v4285_v12  ;;  %v4546_v51 = vadd.f32 %v4545_v45, %v11228_v25  ;;  %v4192_v52 = vadd.f32 %v11232_v31, %v11230_v5  ;;  %v9555_v31 = vld [vmem:[#allocation16 + $0xa4] sm:$0xf0]  ;;  %v8690_v45 = vld [vmem:[#allocation16 + $0x18] sm:$0xf0] }
 0x5db   :  { %v4596_v37 = vpop.f32.mrf.mxu1  ;;  %v8765_v5 = vor.u32 %v9554_v33, %v8762_v44  ;;  %v8761_v30 = vor.u32 %v9555_v31, %v8760_v48 }
 0x5dc   :  { %4642 = vmatmul.bf16.gmra.mxu2 %v11063_v53  ;;  %5019 = vmatmul.bf16.gmra.mxu0 %v11355_v61  ;;  %v4595_v58 = vadd.f32 %v4594_v15, %v4546_v51  ;;  %v4241_v15 = vadd.f32 %v11221_v27, %v4192_v52  ;;  %v9552_v52 = vld [vmem:[#allocation16 + $0x94] sm:$0xf] }
 0x5dd   :  { %5148 = vmatpush.bf16.msrb.mxu3 %v8765_v5  ;;  %5050 = vmatpush.bf16.msra.mxu1 %v8761_v30 }
 0x5de   :  { %v4734_v0 = vadd.f32 %v11300_v18, %v4595_v58  ;;  %v4197_v58 = vadd.f32 %v11250_v34, %v11248_v11  ;;  %v9553_v11 = vld [vmem:[#allocation16 + $0x94] sm:$0xf0]  ;;  %v9534_v34 = vld [vmem:[#allocation16 + $0x4] sm:$0xf] }
 0x5df   :  { %v4287_v22 = vpop.f32.mrf.mxu2 }
 0x5e0   :  { %v4288_v29 = vadd.f32 %v4287_v22, %v11225_v32  ;;  %v4246_v42 = vadd.f32 %v11239_v28, %v4197_v58 }
 0x5e1   :  { %v11363_v57 = vpop.f32.mrf.mxu3  ;;  %v4547_v24 = vpop.f32.mrf.mxu0 }
 0x5e2   :  { %v4548_v8 = vadd.f32 %v4547_v24, %v11237_v43  ;;  %v11368_v25 = vadd.f32 %v4336_v36, %v4288_v29  ;;  %v4766_v43 = vmax.f32 %v4734_v0, 0.0  ;;  %v9536_v36 = vld [vmem:[#allocation16 + $0x14] sm:$0xf] }
 0x5e3   :  { %v4599_v53 = vpop.f32.mrf.mxu1 }
 0x5e4   :  { %v4597_v49 = vadd.f32 %v4596_v37, %v4548_v8  ;;  %v8754_v8 = vld [vmem:[#allocation16 + $0x98] sm:$0xf0] }
 0x5e6   :  { %v4736_v32 = vadd.f32 %v11300_v18, %v4597_v49  ;;  %4696 = vmatmul.bf16.gmra.mxu3 %v11070_v56  ;;  %v8757_v49 = vor.u32 %v9552_v52, %v8754_v8  ;;  %v12127_v8 = vld [vmem:[#allocation32_spill] sm:$0xff] }
 0x5e7   :  { %v4289_v2 = vpop.f32.mrf.mxu2 }
 0x5e8   :  { %v11374_v23 = vadd.f32 %v4289_v2, %v4241_v15  ;;  %v4768_v19 = vmax.f32 %v4736_v32, 0.0  ;;  %5149 = vmatpush.bf16.msrb.mxu3 %v8757_v49 }
 0x5e9   :  { %v4341_v40 = vpop.f32.mrf.mxu3  ;;  %v4550_v55 = vpop.f32.mrf.mxu0 }
 0x5ea   :  { %v4551_v26 = vadd.f32 %v4550_v55, %v11246_v20  ;;  %v11377_v12 = vpack.c.bf16 %v4768_v19, %v4766_v43  ;;  %v8693_v20 = vor.u32 %v9536_v36, %v8690_v45  ;;  %v12124_v55 = vld [vmem:[#allocation29_spill] sm:$0xff]  ;;  %v12126_v36 = vld [vmem:[#allocation47_spill] sm:$0xff] }
 0x5eb   :  { %v4601_v56 = vpop.f32.mrf.mxu1 }
 0x5ec   :  { %4647 = vmatmul.bf16.gmra.mxu2 %v12109_v3  ;;  %5024 = vmatmul.bf16.gmra.mxu0 %v11377_v12  ;;  %v4600_v27 = vadd.f32 %v4599_v53, %v4551_v26  ;;  %v8752_v53 = vld [vmem:[#allocation16 + $0x90] sm:$0xf]  ;;  %v4202_v26 = vadd.f32 %v12124_v55, %v11266_v54 }
 0x5ed   :  { %5100 = vmatpush.bf16.msra.mxu2 %v8693_v20  ;;  %v8753_v33 = vor.u32 %v9553_v11, %v8752_v53 }
 0x5ee   :  { %v4738_v37 = vadd.f32 %v11300_v18, %v4600_v27  ;;  %v4251_v45 = vadd.f32 %v12126_v36, %v4202_v26  ;;  %v12133_v26 = vld [vmem:[#allocation43_spill] sm:$0xff] }
 0x5ef   :  { %v4292_v6 = vpop.f32.mrf.mxu2  ;;  %5051 = vmatpush.bf16.msra.mxu1 %v8753_v33 }
 0x5f0   :  { %v4293_v60 = vadd.f32 %v4292_v6, %v11243_v46  ;;  %v4770_v24 = vmax.f32 %v4738_v37, 0.0  ;;  %v8746_v37 = vld [vmem:[#allocation16 + $0x88] sm:$0xf0] }
 0x5f1   :  { %v11383_v51 = vpop.f32.mrf.mxu3  ;;  %v4552_v22 = vpop.f32.mrf.mxu0 }
 0x5f2   :  { %v4553_v29 = vadd.f32 %v4552_v22, %v11255_v50  ;;  %v11388_v3 = vadd.f32 %v4341_v40, %v4293_v60  ;;  %v8682_v50 = vld [vmem:[#allocation16 + $0x8] sm:$0xf0]  ;;  %v12125_v60 = vld [vmem:[#allocation61_spill] sm:$0xff] }
 0x5f3   :  { %v4604_v13 = vpop.f32.mrf.mxu1  ;;  %v8685_v44 = vor.u32 %v9534_v34, %v8682_v50  ;;  %v8744_v22 = vld [vmem:[#allocation16 + $0x80] sm:$0xf]  ;;  %v12129_v34 = vld [vmem:[#allocation39_spill] sm:$0xff] }
 0x5f4   :  { %v4602_v35 = vadd.f32 %v4601_v56, %v4553_v29  ;;  %v9551_v29 = vld [vmem:[#allocation16 + $0x84] sm:$0xf0] }
 0x5f5   :  { %5101 = vmatpush.bf16.msra.mxu2 %v8685_v44  ;;  %v12130_v44 = vld [vmem:[#allocation31_spill] sm:$0xff] }
 0x5f6   :  { %v4740_v46 = vadd.f32 %v11300_v18, %v4602_v35  ;;  %4701 = vmatmul.bf16.gmra.mxu3 %v12110_v39 }
 0x5f7   :  { %v4294_v0 = vpop.f32.mrf.mxu2 }
 0x5f8   :  { %v11393_v32 = vadd.f32 %v4294_v0, %v4246_v42  ;;  %v4772_v15 = vmax.f32 %v4740_v46, 0.0  ;;  %v12128_v0 = vld [vmem:[#allocation36_spill] sm:$0xff] }
 0x5f9   :  { %v4346_v48 = vpop.f32.mrf.mxu3  ;;  %v4555_v2 = vpop.f32.mrf.mxu0 }
 0x5fa   :  { %v11395_v5 = vpack.c.bf16 %v4772_v15, %v4770_v24  ;;  %v4556_v28 = vadd.f32 %v4555_v2, %v11264_v4  ;;  %v8745_v24 = vor.u32 %v9551_v29, %v8744_v22  ;;  %v9580_v29 = vld [vmem:[#allocation17 + $0x74] sm:$0xf] }
 0x5fb   :  { %v4606_v39 = vpop.f32.mrf.mxu1 }
 0x5fc   :  { %4652 = vmatmul.bf16.gmra.mxu2 %v11087_v9  ;;  %5029 = vmatmul.bf16.gmra.mxu0 %v11395_v5  ;;  %v4605_v43 = vadd.f32 %v4604_v13, %v4556_v28  ;;  %v12132_v28 = vld [vmem:[#allocation34_spill] sm:$0xff] }
 0x5fd   :  { %5052 = vmatpush.bf16.msra.mxu1 %v8745_v24  ;;  %v9596_v24 = vld [vmem:[#allocation17 + $0xf4] sm:$0xf] }
 0x5fe   :  { %v4742_v4 = vadd.f32 %v11300_v18, %v4605_v43 }
 0x5ff   :  { %v4297_v31 = vpop.f32.mrf.mxu2 }
 0x600   :  { %v4298_v19 = vadd.f32 %v4297_v31, %v11261_v16  ;;  %v9550_v16 = vld [vmem:[#allocation16 + $0x84] sm:$0xf]  ;;  %v4774_v54 = vmax.f32 %v4742_v4, 0.0 }
 0x601   :  { %v11401_v30 = vpop.f32.mrf.mxu3  ;;  %v4557_v40 = vpop.f32.mrf.mxu0  ;;  %v8749_v58 = vor.u32 %v9550_v16, %v8746_v37 }
 0x602   :  { %v4558_v56 = vadd.f32 %v4557_v40, %v11273_v47  ;;  %v11406_v27 = vadd.f32 %v4346_v48, %v4298_v19  ;;  %v12131_v48 = vld [vmem:[#allocation30_spill] sm:$0xff] }
 0x603   :  { %v4609_v35 = vpop.f32.mrf.mxu1  ;;  %5150 = vmatpush.bf16.msrb.mxu3 %v8749_v58  ;;  %v4207_v2 = vadd.f32 %v12131_v48, %v12130_v44 }
 0x604   :  { %v4607_v9 = vadd.f32 %v4606_v39, %v4558_v56 }
 0x605   :  { %v4256_v56 = vadd.f32 %v12133_v26, %v4207_v2 }
 0x606   :  { %v4744_v6 = vadd.f32 %v11300_v18, %v4607_v9  ;;  %4706 = vmatmul.bf16.gmra.mxu3 %v12125_v60 }
 0x607   :  { %v4299_v20 = vpop.f32.mrf.mxu2 }
 0x608   :  { %v11412_v47 = vadd.f32 %v4299_v20, %v4251_v45  ;;  %v4776_v13 = vmax.f32 %v4744_v6, 0.0 }
 0x609   :  { %v4351_v46 = vpop.f32.mrf.mxu3  ;;  %v4560_v42 = vpop.f32.mrf.mxu0 }
 0x60a   :  { %v11414_v52 = vpack.c.bf16 %v4776_v13, %v4774_v54  ;;  %v4561_v53 = vadd.f32 %v4560_v42, %v12127_v8  ;;  %v8866_v54 = vld [vmem:[#allocation17 + $0x78] sm:$0xf0] }
 0x60b   :  { %v4611_v43 = vpop.f32.mrf.mxu1  ;;  %v8869_v13 = vor.u32 %v9580_v29, %v8866_v54  ;;  %v9595_v54 = vld [vmem:[#allocation17 + $0xe4] sm:$0xf0] }
 0x60c   :  { %4657 = vmatmul.bf16.gmra.mxu2 %v12128_v0  ;;  %5034 = vmatmul.bf16.gmra.mxu0 %v11414_v52  ;;  %v4610_v11 = vadd.f32 %v4609_v35, %v4561_v53 }
 0x60d   :  { %5536 = vmatpush.bf16.msrb.mxu2 %v8869_v13 }
 0x60e   :  { %v4746_v19 = vadd.f32 %v11300_v18, %v4610_v11  ;;  %v9581_v11 = vld [vmem:[#allocation17 + $0x74] sm:$0xf0] }
 0x60f   :  { %v4302_v49 = vpop.f32.mrf.mxu2 }
 0x610   :  { %v4303_v50 = vadd.f32 %v4302_v49, %v12129_v34  ;;  %v4778_v9 = vmax.f32 %v4746_v19, 0.0  ;;  %v8864_v49 = vld [vmem:[#allocation17 + $0x70] sm:$0xf] }
 0x611   :  { %v11420_v15 = vpop.f32.mrf.mxu3  ;;  %v4562_v33 = vpop.f32.mrf.mxu0  ;;  %v8928_v34 = vld [vmem:[#allocation17 + $0xf0] sm:$0xf] }
 0x612   :  { %v4563_v39 = vadd.f32 %v4562_v33, %v12132_v28  ;;  %v11425_v31 = vadd.f32 %v4351_v46, %v4303_v50  ;;  %v8930_v46 = vld [vmem:[#allocation17 + $0xf8] sm:$0xf0]  ;;  %v8865_v50 = vor.u32 %v9581_v11, %v8864_v49  ;;  %v9597_v33 = vld [vmem:[#allocation17 + $0xf4] sm:$0xf0]  ;;  %v9592_v49 = vld [vmem:[#allocation17 + $0xd4] sm:$0xf] }
 0x613   :  { %v8933_v8 = vor.u32 %v9596_v24, %v8930_v46  ;;  %v8929_v2 = vor.u32 %v9597_v33, %v8928_v34  ;;  %v8914_v11 = vld [vmem:[#allocation17 + $0xd8] sm:$0xf0] }
 0x614   :  { %v4612_v40 = vadd.f32 %v4611_v43, %v4563_v39  ;;  %5438 = vmatpush.bf16.msrb.mxu0 %v8865_v50  ;;  %v8917_v50 = vor.u32 %v9592_v49, %v8914_v11  ;;  %v8834_v49 = vld [vmem:[#allocation17 + $0x38] sm:$0xf0] }
 0x615   :  { %5585 = vmatpush.bf16.msra.mxu3 %v8933_v8  ;;  %5487 = vmatpush.bf16.msrb.mxu1 %v8929_v2  ;;  %v8848_v2 = vld [vmem:[#allocation17 + $0x50] sm:$0xf] }
 0x616   :  { %v4748_v55 = vadd.f32 %v11300_v18, %v4612_v40  ;;  %v12134_v18 = vld [vmem:[#allocation33_spill] sm:$0xff] }
 0x617   :  { %v4304_v4 = vpop.f32.mrf.mxu2  ;;  %v11438_v58 = vperm.slane %v12134_v18, 1  ;;  %v9578_v40 = vld [vmem:[#allocation17 + $0x64] sm:$0xf]  ;;  %v8920_v18 = vld [vmem:[#allocation17 + $0xe0] sm:$0xf] }
 0x618   :  { %v11430_v6 = vadd.f32 %v4304_v4, %v4256_v56  ;;  %v4780_v60 = vmax.f32 %v4748_v55, 0.0  ;;  %v9594_v56 = vld [vmem:[#allocation17 + $0xe4] sm:$0xf]  ;;  %v8922_v4 = vld [vmem:[#allocation17 + $0xe8] sm:$0xf0]  ;;  %v8921_v24 = vor.u32 %v9595_v54, %v8920_v18 }
 0x619   :  { %v4672_v36 = vpop.f32.mrf.mxu3  ;;  %v8840_v54 = vld [vmem:[#allocation17 + $0x40] sm:$0xf] }
 0x61a   :  { %v11432_v45 = vpack.c.bf16 %v4780_v60, %v4778_v9  ;;  %v8925_v60 = vor.u32 %v9594_v56, %v8922_v4  ;;  %5488 = vmatpush.bf16.msrb.mxu1 %v8921_v24 }
 0x61c   :  { %5039 = vmatmul.bf16.gmra.mxu0 %v11432_v45  ;;  %5102 = vmatmul.bf16.vlgmr.msra.gmra.mxu2 %v11310_v7 }
 0x61d   :  { %5586 = vmatpush.bf16.msra.mxu3 %v8925_v60 }
 0x61f   :  { %v4623_v16 = vpop.f32.mrf.mxu2 }
 0x620   :  { %v4624_v22 = vadd.f32 %v4623_v16, %v11304_v17 }
 0x621   :  { %v4674_v37 = vpop.f32.mrf.mxu3  ;;  %5587 = vmatpush.bf16.msra.mxu3 %v8917_v50  ;;  %v9588_v50 = vld [vmem:[#allocation17 + $0xb4] sm:$0xf] }
 0x622   :  { %v4673_v20 = vadd.f32 %v4672_v36, %v4624_v22  ;;  %v8856_v22 = vld [vmem:[#allocation17 + $0x60] sm:$0xf] }
 0x624   :  { %v4719_v7 = vadd.f32 %v11438_v58, %v4673_v20  ;;  %v9579_v20 = vld [vmem:[#allocation17 + $0x64] sm:$0xf0] }
 0x625   :  { %v8857_v29 = vor.u32 %v9579_v20, %v8856_v22 }
 0x626   :  { %v4751_v44 = vmax.f32 %v4719_v7, 0.0  ;;  %v9576_v7 = vld [vmem:[#allocation17 + $0x54] sm:$0xf] }
 0x627   :  { %v4625_v35 = vpop.f32.mrf.mxu2  ;;  %5439 = vmatpush.bf16.msrb.mxu0 %v8857_v29 }
 0x628   :  { %v4626_v42 = vadd.f32 %v4625_v35, %v11312_v21 }
 0x629   :  { %v4677_v53 = vpop.f32.mrf.mxu3 }
 0x62a   :  { %v4675_v0 = vadd.f32 %v4674_v37, %v4626_v42 }
 0x62c   :  { %v4721_v17 = vadd.f32 %v11438_v58, %v4675_v0  ;;  %5107 = vmatmul.bf16.gmra.mxu2 %v11325_v63  ;;  %v8858_v63 = vld [vmem:[#allocation17 + $0x68] sm:$0xf0] }
 0x62d   :  { %v8861_v26 = vor.u32 %v9578_v40, %v8858_v63 }
 0x62e   :  { %v4753_v48 = vmax.f32 %v4721_v17, 0.0 }
 0x62f   :  { %v4628_v21 = vpop.f32.mrf.mxu2  ;;  %5537 = vmatpush.bf16.msrb.mxu2 %v8861_v26 }
 0x630   :  { %v4783_v28 = vpack.c.bf16 %v4753_v48, %v4751_v44  ;;  %v4629_v43 = vadd.f32 %v4628_v21, %v11319_v62  ;;  %v9577_v21 = vld [vmem:[#allocation17 + $0x54] sm:$0xf0] }
 0x631   :  { %v4679_v39 = vpop.f32.mrf.mxu3 }
 0x632   :  { %5053 = vmatmul.bf16.vlgmr.msra.gmra.mxu1 %v4783_v28  ;;  %5151 = vmatmul.bf16.vlgmr.msrb.gmra.mxu3 %v4783_v28  ;;  %v4678_v19 = vadd.f32 %v4677_v53, %v4629_v43  ;;  %v8912_v28 = vld [vmem:[#allocation17 + $0xd0] sm:$0xf]  ;;  %v9593_v43 = vld [vmem:[#allocation17 + $0xd4] sm:$0xf0] }
 0x633   :  { %v8913_v63 = vor.u32 %v9593_v43, %v8912_v28  ;;  %v8832_v28 = vld [vmem:[#allocation17 + $0x30] sm:$0xf]  ;;  %v9589_v43 = vld [vmem:[#allocation17 + $0xb4] sm:$0xf0] }
 0x634   :  { %v4723_v16 = vadd.f32 %v11438_v58, %v4678_v19 }
 0x635   :  { %5489 = vmatpush.bf16.msrb.mxu1 %v8913_v63 }
 0x636   :  { %v4755_v35 = vmax.f32 %v4723_v16, 0.0  ;;  %v9590_v16 = vld [vmem:[#allocation17 + $0xc4] sm:$0xf] }
 0x637   :  { %v4630_v55 = vpop.f32.mrf.mxu2 }
 0x638   :  { %v4631_v9 = vadd.f32 %v4630_v55, %v11327_v59 }
 0x639   :  { %v4682_v36 = vpop.f32.mrf.mxu3 }
 0x63a   :  { %v4680_v37 = vadd.f32 %v4679_v39, %v4631_v9  ;;  %v8849_v39 = vor.u32 %v9577_v21, %v8848_v2  ;;  %v9574_v9 = vld [vmem:[#allocation17 + $0x44] sm:$0xf] }
 0x63c   :  { %v4725_v62 = vadd.f32 %v11438_v58, %v4680_v37  ;;  %5112 = vmatmul.bf16.gmra.mxu2 %v11340_v1  ;;  %v8850_v1 = vld [vmem:[#allocation17 + $0x58] sm:$0xf0]  ;;  %5440 = vmatpush.bf16.msrb.mxu0 %v8849_v39  ;;  %v8906_v37 = vld [vmem:[#allocation17 + $0xc8] sm:$0xf0] }
 0x63d   :  { %v8853_v17 = vor.u32 %v9576_v7, %v8850_v1  ;;  %v8909_v22 = vor.u32 %v9590_v16, %v8906_v37  ;;  %v9586_v16 = vld [vmem:[#allocation17 + $0xa4] sm:$0xf]  ;;  %v8890_v37 = vld [vmem:[#allocation17 + $0xa8] sm:$0xf0] }
 0x63e   :  { %v4757_v13 = vmax.f32 %v4725_v62, 0.0 }
 0x63f   :  { %v4633_v59 = vpop.f32.mrf.mxu2  ;;  %5538 = vmatpush.bf16.msrb.mxu2 %v8853_v17  ;;  %5588 = vmatpush.bf16.msra.mxu3 %v8909_v22  ;;  %v9572_v17 = vld [vmem:[#allocation17 + $0x34] sm:$0xf]  ;;  %v8893_v22 = vor.u32 %v9586_v16, %v8890_v37 }
 0x640   :  { %v4785_v46 = vpack.c.bf16 %v4757_v13, %v4755_v35  ;;  %v4634_v8 = vadd.f32 %v4633_v59, %v11334_v10  ;;  %v9575_v35 = vld [vmem:[#allocation17 + $0x44] sm:$0xf0]  ;;  %v8904_v13 = vld [vmem:[#allocation17 + $0xc0] sm:$0xf] }
 0x641   :  { %v4684_v42 = vpop.f32.mrf.mxu3  ;;  %v8841_v24 = vor.u32 %v9575_v35, %v8840_v54  ;;  %v9591_v59 = vld [vmem:[#allocation17 + $0xc4] sm:$0xf0] }
 0x642   :  { %5058 = vmatmul.bf16.gmra.mxu1 %v4785_v46  ;;  %5156 = vmatmul.bf16.gmra.mxu3 %v4785_v46  ;;  %v4683_v53 = vadd.f32 %v4682_v36, %v4634_v8  ;;  %v8905_v8 = vor.u32 %v9591_v59, %v8904_v13  ;;  %v9587_v35 = vld [vmem:[#allocation17 + $0xa4] sm:$0xf0] }
 0x643   :  { %5441 = vmatpush.bf16.msrb.mxu0 %v8841_v24 }
 0x644   :  { %v4727_v44 = vadd.f32 %v11438_v58, %v4683_v53  ;;  %5490 = vmatpush.bf16.msrb.mxu1 %v8905_v8 }
 0x646   :  { %v4759_v19 = vmax.f32 %v4727_v44, 0.0 }
 0x647   :  { %v4635_v0 = vpop.f32.mrf.mxu2 }
 0x648   :  { %v4636_v34 = vadd.f32 %v4635_v0, %v11342_v41 }
 0x649   :  { %v4687_v33 = vpop.f32.mrf.mxu3 }
 0x64a   :  { %v4685_v48 = vadd.f32 %v4684_v42, %v4636_v34  ;;  %v8837_v34 = vor.u32 %v9572_v17, %v8834_v49  ;;  %v4349_v49 = vadd.f32 %v11401_v30, %v11412_v47 }
 0x64c   :  { %v4729_v10 = vadd.f32 %v11438_v58, %v4685_v48  ;;  %5117 = vmatmul.bf16.gmra.mxu2 %v11355_v61  ;;  %v8842_v61 = vld [vmem:[#allocation17 + $0x48] sm:$0xf0] }
 0x64d   :  { %v8845_v36 = vor.u32 %v9574_v9, %v8842_v61  ;;  %v9570_v9 = vld [vmem:[#allocation17 + $0x24] sm:$0xf]  ;;  %v8826_v61 = vld [vmem:[#allocation17 + $0x28] sm:$0xf0] }
 0x64e   :  { %v4761_v40 = vmax.f32 %v4729_v10, 0.0 }
 0x64f   :  { %v4638_v41 = vpop.f32.mrf.mxu2  ;;  %5539 = vmatpush.bf16.msrb.mxu2 %v8845_v36  ;;  %v8829_v36 = vor.u32 %v9570_v9, %v8826_v61 }
 0x650   :  { %v4787_v55 = vpack.c.bf16 %v4761_v40, %v4759_v19  ;;  %v4639_v56 = vadd.f32 %v4638_v41, %v11349_v14 }
 0x651   :  { %v4689_v26 = vpop.f32.mrf.mxu3 }
 0x652   :  { %5063 = vmatmul.bf16.gmra.mxu1 %v4787_v55  ;;  %5161 = vmatmul.bf16.gmra.mxu3 %v4787_v55  ;;  %v4688_v4 = vadd.f32 %v4687_v33, %v4639_v56  ;;  %v8898_v33 = vld [vmem:[#allocation17 + $0xb8] sm:$0xf0] }
 0x653   :  { %v8901_v48 = vor.u32 %v9588_v50, %v8898_v33  ;;  %5540 = vmatpush.bf16.msrb.mxu2 %v8837_v34  ;;  %v8816_v50 = vld [vmem:[#allocation17 + $0x10] sm:$0xf]  ;;  %v9569_v33 = vld [vmem:[#allocation17 + $0x14] sm:$0xf0] }
 0x654   :  { %v4731_v18 = vadd.f32 %v11438_v58, %v4688_v4 }
 0x655   :  { %5589 = vmatpush.bf16.msra.mxu3 %v8901_v48  ;;  %v9585_v48 = vld [vmem:[#allocation17 + $0x94] sm:$0xf0] }
 0x656   :  { %v4763_v46 = vmax.f32 %v4731_v18, 0.0 }
 0x657   :  { %v4640_v60 = vpop.f32.mrf.mxu2  ;;  %5541 = vmatpush.bf16.msrb.mxu2 %v8829_v36 }
 0x658   :  { %v4641_v62 = vadd.f32 %v4640_v60, %v11357_v38 }
 0x659   :  { %v4692_v20 = vpop.f32.mrf.mxu3  ;;  %5590 = vmatpush.bf16.msra.mxu3 %v8893_v22  ;;  %v8872_v22 = vld [vmem:[#allocation17 + $0x80] sm:$0xf] }
 0x65a   :  { %v4690_v29 = vadd.f32 %v4689_v26, %v4641_v62 }
 0x65c   :  { %v4733_v14 = vadd.f32 %v11438_v58, %v4690_v29  ;;  %5122 = vmatmul.bf16.gmra.mxu2 %v11377_v12  ;;  %v4339_v12 = vadd.f32 %v11363_v57, %v11374_v23  ;;  %v9573_v57 = vld [vmem:[#allocation17 + $0x34] sm:$0xf0]  ;;  %v8896_v23 = vld [vmem:[#allocation17 + $0xb0] sm:$0xf] }
 0x65d   :  { %v8833_v39 = vor.u32 %v9573_v57, %v8832_v28  ;;  %v8897_v63 = vor.u32 %v9589_v43, %v8896_v23 }
 0x65e   :  { %v4765_v42 = vmax.f32 %v4733_v14, 0.0  ;;  %v8824_v14 = vld [vmem:[#allocation17 + $0x20] sm:$0xf] }
 0x65f   :  { %v4643_v38 = vpop.f32.mrf.mxu2  ;;  %5442 = vmatpush.bf16.msrb.mxu0 %v8833_v39  ;;  %5491 = vmatpush.bf16.msrb.mxu1 %v8897_v63  ;;  %v9582_v63 = vld [vmem:[#allocation17 + $0x84] sm:$0xf] }
 0x660   :  { %v4789_v53 = vpack.c.bf16 %v4765_v42, %v4763_v46  ;;  %v4644_v1 = vadd.f32 %v4643_v38, %v11368_v25  ;;  %v9568_v38 = vld [vmem:[#allocation17 + $0x14] sm:$0xf] }
 0x661   :  { %v4694_v7 = vpop.f32.mrf.mxu3 }
 0x662   :  { %5068 = vmatmul.bf16.gmra.mxu1 %v4789_v53  ;;  %5166 = vmatmul.bf16.gmra.mxu3 %v4789_v53  ;;  %v4693_v0 = vadd.f32 %v4692_v20, %v4644_v1  ;;  %v8818_v53 = vld [vmem:[#allocation17 + $0x18] sm:$0xf0] }
 0x663   :  { %v8882_v1 = vld [vmem:[#allocation17 + $0x98] sm:$0xf0] }
 0x664   :  { %v4735_v2 = vadd.f32 %v11438_v58, %v4693_v0 }
 0x666   :  { %v4767_v19 = vmax.f32 %v4735_v2, 0.0 }
 0x667   :  { %v4645_v11 = vpop.f32.mrf.mxu2 }
 0x668   :  { %v4646_v44 = vadd.f32 %v4645_v11, %v4339_v12 }
 0x669   :  { %v4697_v10 = vpop.f32.mrf.mxu3 }
 0x66a   :  { %v4695_v21 = vadd.f32 %v4694_v7, %v4646_v44  ;;  %v9584_v7 = vld [vmem:[#allocation17 + $0x94] sm:$0xf]  ;;  %v8817_v44 = vor.u32 %v9569_v33, %v8816_v50  ;;  %v9058_v50 = vld [vmem:[#allocation19 + $0xf8] sm:$0xf0] }
 0x66b   :  { %v8885_v0 = vor.u32 %v9584_v7, %v8882_v1 }
 0x66c   :  { %v4737_v25 = vadd.f32 %v11438_v58, %v4695_v21  ;;  %5127 = vmatmul.bf16.gmra.mxu2 %v11395_v5  ;;  %v4344_v5 = vadd.f32 %v11383_v51, %v11393_v32  ;;  %v9571_v51 = vld [vmem:[#allocation17 + $0x24] sm:$0xf0]  ;;  %v8888_v32 = vld [vmem:[#allocation17 + $0xa0] sm:$0xf] }
 0x66d   :  { %v8825_v54 = vor.u32 %v9571_v51, %v8824_v14  ;;  %v8889_v59 = vor.u32 %v9587_v35, %v8888_v32  ;;  %5591 = vmatpush.bf16.msra.mxu3 %v8885_v0 }
 0x66e   :  { %v4769_v40 = vmax.f32 %v4737_v25, 0.0  ;;  %v5005_v25 = vpop.f32.mrf.mxu0 }
 0x66f   :  { %v4648_v41 = vpop.f32.mrf.mxu2  ;;  %5443 = vmatpush.bf16.msrb.mxu0 %v8825_v54  ;;  %5492 = vmatpush.bf16.msrb.mxu1 %v8889_v59  ;;  %v4830_v54 = vld [vmem:[%s11940_s16] sm:$0x3] }
 0x670   :  { %v4791_v55 = vpack.c.bf16 %v4769_v40, %v4767_v19  ;;  %v4649_v56 = vadd.f32 %v4648_v41, %v11388_v3  ;;  %v9566_v19 = vld [vmem:[#allocation17 + $0x4] sm:$0xf]  ;;  %v8810_v40 = vld [vmem:[#allocation17 + $0x8] sm:$0xf0] }
 0x671   :  { %v4699_v26 = vpop.f32.mrf.mxu3  ;;  %v8813_v41 = vor.u32 %v9566_v19, %v8810_v40  ;;  %v9056_v19 = vld [vmem:[#allocation19 + $0xf0] sm:$0xf]  ;;  %v9629_v40 = vld [vmem:[#allocation19 + $0xf4] sm:$0xf0] }
 0x672   :  { %5073 = vmatmul.bf16.gmra.mxu1 %v4791_v55  ;;  %5171 = vmatmul.bf16.gmra.mxu3 %v4791_v55  ;;  %v4698_v4 = vadd.f32 %v4697_v10, %v4649_v56  ;;  %v8874_v55 = vld [vmem:[#allocation17 + $0x88] sm:$0xf0] }
 0x673   :  { %5444 = vmatpush.bf16.msrb.mxu0 %v8817_v44 }
 0x674   :  { %v4739_v20 = vadd.f32 %v11438_v58, %v4698_v4 }
 0x676   :  { %v4771_v13 = vmax.f32 %v4739_v20, 0.0  ;;  %v5007_v56 = vpop.f32.mrf.mxu0  ;;  %v9583_v20 = vld [vmem:[#allocation17 + $0x84] sm:$0xf0] }
 0x677   :  { %v4650_v60 = vpop.f32.mrf.mxu2 }
 0x678   :  { %v4651_v62 = vadd.f32 %v4650_v60, %v4344_v5  ;;  %v8808_v60 = vld [vmem:[#allocation17] sm:$0xf] }
 0x679   :  { %v4702_v3 = vpop.f32.mrf.mxu3 }
 0x67a   :  { %v4700_v18 = vadd.f32 %v4699_v26, %v4651_v62  ;;  %v8877_v26 = vor.u32 %v9582_v63, %v8874_v55  ;;  %v9057_v63 = vor.u32 %v9629_v40, %v9056_v19  ;;  %v8976_v19 = vld [vmem:[#allocation19 + $0x50] sm:$0xf]  ;;  %v9609_v40 = vld [vmem:[#allocation19 + $0x54] sm:$0xf0] }
 0x67c   :  { %v4741_v29 = vadd.f32 %v11438_v58, %v4700_v18  ;;  %5132 = vmatmul.bf16.gmra.mxu2 %v11414_v52  ;;  %v8821_v52 = vor.u32 %v9568_v38, %v8818_v53  ;;  %5592 = vmatpush.bf16.msra.mxu3 %v8877_v26  ;;  %v8873_v18 = vor.u32 %v9583_v20, %v8872_v22  ;;  %v9050_v22 = vld [vmem:[#allocation19 + $0xe8] sm:$0xf0] }
 0x67e   :  { %v4773_v24 = vmax.f32 %v4741_v29, 0.0  ;;  %5542 = vmatpush.bf16.msrb.mxu2 %v8821_v52 }
 0x67f   :  { %v4653_v46 = vpop.f32.mrf.mxu2 }
 0x680   :  { %v4793_v42 = vpack.c.bf16 %v4773_v24, %v4771_v13  ;;  %v4654_v8 = vadd.f32 %v4653_v46, %v11406_v27  ;;  %v8880_v27 = vld [vmem:[#allocation17 + $0x90] sm:$0xf]  ;;  %v11485_v13 = vperm.slane %v4830_v54, 0 }
 0x681   :  { %v4704_v12 = vpop.f32.mrf.mxu3  ;;  %v8881_v21 = vor.u32 %v9585_v48, %v8880_v27 }
 0x682   :  { %5078 = vmatmul.bf16.gmra.mxu1 %v4793_v42  ;;  %5176 = vmatmul.bf16.gmra.mxu3 %v4793_v42  ;;  %v4703_v17 = vadd.f32 %v4702_v3, %v4654_v8  ;;  %v5006_v24 = vadd.f32 %v5005_v25, %v11485_v13  ;;  %v5008_v42 = vadd.f32 %v5007_v56, %v11485_v13  ;;  %v11491_v8 = vperm.slane %v4830_v54, 1 }
 0x683   :  { %5493 = vmatpush.bf16.msrb.mxu1 %v8881_v21  ;;  %5543 = vmatpush.bf16.msrb.mxu2 %v8813_v41 }
 0x684   :  { %v4743_v10 = vadd.f32 %v11438_v58, %v4703_v17  ;;  %v9612_v17 = vld [vmem:[#allocation19 + $0x74] sm:$0xf] }
 0x686   :  { %v4775_v30 = vmax.f32 %v4743_v10, 0.0 }
 0x687   :  { %v4655_v11 = vpop.f32.mrf.mxu2  ;;  %5494 = vmatpush.bf16.msrb.mxu1 %v8873_v18 }
 0x688   :  { %v4656_v34 = vadd.f32 %v4655_v11, %v4349_v49  ;;  %v8994_v49 = vld [vmem:[#allocation19 + $0x78] sm:$0xf0] }
 0x689   :  { %v4707_v57 = vpop.f32.mrf.mxu3  ;;  %v8997_v11 = vor.u32 %v9612_v17, %v8994_v49 }
 0x68a   :  { %v4705_v2 = vadd.f32 %v4704_v12, %v4656_v34  ;;  %v9628_v34 = vld [vmem:[#allocation19 + $0xf4] sm:$0xf] }
 0x68b   :  { %v9061_v48 = vor.u32 %v9628_v34, %v9058_v50  ;;  %6356 = vmatpush.bf16.msra.mxu2 %v8997_v11  ;;  %6307 = vmatpush.bf16.msra.mxu1 %v9057_v63  ;;  %v8977_v63 = vor.u32 %v9609_v40, %v8976_v19 }
 0x68c   :  { %v4745_v28 = vadd.f32 %v11438_v58, %v4705_v2  ;;  %5137 = vmatmul.bf16.gmra.mxu2 %v11432_v45  ;;  %v4354_v45 = vadd.f32 %v11420_v15, %v11430_v6  ;;  %v5010_v15 = vpop.f32.mrf.mxu0 }
 0x68d   :  { %6405 = vmatpush.bf16.msrb.mxu3 %v9061_v48  ;;  %v5011_v41 = vadd.f32 %v5010_v15, %v11485_v13 }
 0x68e   :  { %v4777_v47 = vmax.f32 %v4745_v28, 0.0 }
 0x68f   :  { %v4658_v23 = vpop.f32.mrf.mxu2 }
 0x690   :  { %v4795_v39 = vpack.c.bf16 %v4777_v47, %v4775_v30  ;;  %v4659_v43 = vadd.f32 %v4658_v23, %v11425_v31  ;;  %v9567_v31 = vld [vmem:[#allocation17 + $0x4] sm:$0xf0]  ;;  %v9613_v23 = vld [vmem:[#allocation19 + $0x74] sm:$0xf0] }
 0x691   :  { %v4709_v61 = vpop.f32.mrf.mxu3  ;;  %v8809_v37 = vor.u32 %v9567_v31, %v8808_v60 }
 0x692   :  { %5083 = vmatmul.bf16.gmra.mxu1 %v4795_v39  ;;  %5181 = vmatmul.bf16.gmra.mxu3 %v4795_v39  ;;  %v4708_v4 = vadd.f32 %v4707_v57, %v4659_v43  ;;  %v8992_v57 = vld [vmem:[#allocation19 + $0x70] sm:$0xf] }
 0x693   :  { %5445 = vmatpush.bf16.msrb.mxu0 %v8809_v37  ;;  %v8993_v39 = vor.u32 %v9613_v23, %v8992_v57 }
 0x694   :  { %v4747_v36 = vadd.f32 %v11438_v58, %v4708_v4  ;;  %v5012_v32 = vpop.f32.mrf.mxu0 }
 0x695   :  { %v5013_v26 = vadd.f32 %v5012_v32, %v11485_v13 }
 0x696   :  { %v4779_v3 = vmax.f32 %v4747_v36, 0.0  ;;  %v9610_v36 = vld [vmem:[#allocation19 + $0x64] sm:$0xf] }
 0x697   :  { %v4660_v5 = vpop.f32.mrf.mxu2  ;;  %6258 = vmatpush.bf16.msra.mxu0 %v8993_v39 }
 0x698   :  { %v4661_v9 = vadd.f32 %v4660_v5, %v4354_v45 }
 0x69a   :  { %v4710_v16 = vadd.f32 %v4709_v61, %v4661_v9 }
 0x69c   :  { %v4749_v62 = vadd.f32 %v11438_v58, %v4710_v16  ;;  %v11488_v59 = vpop.f32.mrf.mxu0  ;;  %v8986_v16 = vld [vmem:[#allocation19 + $0x68] sm:$0xf0] }
 0x69d   :  { %v8989_v37 = vor.u32 %v9610_v36, %v8986_v16 }
 0x69e   :  { %v4781_v29 = vmax.f32 %v4749_v62, 0.0  ;;  %v9626_v62 = vld [vmem:[#allocation19 + $0xe4] sm:$0xf] }
 0x69f   :  { %v5103_v14 = vpop.f32.mrf.mxu2  ;;  %6357 = vmatpush.bf16.msra.mxu2 %v8989_v37 }
 0x6a0   :  { %v4797_v6 = vpack.c.bf16 %v4781_v29, %v4779_v3  ;;  %v5104_v1 = vadd.f32 %v5103_v14, %v11491_v8  ;;  %v9053_v29 = vor.u32 %v9626_v62, %v9050_v22 }
 0x6a2   :  { %5088 = vmatmul.bf16.gmra.mxu1 %v4797_v6  ;;  %5186 = vmatmul.bf16.gmra.mxu3 %v4797_v6 }
 0x6a3   :  { %6406 = vmatpush.bf16.msrb.mxu3 %v9053_v29  ;;  %v9622_v29 = vld [vmem:[#allocation19 + $0xc4] sm:$0xf] }
 0x6a4   :  { %v11495_v2 = vpop.f32.mrf.mxu0 }
 0x6a7   :  { %v5105_v51 = vpop.f32.mrf.mxu2 }
 0x6a8   :  { %v5106_v33 = vadd.f32 %v5105_v51, %v11491_v8 }
 0x6ac   :  { %v11501_v9 = vpop.f32.mrf.mxu0 }
 0x6af   :  { %v5054_v35 = vpop.f32.mrf.mxu1  ;;  %v5108_v58 = vpop.f32.mrf.mxu2 }
 0x6b0   :  { %v5055_v38 = vadd.f32 %v5054_v35, %v5006_v24  ;;  %v5109_v61 = vadd.f32 %v5108_v58, %v11491_v8  ;;  %v8984_v35 = vld [vmem:[#allocation19 + $0x60] sm:$0xf]  ;;  %v9611_v58 = vld [vmem:[#allocation19 + $0x64] sm:$0xf0] }
 0x6b1   :  { %v8985_v24 = vor.u32 %v9611_v58, %v8984_v35 }
 0x6b2   :  { %v5192_v0 = vmax.f32 %v5055_v38, 0.0  ;;  %v9627_v38 = vld [vmem:[#allocation19 + $0xe4] sm:$0xf0] }
 0x6b3   :  { %6259 = vmatpush.bf16.msra.mxu0 %v8985_v24 }
 0x6b5   :  { %v5152_v46 = vpop.f32.mrf.mxu3 }
 0x6b6   :  { %v5153_v27 = vadd.f32 %v5152_v46, %v5104_v1 }
 0x6b7   :  { %v5056_v53 = vpop.f32.mrf.mxu1  ;;  %v5110_v7 = vpop.f32.mrf.mxu2  ;;  %6260 = vmatpush.bf16.msra.mxu0 %v8977_v63 }
 0x6b8   :  { %v5057_v52 = vadd.f32 %v5056_v53, %v5008_v42  ;;  %v5193_v30 = vmax.f32 %v5153_v27, 0.0  ;;  %v5111_v20 = vadd.f32 %v5110_v7, %v11491_v8  ;;  %v9048_v42 = vld [vmem:[#allocation19 + $0xe0] sm:$0xf]  ;;  %v5022_v53 = vpop.f32.mrf.mxu0  ;;  %v9608_v27 = vld [vmem:[#allocation19 + $0x54] sm:$0xf] }
 0x6b9   :  { %v9049_v7 = vor.u32 %v9627_v38, %v9048_v42  ;;  %v8968_v42 = vld [vmem:[#allocation19 + $0x40] sm:$0xf]  ;;  %v9607_v38 = vld [vmem:[#allocation19 + $0x44] sm:$0xf0] }
 0x6ba   :  { %v5194_v12 = vmax.f32 %v5057_v52, 0.0  ;;  %v5016_v52 = vadd.f32 %v11488_v59, %v11485_v13  ;;  %v9624_v59 = vld [vmem:[#allocation19 + $0xd4] sm:$0xf] }
 0x6bb   :  { %6308 = vmatpush.bf16.msra.mxu1 %v9049_v7  ;;  %v8969_v7 = vor.u32 %v9607_v38, %v8968_v42 }
 0x6bc   :  { %v5224_v44 = vpack.c.bf16 %v5194_v12, %v5192_v0  ;;  %v5018_v0 = vadd.f32 %v11495_v2, %v11485_v13 }
 0x6bd   :  { %v5154_v10 = vpop.f32.mrf.mxu3  ;;  %6261 = vmatpush.bf16.msra.mxu0 %v8969_v7 }
 0x6be   :  { %v5155_v21 = vadd.f32 %v5154_v10, %v5106_v33  ;;  %5446 = vmatmul.bf16.vlgmr.msrb.gmra.mxu0 %v5224_v44  ;;  %5544 = vmatmul.bf16.vlgmr.msrb.gmra.mxu2 %v5224_v44  ;;  %v8978_v44 = vld [vmem:[#allocation19 + $0x58] sm:$0xf0] }
 0x6bf   :  { %v5059_v25 = vpop.f32.mrf.mxu1  ;;  %v11497_v28 = vpop.f32.mrf.mxu2  ;;  %v8981_v48 = vor.u32 %v9608_v27, %v8978_v44  ;;  %v9042_v10 = vld [vmem:[#allocation19 + $0xd8] sm:$0xf0] }
 0x6c0   :  { %v5195_v47 = vmax.f32 %v5155_v21, 0.0  ;;  %v5060_v56 = vadd.f32 %v5059_v25, %v5011_v41  ;;  %v5114_v34 = vadd.f32 %v11497_v28, %v11491_v8  ;;  %v5025_v2 = vpop.f32.mrf.mxu0 }
 0x6c1   :  { %6358 = vmatpush.bf16.msra.mxu2 %v8981_v48 }
 0x6c2   :  { %v5225_v43 = vpack.c.bf16 %v5195_v47, %v5193_v30  ;;  %v5196_v60 = vmax.f32 %v5060_v56, 0.0  ;;  %v9045_v47 = vor.u32 %v9624_v59, %v9042_v10  ;;  %v9604_v10 = vld [vmem:[#allocation19 + $0x34] sm:$0xf] }
 0x6c4   :  { %5495 = vmatmul.bf16.vlgmr.msrb.gmra.mxu1 %v5225_v43  ;;  %5593 = vmatmul.bf16.vlgmr.msra.gmra.mxu3 %v5225_v43 }
 0x6c5   :  { %v5157_v55 = vpop.f32.mrf.mxu3  ;;  %6407 = vmatpush.bf16.msrb.mxu3 %v9045_v47  ;;  %v9620_v47 = vld [vmem:[#allocation19 + $0xb4] sm:$0xf] }
 0x6c6   :  { %v5158_v18 = vadd.f32 %v5157_v55, %v5109_v61  ;;  %v9040_v55 = vld [vmem:[#allocation19 + $0xd0] sm:$0xf]  ;;  %v5023_v61 = vadd.f32 %v5022_v53, %v11485_v13 }
 0x6c7   :  { %v5061_v4 = vpop.f32.mrf.mxu1  ;;  %v5115_v45 = vpop.f32.mrf.mxu2 }
 0x6c8   :  { %v5062_v5 = vadd.f32 %v5061_v4, %v5013_v26  ;;  %v5197_v32 = vmax.f32 %v5158_v18, 0.0  ;;  %v5116_v21 = vadd.f32 %v5115_v45, %v11491_v8  ;;  %v9625_v26 = vld [vmem:[#allocation19 + $0xd4] sm:$0xf0]  ;;  %v5021_v45 = vadd.f32 %v11501_v9, %v11485_v13  ;;  %v8970_v18 = vld [vmem:[#allocation19 + $0x48] sm:$0xf0] }
 0x6c9   :  { %v9041_v4 = vor.u32 %v9625_v26, %v9040_v55  ;;  %v9034_v9 = vld [vmem:[#allocation19 + $0xc8] sm:$0xf0]  ;;  %v8960_v55 = vld [vmem:[#allocation19 + $0x30] sm:$0xf]  ;;  %v9605_v26 = vld [vmem:[#allocation19 + $0x34] sm:$0xf0] }
 0x6ca   :  { %v5198_v31 = vmax.f32 %v5062_v5, 0.0 }
 0x6cb   :  { %6309 = vmatpush.bf16.msra.mxu1 %v9041_v4  ;;  %v8961_v4 = vor.u32 %v9605_v26, %v8960_v55  ;;  %v9601_v26 = vld [vmem:[#allocation19 + $0x14] sm:$0xf0] }
 0x6cc   :  { %v5226_v3 = vpack.c.bf16 %v5198_v31, %v5196_v60  ;;  %v5027_v31 = vpop.f32.mrf.mxu0 }
 0x6cd   :  { %v5159_v14 = vpop.f32.mrf.mxu3  ;;  %6262 = vmatpush.bf16.msra.mxu0 %v8961_v4  ;;  %v9617_v4 = vld [vmem:[#allocation19 + $0x94] sm:$0xf0] }
 0x6ce   :  { %v5160_v15 = vadd.f32 %v5159_v14, %v5111_v20  ;;  %5451 = vmatmul.bf16.gmra.mxu0 %v5226_v3  ;;  %5549 = vmatmul.bf16.gmra.mxu2 %v5226_v3  ;;  %v9606_v20 = vld [vmem:[#allocation19 + $0x44] sm:$0xf] }
 0x6cf   :  { %v5064_v6 = vpop.f32.mrf.mxu1  ;;  %v11505_v51 = vpop.f32.mrf.mxu2  ;;  %v8973_v3 = vor.u32 %v9606_v20, %v8970_v18 }
 0x6d0   :  { %v5199_v54 = vmax.f32 %v5160_v15, 0.0  ;;  %v5065_v12 = vadd.f32 %v5064_v6, %v5016_v52  ;;  %v5119_v37 = vadd.f32 %v11505_v51, %v11491_v8 }
 0x6d1   :  { %6359 = vmatpush.bf16.msra.mxu2 %v8973_v3 }
 0x6d2   :  { %v5227_v46 = vpack.c.bf16 %v5199_v54, %v5197_v32  ;;  %v5200_v50 = vmax.f32 %v5065_v12, 0.0  ;;  %v9037_v32 = vor.u32 %v9622_v29, %v9034_v9  ;;  %v9602_v9 = vld [vmem:[#allocation19 + $0x24] sm:$0xf] }
 0x6d4   :  { %5500 = vmatmul.bf16.gmra.mxu1 %v5227_v46  ;;  %5598 = vmatmul.bf16.gmra.mxu3 %v5227_v46  ;;  %v5030_v53 = vpop.f32.mrf.mxu0 }
 0x6d5   :  { %v5162_v1 = vpop.f32.mrf.mxu3  ;;  %6408 = vmatpush.bf16.msrb.mxu3 %v9037_v32  ;;  %v9618_v32 = vld [vmem:[#allocation19 + $0xa4] sm:$0xf] }
 0x6d6   :  { %v5163_v25 = vadd.f32 %v5162_v1, %v5114_v34  ;;  %v9032_v1 = vld [vmem:[#allocation19 + $0xc0] sm:$0xf] }
 0x6d7   :  { %v5066_v17 = vpop.f32.mrf.mxu1  ;;  %v5120_v11 = vpop.f32.mrf.mxu2 }
 0x6d8   :  { %v5067_v49 = vadd.f32 %v5066_v17, %v5018_v0  ;;  %v5201_v28 = vmax.f32 %v5163_v25, 0.0  ;;  %v5121_v14 = vadd.f32 %v5120_v11, %v11491_v8  ;;  %v9623_v0 = vld [vmem:[#allocation19 + $0xc4] sm:$0xf0]  ;;  %v5026_v17 = vadd.f32 %v5025_v2, %v11485_v13  ;;  %v9026_v2 = vld [vmem:[#allocation19 + $0xb8] sm:$0xf0] }
 0x6d9   :  { %v9033_v12 = vor.u32 %v9623_v0, %v9032_v1  ;;  %v5028_v11 = vadd.f32 %v5027_v31, %v11485_v13  ;;  %v5031_v31 = vadd.f32 %v5030_v53, %v11485_v13  ;;  %v8952_v1 = vld [vmem:[#allocation19 + $0x20] sm:$0xf]  ;;  %v9603_v0 = vld [vmem:[#allocation19 + $0x24] sm:$0xf0] }
 0x6da   :  { %v5202_v33 = vmax.f32 %v5067_v49, 0.0 }
 0x6db   :  { %6310 = vmatpush.bf16.msra.mxu1 %v9033_v12  ;;  %v8953_v12 = vor.u32 %v9603_v0, %v8952_v1 }
 0x6dc   :  { %v5228_v30 = vpack.c.bf16 %v5202_v33, %v5200_v50  ;;  %v5032_v25 = vpop.f32.mrf.mxu0 }
 0x6dd   :  { %v5164_v57 = vpop.f32.mrf.mxu3  ;;  %6263 = vmatpush.bf16.msra.mxu0 %v8953_v12 }
 0x6de   :  { %v5165_v23 = vadd.f32 %v5164_v57, %v5116_v21  ;;  %5456 = vmatmul.bf16.gmra.mxu0 %v5228_v30  ;;  %5554 = vmatmul.bf16.gmra.mxu2 %v5228_v30  ;;  %v8962_v21 = vld [vmem:[#allocation19 + $0x38] sm:$0xf0] }
 0x6df   :  { %v5069_v39 = vpop.f32.mrf.mxu1  ;;  %v5123_v56 = vpop.f32.mrf.mxu2  ;;  %v8965_v30 = vor.u32 %v9604_v10, %v8962_v21 }
 0x6e0   :  { %v5203_v43 = vmax.f32 %v5165_v23, 0.0  ;;  %v5070_v60 = vadd.f32 %v5069_v39, %v5021_v45  ;;  %v5124_v44 = vadd.f32 %v5123_v56, %v11491_v8 }
 0x6e1   :  { %6360 = vmatpush.bf16.msra.mxu2 %v8965_v30 }
 0x6e2   :  { %v5229_v41 = vpack.c.bf16 %v5203_v43, %v5201_v28  ;;  %v5204_v62 = vmax.f32 %v5070_v60, 0.0  ;;  %v9029_v28 = vor.u32 %v9620_v47, %v9026_v2 }
 0x6e4   :  { %5505 = vmatmul.bf16.gmra.mxu1 %v5229_v41  ;;  %5603 = vmatmul.bf16.gmra.mxu3 %v5229_v41 }
 0x6e5   :  { %v5167_v5 = vpop.f32.mrf.mxu3  ;;  %6409 = vmatpush.bf16.msrb.mxu3 %v9029_v28 }
 0x6e6   :  { %v5168_v15 = vadd.f32 %v5167_v5, %v5119_v37  ;;  %v9024_v5 = vld [vmem:[#allocation19 + $0xb0] sm:$0xf]  ;;  %v5033_v37 = vadd.f32 %v5032_v25, %v11485_v13 }
 0x6e7   :  { %v5071_v36 = vpop.f32.mrf.mxu1  ;;  %v5125_v54 = vpop.f32.mrf.mxu2 }
 0x6e8   :  { %v5072_v16 = vadd.f32 %v5071_v36, %v5023_v61  ;;  %v5205_v51 = vmax.f32 %v5168_v15, 0.0  ;;  %v5126_v57 = vadd.f32 %v5125_v54, %v11491_v8  ;;  %v9621_v61 = vld [vmem:[#allocation19 + $0xb4] sm:$0xf0]  ;;  %v5035_v36 = vpop.f32.mrf.mxu0  ;;  %v9018_v54 = vld [vmem:[#allocation19 + $0xa8] sm:$0xf0] }
 0x6e9   :  { %v9025_v60 = vor.u32 %v9621_v61, %v9024_v5 }
 0x6ea   :  { %v5206_v22 = vmax.f32 %v5072_v16, 0.0 }
 0x6eb   :  { %6311 = vmatpush.bf16.msra.mxu1 %v9025_v60 }
 0x6ec   :  { %v5230_v6 = vpack.c.bf16 %v5206_v22, %v5204_v62 }
 0x6ed   :  { %v5169_v35 = vpop.f32.mrf.mxu3 }
 0x6ee   :  { %v5170_v58 = vadd.f32 %v5169_v35, %v5121_v14  ;;  %5461 = vmatmul.bf16.gmra.mxu0 %v5230_v6  ;;  %5559 = vmatmul.bf16.gmra.mxu2 %v5230_v6  ;;  %v8954_v14 = vld [vmem:[#allocation19 + $0x28] sm:$0xf0] }
 0x6ef   :  { %v5074_v24 = vpop.f32.mrf.mxu1  ;;  %v5128_v50 = vpop.f32.mrf.mxu2  ;;  %v8957_v6 = vor.u32 %v9602_v9, %v8954_v14 }
 0x6f0   :  { %v5207_v46 = vmax.f32 %v5170_v58, 0.0  ;;  %v5075_v34 = vadd.f32 %v5074_v24, %v5026_v17  ;;  %v5129_v18 = vadd.f32 %v5128_v50, %v11491_v8  ;;  %v5037_v38 = vpop.f32.mrf.mxu0  ;;  %v9016_v17 = vld [vmem:[#allocation19 + $0xa0] sm:$0xf]  ;;  %v5036_v50 = vadd.f32 %v5035_v36, %v11485_v13 }
 0x6f1   :  { %6361 = vmatpush.bf16.msra.mxu2 %v8957_v6  ;;  %v5038_v10 = vadd.f32 %v5037_v38, %v11485_v13  ;;  %v9614_v38 = vld [vmem:[#allocation19 + $0x84] sm:$0xf] }
 0x6f2   :  { %v5231_v52 = vpack.c.bf16 %v5207_v46, %v5205_v51  ;;  %v5208_v48 = vmax.f32 %v5075_v34, 0.0  ;;  %v9021_v51 = vor.u32 %v9618_v32, %v9018_v54 }
 0x6f4   :  { %5510 = vmatmul.bf16.gmra.mxu1 %v5231_v52  ;;  %5608 = vmatmul.bf16.gmra.mxu3 %v5231_v52 }
 0x6f5   :  { %v5172_v49 = vpop.f32.mrf.mxu3  ;;  %6410 = vmatpush.bf16.msrb.mxu3 %v9021_v51 }
 0x6f6   :  { %v5173_v23 = vadd.f32 %v5172_v49, %v5124_v44  ;;  %v9619_v49 = vld [vmem:[#allocation19 + $0xa4] sm:$0xf0] }
 0x6f7   :  { %v5076_v33 = vpop.f32.mrf.mxu1  ;;  %v5130_v56 = vpop.f32.mrf.mxu2  ;;  %v9017_v34 = vor.u32 %v9619_v49, %v9016_v17 }
 0x6f8   :  { %v5077_v27 = vadd.f32 %v5076_v33, %v5028_v11  ;;  %v5209_v63 = vmax.f32 %v5173_v23, 0.0  ;;  %v5131_v35 = vadd.f32 %v5130_v56, %v11491_v8  ;;  %v9600_v33 = vld [vmem:[#allocation19 + $0x14] sm:$0xf]  ;;  %v5040_v47 = vpop.f32.mrf.mxu0  ;;  %v9008_v56 = vld [vmem:[#allocation19 + $0x90] sm:$0xf] }
 0x6f9   :  { %6312 = vmatpush.bf16.msra.mxu1 %v9017_v34  ;;  %v9009_v61 = vor.u32 %v9617_v4, %v9008_v56  ;;  %v9645_v56 = vld [vmem:[#allocation20 + $0x78] sm:$0xff] }
 0x6fa   :  { %v5210_v59 = vmax.f32 %v5077_v27, 0.0  ;;  %v8946_v27 = vld [vmem:[#allocation19 + $0x18] sm:$0xf0] }
 0x6fc   :  { %v5232_v39 = vpack.c.bf16 %v5210_v59, %v5208_v48  ;;  %v8949_v59 = vor.u32 %v9600_v33, %v8946_v27  ;;  %v5272_v33 = vld [vmem:[%s11942_s18] sm:$0x3] }
 0x6fd   :  { %v5174_v43 = vpop.f32.mrf.mxu3  ;;  %6313 = vmatpush.bf16.msra.mxu1 %v9009_v61  ;;  %v11539_v27 = vperm.slane %v5272_v33, 0 }
 0x6fe   :  { %v5175_v19 = vadd.f32 %v5174_v43, %v5126_v57  ;;  %5466 = vmatmul.bf16.gmra.mxu0 %v5232_v39  ;;  %5564 = vmatmul.bf16.gmra.mxu2 %v5232_v39 }
 0x6ff   :  { %v5079_v40 = vpop.f32.mrf.mxu1  ;;  %v5133_v15 = vpop.f32.mrf.mxu2  ;;  %6362 = vmatpush.bf16.msra.mxu2 %v8949_v59  ;;  %v11541_v59 = vperm.slane %v5272_v33, 1 }
 0x700   :  { %v5211_v41 = vmax.f32 %v5175_v19, 0.0  ;;  %v5080_v62 = vadd.f32 %v5079_v40, %v5031_v31  ;;  %v5134_v2 = vadd.f32 %v5133_v15, %v11491_v8  ;;  %v9616_v19 = vld [vmem:[#allocation19 + $0x94] sm:$0xf]  ;;  %v9010_v40 = vld [vmem:[#allocation19 + $0x98] sm:$0xf0] }
 0x701   :  { %v9013_v55 = vor.u32 %v9616_v19, %v9010_v40 }
 0x702   :  { %v5233_v45 = vpack.c.bf16 %v5211_v41, %v5209_v63  ;;  %v5212_v3 = vmax.f32 %v5080_v62, 0.0  ;;  %v8944_v63 = vld [vmem:[#allocation19 + $0x10] sm:$0xf]  ;;  %v5042_v62 = vpop.f32.mrf.mxu0 }
 0x703   :  { %v8945_v5 = vor.u32 %v9601_v26, %v8944_v63  ;;  %6411 = vmatpush.bf16.msrb.mxu3 %v9013_v55  ;;  %v9637_v26 = vld [vmem:[#allocation20 + $0x38] sm:$0xff] }
 0x704   :  { %5515 = vmatmul.bf16.gmra.mxu1 %v5233_v45  ;;  %5613 = vmatmul.bf16.gmra.mxu3 %v5233_v45 }
 0x705   :  { %v5177_v16 = vpop.f32.mrf.mxu3  ;;  %6264 = vmatpush.bf16.msra.mxu0 %v8945_v5 }
 0x706   :  { %v5178_v58 = vadd.f32 %v5177_v16, %v5129_v18  ;;  %v5043_v18 = vadd.f32 %v5042_v62, %v11485_v13 }
 0x707   :  { %v5081_v22 = vpop.f32.mrf.mxu1  ;;  %v5135_v44 = vpop.f32.mrf.mxu2 }
 0x708   :  { %v5082_v20 = vadd.f32 %v5081_v22, %v5033_v37  ;;  %v5213_v7 = vmax.f32 %v5178_v58, 0.0  ;;  %v5136_v39 = vadd.f32 %v5135_v44, %v11491_v8  ;;  %v5041_v22 = vadd.f32 %v5040_v47, %v11485_v13 }
 0x70a   :  { %v5214_v29 = vmax.f32 %v5082_v20, 0.0 }
 0x70c   :  { %v5234_v24 = vpack.c.bf16 %v5214_v29, %v5212_v3 }
 0x70d   :  { %v5179_v46 = vpop.f32.mrf.mxu3 }
 0x70e   :  { %v5180_v42 = vadd.f32 %v5179_v46, %v5131_v35  ;;  %5471 = vmatmul.bf16.gmra.mxu0 %v5234_v24  ;;  %5569 = vmatmul.bf16.gmra.mxu2 %v5234_v24  ;;  %v9598_v46 = vld [vmem:[#allocation19 + $0x4] sm:$0xf] }
 0x70f   :  { %v5084_v53 = vpop.f32.mrf.mxu1  ;;  %v5138_v60 = vpop.f32.mrf.mxu2 }
 0x710   :  { %v5215_v52 = vmax.f32 %v5180_v42, 0.0  ;;  %v5085_v21 = vadd.f32 %v5084_v53, %v5036_v50  ;;  %v5139_v15 = vadd.f32 %v5138_v60, %v11491_v8  ;;  %v8938_v42 = vld [vmem:[#allocation19 + $0x8] sm:$0xf0] }
 0x711   :  { %v8941_v13 = vor.u32 %v9598_v46, %v8938_v42  ;;  %v9002_v53 = vld [vmem:[#allocation19 + $0x88] sm:$0xf0] }
 0x712   :  { %v5235_v11 = vpack.c.bf16 %v5215_v52, %v5213_v7  ;;  %v5216_v57 = vmax.f32 %v5085_v21, 0.0  ;;  %v8936_v7 = vld [vmem:[#allocation19] sm:$0xf]  ;;  %v9599_v52 = vld [vmem:[#allocation19 + $0x4] sm:$0xf0]  ;;  %v9005_v12 = vor.u32 %v9614_v38, %v9002_v53 }
 0x713   :  { %v8937_v17 = vor.u32 %v9599_v52, %v8936_v7  ;;  %6363 = vmatpush.bf16.msra.mxu2 %v8941_v13 }
 0x714   :  { %5520 = vmatmul.bf16.gmra.mxu1 %v5235_v11  ;;  %5618 = vmatmul.bf16.gmra.mxu3 %v5235_v11  ;;  %v9615_v11 = vld [vmem:[#allocation19 + $0x84] sm:$0xf0] }
 0x715   :  { %v5182_v48 = vpop.f32.mrf.mxu3  ;;  %6412 = vmatpush.bf16.msrb.mxu3 %v9005_v12  ;;  %6265 = vmatpush.bf16.msra.mxu0 %v8937_v17 }
 0x716   :  { %v5183_v28 = vadd.f32 %v5182_v48, %v5134_v2 }
 0x717   :  { %v5086_v25 = vpop.f32.mrf.mxu1  ;;  %v5140_v14 = vpop.f32.mrf.mxu2 }
 0x718   :  { %v5087_v30 = vadd.f32 %v5086_v25, %v5038_v10  ;;  %v5217_v36 = vmax.f32 %v5183_v28, 0.0  ;;  %v5141_v54 = vadd.f32 %v5140_v14, %v11491_v8  ;;  %v9000_v8 = vld [vmem:[#allocation19 + $0x80] sm:$0xf] }
 0x719   :  { %v9001_v34 = vor.u32 %v9615_v11, %v9000_v8  ;;  %6598 = vmatpush.bf16.msrb.mxu0 %v9637_v26  ;;  %v9636_v11 = vld [vmem:[#allocation20 + $0x30] sm:$0xff] }
 0x71a   :  { %v5218_v23 = vmax.f32 %v5087_v30, 0.0 }
 0x71b   :  { %6314 = vmatpush.bf16.msra.mxu1 %v9001_v34  ;;  %v9644_v34 = vld [vmem:[#allocation20 + $0x70] sm:$0xff] }
 0x71c   :  { %v5236_v43 = vpack.c.bf16 %v5218_v23, %v5216_v57 }
 0x71d   :  { %v5184_v41 = vpop.f32.mrf.mxu3  ;;  %6599 = vmatpush.bf16.msrb.mxu0 %v9636_v11 }
 0x71e   :  { %v5185_v45 = vadd.f32 %v5184_v41, %v5136_v39  ;;  %5476 = vmatmul.bf16.gmra.mxu0 %v5236_v43  ;;  %5574 = vmatmul.bf16.gmra.mxu2 %v5236_v43  ;;  %v5714_v39 = vld [vmem:[%s11943_s19] sm:$0x3] }
 0x71f   :  { %v5089_v31 = vpop.f32.mrf.mxu1  ;;  %v11549_v41 = vperm.slane %v5714_v39, 0  ;;  %v11551_v55 = vperm.slane %v5714_v39, 1  ;;  %6647 = vmatpush.bf16.msrb.mxu1 %v9645_v56 }
 0x720   :  { %v5219_v16 = vmax.f32 %v5185_v45, 0.0  ;;  %v5090_v3 = vadd.f32 %v5089_v31, %v5041_v22 }
 0x722   :  { %v5237_v37 = vpack.c.bf16 %v5219_v16, %v5217_v36  ;;  %v5220_v6 = vmax.f32 %v5090_v3, 0.0 }
 0x723   :  { %6648 = vmatpush.bf16.msrb.mxu1 %v9644_v34 }
 0x724   :  { %5525 = vmatmul.bf16.gmra.mxu1 %v5237_v37  ;;  %5623 = vmatmul.bf16.gmra.mxu3 %v5237_v37 }
 0x725   :  { %v5187_v20 = vpop.f32.mrf.mxu3 }
 0x726   :  { %v5188_v35 = vadd.f32 %v5187_v20, %v5139_v15 }
 0x727   :  { %v5091_v29 = vpop.f32.mrf.mxu1 }
 0x728   :  { %v5092_v9 = vadd.f32 %v5091_v29, %v5043_v18  ;;  %v5221_v1 = vmax.f32 %v5188_v35, 0.0 }
 0x72a   :  { %v5222_v32 = vmax.f32 %v5092_v9, 0.0 }
 0x72c   :  { %v5238_v58 = vpack.c.bf16 %v5222_v32, %v5220_v6 }
 0x72d   :  { %v5189_v24 = vpop.f32.mrf.mxu3 }
 0x72e   :  { %v5190_v51 = vadd.f32 %v5189_v24, %v5141_v54  ;;  %5481 = vmatmul.bf16.gmra.mxu0 %v5238_v58  ;;  %5579 = vmatmul.bf16.gmra.mxu2 %v5238_v58 }
 0x730   :  { %v5223_v0 = vmax.f32 %v5190_v51, 0.0 }
 0x732   :  { %v5239_v49 = vpack.c.bf16 %v5223_v0, %v5221_v1 }
 0x734   :  { %5530 = vmatmul.bf16.gmra.mxu1 %v5239_v49  ;;  %5628 = vmatmul.bf16.gmra.mxu3 %v5239_v49 }
 0x73b   :  { %v5447_v50 = vpop.f32.mrf.mxu0 }
 0x73c   :  { %v5448_v21 = vadd.f32 %v5447_v50, %v11539_v27 }
 0x741   :  { %v5496_v44 = vpop.f32.mrf.mxu1  ;;  %v5545_v48 = vpop.f32.mrf.mxu2 }
 0x742   :  { %v5497_v25 = vadd.f32 %v5496_v44, %v5448_v21  ;;  %v5546_v30 = vadd.f32 %v5545_v48, %v11541_v59 }
 0x743   :  { %v5449_v10 = vpop.f32.mrf.mxu0 }
 0x744   :  { %v5634_v28 = vmax.f32 %v5497_v25, 0.0  ;;  %v5450_v40 = vadd.f32 %v5449_v10, %v11539_v27 }
 0x747   :  { %v5594_v47 = vpop.f32.mrf.mxu3 }
 0x748   :  { %v5595_v2 = vadd.f32 %v5594_v47, %v5546_v30 }
 0x749   :  { %v5498_v57 = vpop.f32.mrf.mxu1  ;;  %v5547_v23 = vpop.f32.mrf.mxu2 }
 0x74a   :  { %v5635_v43 = vmax.f32 %v5595_v2, 0.0  ;;  %v5499_v4 = vadd.f32 %v5498_v57, %v5450_v40  ;;  %v5548_v45 = vadd.f32 %v5547_v23, %v11541_v59 }
 0x74b   :  { %v5452_v19 = vpop.f32.mrf.mxu0 }
 0x74c   :  { %v5666_v63 = vpack.c.bf16 %v5635_v43, %v5634_v28  ;;  %v5636_v22 = vmax.f32 %v5499_v4, 0.0  ;;  %v5453_v3 = vadd.f32 %v5452_v19, %v11539_v27 }
 0x74e   :  { %v5682_v5 = vunpack.c.l.bf16 %v5666_v63  ;;  %v5683_v61 = vunpack.c.h.bf16 %v5666_v63  ;;  %v6034_v14 = vunpack.c.l.b16 %v5666_v63  ;;  %v6035_v15 = vunpack.c.h.b16 %v5666_v63 }
 0x74f   :  { %v5596_v60 = vpop.f32.mrf.mxu3 }
 0x750   :  { %v5597_v31 = vadd.f32 %v5596_v60, %v5548_v45  ;;  %v5720_v36 = vmul.f32 %v11549_v41, %v5682_v5  ;;  %v5721_v16 = vmul.f32 %v11551_v55, %v5683_v61 }
 0x751   :  { %v5501_v37 = vpop.f32.mrf.mxu1  ;;  %v5550_v62 = vpop.f32.mrf.mxu2 }
 0x752   :  { %v5637_v20 = vmax.f32 %v5597_v31, 0.0  ;;  %v5752_v18 = vadd.f32 %v5721_v16, %v5720_v36  ;;  %v5502_v6 = vadd.f32 %v5501_v37, %v5453_v3  ;;  %v5551_v32 = vadd.f32 %v5550_v62, %v11541_v59 }
 0x753   :  { %v5454_v29 = vpop.f32.mrf.mxu0 }
 0x754   :  { %v5667_v9 = vpack.c.bf16 %v5637_v20, %v5636_v22  ;;  %5753 = vadd.xlane.f32.xlu0 %v5752_v18  ;;  %v5638_v1 = vmax.f32 %v5502_v6, 0.0  ;;  %v5455_v49 = vadd.f32 %v5454_v29, %v11539_v27  ;;  %v9635_v6 = vld [vmem:[#allocation20 + $0x28] sm:$0xff] }
 0x755   :  { %6600 = vmatpush.bf16.msrb.mxu0 %v9635_v6 }
 0x756   :  { %v6036_v54 = vunpack.c.l.b16 %v5667_v9  ;;  %v6037_v35 = vunpack.c.h.b16 %v5667_v9  ;;  %v5684_v58 = vunpack.c.l.bf16 %v5667_v9  ;;  %v5685_v24 = vunpack.c.h.bf16 %v5667_v9 }
 0x757   :  { %v5599_v51 = vpop.f32.mrf.mxu3 }
 0x758   :  { %v5600_v46 = vadd.f32 %v5599_v51, %v5551_v32  ;;  %v6066_v42 = vpack.c.b16 %v6036_v54, %v6034_v14  ;;  %v6067_v38 = vpack.c.b16 %v6037_v35, %v6035_v15  ;;  %v5722_v13 = vmul.f32 %v11549_v41, %v5684_v58  ;;  %v9643_v32 = vld [vmem:[#allocation20 + $0x68] sm:$0xff] }
 0x759   :  { %v5503_v53 = vpop.f32.mrf.mxu1  ;;  %v5552_v7 = vpop.f32.mrf.mxu2  ;;  %v5723_v52 = vmul.f32 %v11551_v55, %v5685_v24  ;;  %6649 = vmatpush.bf16.msrb.mxu1 %v9643_v32 }
 0x75a   :  { %v5639_v0 = vmax.f32 %v5600_v46, 0.0  ;;  %6266 = vmatmul.bf16.vlgmr.msra.gmra.mxu0 %v6066_v42  ;;  %6315 = vmatmul.bf16.vlgmr.msra.gmra.mxu1 %v6067_v38  ;;  %v5504_v50 = vadd.f32 %v5503_v53, %v5455_v49  ;;  %v5553_v33 = vadd.f32 %v5552_v7, %v11541_v59 }
 0x75b   :  { %6364 = vmatmul.bf16.vlgmr.msra.gmra.mxu2 %v6066_v42  ;;  %6413 = vmatmul.bf16.vlgmr.msrb.gmra.mxu3 %v6067_v38  ;;  %v5457_v12 = vpop.f32.mrf.mxu0  ;;  %v5755_v17 = vadd.f32 %v5723_v52, %v5722_v13 }
 0x75c   :  { %v5668_v8 = vpack.c.bf16 %v5639_v0, %v5638_v1  ;;  %v5640_v57 = vmax.f32 %v5504_v50, 0.0  ;;  %v5458_v28 = vadd.f32 %v5457_v12, %v11539_v27 }
 0x75d   :  { %5756 = vadd.xlane.f32.xlu0 %v5755_v17 }
 0x75e   :  { %v5686_v44 = vunpack.c.l.bf16 %v5668_v8  ;;  %v5687_v48 = vunpack.c.h.bf16 %v5668_v8  ;;  %v6038_v26 = vunpack.c.l.b16 %v5668_v8  ;;  %v6039_v56 = vunpack.c.h.b16 %v5668_v8 }
 0x75f   :  { %v5601_v10 = vpop.f32.mrf.mxu3 }
 0x760   :  { %v5602_v21 = vadd.f32 %v5601_v10, %v5553_v33  ;;  %v5724_v25 = vmul.f32 %v11549_v41, %v5686_v44  ;;  %v5725_v30 = vmul.f32 %v11551_v55, %v5687_v48 }
 0x761   :  { %v5506_v47 = vpop.f32.mrf.mxu1  ;;  %v5555_v2 = vpop.f32.mrf.mxu2 }
 0x762   :  { %v5641_v23 = vmax.f32 %v5602_v21, 0.0  ;;  %v5758_v39 = vadd.f32 %v5725_v30, %v5724_v25  ;;  %v5507_v40 = vadd.f32 %v5506_v47, %v5458_v28  ;;  %v5556_v63 = vadd.f32 %v5555_v2, %v11541_v59 }
 0x763   :  { %v5459_v43 = vpop.f32.mrf.mxu0 }
 0x764   :  { %v5669_v19 = vpack.c.bf16 %v5641_v23, %v5640_v57  ;;  %5759 = vadd.xlane.f32.xlu1 %v5758_v39  ;;  %v5642_v18 = vmax.f32 %v5507_v40, 0.0  ;;  %v5460_v14 = vadd.f32 %v5459_v43, %v11539_v27 }
 0x766   :  { %v6040_v4 = vunpack.c.l.b16 %v5669_v19  ;;  %v6041_v45 = vunpack.c.h.b16 %v5669_v19  ;;  %v5688_v5 = vunpack.c.l.bf16 %v5669_v19  ;;  %v5689_v61 = vunpack.c.h.bf16 %v5669_v19 }
 0x767   :  { %v5604_v60 = vpop.f32.mrf.mxu3 }
 0x768   :  { %v5605_v31 = vadd.f32 %v5604_v60, %v5556_v63  ;;  %v6068_v36 = vpack.c.b16 %v6040_v4, %v6038_v26  ;;  %v6069_v16 = vpack.c.b16 %v6041_v45, %v6039_v56  ;;  %v5726_v37 = vmul.f32 %v11549_v41, %v5688_v5  ;;  %v9634_v26 = vld [vmem:[#allocation20 + $0x20] sm:$0xff] }
 0x769   :  { %v5508_v62 = vpop.f32.mrf.mxu1  ;;  %v5557_v22 = vpop.f32.mrf.mxu2  ;;  %v5727_v20 = vmul.f32 %v11551_v55, %v5689_v61  ;;  %v9642_v56 = vld [vmem:[#allocation20 + $0x60] sm:$0xff]  ;;  %6601 = vmatpush.bf16.msrb.mxu0 %v9634_v26 }
 0x76a   :  { %v5643_v3 = vmax.f32 %v5605_v31, 0.0  ;;  %6271 = vmatmul.bf16.gmra.mxu0 %v6068_v36  ;;  %6320 = vmatmul.bf16.gmra.mxu1 %v6069_v16  ;;  %v5509_v54 = vadd.f32 %v5508_v62, %v5460_v14  ;;  %v5558_v35 = vadd.f32 %v5557_v22, %v11541_v59 }
 0x76b   :  { %6369 = vmatmul.bf16.gmra.mxu2 %v6068_v36  ;;  %6418 = vmatmul.bf16.gmra.mxu3 %v6069_v16  ;;  %v5462_v29 = vpop.f32.mrf.mxu0  ;;  %v5761_v9 = vadd.f32 %v5727_v20, %v5726_v37 }
 0x76c   :  { %v5670_v15 = vpack.c.bf16 %v5643_v3, %v5642_v18  ;;  %v5644_v7 = vmax.f32 %v5509_v54, 0.0  ;;  %v5463_v0 = vadd.f32 %v5462_v29, %v11539_v27  ;;  %6650 = vmatpush.bf16.msrb.mxu1 %v9642_v56 }
 0x76d   :  { %5762 = vadd.xlane.f32.xlu1 %v5761_v9 }
 0x76e   :  { %v5690_v58 = vunpack.c.l.bf16 %v5670_v15  ;;  %v5691_v24 = vunpack.c.h.bf16 %v5670_v15  ;;  %v6042_v11 = vunpack.c.l.b16 %v5670_v15  ;;  %v6043_v34 = vunpack.c.h.b16 %v5670_v15 }
 0x76f   :  { %v5606_v51 = vpop.f32.mrf.mxu3 }
 0x770   :  { %v5607_v46 = vadd.f32 %v5606_v51, %v5558_v35  ;;  %v5728_v42 = vmul.f32 %v11549_v41, %v5690_v58  ;;  %v5729_v38 = vmul.f32 %v11551_v55, %v5691_v24 }
 0x771   :  { %v5511_v13 = vpop.f32.mrf.mxu1  ;;  %v5560_v53 = vpop.f32.mrf.mxu2 }
 0x772   :  { %v5645_v52 = vmax.f32 %v5607_v46, 0.0  ;;  %v5764_v1 = vadd.f32 %v5729_v38, %v5728_v42  ;;  %v5512_v49 = vadd.f32 %v5511_v13, %v5463_v0  ;;  %v5561_v8 = vadd.f32 %v5560_v53, %v11541_v59 }
 0x773   :  { %v5464_v12 = vpop.f32.mrf.mxu0 }
 0x774   :  { %v5671_v17 = vpack.c.bf16 %v5645_v52, %v5644_v7  ;;  %5765 = vadd.xlane.f32.xlu2 %v5764_v1  ;;  %v5646_v39 = vmax.f32 %v5512_v49, 0.0  ;;  %v5465_v40 = vadd.f32 %v5464_v12, %v11539_v27 }
 0x776   :  { %v6044_v50 = vunpack.c.l.b16 %v5671_v17  ;;  %v6045_v33 = vunpack.c.h.b16 %v5671_v17  ;;  %v5692_v44 = vunpack.c.l.bf16 %v5671_v17  ;;  %v5693_v48 = vunpack.c.h.bf16 %v5671_v17 }
 0x777   :  { %v5609_v10 = vpop.f32.mrf.mxu3 }
 0x778   :  { %v5610_v21 = vadd.f32 %v5609_v10, %v5561_v8  ;;  %v6070_v25 = vpack.c.b16 %v6044_v50, %v6042_v11  ;;  %v6071_v30 = vpack.c.b16 %v6045_v33, %v6043_v34  ;;  %v5730_v47 = vmul.f32 %v11549_v41, %v5692_v44  ;;  %v9633_v11 = vld [vmem:[#allocation20 + $0x18] sm:$0xff] }
 0x779   :  { %v5513_v2 = vpop.f32.mrf.mxu1  ;;  %v5562_v57 = vpop.f32.mrf.mxu2  ;;  %v5731_v23 = vmul.f32 %v11551_v55, %v5693_v48  ;;  %v9641_v34 = vld [vmem:[#allocation20 + $0x58] sm:$0xff]  ;;  %6602 = vmatpush.bf16.msrb.mxu0 %v9633_v11 }
 0x77a   :  { %v5647_v28 = vmax.f32 %v5610_v21, 0.0  ;;  %6276 = vmatmul.bf16.gmra.mxu0 %v6070_v25  ;;  %6325 = vmatmul.bf16.gmra.mxu1 %v6071_v30  ;;  %v5514_v4 = vadd.f32 %v5513_v2, %v5465_v40  ;;  %v5563_v45 = vadd.f32 %v5562_v57, %v11541_v59 }
 0x77b   :  { %6374 = vmatmul.bf16.gmra.mxu2 %v6070_v25  ;;  %6423 = vmatmul.bf16.gmra.mxu3 %v6071_v30  ;;  %v5467_v43 = vpop.f32.mrf.mxu0  ;;  %v5767_v19 = vadd.f32 %v5731_v23, %v5730_v47 }
 0x77c   :  { %v5672_v63 = vpack.c.bf16 %v5647_v28, %v5646_v39  ;;  %v5648_v22 = vmax.f32 %v5514_v4, 0.0  ;;  %v5468_v3 = vadd.f32 %v5467_v43, %v11539_v27  ;;  %6651 = vmatpush.bf16.msrb.mxu1 %v9641_v34 }
 0x77d   :  { %5768 = vadd.xlane.f32.xlu2 %v5767_v19 }
 0x77e   :  { %v5694_v5 = vunpack.c.l.bf16 %v5672_v63  ;;  %v5695_v61 = vunpack.c.h.bf16 %v5672_v63  ;;  %v6046_v6 = vunpack.c.l.b16 %v5672_v63  ;;  %v6047_v32 = vunpack.c.h.b16 %v5672_v63 }
 0x77f   :  { %v5611_v60 = vpop.f32.mrf.mxu3 }
 0x780   :  { %v5612_v31 = vadd.f32 %v5611_v60, %v5563_v45  ;;  %v5732_v36 = vmul.f32 %v11549_v41, %v5694_v5  ;;  %v5733_v16 = vmul.f32 %v11551_v55, %v5695_v61 }
 0x781   :  { %v5516_v37 = vpop.f32.mrf.mxu1  ;;  %v5565_v62 = vpop.f32.mrf.mxu2 }
 0x782   :  { %v5649_v20 = vmax.f32 %v5612_v31, 0.0  ;;  %v5770_v18 = vadd.f32 %v5733_v16, %v5732_v36  ;;  %v5517_v14 = vadd.f32 %v5516_v37, %v5468_v3  ;;  %v5566_v15 = vadd.f32 %v5565_v62, %v11541_v59 }
 0x783   :  { %v5469_v29 = vpop.f32.mrf.mxu0 }
 0x784   :  { %v5673_v9 = vpack.c.bf16 %v5649_v20, %v5648_v22  ;;  %5771 = vadd.xlane.f32.xlu0 %v5770_v18  ;;  %v5650_v1 = vmax.f32 %v5517_v14, 0.0  ;;  %v5470_v49 = vadd.f32 %v5469_v29, %v11539_v27 }
 0x786   :  { %v6048_v54 = vunpack.c.l.b16 %v5673_v9  ;;  %v6049_v35 = vunpack.c.h.b16 %v5673_v9  ;;  %v5696_v58 = vunpack.c.l.bf16 %v5673_v9  ;;  %v5697_v24 = vunpack.c.h.bf16 %v5673_v9 }
 0x787   :  { %v5614_v51 = vpop.f32.mrf.mxu3 }
 0x788   :  { %v5615_v46 = vadd.f32 %v5614_v51, %v5566_v15  ;;  %v6072_v42 = vpack.c.b16 %v6048_v54, %v6046_v6  ;;  %v6073_v38 = vpack.c.b16 %v6049_v35, %v6047_v32  ;;  %v5734_v13 = vmul.f32 %v11549_v41, %v5696_v58  ;;  %v9632_v6 = vld [vmem:[#allocation20 + $0x10] sm:$0xff] }
 0x789   :  { %v5518_v53 = vpop.f32.mrf.mxu1  ;;  %v5567_v7 = vpop.f32.mrf.mxu2  ;;  %v5735_v52 = vmul.f32 %v11551_v55, %v5697_v24  ;;  %v9640_v32 = vld [vmem:[#allocation20 + $0x50] sm:$0xff]  ;;  %6603 = vmatpush.bf16.msrb.mxu0 %v9632_v6 }
 0x78a   :  { %v5651_v0 = vmax.f32 %v5615_v46, 0.0  ;;  %6281 = vmatmul.bf16.gmra.mxu0 %v6072_v42  ;;  %6330 = vmatmul.bf16.gmra.mxu1 %v6073_v38  ;;  %v5519_v50 = vadd.f32 %v5518_v53, %v5470_v49  ;;  %v5568_v33 = vadd.f32 %v5567_v7, %v11541_v59 }
 0x78b   :  { %6379 = vmatmul.bf16.gmra.mxu2 %v6072_v42  ;;  %6428 = vmatmul.bf16.gmra.mxu3 %v6073_v38  ;;  %v5472_v12 = vpop.f32.mrf.mxu0  ;;  %v5773_v17 = vadd.f32 %v5735_v52, %v5734_v13 }
 0x78c   :  { %v5674_v8 = vpack.c.bf16 %v5651_v0, %v5650_v1  ;;  %v5652_v57 = vmax.f32 %v5519_v50, 0.0  ;;  %v5473_v28 = vadd.f32 %v5472_v12, %v11539_v27  ;;  %6652 = vmatpush.bf16.msrb.mxu1 %v9640_v32 }
 0x78d   :  { %5774 = vadd.xlane.f32.xlu1 %v5773_v17 }
 0x78e   :  { %v5698_v44 = vunpack.c.l.bf16 %v5674_v8  ;;  %v5699_v48 = vunpack.c.h.bf16 %v5674_v8  ;;  %v6050_v26 = vunpack.c.l.b16 %v5674_v8  ;;  %v6051_v56 = vunpack.c.h.b16 %v5674_v8 }
 0x78f   :  { %v5616_v10 = vpop.f32.mrf.mxu3 }
 0x790   :  { %v5617_v21 = vadd.f32 %v5616_v10, %v5568_v33  ;;  %v5736_v25 = vmul.f32 %v11549_v41, %v5698_v44  ;;  %v5737_v30 = vmul.f32 %v11551_v55, %v5699_v48 }
 0x791   :  { %v5521_v47 = vpop.f32.mrf.mxu1  ;;  %v5570_v2 = vpop.f32.mrf.mxu2 }
 0x792   :  { %v5653_v23 = vmax.f32 %v5617_v21, 0.0  ;;  %v5776_v39 = vadd.f32 %v5737_v30, %v5736_v25  ;;  %v5522_v40 = vadd.f32 %v5521_v47, %v5473_v28  ;;  %v5571_v63 = vadd.f32 %v5570_v2, %v11541_v59 }
 0x793   :  { %v5474_v43 = vpop.f32.mrf.mxu0 }
 0x794   :  { %v5675_v19 = vpack.c.bf16 %v5653_v23, %v5652_v57  ;;  %5777 = vadd.xlane.f32.xlu2 %v5776_v39  ;;  %v5654_v18 = vmax.f32 %v5522_v40, 0.0  ;;  %v5475_v14 = vadd.f32 %v5474_v43, %v11539_v27 }
 0x796   :  { %v6052_v4 = vunpack.c.l.b16 %v5675_v19  ;;  %v6053_v45 = vunpack.c.h.b16 %v5675_v19  ;;  %v5700_v5 = vunpack.c.l.bf16 %v5675_v19  ;;  %v5701_v61 = vunpack.c.h.bf16 %v5675_v19 }
 0x797   :  { %v5619_v60 = vpop.f32.mrf.mxu3 }
 0x798   :  { %v5620_v31 = vadd.f32 %v5619_v60, %v5571_v63  ;;  %v6074_v36 = vpack.c.b16 %v6052_v4, %v6050_v26  ;;  %v6075_v16 = vpack.c.b16 %v6053_v45, %v6051_v56  ;;  %v5738_v37 = vmul.f32 %v11549_v41, %v5700_v5 }
 0x799   :  { %v5523_v62 = vpop.f32.mrf.mxu1  ;;  %v5572_v22 = vpop.f32.mrf.mxu2  ;;  %v5739_v20 = vmul.f32 %v11551_v55, %v5701_v61 }
 0x79a   :  { %v5655_v3 = vmax.f32 %v5620_v31, 0.0  ;;  %6286 = vmatmul.bf16.gmra.mxu0 %v6074_v36  ;;  %6335 = vmatmul.bf16.gmra.mxu1 %v6075_v16  ;;  %v5524_v54 = vadd.f32 %v5523_v62, %v5475_v14  ;;  %v5573_v35 = vadd.f32 %v5572_v22, %v11541_v59 }
 0x79b   :  { %6384 = vmatmul.bf16.gmra.mxu2 %v6074_v36  ;;  %6433 = vmatmul.bf16.gmra.mxu3 %v6075_v16  ;;  %v5477_v29 = vpop.f32.mrf.mxu0  ;;  %v5779_v9 = vadd.f32 %v5739_v20, %v5738_v37 }
 0x79c   :  { %v5676_v15 = vpack.c.bf16 %v5655_v3, %v5654_v18  ;;  %v5656_v7 = vmax.f32 %v5524_v54, 0.0  ;;  %v5478_v0 = vadd.f32 %v5477_v29, %v11539_v27 }
 0x79d   :  { %5780 = vadd.xlane.f32.xlu0 %v5779_v9 }
 0x79e   :  { %v5702_v58 = vunpack.c.l.bf16 %v5676_v15  ;;  %v5703_v24 = vunpack.c.h.bf16 %v5676_v15  ;;  %v6054_v11 = vunpack.c.l.b16 %v5676_v15  ;;  %v6055_v34 = vunpack.c.h.b16 %v5676_v15 }
 0x79f   :  { %v5621_v51 = vpop.f32.mrf.mxu3 }
 0x7a0   :  { %v5622_v46 = vadd.f32 %v5621_v51, %v5573_v35  ;;  %v5740_v42 = vmul.f32 %v11549_v41, %v5702_v58  ;;  %v5741_v38 = vmul.f32 %v11551_v55, %v5703_v24 }
 0x7a1   :  { %v5526_v13 = vpop.f32.mrf.mxu1  ;;  %v5575_v53 = vpop.f32.mrf.mxu2 }
 0x7a2   :  { %v5657_v52 = vmax.f32 %v5622_v46, 0.0  ;;  %v5782_v1 = vadd.f32 %v5741_v38, %v5740_v42  ;;  %v5527_v17 = vadd.f32 %v5526_v13, %v5478_v0  ;;  %v5576_v49 = vadd.f32 %v5575_v53, %v11541_v59 }
 0x7a3   :  { %v5479_v8 = vpop.f32.mrf.mxu0 }
 0x7a4   :  { %v5677_v12 = vpack.c.bf16 %v5657_v52, %v5656_v7  ;;  %5783 = vadd.xlane.f32.xlu1 %v5782_v1  ;;  %v5658_v39 = vmax.f32 %v5527_v17, 0.0  ;;  %v5480_v19 = vadd.f32 %v5479_v8, %v11539_v27 }
 0x7a6   :  { %v6056_v50 = vunpack.c.l.b16 %v5677_v12  ;;  %v6057_v33 = vunpack.c.h.b16 %v5677_v12  ;;  %v5704_v44 = vunpack.c.l.bf16 %v5677_v12  ;;  %v5705_v48 = vunpack.c.h.bf16 %v5677_v12 }
 0x7a7   :  { %v5624_v10 = vpop.f32.mrf.mxu3 }
 0x7a8   :  { %v5625_v21 = vadd.f32 %v5624_v10, %v5576_v49  ;;  %v6076_v25 = vpack.c.b16 %v6056_v50, %v6054_v11  ;;  %v6077_v30 = vpack.c.b16 %v6057_v33, %v6055_v34  ;;  %v5742_v47 = vmul.f32 %v11549_v41, %v5704_v44  ;;  %v9631_v34 = vld [vmem:[#allocation20 + $0x8] sm:$0xff] }
 0x7a9   :  { %v5528_v2 = vpop.f32.mrf.mxu1  ;;  %v5577_v57 = vpop.f32.mrf.mxu2  ;;  %v5743_v23 = vmul.f32 %v11551_v55, %v5705_v48  ;;  %6604 = vmatpush.bf16.msrb.mxu0 %v9631_v34 }
 0x7aa   :  { %v5659_v28 = vmax.f32 %v5625_v21, 0.0  ;;  %6291 = vmatmul.bf16.gmra.mxu0 %v6076_v25  ;;  %6340 = vmatmul.bf16.gmra.mxu1 %v6077_v30  ;;  %v5529_v63 = vadd.f32 %v5528_v2, %v5480_v19  ;;  %v5578_v26 = vadd.f32 %v5577_v57, %v11541_v59  ;;  %v9639_v2 = vld [vmem:[#allocation20 + $0x48] sm:$0xff] }
 0x7ab   :  { %6389 = vmatmul.bf16.gmra.mxu2 %v6076_v25  ;;  %6438 = vmatmul.bf16.gmra.mxu3 %v6077_v30  ;;  %v5785_v43 = vadd.f32 %v5743_v23, %v5742_v47  ;;  %v5482_v45 = vpop.f32.mrf.mxu0  ;;  %v9630_v30 = vld [vmem:[#allocation20] sm:$0xff]  ;;  %v11612_v47 = vld [vmem:[#allocation2] ss:$0 sm:$0xff] }
 0x7ac   :  { %v5678_v40 = vpack.c.bf16 %v5659_v28, %v5658_v39  ;;  %v5660_v37 = vmax.f32 %v5529_v63, 0.0  ;;  %v5483_v20 = vadd.f32 %v5482_v45, %v11539_v27  ;;  %6653 = vmatpush.bf16.msrb.mxu1 %v9639_v2  ;;  %v9638_v45 = vld [vmem:[#allocation20 + $0x40] sm:$0xff] }
 0x7ad   :  { %5786 = vadd.xlane.f32.xlu2 %v5785_v43  ;;  %6605 = vmatpush.bf16.msrb.mxu0 %v9630_v30 }
 0x7ae   :  { %v5706_v56 = vunpack.c.l.bf16 %v5678_v40  ;;  %v5707_v4 = vunpack.c.h.bf16 %v5678_v40  ;;  %v6058_v9 = vunpack.c.l.b16 %v5678_v40  ;;  %v6059_v14 = vunpack.c.h.b16 %v5678_v40 }
 0x7af   :  { %v5626_v5 = vpop.f32.mrf.mxu3 }
 0x7b0   :  { %v5627_v61 = vadd.f32 %v5626_v5, %v5578_v26  ;;  %v5744_v60 = vmul.f32 %v11549_v41, %v5706_v56  ;;  %v5745_v31 = vmul.f32 %v11551_v55, %v5707_v4  ;;  %6654 = vmatpush.bf16.msrb.mxu1 %v9638_v45 }
 0x7b1   :  { %v5531_v36 = vpop.f32.mrf.mxu1  ;;  %v5580_v16 = vpop.f32.mrf.mxu2 }
 0x7b2   :  { %v5661_v62 = vmax.f32 %v5627_v61, 0.0  ;;  %v5788_v22 = vadd.f32 %v5745_v31, %v5744_v60  ;;  %v5532_v3 = vadd.f32 %v5531_v36, %v5483_v20  ;;  %v5581_v29 = vadd.f32 %v5580_v16, %v11541_v59  ;;  %v6012_v20 = vld [vmem:[%s11946_s22] sm:$0x3] }
 0x7b3   :  { %v5484_v42 = vpop.f32.mrf.mxu0 }
 0x7b4   :  { %v5679_v18 = vpack.c.bf16 %v5661_v62, %v5660_v37  ;;  %5789 = vadd.xlane.f32.xlu0 %v5788_v22  ;;  %v5662_v13 = vmax.f32 %v5532_v3, 0.0  ;;  %v5485_v0 = vadd.f32 %v5484_v42, %v11539_v27 }
 0x7b6   :  { %v6060_v15 = vunpack.c.l.b16 %v5679_v18  ;;  %v6061_v6 = vunpack.c.h.b16 %v5679_v18  ;;  %v5708_v32 = vunpack.c.l.bf16 %v5679_v18  ;;  %v5709_v54 = vunpack.c.h.bf16 %v5679_v18 }
 0x7b7   :  { %v5629_v35 = vpop.f32.mrf.mxu3 }
 0x7b8   :  { %v5630_v58 = vadd.f32 %v5629_v35, %v5581_v29  ;;  %v6078_v24 = vpack.c.b16 %v6060_v15, %v6058_v9  ;;  %v6079_v51 = vpack.c.b16 %v6061_v6, %v6059_v14  ;;  %v5746_v46 = vmul.f32 %v11549_v41, %v5708_v32 }
 0x7b9   :  { %v5747_v38 = vmul.f32 %v11551_v55, %v5709_v54  ;;  %v5533_v7 = vpop.f32.mrf.mxu1  ;;  %v5582_v52 = vpop.f32.mrf.mxu2  ;;  %v11627_v32 = vperm.slane %v6012_v20, 0 }
 0x7ba   :  { %v5663_v53 = vmax.f32 %v5630_v58, 0.0  ;;  %6296 = vmatmul.bf16.gmra.mxu0 %v6078_v24  ;;  %6345 = vmatmul.bf16.gmra.mxu1 %v6079_v51  ;;  %v5534_v17 = vadd.f32 %v5533_v7, %v5485_v0  ;;  %v5583_v49 = vadd.f32 %v5582_v52, %v11541_v59 }
 0x7bb   :  { %6394 = vmatmul.bf16.gmra.mxu2 %v6078_v24  ;;  %6443 = vmatmul.bf16.gmra.mxu3 %v6079_v51  ;;  %v5791_v1 = vadd.f32 %v5747_v38, %v5746_v46 }
 0x7bc   :  { %v5680_v12 = vpack.c.bf16 %v5663_v53, %v5662_v13  ;;  %v5664_v10 = vmax.f32 %v5534_v17, 0.0 }
 0x7bd   :  { %5792 = vadd.xlane.f32.xlu1 %v5791_v1  ;;  %v11632_v1 = vperm.slane %v6012_v20, 1 }
 0x7be   :  { %v5710_v8 = vunpack.c.l.bf16 %v5680_v12  ;;  %v5711_v11 = vunpack.c.h.bf16 %v5680_v12  ;;  %v6062_v59 = vunpack.c.l.b16 %v5680_v12  ;;  %v6063_v57 = vunpack.c.h.b16 %v5680_v12 }
 0x7bf   :  { %v5631_v50 = vpop.f32.mrf.mxu3 }
 0x7c0   :  { %v5632_v33 = vadd.f32 %v5631_v50, %v5583_v49  ;;  %v5748_v44 = vmul.f32 %v11549_v41, %v5710_v8  ;;  %v5749_v48 = vmul.f32 %v11551_v55, %v5711_v11 }
 0x7c2   :  { %v5665_v21 = vmax.f32 %v5632_v33, 0.0  ;;  %v5794_v25 = vadd.f32 %v5749_v48, %v5748_v44 }
 0x7c4   :  { %v5681_v27 = vpack.c.bf16 %v5665_v21, %v5664_v10  ;;  %5795 = vadd.xlane.f32.xlu2 %v5794_v25 }
 0x7c6   :  { %v6064_v23 = vunpack.c.l.b16 %v5681_v27  ;;  %v6065_v39 = vunpack.c.h.b16 %v5681_v27  ;;  %v5712_v28 = vunpack.c.l.bf16 %v5681_v27  ;;  %v5713_v43 = vunpack.c.h.bf16 %v5681_v27 }
 0x7c7   :  { %v5754_v19 = vpop.xlane.xlu0 %5753 }
 0x7c8   :  { %v5804_v40 = vadd.f32 %v11612_v47, %v5754_v19  ;;  %v6080_v63 = vpack.c.b16 %v6064_v23, %v6062_v59  ;;  %v6081_v26 = vpack.c.b16 %v6065_v39, %v6063_v57  ;;  %v5750_v56 = vmul.f32 %v11549_v41, %v5712_v28 }
 0x7c9   :  { %v5751_v4 = vmul.f32 %v11551_v55, %v5713_v43 }
 0x7ca   :  { %v5820_v5 = vadd.f32 -1.0, %v5804_v40  ;;  %6301 = vmatmul.bf16.gmra.mxu0 %v6080_v63  ;;  %6350 = vmatmul.bf16.gmra.mxu1 %v6081_v26 }
 0x7cb   :  { %6399 = vmatmul.bf16.gmra.mxu2 %v6080_v63  ;;  %6448 = vmatmul.bf16.gmra.mxu3 %v6081_v26  ;;  %v5797_v61 = vadd.f32 %v5751_v4, %v5750_v56 }
 0x7cc   :  { %v5852_v60 = vand.u32 2147483647, %v5820_v5  ;;  %v5836_v52 = vmax.f32 %v5820_v5, 0.0 }
 0x7cd   :  { %5798 = vadd.xlane.f32.xlu0 %v5797_v61 }
 0x7ce   :  { %v5868_v31 = vsub.f32 0.0, %v5852_v60 }
 0x7d0   :  { %v5884_v36 = vmul.f32 1.442695, %v5868_v31  ;;  %v5757_v16 = vpop.xlane.xlu0 %5756 }
 0x7d1   :  { %v5805_v37 = vadd.f32 %v11612_v47, %v5757_v16 }
 0x7d2   :  { %9737 = vpow2.f32 %v5884_v36 }
 0x7d3   :  { %v11618_v62 = vadd.f32 -1.0, %v5805_v37 }
 0x7d5   :  { %v5853_v41 = vand.u32 2147483647, %v11618_v62  ;;  %v5837_v56 = vmax.f32 %v11618_v62, 0.0 }
 0x7d7   :  { %v5869_v55 = vsub.f32 0.0, %v5853_v41  ;;  %v5760_v22 = vpop.xlane.xlu1 %5759  ;;  %v6267_v18 = vpop.f32.mrf.mxu0 }
 0x7d8   :  { %v9738_v3 = vpop.eup %9737  ;;  %v5806_v29 = vadd.f32 %v11612_v47, %v5760_v22  ;;  %v6316_v9 = vpop.f32.mrf.mxu1  ;;  %v6268_v58 = vadd.f32 %v6267_v18, %v11627_v32 }
 0x7d9   :  { %v5916_v14 = vadd.f32 1.0, %v9738_v3  ;;  %v5886_v15 = vmul.f32 1.442695, %v5869_v55 }
 0x7da   :  { %v11625_v6 = vadd.f32 -1.0, %v5806_v29  ;;  %v6317_v49 = vadd.f32 %v6316_v9, %v6268_v58 }
 0x7db   :  { %9739 = vlog2.f32 %v5916_v14 }
 0x7dc   :  { %9741 = vpow2.f32 %v5886_v15  ;;  %v5854_v54 = vand.u32 2147483647, %v11625_v6  ;;  %v5838_v20 = vmax.f32 %v11625_v6, 0.0 }
 0x7de   :  { %v5870_v35 = vsub.f32 0.0, %v5854_v54  ;;  %v6365_v24 = vpop.f32.mrf.mxu2  ;;  %v6414_v51 = vpop.f32.mrf.mxu3 }
 0x7df   :  { %v6269_v46 = vpop.f32.mrf.mxu0  ;;  %v6366_v44 = vadd.f32 %v6365_v24, %v11632_v1 }
 0x7e0   :  { %v5888_v42 = vmul.f32 1.442695, %v5870_v35  ;;  %v5763_v38 = vpop.xlane.xlu1 %5762  ;;  %v6270_v13 = vadd.f32 %v6269_v46, %v11627_v32  ;;  %v6318_v53 = vpop.f32.mrf.mxu1 }
 0x7e1   :  { %v9740_v7 = vpop.eup %9739  ;;  %v5807_v0 = vadd.f32 %v11612_v47, %v5763_v38  ;;  %v6415_v28 = vadd.f32 %v6414_v51, %v6366_v44 }
 0x7e2   :  { %v9742_v12 = vpop.eup %9741  ;;  %v5933_v17 = vmul.f32 0.6931472, %v9740_v7  ;;  %9743 = vpow2.f32 %v5888_v42  ;;  %v6319_v8 = vadd.f32 %v6318_v53, %v6270_v13  ;;  %v9653_v42 = vld [vmem:[%s11948_s24 + $0x38] sm:$0xff] }
 0x7e3   :  { %v5917_v11 = vadd.f32 1.0, %v9742_v12  ;;  %v11635_v34 = vadd.f32 -1.0, %v5807_v0  ;;  %6788 = vmatpush.bf16.msrb.mxu2 %v9653_v42 }
 0x7e4   :  { %v5964_v50 = vadd.f32 %v5933_v17, %v5836_v52  ;;  %v6454_v33 = vpack.c.bf16 %v6319_v8, %v6317_v49 }
 0x7e5   :  { %9745 = vlog2.f32 %v5917_v11  ;;  %v5855_v48 = vand.u32 2147483647, %v11635_v34 }
 0x7e6   :  { %7190 = vst.msk [vmem:[%s11950_s26] sm:$0xff] %vm7189_vm0, %v5964_v50  ;;  %v6367_v10 = vpop.f32.mrf.mxu2  ;;  %v6416_v21 = vpop.f32.mrf.mxu3  ;;  %6606 = vmatmul.bf16.vlgmr.msrb.gmra.mxu0 %v6454_v33 }
 0x7e7   :  { %v5871_v25 = vsub.f32 0.0, %v5855_v48  ;;  %v6368_v30 = vadd.f32 %v6367_v10, %v11632_v1  ;;  %v5766_v27 = vpop.xlane.xlu2 %5765  ;;  %v6272_v2 = vpop.f32.mrf.mxu0  ;;  %v5839_v48 = vmax.f32 %v11635_v34, 0.0 }
 0x7e8   :  { %v9744_v59 = vpop.eup %9743  ;;  %v5808_v57 = vadd.f32 %v11612_v47, %v5766_v27  ;;  %v6321_v23 = vpop.f32.mrf.mxu1  ;;  %v6273_v60 = vadd.f32 %v6272_v2, %v11627_v32 }
 0x7e9   :  { %v5918_v39 = vadd.f32 1.0, %v9744_v59  ;;  %v5890_v43 = vmul.f32 1.442695, %v5871_v25  ;;  %v6417_v19 = vadd.f32 %v6416_v21, %v6368_v30 }
 0x7ea   :  { %v11645_v40 = vadd.f32 -1.0, %v5808_v57  ;;  %v6322_v9 = vadd.f32 %v6321_v23, %v6273_v60 }
 0x7eb   :  { %v9746_v63 = vpop.eup %9745  ;;  %9747 = vlog2.f32 %v5918_v39  ;;  %v6455_v26 = vpack.c.bf16 %v6417_v19, %v6415_v28 }
 0x7ec   :  { %v5935_v4 = vmul.f32 0.6931472, %v9746_v63  ;;  %9749 = vpow2.f32 %v5890_v43  ;;  %v5856_v45 = vand.u32 2147483647, %v11645_v40  ;;  %v5840_v19 = vmax.f32 %v11645_v40, 0.0 }
 0x7ed   :  { %6655 = vmatmul.bf16.vlgmr.msrb.gmra.mxu1 %v6455_v26 }
 0x7ee   :  { %v5965_v5 = vadd.f32 %v5935_v4, %v5837_v56  ;;  %v5872_v61 = vsub.f32 0.0, %v5856_v45  ;;  %v6370_v31 = vpop.f32.mrf.mxu2  ;;  %v6419_v36 = vpop.f32.mrf.mxu3 }
 0x7ef   :  { %v6274_v16 = vpop.f32.mrf.mxu0  ;;  %v6371_v24 = vadd.f32 %v6370_v31, %v11632_v1 }
 0x7f0   :  { %7191 = vst.msk [vmem:[%s11950_s26 + $0x8] sm:$0xff] %vm7189_vm0, %v5965_v5  ;;  %v5892_v37 = vmul.f32 1.442695, %v5872_v61  ;;  %v5769_v41 = vpop.xlane.xlu2 %5768  ;;  %v6275_v62 = vadd.f32 %v6274_v16, %v11627_v32  ;;  %v6323_v55 = vpop.f32.mrf.mxu1 }
 0x7f1   :  { %v9748_v22 = vpop.eup %9747  ;;  %v5809_v18 = vadd.f32 %v11612_v47, %v5769_v41  ;;  %v6420_v49 = vadd.f32 %v6419_v36, %v6371_v24  ;;  %v9652_v41 = vld [vmem:[%s11948_s24 + $0x30] sm:$0xff] }
 0x7f2   :  { %v9750_v3 = vpop.eup %9749  ;;  %v5937_v29 = vmul.f32 0.6931472, %v9748_v22  ;;  %9751 = vpow2.f32 %v5892_v37  ;;  %v6324_v14 = vadd.f32 %v6323_v55, %v6275_v62  ;;  %6789 = vmatpush.bf16.msrb.mxu2 %v9652_v41 }
 0x7f3   :  { %v5919_v15 = vadd.f32 1.0, %v9750_v3  ;;  %v11657_v54 = vadd.f32 -1.0, %v5809_v18 }
 0x7f4   :  { %v5966_v35 = vadd.f32 %v5937_v29, %v5838_v20  ;;  %v6456_v58 = vpack.c.bf16 %v6324_v14, %v6322_v9 }
 0x7f5   :  { %9753 = vlog2.f32 %v5919_v15  ;;  %v5857_v51 = vand.u32 2147483647, %v11657_v54 }
 0x7f6   :  { %7192 = vst.msk [vmem:[%s11950_s26 + $0x10] sm:$0xff] %vm7189_vm0, %v5966_v35  ;;  %v6372_v6 = vpop.f32.mrf.mxu2  ;;  %v6421_v46 = vpop.f32.mrf.mxu3  ;;  %6611 = vmatmul.bf16.gmra.mxu0 %v6456_v58 }
 0x7f7   :  { %v5873_v38 = vsub.f32 0.0, %v5857_v51  ;;  %v6373_v13 = vadd.f32 %v6372_v6, %v11632_v1  ;;  %v6277_v53 = vpop.f32.mrf.mxu0  ;;  %v5772_v7 = vpop.xlane.xlu0 %5771  ;;  %v5841_v6 = vmax.f32 %v11657_v54, 0.0 }
 0x7f8   :  { %v9752_v52 = vpop.eup %9751  ;;  %v6326_v0 = vpop.f32.mrf.mxu1  ;;  %v5810_v12 = vadd.f32 %v11612_v47, %v5772_v7  ;;  %v6278_v30 = vadd.f32 %v6277_v53, %v11627_v32 }
 0x7f9   :  { %v5920_v17 = vadd.f32 1.0, %v9752_v52  ;;  %v5894_v8 = vmul.f32 1.442695, %v5873_v38  ;;  %v6422_v11 = vadd.f32 %v6421_v46, %v6373_v13 }
 0x7fa   :  { %v11670_v50 = vadd.f32 -1.0, %v5810_v12  ;;  %v6327_v4 = vadd.f32 %v6326_v0, %v6278_v30 }
 0x7fb   :  { %v9754_v33 = vpop.eup %9753  ;;  %9755 = vlog2.f32 %v5920_v17  ;;  %v6457_v44 = vpack.c.bf16 %v6422_v11, %v6420_v49 }
 0x7fc   :  { %v5939_v10 = vmul.f32 0.6931472, %v9754_v33  ;;  %9757 = vpow2.f32 %v5894_v8  ;;  %v5858_v21 = vand.u32 2147483647, %v11670_v50  ;;  %v5842_v11 = vmax.f32 %v11670_v50, 0.0 }
 0x7fd   :  { %6660 = vmatmul.bf16.gmra.mxu1 %v6457_v44 }
 0x7fe   :  { %v5967_v25 = vadd.f32 %v5939_v10, %v5839_v48  ;;  %v5874_v27 = vsub.f32 0.0, %v5858_v21  ;;  %v6375_v2 = vpop.f32.mrf.mxu2  ;;  %v6424_v59 = vpop.f32.mrf.mxu3 }
 0x7ff   :  { %v6279_v57 = vpop.f32.mrf.mxu0  ;;  %v6376_v36 = vadd.f32 %v6375_v2, %v11632_v1 }
 0x800   :  { %7193 = vst.msk [vmem:[%s11950_s26 + $0x18] sm:$0xff] %vm7189_vm0, %v5967_v25  ;;  %v5896_v23 = vmul.f32 1.442695, %v5874_v27  ;;  %v5775_v39 = vpop.xlane.xlu1 %5774  ;;  %v6280_v34 = vadd.f32 %v6279_v57, %v11627_v32  ;;  %v6328_v28 = vpop.f32.mrf.mxu1 }
 0x801   :  { %v9756_v43 = vpop.eup %9755  ;;  %v5811_v63 = vadd.f32 %v11612_v47, %v5775_v39  ;;  %v6425_v14 = vadd.f32 %v6424_v59, %v6376_v36  ;;  %v9651_v39 = vld [vmem:[%s11948_s24 + $0x28] sm:$0xff] }
 0x802   :  { %v9758_v26 = vpop.eup %9757  ;;  %v5941_v56 = vmul.f32 0.6931472, %v9756_v43  ;;  %9759 = vpow2.f32 %v5896_v23  ;;  %v6329_v45 = vadd.f32 %v6328_v28, %v6280_v34  ;;  %6790 = vmatpush.bf16.msrb.mxu2 %v9651_v39 }
 0x803   :  { %v5921_v5 = vadd.f32 1.0, %v9758_v26  ;;  %v11682_v61 = vadd.f32 -1.0, %v5811_v63 }
 0x804   :  { %v5968_v60 = vadd.f32 %v5941_v56, %v5840_v19  ;;  %v6458_v31 = vpack.c.bf16 %v6329_v45, %v6327_v4 }
 0x805   :  { %9761 = vlog2.f32 %v5921_v5  ;;  %v5859_v16 = vand.u32 2147483647, %v11682_v61 }
 0x806   :  { %7194 = vst.msk [vmem:[%s11950_s26 + $0x20] sm:$0xff] %vm7189_vm0, %v5968_v60  ;;  %v6377_v40 = vpop.f32.mrf.mxu2  ;;  %v6426_v37 = vpop.f32.mrf.mxu3  ;;  %6616 = vmatmul.bf16.gmra.mxu0 %v6458_v31 }
 0x807   :  { %v5875_v62 = vsub.f32 0.0, %v5859_v16  ;;  %v6378_v55 = vadd.f32 %v6377_v40, %v11632_v1  ;;  %v5778_v22 = vpop.xlane.xlu2 %5777  ;;  %v6282_v20 = vpop.f32.mrf.mxu0  ;;  %v5843_v40 = vmax.f32 %v11682_v61, 0.0 }
 0x808   :  { %v9760_v18 = vpop.eup %9759  ;;  %v5812_v3 = vadd.f32 %v11612_v47, %v5778_v22  ;;  %v6331_v29 = vpop.f32.mrf.mxu1  ;;  %v6283_v53 = vadd.f32 %v6282_v20, %v11627_v32 }
 0x809   :  { %v5922_v9 = vadd.f32 1.0, %v9760_v18  ;;  %v5898_v15 = vmul.f32 1.442695, %v5875_v62  ;;  %v6427_v35 = vadd.f32 %v6426_v37, %v6378_v55 }
 0x80a   :  { %v11695_v58 = vadd.f32 -1.0, %v5812_v3  ;;  %v6332_v10 = vadd.f32 %v6331_v29, %v6283_v53 }
 0x80b   :  { %v9762_v24 = vpop.eup %9761  ;;  %9763 = vlog2.f32 %v5922_v9  ;;  %v6459_v51 = vpack.c.bf16 %v6427_v35, %v6425_v14 }
 0x80c   :  { %v5943_v46 = vmul.f32 0.6931472, %v9762_v24  ;;  %9765 = vpow2.f32 %v5898_v15  ;;  %v5860_v42 = vand.u32 2147483647, %v11695_v58  ;;  %v5844_v35 = vmax.f32 %v11695_v58, 0.0 }
 0x80d   :  { %6665 = vmatmul.bf16.gmra.mxu1 %v6459_v51 }
 0x80e   :  { %v5969_v38 = vadd.f32 %v5943_v46, %v5841_v6  ;;  %v5876_v13 = vsub.f32 0.0, %v5860_v42  ;;  %v6380_v7 = vpop.f32.mrf.mxu2  ;;  %v6429_v52 = vpop.f32.mrf.mxu3 }
 0x80f   :  { %v6284_v0 = vpop.f32.mrf.mxu0  ;;  %v6381_v59 = vadd.f32 %v6380_v7, %v11632_v1 }
 0x810   :  { %7195 = vst.msk [vmem:[%s11950_s26 + $0x28] sm:$0xff] %vm7189_vm0, %v5969_v38  ;;  %v5900_v12 = vmul.f32 1.442695, %v5876_v13  ;;  %v6285_v54 = vadd.f32 %v6284_v0, %v11627_v32  ;;  %v6333_v17 = vpop.f32.mrf.mxu1  ;;  %v5781_v49 = vpop.xlane.xlu0 %5780 }
 0x811   :  { %v9764_v8 = vpop.eup %9763  ;;  %v5813_v33 = vadd.f32 %v11612_v47, %v5781_v49  ;;  %v6430_v45 = vadd.f32 %v6429_v52, %v6381_v59 }
 0x812   :  { %v9766_v44 = vpop.eup %9765  ;;  %v5945_v48 = vmul.f32 0.6931472, %v9764_v8  ;;  %9767 = vpow2.f32 %v5900_v12  ;;  %v6334_v21 = vadd.f32 %v6333_v17, %v6285_v54  ;;  %v9650_v54 = vld [vmem:[%s11948_s24 + $0x20] sm:$0xff] }
 0x813   :  { %v5923_v25 = vadd.f32 1.0, %v9766_v44  ;;  %v11707_v30 = vadd.f32 -1.0, %v5813_v33  ;;  %6791 = vmatpush.bf16.msrb.mxu2 %v9650_v54 }
 0x814   :  { %v5970_v27 = vadd.f32 %v5945_v48, %v5842_v11  ;;  %v6460_v2 = vpack.c.bf16 %v6334_v21, %v6332_v10 }
 0x815   :  { %9769 = vlog2.f32 %v5923_v25  ;;  %v5861_v57 = vand.u32 2147483647, %v11707_v30 }
 0x816   :  { %7196 = vst.msk [vmem:[%s11950_s26 + $0x30] sm:$0xff] %vm7189_vm0, %v5970_v27  ;;  %v6382_v50 = vpop.f32.mrf.mxu2  ;;  %v6431_v23 = vpop.f32.mrf.mxu3  ;;  %6621 = vmatmul.bf16.gmra.mxu0 %v6460_v2 }
 0x817   :  { %v5877_v34 = vsub.f32 0.0, %v5861_v57  ;;  %v6383_v28 = vadd.f32 %v6382_v50, %v11632_v1  ;;  %v5784_v43 = vpop.xlane.xlu1 %5783  ;;  %v6287_v19 = vpop.f32.mrf.mxu0  ;;  %v5845_v50 = vmax.f32 %v11707_v30, 0.0 }
 0x818   :  { %v9768_v63 = vpop.eup %9767  ;;  %v5814_v26 = vadd.f32 %v11612_v47, %v5784_v43  ;;  %v6336_v56 = vpop.f32.mrf.mxu1  ;;  %v6288_v22 = vadd.f32 %v6287_v19, %v11627_v32 }
 0x819   :  { %v5924_v4 = vadd.f32 1.0, %v9768_v63  ;;  %v5902_v5 = vmul.f32 1.442695, %v5877_v34  ;;  %v6432_v60 = vadd.f32 %v6431_v23, %v6383_v28 }
 0x81a   :  { %v11720_v31 = vadd.f32 -1.0, %v5814_v26  ;;  %v6337_v46 = vadd.f32 %v6336_v56, %v6288_v22 }
 0x81b   :  { %v9770_v36 = vpop.eup %9769  ;;  %9771 = vlog2.f32 %v5924_v4  ;;  %v6461_v16 = vpack.c.bf16 %v6432_v60, %v6430_v45 }
 0x81c   :  { %v5947_v37 = vmul.f32 0.6931472, %v9770_v36  ;;  %9773 = vpow2.f32 %v5902_v5  ;;  %v5862_v41 = vand.u32 2147483647, %v11720_v31  ;;  %v5846_v60 = vmax.f32 %v11720_v31, 0.0 }
 0x81d   :  { %6670 = vmatmul.bf16.gmra.mxu1 %v6461_v16 }
 0x81e   :  { %v5971_v62 = vadd.f32 %v5947_v37, %v5843_v40  ;;  %v5878_v55 = vsub.f32 0.0, %v5862_v41  ;;  %v6385_v20 = vpop.f32.mrf.mxu2  ;;  %v6434_v18 = vpop.f32.mrf.mxu3 }
 0x81f   :  { %v6289_v3 = vpop.f32.mrf.mxu0  ;;  %v6386_v52 = vadd.f32 %v6385_v20, %v11632_v1 }
 0x820   :  { %7197 = vst.msk [vmem:[%s11950_s26 + $0x38] sm:$0xff] %vm7189_vm0, %v5971_v62  ;;  %v5904_v29 = vmul.f32 1.442695, %v5878_v55  ;;  %v5787_v9 = vpop.xlane.xlu2 %5786  ;;  %v6290_v61 = vadd.f32 %v6289_v3, %v11627_v32  ;;  %v6338_v14 = vpop.f32.mrf.mxu1 }
 0x821   :  { %v9772_v15 = vpop.eup %9771  ;;  %v5815_v24 = vadd.f32 %v11612_v47, %v5787_v9  ;;  %v6435_v21 = vadd.f32 %v6434_v18, %v6386_v52  ;;  %v9649_v9 = vld [vmem:[%s11948_s24 + $0x18] sm:$0xff] }
 0x822   :  { %v9774_v51 = vpop.eup %9773  ;;  %v5949_v6 = vmul.f32 0.6931472, %v9772_v15  ;;  %9775 = vpow2.f32 %v5904_v29  ;;  %v6339_v42 = vadd.f32 %v6338_v14, %v6290_v61  ;;  %6792 = vmatpush.bf16.msrb.mxu2 %v9649_v9 }
 0x823   :  { %v5925_v38 = vadd.f32 1.0, %v9774_v51  ;;  %v11732_v13 = vadd.f32 -1.0, %v5815_v24 }
 0x824   :  { %v5972_v53 = vadd.f32 %v5949_v6, %v5844_v35  ;;  %v6462_v7 = vpack.c.bf16 %v6339_v42, %v6337_v46 }
 0x825   :  { %9777 = vlog2.f32 %v5925_v38  ;;  %v5863_v0 = vand.u32 2147483647, %v11732_v13 }
 0x826   :  { %7198 = vst.msk [vmem:[%s11950_s26 + $0x40] sm:$0xff] %vm7189_vm0, %v5972_v53  ;;  %v6387_v58 = vpop.f32.mrf.mxu2  ;;  %v6436_v12 = vpop.f32.mrf.mxu3  ;;  %6626 = vmatmul.bf16.gmra.mxu0 %v6462_v7 }
 0x827   :  { %v5879_v17 = vsub.f32 0.0, %v5863_v0  ;;  %v6388_v49 = vadd.f32 %v6387_v58, %v11632_v1  ;;  %v6292_v8 = vpop.f32.mrf.mxu0  ;;  %v5790_v11 = vpop.xlane.xlu0 %5789  ;;  %v5847_v58 = vmax.f32 %v11732_v13, 0.0 }
 0x828   :  { %v9776_v33 = vpop.eup %9775  ;;  %v6341_v44 = vpop.f32.mrf.mxu1  ;;  %v5816_v48 = vadd.f32 %v11612_v47, %v5790_v11  ;;  %v6293_v28 = vadd.f32 %v6292_v8, %v11627_v32 }
 0x829   :  { %v5926_v10 = vadd.f32 1.0, %v9776_v33  ;;  %v5906_v25 = vmul.f32 1.442695, %v5879_v17  ;;  %v6437_v27 = vadd.f32 %v6436_v12, %v6388_v49 }
 0x82a   :  { %v11745_v2 = vadd.f32 -1.0, %v5816_v48  ;;  %v6342_v37 = vadd.f32 %v6341_v44, %v6293_v28  ;;  %v9647_v28 = vld [vmem:[%s11948_s24 + $0x8] sm:$0xff] }
 0x82b   :  { %v9778_v59 = vpop.eup %9777  ;;  %9779 = vlog2.f32 %v5926_v10  ;;  %v6463_v57 = vpack.c.bf16 %v6437_v27, %v6435_v21 }
 0x82c   :  { %v5951_v23 = vmul.f32 0.6931472, %v9778_v59  ;;  %9781 = vpow2.f32 %v5906_v25  ;;  %v5864_v39 = vand.u32 2147483647, %v11745_v2  ;;  %v9648_v25 = vld [vmem:[%s11948_s24 + $0x10] sm:$0xff]  ;;  %v5848_v59 = vmax.f32 %v11745_v2, 0.0 }
 0x82d   :  { %6675 = vmatmul.bf16.gmra.mxu1 %v6463_v57  ;;  %6793 = vmatpush.bf16.msrb.mxu2 %v9648_v25 }
 0x82e   :  { %v5973_v34 = vadd.f32 %v5951_v23, %v5845_v50  ;;  %v5880_v43 = vsub.f32 0.0, %v5864_v39  ;;  %v6390_v19 = vpop.f32.mrf.mxu2  ;;  %v6439_v63 = vpop.f32.mrf.mxu3 }
 0x82f   :  { %v6294_v26 = vpop.f32.mrf.mxu0  ;;  %v6391_v18 = vadd.f32 %v6390_v19, %v11632_v1 }
 0x830   :  { %7199 = vst.msk [vmem:[%s11950_s26 + $0x48] sm:$0xff] %vm7189_vm0, %v5973_v34  ;;  %v5908_v56 = vmul.f32 1.442695, %v5880_v43  ;;  %v5793_v4 = vpop.xlane.xlu1 %5792  ;;  %v6295_v30 = vadd.f32 %v6294_v26, %v11627_v32  ;;  %v6343_v45 = vpop.f32.mrf.mxu1 }
 0x831   :  { %v9780_v5 = vpop.eup %9779  ;;  %v5817_v36 = vadd.f32 %v11612_v47, %v5793_v4  ;;  %v6440_v42 = vadd.f32 %v6439_v63, %v6391_v18  ;;  %6794 = vmatpush.bf16.msrb.mxu2 %v9647_v28 }
 0x832   :  { %v9782_v16 = vpop.eup %9781  ;;  %v5953_v40 = vmul.f32 0.6931472, %v9780_v5  ;;  %9783 = vpow2.f32 %v5908_v56  ;;  %v6344_v41 = vadd.f32 %v6343_v45, %v6295_v30  ;;  %v9646_v30 = vld [vmem:[%s11948_s24] sm:$0xff] }
 0x833   :  { %v5927_v62 = vadd.f32 1.0, %v9782_v16  ;;  %v11757_v55 = vadd.f32 -1.0, %v5817_v36 }
 0x834   :  { %v5974_v22 = vadd.f32 %v5953_v40, %v5846_v60  ;;  %v6464_v20 = vpack.c.bf16 %v6344_v41, %v6342_v37 }
 0x835   :  { %9785 = vlog2.f32 %v5927_v62  ;;  %v5865_v3 = vand.u32 2147483647, %v11757_v55  ;;  %6795 = vmatpush.bf16.msrb.mxu2 %v9646_v30  ;;  %v5849_v18 = vmax.f32 %v11757_v55, 0.0 }
 0x836   :  { %7200 = vst.msk [vmem:[%s11950_s26 + $0x50] sm:$0xff] %vm7189_vm0, %v5974_v22  ;;  %v6392_v31 = vpop.f32.mrf.mxu2  ;;  %v6441_v29 = vpop.f32.mrf.mxu3  ;;  %6631 = vmatmul.bf16.gmra.mxu0 %v6464_v20 }
 0x837   :  { %v5881_v61 = vsub.f32 0.0, %v5865_v3  ;;  %v6393_v14 = vadd.f32 %v6392_v31, %v11632_v1  ;;  %v5796_v15 = vpop.xlane.xlu2 %5795  ;;  %v6297_v35 = vpop.f32.mrf.mxu0 }
 0x838   :  { %v9784_v24 = vpop.eup %9783  ;;  %v5818_v51 = vadd.f32 %v11612_v47, %v5796_v15  ;;  %v6346_v6 = vpop.f32.mrf.mxu1  ;;  %v6298_v8 = vadd.f32 %v6297_v35, %v11627_v32 }
 0x839   :  { %v5928_v46 = vadd.f32 1.0, %v9784_v24  ;;  %v5910_v38 = vmul.f32 1.442695, %v5881_v61  ;;  %v6442_v53 = vadd.f32 %v6441_v29, %v6393_v14 }
 0x83a   :  { %v11770_v7 = vadd.f32 -1.0, %v5818_v51  ;;  %v6347_v39 = vadd.f32 %v6346_v6, %v6298_v8 }
 0x83b   :  { %v9786_v52 = vpop.eup %9785  ;;  %9787 = vlog2.f32 %v5928_v46  ;;  %v6465_v0 = vpack.c.bf16 %v6442_v53, %v6440_v42 }
 0x83c   :  { %v5955_v12 = vmul.f32 0.6931472, %v9786_v52  ;;  %9789 = vpow2.f32 %v5910_v38  ;;  %v5866_v54 = vand.u32 2147483647, %v11770_v7  ;;  %v5850_v55 = vmax.f32 %v11770_v7, 0.0 }
 0x83d   :  { %6680 = vmatmul.bf16.gmra.mxu1 %v6465_v0 }
 0x83e   :  { %v5975_v17 = vadd.f32 %v5955_v12, %v5847_v58  ;;  %v5882_v49 = vsub.f32 0.0, %v5866_v54  ;;  %v6395_v11 = vpop.f32.mrf.mxu2  ;;  %v6444_v33 = vpop.f32.mrf.mxu3 }
 0x83f   :  { %v6299_v44 = vpop.f32.mrf.mxu0  ;;  %v6396_v56 = vadd.f32 %v6395_v11, %v11632_v1 }
 0x840   :  { %7201 = vst.msk [vmem:[%s11950_s26 + $0x58] sm:$0xff] %vm7189_vm0, %v5975_v17  ;;  %v5912_v48 = vmul.f32 1.442695, %v5882_v49  ;;  %v6300_v13 = vadd.f32 %v6299_v44, %v11627_v32  ;;  %v6348_v10 = vpop.f32.mrf.mxu1  ;;  %v5799_v21 = vpop.xlane.xlu0 %5798 }
 0x841   :  { %v9788_v27 = vpop.eup %9787  ;;  %v5819_v57 = vadd.f32 %v11612_v47, %v5799_v21  ;;  %v6445_v37 = vadd.f32 %v6444_v33, %v6396_v56 }
 0x842   :  { %v9790_v50 = vpop.eup %9789  ;;  %v5957_v23 = vmul.f32 0.6931472, %v9788_v27  ;;  %9791 = vpow2.f32 %v5912_v48  ;;  %v6349_v34 = vadd.f32 %v6348_v10, %v6300_v13  ;;  %v9655_v48 = vld [vmem:[%s12135_s9] sm:$0xff]  }
 0x843   :  { %v5929_v43 = vadd.f32 1.0, %v9790_v50  ;;  %v5835_v19 = vadd.f32 -1.0, %v5819_v57  ;;  %v9656_v13 = vunpack.c.l.bf16 %v9655_v48  ;;  %v9657_v21 = vunpack.c.h.bf16 %v9655_v48 }
 0x844   :  { %v5976_v63 = vadd.f32 %v5957_v23, %v5848_v59  ;;  %v6466_v26 = vpack.c.bf16 %v6349_v34, %v6347_v39 }
 0x845   :  { %9793 = vlog2.f32 %v5929_v43  ;;  %v5867_v2 = vand.u32 2147483647, %v5835_v19  ;;  %v5851_v8 = vmax.f32 %v5835_v19, 0.0  ;;  %v9686_v43 = vld [vmem:[%s12135_s9 + $0x8] sm:$0xff]  }
 0x846   :  { %7202 = vst.msk [vmem:[%s11950_s26 + $0x60] sm:$0xff] %vm7189_vm0, %v5976_v63  ;;  %v6397_v47 = vpop.f32.mrf.mxu2  ;;  %v6446_v4 = vpop.f32.mrf.mxu3  ;;  %6636 = vmatmul.bf16.gmra.mxu0 %v6466_v26  ;;  %v9660_v63 = vunpack.c.l.bf16 %v9686_v43  ;;  %v9661_v56 = vunpack.c.h.bf16 %v9686_v43 }
 0x847   :  { %v5883_v45 = vsub.f32 0.0, %v5867_v2  ;;  %v6398_v5 = vadd.f32 %v6397_v47, %v11632_v1  ;;  %v6302_v60 = vpop.f32.mrf.mxu0 }
 0x848   :  { %v9792_v36 = vpop.eup %9791  ;;  %v6351_v16 = vpop.f32.mrf.mxu1  ;;  %v6303_v29 = vadd.f32 %v6302_v60, %v11627_v32 }
 0x849   :  { %v5930_v40 = vadd.f32 1.0, %v9792_v36  ;;  %v5914_v41 = vmul.f32 1.442695, %v5883_v45  ;;  %v6447_v62 = vadd.f32 %v6446_v4, %v6398_v5 }
 0x84a   :  { %v6352_v46 = vadd.f32 %v6351_v16, %v6303_v29 }
 0x84b   :  { %v9794_v22 = vpop.eup %9793  ;;  %9795 = vlog2.f32 %v5930_v40  ;;  %v6467_v20 = vpack.c.bf16 %v6447_v62, %v6445_v37  ;;  %v9687_v40 = vld [vmem:[%s12135_s9 + $0x10] sm:$0xff]  }
 0x84c   :  { %v5959_v3 = vmul.f32 0.6931472, %v9794_v22  ;;  %9797 = vpow2.f32 %v5914_v41  ;;  %v9664_v41 = vunpack.c.l.bf16 %v9687_v40  ;;  %v9665_v22 = vunpack.c.h.bf16 %v9687_v40 }
 0x84d   :  { %6685 = vmatmul.bf16.gmra.mxu1 %v6467_v20 }
 0x84e   :  { %v5977_v31 = vadd.f32 %v5959_v3, %v5849_v18  ;;  %v6400_v9 = vpop.f32.mrf.mxu2  ;;  %v6449_v61 = vpop.f32.mrf.mxu3 }
 0x84f   :  { %v6304_v14 = vpop.f32.mrf.mxu0  ;;  %v6401_v0 = vadd.f32 %v6400_v9, %v11632_v1 }
 0x850   :  { %7203 = vst.msk [vmem:[%s11950_s26 + $0x68] sm:$0xff] %vm7189_vm0, %v5977_v31  ;;  %v6305_v15 = vadd.f32 %v6304_v14, %v11627_v32  ;;  %v6353_v24 = vpop.f32.mrf.mxu1 }
 0x851   :  { %v9796_v35 = vpop.eup %9795  ;;  %v6450_v7 = vadd.f32 %v6449_v61, %v6401_v0 }
 0x852   :  { %v9798_v51 = vpop.eup %9797  ;;  %v5961_v6 = vmul.f32 0.6931472, %v9796_v35  ;;  %v6354_v42 = vadd.f32 %v6353_v24, %v6305_v15  ;;  %v9688_v35 = vld [vmem:[%s12135_s9 + $0x18] sm:$0xff]  }
 0x853   :  { %v5931_v38 = vadd.f32 1.0, %v9798_v51  ;;  %v9668_v51 = vunpack.c.l.bf16 %v9688_v35 }
 0x854   :  { %v5978_v53 = vadd.f32 %v5961_v6, %v5850_v55  ;;  %v6468_v52 = vpack.c.bf16 %v6354_v42, %v6352_v46  ;;  %v9669_v6 = vunpack.c.h.bf16 %v9688_v35 }
 0x855   :  { %9799 = vlog2.f32 %v5931_v38 }
 0x856   :  { %7204 = vst.msk [vmem:[%s11950_s26 + $0x70] sm:$0xff] %vm7189_vm0, %v5978_v53  ;;  %v6402_v32 = vpop.f32.mrf.mxu2  ;;  %6641 = vmatmul.bf16.gmra.mxu0 %v6468_v52  ;;  %v6451_v12 = vpop.f32.mrf.mxu3 }
 0x857   :  { %v6403_v58 = vadd.f32 %v6402_v32, %v11632_v1 }
 0x859   :  { %v6452_v54 = vadd.f32 %v6451_v12, %v6403_v58 }
 0x85b   :  { %v9800_v17 = vpop.eup %9799  ;;  %v6469_v49 = vpack.c.bf16 %v6452_v54, %v6450_v7  ;;  %v9689_v7 = vld [vmem:[%s12135_s9 + $0x20] sm:$0xff]  }
 0x85c   :  { %v5963_v11 = vmul.f32 0.6931472, %v9800_v17  ;;  %v9672_v17 = vunpack.c.l.bf16 %v9689_v7 }
 0x85d   :  { %6690 = vmatmul.bf16.gmra.mxu1 %v6469_v49 }
 0x85e   :  { %v5979_v33 = vadd.f32 %v5963_v11, %v5851_v8  ;;  %v9673_v8 = vunpack.c.h.bf16 %v9689_v7 }
 0x860   :  { %7205 = vst.msk [vmem:[%s11950_s26 + $0x78] sm:$0xff] %vm7189_vm0, %v5979_v33 }
 0x863   :  { %v6607_v44 = vpop.f32.mrf.mxu0 }
 0x864   :  { %v6608_v25 = vadd.f32 %v9656_v13, %v6607_v44 }
 0x86a   :  { %v6656_v1 = vpop.f32.mrf.mxu1 }
 0x86b   :  { %v6609_v10 = vpop.f32.mrf.mxu0  ;;  %v6657_v27 = vadd.f32 %v6656_v1, %v6608_v25 }
 0x86c   :  { %v6610_v59 = vadd.f32 %v9657_v21, %v6609_v10 }
 0x86d   :  { %v6696_v39 = vmax.f32 %v6657_v27, 0.0  ;;  %v9690_v27 = vld [vmem:[%s12135_s9 + $0x28] sm:$0xff]  }
 0x872   :  { %v6658_v57 = vpop.f32.mrf.mxu1 }
 0x873   :  { %v6659_v50 = vadd.f32 %v6658_v57, %v6610_v59  ;;  %v6612_v23 = vpop.f32.mrf.mxu0  ;;  %v9676_v57 = vunpack.c.l.bf16 %v9690_v27 }
 0x874   :  { %v6613_v2 = vadd.f32 %v9660_v63, %v6612_v23  ;;  %v9677_v23 = vunpack.c.h.bf16 %v9690_v27 }
 0x875   :  { %v6697_v34 = vmax.f32 %v6659_v50, 0.0 }
 0x877   :  { %v6712_v28 = vpack.c.bf16 %v6697_v34, %v6696_v39 }
 0x879   :  { %6796 = vmatmul.bf16.vlgmr.msrb.gmra.mxu2 %v6712_v28 }
 0x87a   :  { %v6661_v19 = vpop.f32.mrf.mxu1 }
 0x87b   :  { %v6614_v26 = vpop.f32.mrf.mxu0  ;;  %v6662_v47 = vadd.f32 %v6661_v19, %v6613_v2 }
 0x87c   :  { %v6615_v4 = vadd.f32 %v9661_v56, %v6614_v26 }
 0x87d   :  { %v6698_v60 = vmax.f32 %v6662_v47, 0.0  ;;  %v9691_v47 = vld [vmem:[%s12135_s9 + $0x30] sm:$0xff]  }
 0x882   :  { %v6663_v30 = vpop.f32.mrf.mxu1 }
 0x883   :  { %v6664_v45 = vadd.f32 %v6663_v30, %v6615_v4  ;;  %v6617_v5 = vpop.f32.mrf.mxu0  ;;  %v9680_v30 = vunpack.c.l.bf16 %v9691_v47 }
 0x884   :  { %v6618_v20 = vadd.f32 %v9664_v41, %v6617_v5  ;;  %v9681_v5 = vunpack.c.h.bf16 %v9691_v47 }
 0x885   :  { %v6699_v36 = vmax.f32 %v6664_v45, 0.0 }
 0x887   :  { %v6713_v16 = vpack.c.bf16 %v6699_v36, %v6698_v60 }
 0x889   :  { %6801 = vmatmul.bf16.gmra.mxu2 %v6713_v16 }
 0x88a   :  { %v6666_v37 = vpop.f32.mrf.mxu1 }
 0x88b   :  { %v6619_v62 = vpop.f32.mrf.mxu0  ;;  %v6667_v18 = vadd.f32 %v6666_v37, %v6618_v20 }
 0x88c   :  { %v6620_v3 = vadd.f32 %v9665_v22, %v6619_v62 }
 0x88d   :  { %v6700_v61 = vmax.f32 %v6667_v18, 0.0  ;;  %v9692_v18 = vld [vmem:[%s12135_s9 + $0x38] sm:$0xff]  }
 0x892   :  { %v6668_v31 = vpop.f32.mrf.mxu1 }
 0x893   :  { %v6669_v29 = vadd.f32 %v6668_v31, %v6620_v3  ;;  %v6622_v9 = vpop.f32.mrf.mxu0  ;;  %v9684_v31 = vunpack.c.l.bf16 %v9692_v18 }
 0x894   :  { %v6623_v46 = vadd.f32 %v9668_v51, %v6622_v9 }
 0x895   :  { %v6701_v14 = vmax.f32 %v6669_v29, 0.0  ;;  %v9685_v29 = vunpack.c.h.bf16 %v9692_v18 }
 0x897   :  { %v6714_v15 = vpack.c.bf16 %v6701_v14, %v6700_v61 }
 0x899   :  { %6806 = vmatmul.bf16.gmra.mxu2 %v6714_v15 }
 0x89a   :  { %v6671_v24 = vpop.f32.mrf.mxu1 }
 0x89b   :  { %v6624_v55 = vpop.f32.mrf.mxu0  ;;  %v6672_v42 = vadd.f32 %v6671_v24, %v6623_v46  ;;  %v11842_v46 = vld [vmem:[%s11949_s25] ss:$0 sm:$0xff] }
 0x89c   :  { %v6625_v38 = vadd.f32 %v9669_v6, %v6624_v55 }
 0x89d   :  { %v6702_v32 = vmax.f32 %v6672_v42, 0.0 }
 0x8a2   :  { %v6673_v53 = vpop.f32.mrf.mxu1 }
 0x8a3   :  { %v6674_v52 = vadd.f32 %v6673_v53, %v6625_v38  ;;  %v6627_v0 = vpop.f32.mrf.mxu0 }
 0x8a4   :  { %v6628_v11 = vadd.f32 %v9672_v17, %v6627_v0 }
 0x8a5   :  { %v6703_v58 = vmax.f32 %v6674_v52, 0.0 }
 0x8a7   :  { %v6715_v12 = vpack.c.bf16 %v6703_v58, %v6702_v32 }
 0x8a9   :  { %6811 = vmatmul.bf16.gmra.mxu2 %v6715_v12 }
 0x8aa   :  { %v6676_v54 = vpop.f32.mrf.mxu1 }
 0x8ab   :  { %v6629_v49 = vpop.f32.mrf.mxu0  ;;  %v6677_v33 = vadd.f32 %v6676_v54, %v6628_v11 }
 0x8ac   :  { %v6630_v44 = vadd.f32 %v9673_v8, %v6629_v49 }
 0x8ad   :  { %v6704_v10 = vmax.f32 %v6677_v33, 0.0 }
 0x8b2   :  { %v6678_v48 = vpop.f32.mrf.mxu1 }
 0x8b3   :  { %v6679_v1 = vadd.f32 %v6678_v48, %v6630_v44  ;;  %v6632_v13 = vpop.f32.mrf.mxu0 }
 0x8b4   :  { %v6633_v39 = vadd.f32 %v9676_v57, %v6632_v13 }
 0x8b5   :  { %v6705_v21 = vmax.f32 %v6679_v1, 0.0 }
 0x8b7   :  { %v6716_v25 = vpack.c.bf16 %v6705_v21, %v6704_v10 }
 0x8b9   :  { %6816 = vmatmul.bf16.gmra.mxu2 %v6716_v25 }
 0x8ba   :  { %v6681_v59 = vpop.f32.mrf.mxu1 }
 0x8bb   :  { %v6634_v50 = vpop.f32.mrf.mxu0  ;;  %v6682_v34 = vadd.f32 %v6681_v59, %v6633_v39 }
 0x8bc   :  { %v6635_v28 = vadd.f32 %v9677_v23, %v6634_v50 }
 0x8bd   :  { %v6706_v26 = vmax.f32 %v6682_v34, 0.0 }
 0x8c2   :  { %v6683_v43 = vpop.f32.mrf.mxu1 }
 0x8c3   :  { %v6684_v19 = vadd.f32 %v6683_v43, %v6635_v28  ;;  %v6637_v63 = vpop.f32.mrf.mxu0 }
 0x8c4   :  { %v6638_v60 = vadd.f32 %v9680_v30, %v6637_v63 }
 0x8c5   :  { %v6707_v56 = vmax.f32 %v6684_v19, 0.0 }
 0x8c7   :  { %v6717_v2 = vpack.c.bf16 %v6707_v56, %v6706_v26 }
 0x8c9   :  { %6821 = vmatmul.bf16.gmra.mxu2 %v6717_v2 }
 0x8ca   :  { %v6686_v4 = vpop.f32.mrf.mxu1 }
 0x8cb   :  { %v6639_v45 = vpop.f32.mrf.mxu0  ;;  %v6687_v36 = vadd.f32 %v6686_v4, %v6638_v60 }
 0x8cc   :  { %v6640_v16 = vadd.f32 %v9681_v5, %v6639_v45 }
 0x8cd   :  { %v6708_v62 = vmax.f32 %v6687_v36, 0.0 }
 0x8d2   :  { %v6688_v40 = vpop.f32.mrf.mxu1 }
 0x8d3   :  { %v6689_v37 = vadd.f32 %v6688_v40, %v6640_v16  ;;  %v6642_v41 = vpop.f32.mrf.mxu0 }
 0x8d4   :  { %v6643_v61 = vadd.f32 %v9684_v31, %v6642_v41 }
 0x8d5   :  { %v6709_v22 = vmax.f32 %v6689_v37, 0.0 }
 0x8d7   :  { %v6718_v20 = vpack.c.bf16 %v6709_v22, %v6708_v62 }
 0x8d9   :  { %6826 = vmatmul.bf16.gmra.mxu2 %v6718_v20 }
 0x8da   :  { %v6691_v3 = vpop.f32.mrf.mxu1 }
 0x8db   :  { %v6644_v9 = vpop.f32.mrf.mxu0  ;;  %v6692_v14 = vadd.f32 %v6691_v3, %v6643_v61 }
 0x8dc   :  { %v6645_v15 = vadd.f32 %v9685_v29, %v6644_v9 }
 0x8dd   :  { %v6710_v51 = vmax.f32 %v6692_v14, 0.0 }
 0x8e2   :  { %v6693_v35 = vpop.f32.mrf.mxu1 }
 0x8e3   :  { %v6694_v24 = vadd.f32 %v6693_v35, %v6645_v15 }
 0x8e5   :  { %v6711_v55 = vmax.f32 %v6694_v24, 0.0 }
 0x8e7   :  { %v6719_v6 = vpack.c.bf16 %v6711_v55, %v6710_v51 }
 0x8e9   :  { %6831 = vmatmul.bf16.gmra.mxu2 %v6719_v6 }
 0x8fc   :  { %v6797_v42 = vpop.f32.mrf.mxu2 }
 0x8fd   :  { %v6798_v38 = vadd.f32 %v11842_v46, %v6797_v42 }
 0x8ff   :  { %v6853_v53 = vsub.f32 0.0, %v6798_v38 }
 0x901   :  { %v6869_v52 = vmul.f32 1.442695, %v6853_v53 }
 0x903   :  { %9801 = vpow2.f32 %v6869_v52 }
 0x904   :  { %v6799_v0 = vpop.f32.mrf.mxu2 }
 0x905   :  { %v6800_v32 = vadd.f32 %v11842_v46, %v6799_v0 }
 0x907   :  { %v6854_v58 = vsub.f32 0.0, %v6800_v32 }
 0x909   :  { %v9802_v12 = vpop.eup %9801  ;;  %v6871_v7 = vmul.f32 1.442695, %v6854_v58 }
 0x90a   :  { %v6901_v54 = vadd.f32 1.0, %v9802_v12 }
 0x90b   :  { %9803 = vpow2.f32 %v6871_v7 }
 0x90c   :  { %9805 = vrcp.f32 %v6901_v54  ;;  %v6802_v17 = vpop.f32.mrf.mxu2  ;;  %v6928_v25 = vand.u32 2147483648, %v6901_v54  ;;  %v6926_v59 = vand.u32 2147483647, %v6901_v54  ;;  %vm6922_vm2 = vweird.f32 %v6901_v54 }
 0x90d   :  { %v6803_v49 = vadd.f32 %v11842_v46, %v6802_v17 }
 0x90e   :  { %v6929_v28 = vor.u32 1.1754944e-38, %v6928_v25  ;;  %vm6927_vm4 = vcmp.eq.f32.partialorder %v6926_v59, 8.507059e+37 }
 0x90f   :  { %v6855_v8 = vsub.f32 0.0, %v6803_v49 }
 0x911   :  { %v9804_v11 = vpop.eup %9803  ;;  %v6873_v33 = vmul.f32 1.442695, %v6855_v8 }
 0x912   :  { %v9806_v44 = vpop.eup %9805  ;;  %v6902_v48 = vadd.f32 1.0, %v9804_v11 }
 0x913   :  { %v6918_v1 = vmul.f32 %v9806_v44, %v6901_v54  ;;  %9807 = vpow2.f32 %v6873_v33  ;;  %vm6923_vm1 = vweird.f32 %v9806_v44 }
 0x914   :  { %9809 = vrcp.f32 %v6902_v48  ;;  %v6804_v13 = vpop.f32.mrf.mxu2  ;;  %vm6924_vm3 = vmor %vm6922_vm2, %vm6923_vm1  ;;  %v6941_v30 = vand.u32 2147483647, %v6902_v48  ;;  %v6943_v45 = vand.u32 2147483648, %v6902_v48  ;;  %vm6937_vm7 = vweird.f32 %v6902_v48 }
 0x915   :  { %v6919_v10 = vsub.f32 1.0, %v6918_v1  ;;  %v6805_v21 = vadd.f32 %v11842_v46, %v6804_v13 }
 0x916   :  { %v6944_v62 = vor.u32 1.1754944e-38, %v6943_v45  ;;  %vm6942_vm9 = vcmp.eq.f32.partialorder %v6941_v30, 8.507059e+37 }
 0x917   :  { %v6920_v27 = vmul.f32 %v9806_v44, %v6919_v10  ;;  %v6856_v57 = vsub.f32 0.0, %v6805_v21 }
 0x919   :  { %v9808_v50 = vpop.eup %9807  ;;  %v6921_v23 = vadd.f32 %v9806_v44, %v6920_v27  ;;  %v6875_v39 = vmul.f32 1.442695, %v6856_v57 }
 0x91a   :  { %v9810_v34 = vpop.eup %9809  ;;  %v6903_v43 = vadd.f32 1.0, %v9808_v50 }
 0x91b   :  { %v6925_v19 = vsel %vm6924_vm3, %v9806_v44, %v6921_v23  ;;  %v6933_v63 = vmul.f32 %v9810_v34, %v6902_v48  ;;  %9811 = vpow2.f32 %v6875_v39  ;;  %vm6938_vm6 = vweird.f32 %v9810_v34 }
 0x91c   :  { %v6930_v26 = vsel %vm6927_vm4, %v6929_v28, %v6925_v19  ;;  %9813 = vrcp.f32 %v6903_v43  ;;  %v6807_v56 = vpop.f32.mrf.mxu2  ;;  %vm6939_vm8 = vmor %vm6937_vm7, %vm6938_vm6  ;;  %v6956_v14 = vand.u32 2147483647, %v6903_v43  ;;  %v6958_v15 = vand.u32 2147483648, %v6903_v43 }
 0x91d   :  { %v7157_v2 = vmul.f32 1.002, %v6930_v26  ;;  %v6934_v47 = vsub.f32 1.0, %v6933_v63  ;;  %v6808_v4 = vadd.f32 %v11842_v46, %v6807_v56  ;;  %vm6952_vm11 = vweird.f32 %v6903_v43 }
 0x91e   :  { %v6959_v53 = vor.u32 1.1754944e-38, %v6958_v15  ;;  %vm6957_vm13 = vcmp.eq.f32.partialorder %v6956_v14, 8.507059e+37 }
 0x91f   :  { %v9158_v5 = vadd.f32 -0.001, %v7157_v2  ;;  %v6935_v60 = vmul.f32 %v9810_v34, %v6934_v47  ;;  %v6857_v36 = vsub.f32 0.0, %v6808_v4 }
 0x921   :  { %v9812_v16 = vpop.eup %9811  ;;  %7207 = vst.msk [vmem:[%s12136_s10] sm:$0xff] %vm7206_vm5, %v9158_v5  ;;  %v6936_v40 = vadd.f32 %v9810_v34, %v6935_v60  ;;  %v6877_v37 = vmul.f32 1.442695, %v6857_v36 }
 0x922   :  { %v9814_v41 = vpop.eup %9813  ;;  %v6904_v22 = vadd.f32 1.0, %v9812_v16 }
 0x923   :  { %v6940_v20 = vsel %vm6939_vm8, %v9810_v34, %v6936_v40  ;;  %v6948_v18 = vmul.f32 %v9814_v41, %v6903_v43  ;;  %9815 = vpow2.f32 %v6877_v37  ;;  %vm6953_vm10 = vweird.f32 %v9814_v41 }
 0x924   :  { %v6945_v3 = vsel %vm6942_vm9, %v6944_v62, %v6940_v20  ;;  %9817 = vrcp.f32 %v6904_v22  ;;  %v6809_v31 = vpop.f32.mrf.mxu2  ;;  %vm6954_vm12 = vmor %vm6952_vm11, %vm6953_vm10  ;;  %v6971_v49 = vand.u32 2147483647, %v6904_v22  ;;  %v6973_v8 = vand.u32 2147483648, %v6904_v22 }
 0x925   :  { %v7158_v29 = vmul.f32 1.002, %v6945_v3  ;;  %v6949_v9 = vsub.f32 1.0, %v6948_v18  ;;  %v6810_v61 = vadd.f32 %v11842_v46, %v6809_v31  ;;  %vm6967_vm15 = vweird.f32 %v6904_v22 }
 0x926   :  { %v6974_v21 = vor.u32 1.1754944e-38, %v6973_v8  ;;  %vm6972_vm1 = vcmp.eq.f32.partialorder %v6971_v49, 8.507059e+37 }
 0x927   :  { %v9159_v35 = vadd.f32 -0.001, %v7158_v29  ;;  %v6950_v24 = vmul.f32 %v9814_v41, %v6949_v9  ;;  %v6858_v51 = vsub.f32 0.0, %v6810_v61 }
 0x929   :  { %v9816_v55 = vpop.eup %9815  ;;  %7208 = vst.msk [vmem:[%s12136_s10 + $0x8] sm:$0xff] %vm7206_vm5, %v9159_v35  ;;  %v6951_v6 = vadd.f32 %v9814_v41, %v6950_v24  ;;  %v6879_v42 = vmul.f32 1.442695, %v6858_v51 }
 0x92a   :  { %v9818_v38 = vpop.eup %9817  ;;  %v6905_v52 = vadd.f32 1.0, %v9816_v55 }
 0x92b   :  { %v6955_v0 = vsel %vm6954_vm12, %v9814_v41, %v6951_v6  ;;  %v6963_v32 = vmul.f32 %v9818_v38, %v6904_v22  ;;  %9819 = vpow2.f32 %v6879_v42  ;;  %vm6968_vm14 = vweird.f32 %v9818_v38 }
 0x92c   :  { %v6960_v58 = vsel %vm6957_vm13, %v6959_v53, %v6955_v0  ;;  %9821 = vrcp.f32 %v6905_v52  ;;  %v6812_v12 = vpop.f32.mrf.mxu2  ;;  %vm6969_vm0 = vmor %vm6967_vm15, %vm6968_vm14  ;;  %v6986_v28 = vand.u32 2147483647, %v6905_v52  ;;  %v6988_v43 = vand.u32 2147483648, %v6905_v52 }
 0x92d   :  { %v7159_v7 = vmul.f32 1.002, %v6960_v58  ;;  %v6964_v54 = vsub.f32 1.0, %v6963_v32  ;;  %v6813_v17 = vadd.f32 %v11842_v46, %v6812_v12  ;;  %vm6982_vm3 = vweird.f32 %v6905_v52 }
 0x92e   :  { %v6989_v30 = vor.u32 1.1754944e-38, %v6988_v43  ;;  %vm6987_vm6 = vcmp.eq.f32.partialorder %v6986_v28, 8.507059e+37 }
 0x92f   :  { %v9160_v11 = vadd.f32 -0.001, %v7159_v7  ;;  %v6965_v33 = vmul.f32 %v9818_v38, %v6964_v54  ;;  %v6859_v44 = vsub.f32 0.0, %v6813_v17 }
 0x931   :  { %v9820_v48 = vpop.eup %9819  ;;  %7209 = vst.msk [vmem:[%s12136_s10 + $0x10] sm:$0xff] %vm7206_vm5, %v9160_v11  ;;  %v6966_v1 = vadd.f32 %v9818_v38, %v6965_v33  ;;  %v6881_v13 = vmul.f32 1.442695, %v6859_v44 }
 0x932   :  { %v9822_v10 = vpop.eup %9821  ;;  %v6906_v25 = vadd.f32 1.0, %v9820_v48 }
 0x933   :  { %v6970_v27 = vsel %vm6969_vm0, %v9818_v38, %v6966_v1  ;;  %v6978_v59 = vmul.f32 %v9822_v10, %v6905_v52  ;;  %9823 = vpow2.f32 %v6881_v13  ;;  %vm6983_vm2 = vweird.f32 %v9822_v10 }
 0x934   :  { %v6975_v57 = vsel %vm6972_vm1, %v6974_v21, %v6970_v27  ;;  %9825 = vrcp.f32 %v6906_v25  ;;  %v6814_v50 = vpop.f32.mrf.mxu2  ;;  %vm6984_vm4 = vmor %vm6982_vm3, %vm6983_vm2  ;;  %v7001_v62 = vand.u32 2147483647, %v6906_v25  ;;  %v7003_v22 = vand.u32 2147483648, %v6906_v25 }
 0x935   :  { %v7160_v23 = vmul.f32 1.002, %v6975_v57  ;;  %v6979_v39 = vsub.f32 1.0, %v6978_v59  ;;  %v6815_v34 = vadd.f32 %v11842_v46, %v6814_v50  ;;  %vm6997_vm8 = vweird.f32 %v6906_v25 }
 0x936   :  { %v7004_v14 = vor.u32 1.1754944e-38, %v7003_v22  ;;  %vm7002_vm10 = vcmp.eq.f32.partialorder %v7001_v62, 8.507059e+37 }
 0x937   :  { %v9161_v19 = vadd.f32 -0.001, %v7160_v23  ;;  %v6980_v63 = vmul.f32 %v9822_v10, %v6979_v39  ;;  %v6860_v26 = vsub.f32 0.0, %v6815_v34 }
 0x939   :  { %v9824_v56 = vpop.eup %9823  ;;  %7210 = vst.msk [vmem:[%s12136_s10 + $0x18] sm:$0xff] %vm7206_vm5, %v9161_v19  ;;  %v6981_v2 = vadd.f32 %v9822_v10, %v6980_v63  ;;  %v6883_v47 = vmul.f32 1.442695, %v6860_v26 }
 0x93a   :  { %v9826_v4 = vpop.eup %9825  ;;  %v6907_v45 = vadd.f32 1.0, %v9824_v56 }
 0x93b   :  { %v6985_v5 = vsel %vm6984_vm4, %v9822_v10, %v6981_v2  ;;  %v6993_v60 = vmul.f32 %v9826_v4, %v6906_v25  ;;  %9827 = vpow2.f32 %v6883_v47  ;;  %vm6998_vm7 = vweird.f32 %v9826_v4 }
 0x93c   :  { %v6990_v36 = vsel %vm6987_vm6, %v6989_v30, %v6985_v5  ;;  %9829 = vrcp.f32 %v6907_v45  ;;  %v6817_v16 = vpop.f32.mrf.mxu2  ;;  %vm6999_vm9 = vmor %vm6997_vm8, %vm6998_vm7  ;;  %v7016_v53 = vand.u32 2147483647, %v6907_v45  ;;  %v7018_v52 = vand.u32 2147483648, %v6907_v45 }
 0x93d   :  { %v7161_v40 = vmul.f32 1.002, %v6990_v36  ;;  %v6994_v37 = vsub.f32 1.0, %v6993_v60  ;;  %v6818_v41 = vadd.f32 %v11842_v46, %v6817_v16  ;;  %vm7012_vm12 = vweird.f32 %v6907_v45 }
 0x93e   :  { %v7019_v49 = vor.u32 1.1754944e-38, %v7018_v52  ;;  %vm7017_vm14 = vcmp.eq.f32.partialorder %v7016_v53, 8.507059e+37 }
 0x93f   :  { %v9162_v20 = vadd.f32 -0.001, %v7161_v40  ;;  %v6995_v18 = vmul.f32 %v9826_v4, %v6994_v37  ;;  %v6861_v3 = vsub.f32 0.0, %v6818_v41 }
 0x941   :  { %v9828_v31 = vpop.eup %9827  ;;  %7211 = vst.msk [vmem:[%s12136_s10 + $0x20] sm:$0xff] %vm7206_vm5, %v9162_v20  ;;  %v6996_v29 = vadd.f32 %v9826_v4, %v6995_v18  ;;  %v6885_v9 = vmul.f32 1.442695, %v6861_v3 }
 0x942   :  { %v9830_v61 = vpop.eup %9829  ;;  %v6908_v15 = vadd.f32 1.0, %v9828_v31 }
 0x943   :  { %v7000_v35 = vsel %vm6999_vm9, %v9826_v4, %v6996_v29  ;;  %v7008_v24 = vmul.f32 %v9830_v61, %v6907_v45  ;;  %9831 = vpow2.f32 %v6885_v9  ;;  %vm7013_vm11 = vweird.f32 %v9830_v61 }
 0x944   :  { %v7005_v51 = vsel %vm7002_vm10, %v7004_v14, %v7000_v35  ;;  %9833 = vrcp.f32 %v6908_v15  ;;  %v6819_v55 = vpop.f32.mrf.mxu2  ;;  %vm7014_vm13 = vmor %vm7012_vm12, %vm7013_vm11  ;;  %v7031_v21 = vand.u32 2147483647, %v6908_v15  ;;  %v7033_v25 = vand.u32 2147483648, %v6908_v15 }
 0x945   :  { %v7162_v6 = vmul.f32 1.002, %v7005_v51  ;;  %v7009_v42 = vsub.f32 1.0, %v7008_v24  ;;  %v6820_v38 = vadd.f32 %v11842_v46, %v6819_v55  ;;  %vm7027_vm0 = vweird.f32 %v6908_v15 }
 0x946   :  { %v7034_v28 = vor.u32 1.1754944e-38, %v7033_v25  ;;  %vm7032_vm2 = vcmp.eq.f32.partialorder %v7031_v21, 8.507059e+37 }
 0x947   :  { %v9163_v0 = vadd.f32 -0.001, %v7162_v6  ;;  %v7010_v32 = vmul.f32 %v9830_v61, %v7009_v42  ;;  %v6862_v58 = vsub.f32 0.0, %v6820_v38 }
 0x949   :  { %v9832_v12 = vpop.eup %9831  ;;  %7212 = vst.msk [vmem:[%s12136_s10 + $0x28] sm:$0xff] %vm7206_vm5, %v9163_v0  ;;  %v7011_v7 = vadd.f32 %v9830_v61, %v7010_v32  ;;  %v6887_v54 = vmul.f32 1.442695, %v6862_v58 }
 0x94a   :  { %v9834_v17 = vpop.eup %9833  ;;  %v6909_v8 = vadd.f32 1.0, %v9832_v12 }
 0x94b   :  { %v7015_v11 = vsel %vm7014_vm13, %v9830_v61, %v7011_v7  ;;  %v7023_v33 = vmul.f32 %v9834_v17, %v6908_v15  ;;  %9835 = vpow2.f32 %v6887_v54  ;;  %vm7028_vm15 = vweird.f32 %v9834_v17 }
 0x94c   :  { %v7020_v44 = vsel %vm7017_vm14, %v7019_v49, %v7015_v11  ;;  %9837 = vrcp.f32 %v6909_v8  ;;  %v6822_v48 = vpop.f32.mrf.mxu2  ;;  %vm7029_vm1 = vmor %vm7027_vm0, %vm7028_vm15  ;;  %v7046_v30 = vand.u32 2147483647, %v6909_v8  ;;  %v7048_v45 = vand.u32 2147483648, %v6909_v8 }
 0x94d   :  { %v7163_v1 = vmul.f32 1.002, %v7020_v44  ;;  %v7024_v13 = vsub.f32 1.0, %v7023_v33  ;;  %v6823_v10 = vadd.f32 %v11842_v46, %v6822_v48  ;;  %vm7042_vm4 = vweird.f32 %v6909_v8 }
 0x94e   :  { %v7049_v62 = vor.u32 1.1754944e-38, %v7048_v45  ;;  %vm7047_vm7 = vcmp.eq.f32.partialorder %v7046_v30, 8.507059e+37 }
 0x94f   :  { %v9164_v27 = vadd.f32 -0.001, %v7163_v1  ;;  %v7025_v59 = vmul.f32 %v9834_v17, %v7024_v13  ;;  %v6863_v57 = vsub.f32 0.0, %v6823_v10 }
 0x951   :  { %v9836_v50 = vpop.eup %9835  ;;  %7213 = vst.msk [vmem:[%s12136_s10 + $0x30] sm:$0xff] %vm7206_vm5, %v9164_v27  ;;  %v7026_v23 = vadd.f32 %v9834_v17, %v7025_v59  ;;  %v6889_v39 = vmul.f32 1.442695, %v6863_v57 }
 0x952   :  { %v9838_v34 = vpop.eup %9837  ;;  %v6910_v43 = vadd.f32 1.0, %v9836_v50 }
 0x953   :  { %v7030_v19 = vsel %vm7029_vm1, %v9834_v17, %v7026_v23  ;;  %v7038_v63 = vmul.f32 %v9838_v34, %v6909_v8  ;;  %9839 = vpow2.f32 %v6889_v39  ;;  %vm7043_vm3 = vweird.f32 %v9838_v34 }
 0x954   :  { %v7035_v26 = vsel %vm7032_vm2, %v7034_v28, %v7030_v19  ;;  %9841 = vrcp.f32 %v6910_v43  ;;  %v6824_v56 = vpop.f32.mrf.mxu2  ;;  %vm7044_vm6 = vmor %vm7042_vm4, %vm7043_vm3  ;;  %v7061_v14 = vand.u32 2147483647, %v6910_v43  ;;  %v7063_v15 = vand.u32 2147483648, %v6910_v43 }
 0x955   :  { %v7164_v2 = vmul.f32 1.002, %v7035_v26  ;;  %v7039_v47 = vsub.f32 1.0, %v7038_v63  ;;  %v6825_v4 = vadd.f32 %v11842_v46, %v6824_v56  ;;  %vm7057_vm9 = vweird.f32 %v6910_v43 }
 0x956   :  { %v7064_v53 = vor.u32 1.1754944e-38, %v7063_v15  ;;  %vm7062_vm11 = vcmp.eq.f32.partialorder %v7061_v14, 8.507059e+37 }
 0x957   :  { %v9165_v5 = vadd.f32 -0.001, %v7164_v2  ;;  %v7040_v60 = vmul.f32 %v9838_v34, %v7039_v47  ;;  %v6864_v36 = vsub.f32 0.0, %v6825_v4 }
 0x959   :  { %v9840_v16 = vpop.eup %9839  ;;  %7214 = vst.msk [vmem:[%s12136_s10 + $0x38] sm:$0xff] %vm7206_vm5, %v9165_v5  ;;  %v7041_v40 = vadd.f32 %v9838_v34, %v7040_v60  ;;  %v6891_v37 = vmul.f32 1.442695, %v6864_v36 }
 0x95a   :  { %v9842_v41 = vpop.eup %9841  ;;  %v6911_v22 = vadd.f32 1.0, %v9840_v16 }
 0x95b   :  { %v7045_v20 = vsel %vm7044_vm6, %v9838_v34, %v7041_v40  ;;  %v7053_v18 = vmul.f32 %v9842_v41, %v6910_v43  ;;  %9843 = vpow2.f32 %v6891_v37  ;;  %vm7058_vm8 = vweird.f32 %v9842_v41 }
 0x95c   :  { %v7050_v3 = vsel %vm7047_vm7, %v7049_v62, %v7045_v20  ;;  %9845 = vrcp.f32 %v6911_v22  ;;  %v6827_v31 = vpop.f32.mrf.mxu2  ;;  %vm7059_vm10 = vmor %vm7057_vm9, %vm7058_vm8  ;;  %v7076_v49 = vand.u32 2147483647, %v6911_v22  ;;  %v7078_v8 = vand.u32 2147483648, %v6911_v22 }
 0x95d   :  { %v7165_v29 = vmul.f32 1.002, %v7050_v3  ;;  %v7054_v9 = vsub.f32 1.0, %v7053_v18  ;;  %v6828_v61 = vadd.f32 %v11842_v46, %v6827_v31  ;;  %vm7072_vm13 = vweird.f32 %v6911_v22 }
 0x95e   :  { %v7079_v21 = vor.u32 1.1754944e-38, %v7078_v8  ;;  %vm7077_vm15 = vcmp.eq.f32.partialorder %v7076_v49, 8.507059e+37 }
 0x95f   :  { %v9166_v35 = vadd.f32 -0.001, %v7165_v29  ;;  %v7055_v24 = vmul.f32 %v9842_v41, %v7054_v9  ;;  %v6865_v51 = vsub.f32 0.0, %v6828_v61 }
 0x961   :  { %v9844_v55 = vpop.eup %9843  ;;  %7215 = vst.msk [vmem:[%s12136_s10 + $0x40] sm:$0xff] %vm7206_vm5, %v9166_v35  ;;  %v7056_v6 = vadd.f32 %v9842_v41, %v7055_v24  ;;  %v6893_v42 = vmul.f32 1.442695, %v6865_v51 }
 0x962   :  { %v9846_v38 = vpop.eup %9845  ;;  %v6912_v52 = vadd.f32 1.0, %v9844_v55 }
 0x963   :  { %v7060_v0 = vsel %vm7059_vm10, %v9842_v41, %v7056_v6  ;;  %v7068_v32 = vmul.f32 %v9846_v38, %v6911_v22  ;;  %9847 = vpow2.f32 %v6893_v42  ;;  %vm7073_vm12 = vweird.f32 %v9846_v38 }
 0x964   :  { %v7065_v58 = vsel %vm7062_vm11, %v7064_v53, %v7060_v0  ;;  %9849 = vrcp.f32 %v6912_v52  ;;  %v6829_v12 = vpop.f32.mrf.mxu2  ;;  %vm7074_vm14 = vmor %vm7072_vm13, %vm7073_vm12  ;;  %v7091_v28 = vand.u32 2147483647, %v6912_v52  ;;  %v7093_v43 = vand.u32 2147483648, %v6912_v52 }
 0x965   :  { %v7166_v7 = vmul.f32 1.002, %v7065_v58  ;;  %v7069_v54 = vsub.f32 1.0, %v7068_v32  ;;  %v6830_v17 = vadd.f32 %v11842_v46, %v6829_v12  ;;  %vm7087_vm1 = vweird.f32 %v6912_v52 }
 0x966   :  { %v7094_v30 = vor.u32 1.1754944e-38, %v7093_v43  ;;  %vm7092_vm3 = vcmp.eq.f32.partialorder %v7091_v28, 8.507059e+37 }
 0x967   :  { %v9167_v11 = vadd.f32 -0.001, %v7166_v7  ;;  %v7070_v33 = vmul.f32 %v9846_v38, %v7069_v54  ;;  %v6866_v44 = vsub.f32 0.0, %v6830_v17 }
 0x969   :  { %v9848_v48 = vpop.eup %9847  ;;  %7216 = vst.msk [vmem:[%s12136_s10 + $0x48] sm:$0xff] %vm7206_vm5, %v9167_v11  ;;  %v7071_v1 = vadd.f32 %v9846_v38, %v7070_v33  ;;  %v6895_v13 = vmul.f32 1.442695, %v6866_v44 }
 0x96a   :  { %v9850_v10 = vpop.eup %9849  ;;  %v6913_v25 = vadd.f32 1.0, %v9848_v48 }
 0x96b   :  { %v7075_v27 = vsel %vm7074_vm14, %v9846_v38, %v7071_v1  ;;  %v7083_v59 = vmul.f32 %v9850_v10, %v6912_v52  ;;  %9851 = vpow2.f32 %v6895_v13  ;;  %vm7088_vm0 = vweird.f32 %v9850_v10 }
 0x96c   :  { %v7080_v57 = vsel %vm7077_vm15, %v7079_v21, %v7075_v27  ;;  %9853 = vrcp.f32 %v6913_v25  ;;  %v6832_v50 = vpop.f32.mrf.mxu2  ;;  %vm7089_vm2 = vmor %vm7087_vm1, %vm7088_vm0  ;;  %v7106_v62 = vand.u32 2147483647, %v6913_v25  ;;  %v7108_v22 = vand.u32 2147483648, %v6913_v25 }
 0x96d   :  { %v7167_v23 = vmul.f32 1.002, %v7080_v57  ;;  %v7084_v39 = vsub.f32 1.0, %v7083_v59  ;;  %v6833_v34 = vadd.f32 %v11842_v46, %v6832_v50  ;;  %vm7102_vm6 = vweird.f32 %v6913_v25 }
 0x96e   :  { %v7109_v14 = vor.u32 1.1754944e-38, %v7108_v22  ;;  %vm7107_vm8 = vcmp.eq.f32.partialorder %v7106_v62, 8.507059e+37 }
 0x96f   :  { %v9168_v19 = vadd.f32 -0.001, %v7167_v23  ;;  %v7085_v63 = vmul.f32 %v9850_v10, %v7084_v39  ;;  %v6867_v26 = vsub.f32 0.0, %v6833_v34 }
 0x971   :  { %v9852_v56 = vpop.eup %9851  ;;  %7217 = vst.msk [vmem:[%s12136_s10 + $0x50] sm:$0xff] %vm7206_vm5, %v9168_v19  ;;  %v7086_v2 = vadd.f32 %v9850_v10, %v7085_v63  ;;  %v6897_v47 = vmul.f32 1.442695, %v6867_v26 }
 0x972   :  { %v9854_v4 = vpop.eup %9853  ;;  %v6914_v45 = vadd.f32 1.0, %v9852_v56 }
 0x973   :  { %v7090_v5 = vsel %vm7089_vm2, %v9850_v10, %v7086_v2  ;;  %v7098_v60 = vmul.f32 %v9854_v4, %v6913_v25  ;;  %9855 = vpow2.f32 %v6897_v47  ;;  %vm7103_vm4 = vweird.f32 %v9854_v4 }
 0x974   :  { %v7095_v36 = vsel %vm7092_vm3, %v7094_v30, %v7090_v5  ;;  %9857 = vrcp.f32 %v6914_v45  ;;  %v6834_v16 = vpop.f32.mrf.mxu2  ;;  %vm7104_vm7 = vmor %vm7102_vm6, %vm7103_vm4  ;;  %v7123_v6 = vand.u32 2147483648, %v6914_v45  ;;  %v7121_v53 = vand.u32 2147483647, %v6914_v45 }
 0x975   :  { %v7168_v40 = vmul.f32 1.002, %v7095_v36  ;;  %v7099_v37 = vsub.f32 1.0, %v7098_v60  ;;  %v6835_v41 = vadd.f32 %v11842_v46, %v6834_v16  ;;  %vm7117_vm10 = vweird.f32 %v6914_v45 }
 0x976   :  { %v7124_v58 = vor.u32 1.1754944e-38, %v7123_v6  ;;  %vm7122_vm12 = vcmp.eq.f32.partialorder %v7121_v53, 8.507059e+37 }
 0x977   :  { %v9169_v20 = vadd.f32 -0.001, %v7168_v40  ;;  %v7100_v18 = vmul.f32 %v9854_v4, %v7099_v37  ;;  %v6868_v3 = vsub.f32 0.0, %v6835_v41 }
 0x979   :  { %v9856_v31 = vpop.eup %9855  ;;  %7218 = vst.msk [vmem:[%s12136_s10 + $0x58] sm:$0xff] %vm7206_vm5, %v9169_v20  ;;  %v7101_v29 = vadd.f32 %v9854_v4, %v7100_v18  ;;  %v6899_v9 = vmul.f32 1.442695, %v6868_v3 }
 0x97a   :  { %v9858_v61 = vpop.eup %9857  ;;  %v6915_v15 = vadd.f32 1.0, %v9856_v31 }
 0x97b   :  { %v7105_v46 = vsel %vm7104_vm7, %v9854_v4, %v7101_v29  ;;  %v7113_v35 = vmul.f32 %v9858_v61, %v6914_v45  ;;  %9859 = vpow2.f32 %v6899_v9  ;;  %vm7118_vm9 = vweird.f32 %v9858_v61 }
 0x97c   :  { %v7110_v24 = vsel %vm7107_vm8, %v7109_v14, %v7105_v46  ;;  %9861 = vrcp.f32 %v6915_v15  ;;  %vm7119_vm11 = vmor %vm7117_vm10, %vm7118_vm9  ;;  %v7138_v11 = vand.u32 2147483648, %v6915_v15  ;;  %v7136_v48 = vand.u32 2147483647, %v6915_v15 }
 0x97d   :  { %v7169_v51 = vmul.f32 1.002, %v7110_v24  ;;  %v7114_v55 = vsub.f32 1.0, %v7113_v35  ;;  %vm7132_vm14 = vweird.f32 %v6915_v15 }
 0x97e   :  { %v7139_v10 = vor.u32 1.1754944e-38, %v7138_v11  ;;  %vm7137_vm0 = vcmp.eq.f32.partialorder %v7136_v48, 8.507059e+37 }
 0x97f   :  { %v9170_v42 = vadd.f32 -0.001, %v7169_v51  ;;  %v7115_v38 = vmul.f32 %v9858_v61, %v7114_v55 }
 0x981   :  { %v9860_v52 = vpop.eup %9859  ;;  %7219 = vst.msk [vmem:[%s12136_s10 + $0x60] sm:$0xff] %vm7206_vm5, %v9170_v42  ;;  %v7116_v0 = vadd.f32 %v9858_v61, %v7115_v38 }
 0x982   :  { %v9862_v32 = vpop.eup %9861  ;;  %v6916_v12 = vadd.f32 1.0, %v9860_v52 }
 0x983   :  { %v7120_v7 = vsel %vm7119_vm11, %v9858_v61, %v7116_v0  ;;  %v7128_v54 = vmul.f32 %v9862_v32, %v6915_v15  ;;  %vm7133_vm13 = vweird.f32 %v9862_v32 }
 0x984   :  { %v7125_v17 = vsel %vm7122_vm12, %v7124_v58, %v7120_v7  ;;  %9863 = vrcp.f32 %v6916_v12  ;;  %vm7134_vm15 = vmor %vm7132_vm14, %vm7133_vm13  ;;  %v7153_v50 = vand.u32 2147483648, %v6916_v12  ;;  %v7151_v34 = vand.u32 2147483647, %v6916_v12 }
 0x985   :  { %v7170_v49 = vmul.f32 1.002, %v7125_v17  ;;  %v7129_v8 = vsub.f32 1.0, %v7128_v54  ;;  %vm7147_vm2 = vweird.f32 %v6916_v12 }
 0x986   :  { %v7154_v43 = vor.u32 1.1754944e-38, %v7153_v50  ;;  %vm7152_vm4 = vcmp.eq.f32.partialorder %v7151_v34, 8.507059e+37 }
 0x987   :  { %v9171_v33 = vadd.f32 -0.001, %v7170_v49  ;;  %v7130_v44 = vmul.f32 %v9862_v32, %v7129_v8 }
 0x989   :  { %7220 = vst.msk [vmem:[%s12136_s10 + $0x68] sm:$0xff] %vm7206_vm5, %v9171_v33  ;;  %v7131_v1 = vadd.f32 %v9862_v32, %v7130_v44 }
 0x98a   :  { %v9864_v13 = vpop.eup %9863 }
 0x98b   :  { %v7135_v21 = vsel %vm7134_vm15, %v9862_v32, %v7131_v1  ;;  %v7143_v25 = vmul.f32 %v9864_v13, %v6916_v12  ;;  %vm7148_vm1 = vweird.f32 %v9864_v13 }
 0x98c   :  { %v7140_v27 = vsel %vm7137_vm0, %v7139_v10, %v7135_v21  ;;  %vm7149_vm3 = vmor %vm7147_vm2, %vm7148_vm1 }
 0x98d   :  { %v7171_v59 = vmul.f32 1.002, %v7140_v27  ;;  %v7144_v57 = vsub.f32 1.0, %v7143_v25 }
 0x98f   :  { %v9172_v23 = vadd.f32 -0.001, %v7171_v59  ;;  %v7145_v39 = vmul.f32 %v9864_v13, %v7144_v57 }
 0x991   :  { %7221 = vst.msk [vmem:[%s12136_s10 + $0x70] sm:$0xff] %vm7206_vm5, %v9172_v23  ;;  %v7146_v28 = vadd.f32 %v9864_v13, %v7145_v39 }
 0x993   :  { %v7150_v19 = vsel %vm7149_vm3, %v9864_v13, %v7146_v28 }
 0x994   :  { %v7155_v63 = vsel %vm7152_vm4, %v7154_v43, %v7150_v19 }
 0x995   :  { %v7172_v26 = vmul.f32 1.002, %v7155_v63 }
 0x997   :  { %v9173_v56 = vadd.f32 -0.001, %v7172_v26 }
 0x999   :  { %7222 = vst.msk [vmem:[%s12136_s10 + $0x78] sm:$0xff] %vm7206_vm5, %v9173_v56 }
 0x99a   :  { %7231 = vsyncpa [#allocation4], 1 }
 0x99b   :  { %7232 = vsyncpa [#allocation6], 1 }
 0x99c   :  { %7233 = vsyncpa [#allocation9], 1 }
 0x99d   :  { %7234 = vsyncpa [#allocation12], 1 }
 0x99e   :  { %7235 = vsyncpa [#allocation15], 1 }
 0x99f   :  { %7236 = vsyncpa [#allocation18], 1 }
 0x9a0   :  { %7237 = vsyncpa [#allocation21], 1 }

</bundles_post_ra>
